<compile_context>
chip_gen: v7x
topology: tpu7x:2x2x1
jax: 0.10.0
libtpu: 0.0.40
codegen_flags: <defaults>
</compile_context>

<pallas_src>
import jax
import jax.numpy as jnp
from jax import lax
from jax.experimental import pallas as pl
from jax.experimental.pallas import tpu as pltpu

NC_PAD = 128  # lane-dense logits width (NUM_CLASSES zero-padded to one full vreg lane row)


def _round_up(x, m):
    return (x + m - 1) // m * m


# ----------------------------- Pallas kernel ---------------------------------
def _make_backbone_kernel(Bt, C, HWp, Wp, hidden, inv_hw):
    """Build the fused conv3x3 + ReLU + GAP + linear-head kernel for one batch tile."""
    # Tap t = di*3 + dj reads flattened padded row  p + di*Wp + dj  for output position p.
    tap_offsets = tuple(di * Wp + dj for di in range(3) for dj in range(3))

    def kernel(xrows_ref, wconv_ref, bconv_ref, mask_ref, whead_ref, bhead_ref, out_ref):
        # xrows_ref : (Bt, R_in, C)     bf16  zero-padded pixels, rows = flattened (h', w')
        # wconv_ref : (9, C, hidden)    bf16  3x3 conv taps
        # bconv_ref : (1, hidden)       f32
        # mask_ref  : (Bt*HWp, 1)       f32   1.0 at valid (w < W) output positions, else 0.0
        # whead_ref : (hidden, NC_PAD)  bf16  head weight, zero-padded to 128 classes
        # bhead_ref : (1, NC_PAD)       f32
        # out_ref   : (Bt, NC_PAD)      f32   lane-dense logits tile
        #
        # In-kernel im2col: 9 shifted (Bt*HWp, C) x (C, hidden) matmuls, f32 accumulation.
        acc = None
        for t, off in enumerate(tap_offsets):
            patch = xrows_ref[:, off:off + HWp, :].reshape(Bt * HWp, C)   # bf16, MXU lhs
            y = jnp.dot(patch, wconv_ref[t], preferred_element_type=jnp.float32)
            acc = y if acc is None else acc + y

        h = jnp.maximum(acc + bconv_ref[...], 0.0)    # conv bias + ReLU (VPU, f32)
        h = h * mask_ref[...]                         # zero out padded-width columns

        # Per-image global average pool: sublane sum (XLU), sum-then-scale. No pool matmul.
        pooled_rows = [
            jnp.sum(h[b * HWp:(b + 1) * HWp, :], axis=0, keepdims=True)
            for b in range(Bt)
        ]
        pooled = jnp.concatenate(pooled_rows, axis=0) * inv_hw            # (Bt, hidden) f32

        logits = jnp.dot(pooled.astype(jnp.bfloat16), whead_ref[...],
                         preferred_element_type=jnp.float32) + bhead_ref[...]
        out_ref[...] = logits                          # unmasked 128-lane f32 store

    return kernel


# ------------------------------ JAX wrapper -----------------------------------
def classifier_forward(pixel_values_nchw, w_conv_hwio, b_conv, w_head, b_head):
    """Equivalent of ClassifierWrapper.forward(batch) -> logits [B, NUM_CLASSES]."""
    # Cast to bf16 BEFORE any padding/reshape so the wrapper never touches f32 pixel copies.
    x = jnp.transpose(pixel_values_nchw, (0, 2, 3, 1)).astype(jnp.bfloat16)   # NCHW -> NHWC
    B, H, W, C = x.shape
    hidden = w_conv_hwio.shape[-1]
    nc = w_head.shape[-1]

    # Padded width: +2 halo for the 3x3 conv, grown until H*Wp is sublane (8) aligned so the
    # per-image row blocks stay layout-aligned.  Output positions with w >= W are computed but
    # masked out of the pool.
    Wp = W + 2
    while (H * Wp) % 8 != 0:
        Wp += 1
    HWp = H * Wp                                     # computed output positions per image
    R_in = _round_up((H + 2) * Wp + 2, 8)            # +2 tail rows so every tap slice is in-bounds

    # Batch tile: single tile for tiny batches, else a multiple of 8 sized from a VMEM budget
    # (double-buffered bf16 pixel stream + live f32 conv activation) that fits v5e's 16 MiB
    # default scoped VMEM and v7x's 64 MiB physical VMEM.
    if B <= 8:
        Bt = B
    else:
        Bt = 8
        budget = 8 * 1024 * 1024

        def _footprint(bt):
            return 2 * bt * R_in * C * 2 + bt * HWp * hidden * 4

        while Bt * 2 <= min(64, _round_up(B, 8)) and _footprint(Bt * 2) <= budget:
            Bt *= 2
    B_pad = _round_up(B, Bt)
    num_tiles = B_pad // Bt

    # Zero-pad: 1-pixel halo (top/bottom/left), right pad to Wp, batch pad to B_pad; flatten
    # spatial dims into rows (channel stays minor) and append the alignment tail rows.
    x_pad = jnp.pad(x, ((0, B_pad - B), (1, 1), (1, Wp - W - 1), (0, 0)))   # (B_pad, H+2, Wp, C)
    x_rows = x_pad.reshape(B_pad, (H + 2) * Wp, C)
    x_rows = jnp.pad(x_rows, ((0, 0), (0, R_in - (H + 2) * Wp), (0, 0)))    # (B_pad, R_in, C) bf16

    # Conv weight HWIO -> (9, C, hidden) taps (t = di*3 + dj), bf16 MXU operands.
    w_taps = w_conv_hwio.reshape(9, C, hidden).astype(jnp.bfloat16)
    b_conv2d = b_conv.reshape(1, hidden).astype(jnp.float32)

    # Lane-dense head: pad NUM_CLASSES out to 128 zero columns; bf16 weight, f32 bias.
    w_head_p = jnp.zeros((hidden, NC_PAD), jnp.bfloat16).at[:, :nc].set(w_head.astype(jnp.bfloat16))
    b_head_p = jnp.zeros((1, NC_PAD), jnp.float32).at[:, :nc].set(b_head.astype(jnp.float32))

    # Pooling mask over computed output positions: valid iff (p mod Wp) < W.
    col = jnp.arange(HWp, dtype=jnp.int32) % Wp
    mask = (col < W).astype(jnp.float32).reshape(HWp, 1)
    mask_tile = jnp.tile(mask, (Bt, 1))                                     # (Bt*HWp, 1) f32

    kernel = _make_backbone_kernel(Bt, C, HWp, Wp, hidden, 1.0 / (H * W))

    grid_spec = pltpu.PrefetchScalarGridSpec(
        num_scalar_prefetch=0,
        grid=(num_tiles,),
        in_specs=[
            pl.BlockSpec((Bt, R_in, C), lambda b: (b, 0, 0)),       # streamed pixel rows
            pl.BlockSpec((9, C, hidden), lambda b: (0, 0, 0)),      # conv taps (resident)
            pl.BlockSpec((1, hidden), lambda b: (0, 0)),            # conv bias
            pl.BlockSpec((Bt * HWp, 1), lambda b: (0, 0)),          # pool mask (resident)
            pl.BlockSpec((hidden, NC_PAD), lambda b: (0, 0)),       # head weight (padded)
            pl.BlockSpec((1, NC_PAD), lambda b: (0, 0)),            # head bias (padded)
        ],
        out_specs=pl.BlockSpec((Bt, NC_PAD), lambda b: (b, 0)),
    )

    logits_p = pl.pallas_call(
        kernel,
        out_shape=jax.ShapeDtypeStruct((B_pad, NC_PAD), jnp.float32),
        grid_spec=grid_spec,
        compiler_params=pltpu.CompilerParams(
            dimension_semantics=("parallel",),       # shard batch tiles across TCs (>=2 tiles)
            vmem_limit_bytes=32 * 1024 * 1024,
        ),
    )(x_rows, w_taps, b_conv2d, mask_tile, w_head_p, b_head_p)

    return logits_p[:B, :nc]


# ----------------------------- reference (pure JAX) ---------------------------
def classifier_forward_ref(pixel_values_nchw, w_conv_hwio, b_conv, w_head, b_head):
    # Independent reference via lax.conv; mirrors the kernel's bf16 MXU inputs (f32 accumulate).
    x = jnp.transpose(pixel_values_nchw, (0, 2, 3, 1)).astype(jnp.bfloat16)
    h = lax.conv_general_dilated(
        x, w_conv_hwio.astype(jnp.bfloat16),
        window_strides=(1, 1), padding="SAME",
        dimension_numbers=("NHWC", "HWIO", "NHWC"),
        preferred_element_type=jnp.float32)
    h = jnp.maximum(h + b_conv[None, None, None, :], 0.0)
    pooled = jnp.mean(h, axis=(1, 2))
    logits = jnp.dot(pooled.astype(jnp.bfloat16), w_head.astype(jnp.bfloat16),
                     preferred_element_type=jnp.float32) + b_head[None, :].astype(jnp.float32)
    return logits


# ---------------------------------- main ---------------------------------------
if __name__ == "__main__":
    # Small shapes consistent with an image-classification forward pass.
    B, C, H, W = 2, 4, 16, 16
    HIDDEN, NUM_CLASSES = 32, 10

    key = jax.random.PRNGKey(0)
    k_x, k_wc, k_bc, k_wh, k_bh = jax.random.split(key, 5)

    pixel_values = jax.random.normal(k_x, (B, C, H, W), dtype=jnp.float32)   # NCHW input

    # Synthetic backbone parameters.  Conv2d weight in HWIO layout (a real PyTorch weight
    # [C_out, C_in, 3, 3] maps via permute(2, 3, 1, 0)); Linear(HIDDEN, NC) as [in, out]
    # (PyTorch weight.T).
    w_conv = 0.1 * jax.random.normal(k_wc, (3, 3, C, HIDDEN), dtype=jnp.float32)
    b_conv = 0.05 * jax.random.normal(k_bc, (HIDDEN,), dtype=jnp.float32)
    w_head = 0.1 * jax.random.normal(k_wh, (HIDDEN, NUM_CLASSES), dtype=jnp.float32)
    b_head = 0.05 * jax.random.normal(k_bh, (NUM_CLASSES,), dtype=jnp.float32)

    logits = classifier_forward(pixel_values, w_conv, b_conv, w_head, b_head)
    logits = jax.block_until_ready(logits)

    ref = classifier_forward_ref(pixel_values, w_conv, b_conv, w_head, b_head)
    assert logits.shape == (B, NUM_CLASSES)
    err = float(jnp.max(jnp.abs(logits - ref)))
    assert err < 1e-2, f"Pallas kernel mismatch vs reference, max abs err = {err}"

    print("KERNEL_OK")
</pallas_src>

<mosaic_0001>
module attributes {stable_mosaic.version = 11 : i64} {
  func.func @kernel(%arg0: i32, %arg1: memref<2x328x4xbf16, #tpu.memory_space<vmem>>, %arg2: memref<9x4x32xbf16, #tpu.memory_space<vmem>>, %arg3: memref<1x32xf32, #tpu.memory_space<vmem>>, %arg4: memref<576x1xf32, #tpu.memory_space<vmem>>, %arg5: memref<32x128xbf16, #tpu.memory_space<vmem>>, %arg6: memref<1x128xf32, #tpu.memory_space<vmem>>, %arg7: memref<2x128xf32, #tpu.memory_space<vmem>>) attributes {dimension_semantics = [#tpu.dimension_semantics<parallel>], iteration_bounds = array<i64: 1>, scalar_prefetch = 0 : i64, scratch_operands = 0 : i64, tpu.core_type = #tpu.core_type<tc>, window_params = [{transform_indices = @transform_0, window_bounds = array<i64: 2, 328, 4>}, {pipeline_mode = #tpu.pipeline_mode<synchronous>, transform_indices = @transform_1, window_bounds = array<i64: 9, 4, 32>}, {pipeline_mode = #tpu.pipeline_mode<synchronous>, transform_indices = @transform_2, window_bounds = array<i64: 1, 32>}, {pipeline_mode = #tpu.pipeline_mode<synchronous>, transform_indices = @transform_3, window_bounds = array<i64: 576, 1>}, {pipeline_mode = #tpu.pipeline_mode<synchronous>, transform_indices = @transform_4, window_bounds = array<i64: 32, 128>}, {pipeline_mode = #tpu.pipeline_mode<synchronous>, transform_indices = @transform_5, window_bounds = array<i64: 1, 128>}, {transform_indices = @transform_6, window_bounds = array<i64: 2, 128>}]} {
    %c0 = arith.constant 0 : index
    %c0_0 = arith.constant 0 : index
    %c0_1 = arith.constant 0 : index
    %0 = vector.load %arg1[%c0, %c0_0, %c0_1] : memref<2x328x4xbf16, #tpu.memory_space<vmem>>, vector<2x288x4xbf16>
    %1 = vector.shape_cast %0 : vector<2x288x4xbf16> to vector<576x4xbf16>
    %c0_2 = arith.constant 0 : index
    %c0_3 = arith.constant 0 : index
    %c0_4 = arith.constant 0 : index
    %2 = vector.load %arg2[%c0_2, %c0_3, %c0_4] : memref<9x4x32xbf16, #tpu.memory_space<vmem>>, vector<1x4x32xbf16>
    %3 = vector.shape_cast %2 : vector<1x4x32xbf16> to vector<4x32xbf16>
    %cst = arith.constant dense<0.000000e+00> : vector<576x32xf32>
    %4 = tpu.matmul %1, %3, %cst {dimension_numbers = #tpu.dot_dimension_numbers<[1], [0], [0], [1], [0, 0, 1, 1], [], []>} : vector<576x4xbf16>, vector<4x32xbf16>, vector<576x32xf32> -> vector<576x32xf32>
    %c0_5 = arith.constant 0 : index
    %c1 = arith.constant 1 : index
    %c0_6 = arith.constant 0 : index
    %5 = vector.load %arg1[%c0_5, %c1, %c0_6] : memref<2x328x4xbf16, #tpu.memory_space<vmem>>, vector<2x288x4xbf16>
    %6 = vector.shape_cast %5 : vector<2x288x4xbf16> to vector<576x4xbf16>
    %c1_7 = arith.constant 1 : index
    %c0_8 = arith.constant 0 : index
    %c0_9 = arith.constant 0 : index
    %7 = vector.load %arg2[%c1_7, %c0_8, %c0_9] : memref<9x4x32xbf16, #tpu.memory_space<vmem>>, vector<1x4x32xbf16>
    %8 = vector.shape_cast %7 : vector<1x4x32xbf16> to vector<4x32xbf16>
    %cst_10 = arith.constant dense<0.000000e+00> : vector<576x32xf32>
    %9 = tpu.matmul %6, %8, %cst_10 {dimension_numbers = #tpu.dot_dimension_numbers<[1], [0], [0], [1], [0, 0, 1, 1], [], []>} : vector<576x4xbf16>, vector<4x32xbf16>, vector<576x32xf32> -> vector<576x32xf32>
    %10 = arith.addf %4, %9 : vector<576x32xf32>
    %c0_11 = arith.constant 0 : index
    %c2 = arith.constant 2 : index
    %c0_12 = arith.constant 0 : index
    %11 = vector.load %arg1[%c0_11, %c2, %c0_12] : memref<2x328x4xbf16, #tpu.memory_space<vmem>>, vector<2x288x4xbf16>
    %12 = vector.shape_cast %11 : vector<2x288x4xbf16> to vector<576x4xbf16>
    %c2_13 = arith.constant 2 : index
    %c0_14 = arith.constant 0 : index
    %c0_15 = arith.constant 0 : index
    %13 = vector.load %arg2[%c2_13, %c0_14, %c0_15] : memref<9x4x32xbf16, #tpu.memory_space<vmem>>, vector<1x4x32xbf16>
    %14 = vector.shape_cast %13 : vector<1x4x32xbf16> to vector<4x32xbf16>
    %cst_16 = arith.constant dense<0.000000e+00> : vector<576x32xf32>
    %15 = tpu.matmul %12, %14, %cst_16 {dimension_numbers = #tpu.dot_dimension_numbers<[1], [0], [0], [1], [0, 0, 1, 1], [], []>} : vector<576x4xbf16>, vector<4x32xbf16>, vector<576x32xf32> -> vector<576x32xf32>
    %16 = arith.addf %10, %15 : vector<576x32xf32>
    %c0_17 = arith.constant 0 : index
    %c18 = arith.constant 18 : index
    %c0_18 = arith.constant 0 : index
    %17 = vector.load %arg1[%c0_17, %c18, %c0_18] : memref<2x328x4xbf16, #tpu.memory_space<vmem>>, vector<2x288x4xbf16>
    %18 = vector.shape_cast %17 : vector<2x288x4xbf16> to vector<576x4xbf16>
    %c3 = arith.constant 3 : index
    %c0_19 = arith.constant 0 : index
    %c0_20 = arith.constant 0 : index
    %19 = vector.load %arg2[%c3, %c0_19, %c0_20] : memref<9x4x32xbf16, #tpu.memory_space<vmem>>, vector<1x4x32xbf16>
    %20 = vector.shape_cast %19 : vector<1x4x32xbf16> to vector<4x32xbf16>
    %cst_21 = arith.constant dense<0.000000e+00> : vector<576x32xf32>
    %21 = tpu.matmul %18, %20, %cst_21 {dimension_numbers = #tpu.dot_dimension_numbers<[1], [0], [0], [1], [0, 0, 1, 1], [], []>} : vector<576x4xbf16>, vector<4x32xbf16>, vector<576x32xf32> -> vector<576x32xf32>
    %22 = arith.addf %16, %21 : vector<576x32xf32>
    %c0_22 = arith.constant 0 : index
    %c19 = arith.constant 19 : index
    %c0_23 = arith.constant 0 : index
    %23 = vector.load %arg1[%c0_22, %c19, %c0_23] : memref<2x328x4xbf16, #tpu.memory_space<vmem>>, vector<2x288x4xbf16>
    %24 = vector.shape_cast %23 : vector<2x288x4xbf16> to vector<576x4xbf16>
    %c4 = arith.constant 4 : index
    %c0_24 = arith.constant 0 : index
    %c0_25 = arith.constant 0 : index
    %25 = vector.load %arg2[%c4, %c0_24, %c0_25] : memref<9x4x32xbf16, #tpu.memory_space<vmem>>, vector<1x4x32xbf16>
    %26 = vector.shape_cast %25 : vector<1x4x32xbf16> to vector<4x32xbf16>
    %cst_26 = arith.constant dense<0.000000e+00> : vector<576x32xf32>
    %27 = tpu.matmul %24, %26, %cst_26 {dimension_numbers = #tpu.dot_dimension_numbers<[1], [0], [0], [1], [0, 0, 1, 1], [], []>} : vector<576x4xbf16>, vector<4x32xbf16>, vector<576x32xf32> -> vector<576x32xf32>
    %28 = arith.addf %22, %27 : vector<576x32xf32>
    %c0_27 = arith.constant 0 : index
    %c20 = arith.constant 20 : index
    %c0_28 = arith.constant 0 : index
    %29 = vector.load %arg1[%c0_27, %c20, %c0_28] : memref<2x328x4xbf16, #tpu.memory_space<vmem>>, vector<2x288x4xbf16>
    %30 = vector.shape_cast %29 : vector<2x288x4xbf16> to vector<576x4xbf16>
    %c5 = arith.constant 5 : index
    %c0_29 = arith.constant 0 : index
    %c0_30 = arith.constant 0 : index
    %31 = vector.load %arg2[%c5, %c0_29, %c0_30] : memref<9x4x32xbf16, #tpu.memory_space<vmem>>, vector<1x4x32xbf16>
    %32 = vector.shape_cast %31 : vector<1x4x32xbf16> to vector<4x32xbf16>
    %cst_31 = arith.constant dense<0.000000e+00> : vector<576x32xf32>
    %33 = tpu.matmul %30, %32, %cst_31 {dimension_numbers = #tpu.dot_dimension_numbers<[1], [0], [0], [1], [0, 0, 1, 1], [], []>} : vector<576x4xbf16>, vector<4x32xbf16>, vector<576x32xf32> -> vector<576x32xf32>
    %34 = arith.addf %28, %33 : vector<576x32xf32>
    %c0_32 = arith.constant 0 : index
    %c36 = arith.constant 36 : index
    %c0_33 = arith.constant 0 : index
    %35 = vector.load %arg1[%c0_32, %c36, %c0_33] : memref<2x328x4xbf16, #tpu.memory_space<vmem>>, vector<2x288x4xbf16>
    %36 = vector.shape_cast %35 : vector<2x288x4xbf16> to vector<576x4xbf16>
    %c6 = arith.constant 6 : index
    %c0_34 = arith.constant 0 : index
    %c0_35 = arith.constant 0 : index
    %37 = vector.load %arg2[%c6, %c0_34, %c0_35] : memref<9x4x32xbf16, #tpu.memory_space<vmem>>, vector<1x4x32xbf16>
    %38 = vector.shape_cast %37 : vector<1x4x32xbf16> to vector<4x32xbf16>
    %cst_36 = arith.constant dense<0.000000e+00> : vector<576x32xf32>
    %39 = tpu.matmul %36, %38, %cst_36 {dimension_numbers = #tpu.dot_dimension_numbers<[1], [0], [0], [1], [0, 0, 1, 1], [], []>} : vector<576x4xbf16>, vector<4x32xbf16>, vector<576x32xf32> -> vector<576x32xf32>
    %40 = arith.addf %34, %39 : vector<576x32xf32>
    %c0_37 = arith.constant 0 : index
    %c37 = arith.constant 37 : index
    %c0_38 = arith.constant 0 : index
    %41 = vector.load %arg1[%c0_37, %c37, %c0_38] : memref<2x328x4xbf16, #tpu.memory_space<vmem>>, vector<2x288x4xbf16>
    %42 = vector.shape_cast %41 : vector<2x288x4xbf16> to vector<576x4xbf16>
    %c7 = arith.constant 7 : index
    %c0_39 = arith.constant 0 : index
    %c0_40 = arith.constant 0 : index
    %43 = vector.load %arg2[%c7, %c0_39, %c0_40] : memref<9x4x32xbf16, #tpu.memory_space<vmem>>, vector<1x4x32xbf16>
    %44 = vector.shape_cast %43 : vector<1x4x32xbf16> to vector<4x32xbf16>
    %cst_41 = arith.constant dense<0.000000e+00> : vector<576x32xf32>
    %45 = tpu.matmul %42, %44, %cst_41 {dimension_numbers = #tpu.dot_dimension_numbers<[1], [0], [0], [1], [0, 0, 1, 1], [], []>} : vector<576x4xbf16>, vector<4x32xbf16>, vector<576x32xf32> -> vector<576x32xf32>
    %46 = arith.addf %40, %45 : vector<576x32xf32>
    %c0_42 = arith.constant 0 : index
    %c38 = arith.constant 38 : index
    %c0_43 = arith.constant 0 : index
    %47 = vector.load %arg1[%c0_42, %c38, %c0_43] : memref<2x328x4xbf16, #tpu.memory_space<vmem>>, vector<2x288x4xbf16>
    %48 = vector.shape_cast %47 : vector<2x288x4xbf16> to vector<576x4xbf16>
    %c8 = arith.constant 8 : index
    %c0_44 = arith.constant 0 : index
    %c0_45 = arith.constant 0 : index
    %49 = vector.load %arg2[%c8, %c0_44, %c0_45] : memref<9x4x32xbf16, #tpu.memory_space<vmem>>, vector<1x4x32xbf16>
    %50 = vector.shape_cast %49 : vector<1x4x32xbf16> to vector<4x32xbf16>
    %cst_46 = arith.constant dense<0.000000e+00> : vector<576x32xf32>
    %51 = tpu.matmul %48, %50, %cst_46 {dimension_numbers = #tpu.dot_dimension_numbers<[1], [0], [0], [1], [0, 0, 1, 1], [], []>} : vector<576x4xbf16>, vector<4x32xbf16>, vector<576x32xf32> -> vector<576x32xf32>
    %52 = arith.addf %46, %51 : vector<576x32xf32>
    %c0_47 = arith.constant 0 : index
    %c0_48 = arith.constant 0 : index
    %53 = vector.load %arg3[%c0_47, %c0_48] : memref<1x32xf32, #tpu.memory_space<vmem>>, vector<1x32xf32>
    %54 = vector.broadcast %53 : vector<1x32xf32> to vector<576x32xf32>
    %55 = arith.addf %52, %54 : vector<576x32xf32>
    %cst_49 = arith.constant 0.000000e+00 : f32
    %56 = vector.broadcast %cst_49 : f32 to vector<576x32xf32>
    %57 = arith.maximumf %55, %56 : vector<576x32xf32>
    %c0_50 = arith.constant 0 : index
    %c0_51 = arith.constant 0 : index
    %58 = vector.load %arg4[%c0_50, %c0_51] : memref<576x1xf32, #tpu.memory_space<vmem>>, vector<576x1xf32>
    %59 = vector.broadcast %58 : vector<576x1xf32> to vector<576x32xf32>
    %60 = arith.mulf %57, %59 : vector<576x32xf32>
    %61 = vector.extract_strided_slice %60 {offsets = [0, 0], sizes = [288, 32], strides = [1, 1]} : vector<576x32xf32> to vector<288x32xf32>
    %cst_52 = arith.constant dense<0.000000e+00> : vector<32xf32>
    %62 = vector.multi_reduction <add>, %61, %cst_52 [0] : vector<288x32xf32> to vector<32xf32>
    %63 = vector.shape_cast %62 : vector<32xf32> to vector<1x32xf32>
    %64 = vector.extract_strided_slice %60 {offsets = [288, 0], sizes = [288, 32], strides = [1, 1]} : vector<576x32xf32> to vector<288x32xf32>
    %cst_53 = arith.constant dense<0.000000e+00> : vector<32xf32>
    %65 = vector.multi_reduction <add>, %64, %cst_53 [0] : vector<288x32xf32> to vector<32xf32>
    %66 = vector.shape_cast %65 : vector<32xf32> to vector<1x32xf32>
    %67 = tpu.concatenate %63, %66 in 0 : vector<1x32xf32>, vector<1x32xf32> -> vector<2x32xf32>
    %cst_54 = arith.constant 3.906250e-03 : f32
    %68 = vector.broadcast %cst_54 : f32 to vector<2x32xf32>
    %69 = arith.mulf %67, %68 : vector<2x32xf32>
    %70 = arith.truncf %69 : vector<2x32xf32> to vector<2x32xbf16>
    %c0_55 = arith.constant 0 : index
    %c0_56 = arith.constant 0 : index
    %71 = vector.load %arg5[%c0_55, %c0_56] : memref<32x128xbf16, #tpu.memory_space<vmem>>, vector<32x128xbf16>
    %cst_57 = arith.constant dense<0.000000e+00> : vector<2x128xf32>
    %72 = tpu.matmul %70, %71, %cst_57 {dimension_numbers = #tpu.dot_dimension_numbers<[1], [0], [0], [1], [0, 0, 1, 1], [], []>} : vector<2x32xbf16>, vector<32x128xbf16>, vector<2x128xf32> -> vector<2x128xf32>
    %c0_58 = arith.constant 0 : index
    %c0_59 = arith.constant 0 : index
    %73 = vector.load %arg6[%c0_58, %c0_59] : memref<1x128xf32, #tpu.memory_space<vmem>>, vector<1x128xf32>
    %74 = vector.broadcast %73 : vector<1x128xf32> to vector<2x128xf32>
    %75 = arith.addf %72, %74 : vector<2x128xf32>
    %c0_60 = arith.constant 0 : index
    %c0_61 = arith.constant 0 : index
    %76 = vector.load %arg7[%c0_60, %c0_61] : memref<2x128xf32, #tpu.memory_space<vmem>>, vector<2x128xf32>
    tpu.vector_store %arg7[%c0_60, %c0_61], %75 {strides = array<i32>} : memref<2x128xf32, #tpu.memory_space<vmem>>, vector<2x128xf32>,
    return
  }
  func.func @transform_0(%arg0: i32) -> (i32, i32, i32) {
    %c0_i32 = arith.constant 0 : i32
    %c0_i32_0 = arith.constant 0 : i32
    %c0_i32_1 = arith.constant 0 : i32
    return %arg0, %c0_i32, %c0_i32_0 : i32, i32, i32
  }
  func.func @transform_1(%arg0: i32) -> (i32, i32, i32) {
    %c0_i32 = arith.constant 0 : i32
    %c0_i32_0 = arith.constant 0 : i32
    %c0_i32_1 = arith.constant 0 : i32
    %c0_i32_2 = arith.constant 0 : i32
    return %c0_i32, %c0_i32_0, %c0_i32_1 : i32, i32, i32
  }
  func.func @transform_2(%arg0: i32) -> (i32, i32) {
    %c0_i32 = arith.constant 0 : i32
    %c0_i32_0 = arith.constant 0 : i32
    %c0_i32_1 = arith.constant 0 : i32
    return %c0_i32, %c0_i32_0 : i32, i32
  }
  func.func @transform_3(%arg0: i32) -> (i32, i32) {
    %c0_i32 = arith.constant 0 : i32
    %c0_i32_0 = arith.constant 0 : i32
    %c0_i32_1 = arith.constant 0 : i32
    return %c0_i32, %c0_i32_0 : i32, i32
  }
  func.func @transform_4(%arg0: i32) -> (i32, i32) {
    %c0_i32 = arith.constant 0 : i32
    %c0_i32_0 = arith.constant 0 : i32
    %c0_i32_1 = arith.constant 0 : i32
    return %c0_i32, %c0_i32_0 : i32, i32
  }
  func.func @transform_5(%arg0: i32) -> (i32, i32) {
    %c0_i32 = arith.constant 0 : i32
    %c0_i32_0 = arith.constant 0 : i32
    %c0_i32_1 = arith.constant 0 : i32
    return %c0_i32, %c0_i32_0 : i32, i32
  }
  func.func @transform_6(%arg0: i32) -> (i32, i32) {
    %c0_i32 = arith.constant 0 : i32
    %c0_i32_0 = arith.constant 0 : i32
    return %arg0, %c0_i32 : i32, i32
  }
}

</mosaic_0001>

<bundles_post_ra>
// kernel: tpu_custom_call.1
= control target key start
LH: loop header
LB: loop body
LE: loop exit
PB: predicated region body
PF: predicated region fallthrough
CT: control target
= control target key end

     0   :  { %vm1050_vm0 = vcmask 1041408   ;;  %vm100_vm1 = vsmask.f32 3328  ;;  %vm101_vm2 = vsmask.f32 7440  ;;  %vm941_vm3 = vcmask 31744   ;;  %s19263_s0 = inlined_call_operand.vmem [shape: bf16[2,328,4], index: 0, kind: input, shape index: {}]   ;;  %s19264_s1 = inlined_call_operand.vmem [shape: bf16[9,4,32], index: 1, kind: input, shape index: {}]   ;;  %s19265_s2 = inlined_call_operand.vmem [shape: f32[1,32], index: 2, kind: input, shape index: {}]   ;;  %s19266_s3 = inlined_call_operand.vmem [shape: f32[576,1], index: 3, kind: input, shape index: {}]   ;;  %s19267_s4 = inlined_call_operand.vmem [shape: bf16[32,128], index: 4, kind: input, shape index: {}]   ;;  %s19268_s5 = inlined_call_operand.vmem [shape: f32[1,128], index: 5, kind: input, shape index: {}]   ;;  %s19269_s6 = inlined_call_operand.hbm [shape: f32[2,128], index: 6, kind: output, shape index: {}]  }
   0x1   :  { %v10370_v0 = vld [vmem:[%s19264_s1 + $0x8] sm:$0x3]  ;;  %v10075_v1 = vld [vmem:[%s19264_s1 + $0x2] sm:$0x3]  ;;  %v26_v5 = vld [vmem:[%s19263_s0 + $0x4] sm:$0xf] }
   0x2   :  { %12338 = vmatprep.subr.msk.bf16.mxu0 %vm1050_vm0, %v10370_v0  ;;  %12334 = vmatprep.subr.msk.bf16.mxu1 %vm1050_vm0, %v10075_v1  ;;  %v12816_v2 = vsel %vm1050_vm0, %v10370_v0, 0  ;;  %v1052_v3 = vsel %vm1050_vm0, %v10075_v1, 0  ;;  %v25_v4 = vld [vmem:[%s19263_s0] sm:$0xf]  ;;  %v27_v6 = vld [vmem:[%s19263_s0 + $0x8] sm:$0xf]  ;;  %vm12840_vm6 = vmor %vm100_vm1, %vm101_vm2 }
   0x3   :  { %19462 = vst [vmem:[#allocation5_spill] sm:$0xff] %v12816_v2  ;;  %11379 = vmatpush3.bf16.msra.mxu0 %v12816_v2  ;;  %11083 = vmatpush3.bf16.msra.mxu1 %v1052_v3  ;;  %v104_v7 = vshrl.u32 %v25_v4, 16  ;;  %v107_v8 = vshll.u32 %v25_v4, 16  ;;  %v113_v9 = vshll.u32 %v26_v5, 16  ;;  %v117_v10 = vshrl.u32 %v26_v5, 16 }
   0x4   :  { %v123_v11 = vshll.u32 %v27_v6, 16  ;;  %v127_v12 = vshrl.u32 %v27_v6, 16  ;;  %v2828_v13 = vld [vmem:[%s19263_s0 + $0x8] sm:$0xe]  ;;  %v2829_v17 = vld [vmem:[%s19263_s0 + $0xc] sm:$0xf] }
   0x5   :  { %v106_v14 = vrot.slane %v104_v7, 4  ;;  %v109_v15 = vrot.slane %v107_v8, 5  ;;  %v115_v16 = vrot.slane %v113_v9, 5  ;;  %v119_v18 = vrot.slane %v117_v10, 4  ;;  %v2830_v21 = vld [vmem:[%s19263_s0 + $0x10] sm:$0xf] }
   0x6   :  { %v125_v19 = vrot.slane %v123_v11, 5  ;;  %v129_v20 = vrot.slane %v127_v12, 4  ;;  %v3814_v22 = vshrl.u32 %v2828_v13, 16  ;;  %vm3810_vm4 = vsmask.f32 2304 }
   0x7   :  { %v110_v23 = vor.u32 %v109_v15, %v106_v14  ;;  %vm3811_vm5 = vsmask.f32 6416  ;;  %v3817_v24 = vshll.u32 %v2828_v13, 16  ;;  %v120_v26 = vor.u32 %v119_v18, %v115_v16  ;;  %v10445_v30 = vld [vmem:[%s19264_s1 + $0xa] sm:$0x3] }
   0x8   :  { %v130_v27 = vor.u32 %v129_v20, %v125_v19  ;;  %v3816_v28 = vrot.slane %v3814_v22, 5  ;;  %v3823_v29 = vshrl.u32 %v2829_v17, 16  ;;  %v28_v31 = vld [vmem:[%s19263_s0 + $0xc] sm:$0xf]  ;;  %v3826_v34 = vshll.u32 %v2829_v17, 16  ;;  %12340 = vmatprep.subr.msk.bf16.mxu0 %vm1050_vm0, %v10445_v30  ;;  %vm12860_vm7 = vmor %vm3810_vm4, %vm3811_vm5 }
   0x9   :  { %v111_v32 = vrot.slane %v110_v23, 4  ;;  %v3819_v33 = vrot.slane %v3817_v24, 6  ;;  %v3833_v35 = vshrl.u32 %v2830_v21, 16  ;;  %v121_v36 = vrot.slane %v120_v26, 4  ;;  %v29_v40 = vld [vmem:[%s19263_s0 + $0x10] sm:$0xf] }
   0xa   :  { %v131_v37 = vrot.slane %v130_v27, 4  ;;  %v3825_v38 = vrot.slane %v3823_v29, 5  ;;  %v3836_v39 = vshll.u32 %v2830_v21, 16  ;;  %v3828_v43 = vrot.slane %v3826_v34, 6  ;;  %v2831_v50 = vld [vmem:[%s19263_s0 + $0x14] sm:$0xf] }
   0xb   :  { %v116_v41 = vsel %vm12840_vm6, %v111_v32, %v115_v16  ;;  %v3820_v42 = vor.u32 %v3819_v33, %v3816_v28  ;;  %v3835_v44 = vrot.slane %v3833_v35, 5  ;;  %v126_v45 = vsel %vm12840_vm6, %v121_v36, %v125_v19  ;;  %v2832_v58 = vld [vmem:[%s19263_s0 + $0x18] sm:$0xf]  ;;  %v30_v4 = vld [vmem:[%s19263_s0 + $0x14] sm:$0xf] }
   0xc   :  { %v19465_v46 = vmov 0  ;;  %v3838_v47 = vrot.slane %v3836_v39, 6  ;;  %v133_v48 = vshll.u32 %v28_v31, 16  ;;  %v137_v49 = vshrl.u32 %v28_v31, 16  ;;  %v31_v9 = vld [vmem:[%s19263_s0 + $0x18] sm:$0xf] }
   0xd   :  { %v19466_v46 = vsel %vm12860_vm7, 4294967295, %v19465_v46  ;;  %v10076_v51 = vcombine.low %v116_v41, %v126_v45  ;;  %v3821_v52 = vrot.slane %v3820_v42, 4  ;;  %v3829_v53 = vor.u32 %v3828_v43, %v3825_v38  ;;  %v12887_v14 = vld [vmem:[%s19264_s1] sm:$0x3]  ;;  %v2833_v23 = vld [vmem:[%s19263_s0 + $0x1c] sm:$0xf] }
   0xe   :  { %19467 = vst [vmem:[#allocation6_spill] sm:$0xff] %v19466_v46  ;;  %v143_v54 = vshll.u32 %v29_v40, 16  ;;  %v3839_v55 = vor.u32 %v3838_v47, %v3835_v44  ;;  %v135_v56 = vrot.slane %v133_v48, 5  ;;  %v139_v57 = vrot.slane %v137_v49, 4  ;;  %12335 = vmatprep.subr.msk.bf16.mxu1 %vm1050_vm0, %v12887_v14  ;;  %v2834_v29 = vld [vmem:[%s19263_s0 + $0x20] sm:$0xf] }
   0xf   :  { %11084 = vmatprep.mubr.msk.bf16.mxu1 %vm941_vm3, %v10076_v51  ;;  %v3830_v59 = vsel %vm12860_vm7, %v3821_v52, %v3829_v53  ;;  %v3831_v60 = vrot.slane %v3829_v53, 4  ;;  %v3843_v62 = vshrl.u32 %v2831_v50, 16  ;;  %v3846_v3 = vshll.u32 %v2831_v50, 16  ;;  %v32_v42 = vld [vmem:[%s19263_s0 + $0x1c] sm:$0xf] }
  0x10   :  { %v145_v61 = vrot.slane %v143_v54, 5  ;;  %v3841_v63 = vrot.slane %v3839_v55, 4  ;;  %v136_v0 = vsel %vm12840_vm6, %v131_v37, %v135_v56  ;;  %v140_v1 = vor.u32 %v139_v57, %v135_v56  ;;  %v33_v48 = vld [vmem:[%s19263_s0 + $0x20] sm:$0xf] }
  0x11   :  { %v3840_v5 = vsel %vm12860_vm7, %v3831_v60, %v3839_v55  ;;  %v3845_v6 = vrot.slane %v3843_v62, 5  ;;  %v3853_v7 = vshrl.u32 %v2832_v58, 16  ;;  %v3856_v8 = vshll.u32 %v2832_v58, 16  ;;  %v2836_v62 = vld [vmem:[%s19263_s0 + $0x28] sm:$0xf] }
  0x12   :  { %v10371_v10 = vcombine.low %v3830_v59, %v3840_v5  ;;  %v141_v11 = vrot.slane %v140_v1, 4  ;;  %v3848_v12 = vrot.slane %v3846_v3, 6  ;;  %v5609_v13 = vsel %vm1050_vm0, %v10445_v30, 0 }
  0x13   :  { %v3855_v15 = vrot.slane %v3853_v7, 5  ;;  %v3858_v16 = vrot.slane %v3856_v8, 6  ;;  %v147_v17 = vshrl.u32 %v29_v40, 16  ;;  %v153_v18 = vshll.u32 %v30_v4, 16 }
  0x14   :  { %11380 = vmatprep.mubr.msk.bf16.mxu0 %vm941_vm3, %v10371_v10  ;;  %v146_v19 = vsel %vm12840_vm6, %v141_v11, %v145_v61  ;;  %v3849_v20 = vor.u32 %v3848_v12, %v3845_v6  ;;  %v157_v21 = vshrl.u32 %v30_v4, 16  ;;  %v163_v22 = vshll.u32 %v31_v9, 16  ;;  %v34_v12 = vld [vmem:[%s19263_s0 + $0x24] sm:$0xf] }
  0x15   :  { %v10077_v24 = vcombine.low %v136_v0, %v146_v19  ;;  %v3859_v26 = vor.u32 %v3858_v16, %v3855_v15  ;;  %v149_v27 = vrot.slane %v147_v17, 4  ;;  %v155_v28 = vrot.slane %v153_v18, 5  ;;  %v35_v18 = vld [vmem:[%s19263_s0 + $0x28] sm:$0xf] }
  0x16   :  { %v3850_v30 = vsel %vm12860_vm7, %v3841_v63, %v3849_v20  ;;  %v3851_v31 = vrot.slane %v3849_v20, 4  ;;  %v159_v32 = vrot.slane %v157_v21, 4  ;;  %v165_v33 = vrot.slane %v163_v22, 5 }
  0x17   :  { %11085 = vmatmul.mubr.msk.bf16.vlgmr.msra.gmra.mrb[0].mxu1 %vm941_vm3, %v10077_v24  ;;  %v150_v34 = vor.u32 %v149_v27, %v145_v61  ;;  %v3861_v35 = vrot.slane %v3859_v26, 4  ;;  %v3863_v36 = vshrl.u32 %v2833_v23, 16  ;;  %v3866_v37 = vshll.u32 %v2833_v23, 16  ;;  %v2835_v61 = vld [vmem:[%s19263_s0 + $0x24] sm:$0xf] }
  0x18   :  { %v3860_v38 = vsel %vm12860_vm7, %v3851_v31, %v3859_v26  ;;  %v160_v39 = vor.u32 %v159_v32, %v155_v28  ;;  %v3873_v40 = vshrl.u32 %v2834_v29, 16  ;;  %v3876_v41 = vshll.u32 %v2834_v29, 16  ;;  %v2837_v23 = vld [vmem:[%s19263_s0 + $0x2c] sm:$0xf] }
  0x19   :  { %v10372_v43 = vcombine.low %v3850_v30, %v3860_v38  ;;  %v151_v44 = vrot.slane %v150_v34, 4  ;;  %v3865_v45 = vrot.slane %v3863_v36, 5  ;;  %v3868_v47 = vrot.slane %v3866_v37, 6  ;;  %v2838_v36 = vld [vmem:[%s19263_s0 + $0x30] sm:$0xf] }
  0x1a   :  { %v161_v49 = vrot.slane %v160_v39, 4  ;;  %v3875_v50 = vrot.slane %v3873_v40, 5  ;;  %v3878_v51 = vrot.slane %v3876_v41, 6  ;;  %v167_v52 = vshrl.u32 %v31_v9, 16 }
  0x1b   :  { %11381 = vmatmul.mubr.msk.bf16.vlgmr.msra.gmra.mrb[0].mxu0 %vm941_vm3, %v10372_v43  ;;  %v156_v53 = vsel %vm12840_vm6, %v151_v44, %v155_v28  ;;  %v3869_v54 = vor.u32 %v3868_v47, %v3865_v45  ;;  %v173_v55 = vshll.u32 %v32_v42, 16  ;;  %v177_v56 = vshrl.u32 %v32_v42, 16  ;;  %v36_v47 = vld [vmem:[%s19263_s0 + $0x2c] sm:$0xf] }
  0x1c   :  { %11453 = vmatpush3.bf16.msra.mxu0 %v5609_v13  ;;  %v166_v57 = vsel %vm12840_vm6, %v161_v49, %v165_v33  ;;  %v3879_v58 = vor.u32 %v3878_v51, %v3875_v50  ;;  %v169_v59 = vrot.slane %v167_v52, 4  ;;  %v183_v60 = vshll.u32 %v33_v48, 16 }
  0x1d   :  { %v10078_v63 = vcombine.low %v156_v53, %v166_v57  ;;  %v3870_v0 = vsel %vm12860_vm7, %v3861_v35, %v3869_v54  ;;  %v3871_v1 = vrot.slane %v3869_v54, 4  ;;  %v175_v3 = vrot.slane %v173_v55, 5  ;;  %v37_v55 = vld [vmem:[%s19263_s0 + $0x30] sm:$0xf] }
  0x1e   :  { %v170_v4 = vor.u32 %v169_v59, %v165_v33  ;;  %v179_v5 = vrot.slane %v177_v56, 4  ;;  %v185_v6 = vrot.slane %v183_v60, 5  ;;  %v3881_v7 = vrot.slane %v3879_v58, 4 }
  0x1f   :  { %11088 = vmatprep.mubr.msk.bf16.mxu1 %vm941_vm3, %v10078_v63  ;;  %v3880_v8 = vsel %vm12860_vm7, %v3871_v1, %v3879_v58  ;;  %v3883_v9 = vshrl.u32 %v2835_v61, 16  ;;  %v3886_v10 = vshll.u32 %v2835_v61, 16  ;;  %v3893_v11 = vshrl.u32 %v2836_v62, 16 }
  0x20   :  { %v10373_v13 = vcombine.low %v3870_v0, %v3880_v8  ;;  %v171_v15 = vrot.slane %v170_v4, 4  ;;  %v180_v16 = vor.u32 %v179_v5, %v175_v3  ;;  %v3896_v17 = vshll.u32 %v2836_v62, 16 }
  0x21   :  { %v3885_v19 = vrot.slane %v3883_v9, 5  ;;  %v3888_v20 = vrot.slane %v3886_v10, 6  ;;  %v3895_v21 = vrot.slane %v3893_v11, 5  ;;  %v187_v22 = vshrl.u32 %v33_v48, 16  ;;  %v2840_v11 = vld [vmem:[%s19263_s0 + $0x38] sm:$0xf] }
  0x22   :  { %11384 = vmatprep.mubr.msk.bf16.mxu0 %vm941_vm3, %v10373_v13  ;;  %v176_v24 = vsel %vm12840_vm6, %v171_v15, %v175_v3  ;;  %v181_v26 = vrot.slane %v180_v16, 4  ;;  %v3898_v27 = vrot.slane %v3896_v17, 6  ;;  %v193_v28 = vshll.u32 %v34_v12, 16 }
  0x23   :  { %v3889_v29 = vor.u32 %v3888_v20, %v3885_v19  ;;  %v189_v30 = vrot.slane %v187_v22, 4  ;;  %v197_v31 = vshrl.u32 %v34_v12, 16  ;;  %v203_v32 = vshll.u32 %v35_v18, 16  ;;  %v38_v20 = vld [vmem:[%s19263_s0 + $0x34] sm:$0xf] }
  0x24   :  { %v186_v33 = vsel %vm12840_vm6, %v181_v26, %v185_v6  ;;  %v3899_v34 = vor.u32 %v3898_v27, %v3895_v21  ;;  %v195_v35 = vrot.slane %v193_v28, 5  ;;  %v3903_v37 = vshrl.u32 %v2837_v23, 16  ;;  %v39_v26 = vld [vmem:[%s19263_s0 + $0x38] sm:$0xf] }
  0x25   :  { %v10079_v38 = vcombine.low %v176_v24, %v186_v33  ;;  %v3890_v39 = vsel %vm12860_vm7, %v3881_v7, %v3889_v29  ;;  %v3891_v40 = vrot.slane %v3889_v29, 4  ;;  %v190_v41 = vor.u32 %v189_v30, %v185_v6  ;;  %v2839_v6 = vld [vmem:[%s19263_s0 + $0x34] sm:$0xf] }
  0x26   :  { %v199_v42 = vrot.slane %v197_v31, 4  ;;  %v205_v43 = vrot.slane %v203_v32, 5  ;;  %v3901_v44 = vrot.slane %v3899_v34, 4  ;;  %v3905_v45 = vrot.slane %v3903_v37, 5 }
  0x27   :  { %11089 = vmatmul.mubr.msk.bf16.gmra.mrb[4].mxu1 %vm941_vm3, %v10079_v38  ;;  %v3900_v48 = vsel %vm12860_vm7, %v3891_v40, %v3899_v34  ;;  %v191_v49 = vrot.slane %v190_v41, 4  ;;  %v3906_v50 = vshll.u32 %v2837_v23, 16  ;;  %v3913_v51 = vshrl.u32 %v2838_v36, 16 }
  0x28   :  { %v10374_v52 = vcombine.low %v3890_v39, %v3900_v48  ;;  %v200_v53 = vor.u32 %v199_v42, %v195_v35  ;;  %v3916_v54 = vshll.u32 %v2838_v36, 16  ;;  %v207_v56 = vshrl.u32 %v35_v18, 16 }
  0x29   :  { %v196_v57 = vsel %vm12840_vm6, %v191_v49, %v195_v35  ;;  %v3908_v58 = vrot.slane %v3906_v50, 6  ;;  %v3915_v59 = vrot.slane %v3913_v51, 5  ;;  %v213_v60 = vshll.u32 %v36_v47, 16  ;;  %v2841_v35 = vld [vmem:[%s19263_s0 + $0x3c] sm:$0xf] }
  0x2a   :  { %11385 = vmatmul.mubr.msk.bf16.gmra.mrb[4].mxu0 %vm941_vm3, %v10374_v52  ;;  %v201_v61 = vrot.slane %v200_v53, 4  ;;  %v3918_v62 = vrot.slane %v3916_v54, 6  ;;  %v209_v63 = vrot.slane %v207_v56, 4  ;;  %v217_v0 = vshrl.u32 %v36_v47, 16 }
  0x2b   :  { %v3909_v1 = vor.u32 %v3908_v58, %v3905_v45  ;;  %v215_v3 = vrot.slane %v213_v60, 5  ;;  %v223_v4 = vshll.u32 %v37_v55, 16  ;;  %v1664_v5 = vsel %vm1050_vm0, %v12887_v14, 0  ;;  %v40_v58 = vld [vmem:[%s19263_s0 + $0x3c] sm:$0xf] }
  0x2c   :  { %v206_v7 = vsel %vm12840_vm6, %v201_v61, %v205_v43  ;;  %v3919_v8 = vor.u32 %v3918_v62, %v3915_v59  ;;  %v210_v9 = vor.u32 %v209_v63, %v205_v43  ;;  %v219_v10 = vrot.slane %v217_v0, 4  ;;  %11157 = vmatpush3.bf16.msra.mxu1 %v1664_v5  ;;  %v41_v62 = vld [vmem:[%s19263_s0 + $0x40] sm:$0xf] }
  0x2d   :  { %v10080_v12 = vcombine.low %v196_v57, %v206_v7  ;;  %v3910_v13 = vsel %vm12860_vm7, %v3901_v44, %v3909_v1  ;;  %v3911_v14 = vrot.slane %v3909_v1, 4  ;;  %v225_v15 = vrot.slane %v223_v4, 5  ;;  %v2842_v44 = vld [vmem:[%s19263_s0 + $0x40] sm:$0xf] }
  0x2e   :  { %v211_v16 = vrot.slane %v210_v9, 4  ;;  %v220_v17 = vor.u32 %v219_v10, %v215_v3  ;;  %v3921_v18 = vrot.slane %v3919_v8, 4  ;;  %v3923_v19 = vshrl.u32 %v2839_v6, 16 }
  0x2f   :  { %11092 = vmatprep.mubr.msk.bf16.mxu1 %vm941_vm3, %v10080_v12  ;;  %v3920_v21 = vsel %vm12860_vm7, %v3911_v14, %v3919_v8  ;;  %v3926_v22 = vshll.u32 %v2839_v6, 16  ;;  %v3933_v23 = vshrl.u32 %v2840_v11, 16  ;;  %v3936_v24 = vshll.u32 %v2840_v11, 16 }
  0x30   :  { %v10375_v27 = vcombine.low %v3910_v13, %v3920_v21  ;;  %v216_v28 = vsel %vm12840_vm6, %v211_v16, %v215_v3  ;;  %v221_v29 = vrot.slane %v220_v17, 4  ;;  %v3925_v30 = vrot.slane %v3923_v19, 5  ;;  %v2843_v13 = vld [vmem:[%s19263_s0 + $0x44] sm:$0xf] }
  0x31   :  { %v3928_v31 = vrot.slane %v3926_v22, 6  ;;  %v3935_v32 = vrot.slane %v3933_v23, 5  ;;  %v3938_v33 = vrot.slane %v3936_v24, 6  ;;  %v227_v34 = vshrl.u32 %v37_v55, 16 }
  0x32   :  { %11388 = vmatprep.mubr.msk.bf16.mxu0 %vm941_vm3, %v10375_v27  ;;  %v226_v36 = vsel %vm12840_vm6, %v221_v29, %v225_v15  ;;  %v233_v37 = vshll.u32 %v38_v20, 16  ;;  %v237_v38 = vshrl.u32 %v38_v20, 16  ;;  %v243_v39 = vshll.u32 %v39_v26, 16 }
  0x33   :  { %v10081_v40 = vcombine.low %v216_v28, %v226_v36  ;;  %v3929_v41 = vor.u32 %v3928_v31, %v3925_v30  ;;  %v3939_v42 = vor.u32 %v3938_v33, %v3935_v32  ;;  %v229_v43 = vrot.slane %v227_v34, 4  ;;  %v42_v32 = vld [vmem:[%s19263_s0 + $0x44] sm:$0xf]  ;;  %v43_v33 = vld [vmem:[%s19263_s0 + $0x48] sm:$0xf] }
  0x34   :  { %v235_v45 = vrot.slane %v233_v37, 5  ;;  %v239_v47 = vrot.slane %v237_v38, 4  ;;  %v245_v48 = vrot.slane %v243_v39, 5  ;;  %v3943_v49 = vshrl.u32 %v2841_v35, 16  ;;  %v2845_v38 = vld [vmem:[%s19263_s0 + $0x4c] sm:$0xf] }
  0x35   :  { %11093 = vmatmul.mubr.msk.bf16.gmra.mrb[8].mxu1 %vm941_vm3, %v10081_v40  ;;  %v3930_v50 = vsel %vm12860_vm7, %v3921_v18, %v3929_v41  ;;  %v3931_v51 = vrot.slane %v3929_v41, 4  ;;  %v230_v52 = vor.u32 %v229_v43, %v225_v15  ;;  %v3941_v53 = vrot.slane %v3939_v42, 4  ;;  %v2844_v18 = vld [vmem:[%s19263_s0 + $0x48] sm:$0xf] }
  0x36   :  { %v240_v54 = vor.u32 %v239_v47, %v235_v45  ;;  %v3945_v55 = vrot.slane %v3943_v49, 5  ;;  %v3946_v56 = vshll.u32 %v2841_v35, 16  ;;  %v3953_v57 = vshrl.u32 %v2842_v44, 16 }
  0x37   :  { %v3940_v59 = vsel %vm12860_vm7, %v3931_v51, %v3939_v42  ;;  %v231_v60 = vrot.slane %v230_v52, 4  ;;  %v3956_v61 = vshll.u32 %v2842_v44, 16  ;;  %v247_v63 = vshrl.u32 %v39_v26, 16  ;;  %v2846_v51 = vld [vmem:[%s19263_s0 + $0x50] sm:$0xf] }
  0x38   :  { %v10376_v0 = vcombine.low %v3930_v50, %v3940_v59  ;;  %v241_v1 = vrot.slane %v240_v54, 4  ;;  %v3948_v3 = vrot.slane %v3946_v56, 6  ;;  %v3955_v4 = vrot.slane %v3953_v57, 5 }
  0x39   :  { %v236_v5 = vsel %vm12840_vm6, %v231_v60, %v235_v45  ;;  %v3958_v6 = vrot.slane %v3956_v61, 6  ;;  %v249_v7 = vrot.slane %v247_v63, 4  ;;  %v253_v8 = vshll.u32 %v40_v58, 16 }
  0x3a   :  { %11389 = vmatmul.mubr.msk.bf16.gmra.mrb[8].mxu0 %vm941_vm3, %v10376_v0  ;;  %v246_v9 = vsel %vm12840_vm6, %v241_v1, %v245_v48  ;;  %v3949_v10 = vor.u32 %v3948_v3, %v3945_v55  ;;  %v257_v11 = vshrl.u32 %v40_v58, 16  ;;  %v263_v12 = vshll.u32 %v41_v62, 16 }
  0x3b   :  { %v10082_v14 = vcombine.low %v236_v5, %v246_v9  ;;  %v3959_v15 = vor.u32 %v3958_v6, %v3955_v4  ;;  %v250_v16 = vor.u32 %v249_v7, %v245_v48  ;;  %v255_v17 = vrot.slane %v253_v8, 5  ;;  %v45_v8 = vld [vmem:[%s19263_s0 + $0x50] sm:$0xf] }
  0x3c   :  { %v3950_v19 = vsel %vm12860_vm7, %v3941_v53, %v3949_v10  ;;  %v3951_v20 = vrot.slane %v3949_v10, 4  ;;  %v259_v21 = vrot.slane %v257_v11, 4  ;;  %v265_v22 = vrot.slane %v263_v12, 5  ;;  %v13037_v53 = vld [vmem:[%s19264_s1 + $0xc] sm:$0x3] }
  0x3d   :  { %11096 = vmatprep.mubr.msk.bf16.mxu1 %vm941_vm3, %v10082_v14  ;;  %v251_v23 = vrot.slane %v250_v16, 4  ;;  %v3961_v24 = vrot.slane %v3959_v15, 4  ;;  %v3963_v26 = vshrl.u32 %v2843_v13, 16  ;;  %v3966_v27 = vshll.u32 %v2843_v13, 16  ;;  %12341 = vmatprep.subr.msk.bf16.mxu0 %vm1050_vm0, %v13037_v53  ;;  %v2847_v13 = vld [vmem:[%s19263_s0 + $0x54] sm:$0xf] }
  0x3e   :  { %v3960_v28 = vsel %vm12860_vm7, %v3951_v20, %v3959_v15  ;;  %v260_v29 = vor.u32 %v259_v21, %v255_v17  ;;  %v3973_v30 = vshrl.u32 %v2844_v18, 16  ;;  %v3976_v31 = vshll.u32 %v2844_v18, 16 }
  0x3f   :  { %v10377_v34 = vcombine.low %v3950_v19, %v3960_v28  ;;  %v256_v35 = vsel %vm12840_vm6, %v251_v23, %v255_v17  ;;  %v3965_v36 = vrot.slane %v3963_v26, 5  ;;  %v3968_v37 = vrot.slane %v3966_v27, 6  ;;  %v2848_v26 = vld [vmem:[%s19263_s0 + $0x58] sm:$0xf] }
  0x40   :  { %v261_v39 = vrot.slane %v260_v29, 4  ;;  %v3975_v40 = vrot.slane %v3973_v30, 5  ;;  %v3978_v41 = vrot.slane %v3976_v31, 6  ;;  %v267_v42 = vshrl.u32 %v41_v62, 16  ;;  %v44_v62 = vld [vmem:[%s19263_s0 + $0x4c] sm:$0xf] }
  0x41   :  { %11392 = vmatprep.mubr.msk.bf16.mxu0 %vm941_vm3, %v10377_v34  ;;  %v3969_v43 = vor.u32 %v3968_v37, %v3965_v36  ;;  %v273_v44 = vshll.u32 %v42_v32, 16  ;;  %v277_v45 = vshrl.u32 %v42_v32, 16  ;;  %v283_v47 = vshll.u32 %v43_v33, 16  ;;  %v46_v36 = vld [vmem:[%s19263_s0 + $0x54] sm:$0xf] }
  0x42   :  { %v266_v48 = vsel %vm12840_vm6, %v261_v39, %v265_v22  ;;  %v3979_v49 = vor.u32 %v3978_v41, %v3975_v40  ;;  %v269_v50 = vrot.slane %v267_v42, 4  ;;  %v3983_v52 = vshrl.u32 %v2845_v38, 16 }
  0x43   :  { %v10083_v54 = vcombine.low %v256_v35, %v266_v48  ;;  %v3970_v55 = vsel %vm12860_vm7, %v3961_v24, %v3969_v43  ;;  %v3971_v56 = vrot.slane %v3969_v43, 4  ;;  %v275_v57 = vrot.slane %v273_v44, 5  ;;  %v47_v44 = vld [vmem:[%s19263_s0 + $0x58] sm:$0xf] }
  0x44   :  { %v270_v58 = vor.u32 %v269_v50, %v265_v22  ;;  %v279_v59 = vrot.slane %v277_v45, 4  ;;  %v285_v60 = vrot.slane %v283_v47, 5  ;;  %v3981_v61 = vrot.slane %v3979_v49, 4 }
  0x45   :  { %11097 = vmatmul.mubr.msk.bf16.gmra.mrb[12].mxu1 %vm941_vm3, %v10083_v54  ;;  %v3980_v63 = vsel %vm12860_vm7, %v3971_v56, %v3979_v49  ;;  %v3985_v0 = vrot.slane %v3983_v52, 5  ;;  %v3986_v1 = vshll.u32 %v2845_v38, 16  ;;  %v3993_v3 = vshrl.u32 %v2846_v51, 16 }
  0x46   :  { %v10378_v4 = vcombine.low %v3970_v55, %v3980_v63  ;;  %v271_v5 = vrot.slane %v270_v58, 4  ;;  %v280_v6 = vor.u32 %v279_v59, %v275_v57  ;;  %v3996_v7 = vshll.u32 %v2846_v51, 16  ;;  %v2849_v51 = vld [vmem:[%s19263_s0 + $0x5c] sm:$0xf] }
  0x47   :  { %v3988_v9 = vrot.slane %v3986_v1, 6  ;;  %v3995_v10 = vrot.slane %v3993_v3, 5  ;;  %v287_v11 = vshrl.u32 %v43_v33, 16  ;;  %v293_v12 = vshll.u32 %v44_v62, 16 }
  0x48   :  { %11393 = vmatmul.mubr.msk.bf16.gmra.mrb[12].mxu0 %vm941_vm3, %v10378_v4  ;;  %v276_v14 = vsel %vm12840_vm6, %v271_v5, %v275_v57  ;;  %v281_v15 = vrot.slane %v280_v6, 4  ;;  %v3998_v16 = vrot.slane %v3996_v7, 6  ;;  %v297_v17 = vshrl.u32 %v44_v62, 16  ;;  %v2850_v57 = vld [vmem:[%s19263_s0 + $0x60] sm:$0xf] }
  0x49   :  { %v3989_v18 = vor.u32 %v3988_v9, %v3985_v0  ;;  %v289_v19 = vrot.slane %v287_v11, 4  ;;  %v295_v20 = vrot.slane %v293_v12, 5  ;;  %v303_v21 = vshll.u32 %v45_v8, 16 }
  0x4a   :  { %v286_v22 = vsel %vm12840_vm6, %v281_v15, %v285_v60  ;;  %v3999_v23 = vor.u32 %v3998_v16, %v3995_v10  ;;  %v299_v24 = vrot.slane %v297_v17, 4  ;;  %v4003_v27 = vshrl.u32 %v2847_v13, 16 }
  0x4b   :  { %v10084_v28 = vcombine.low %v276_v14, %v286_v22  ;;  %v3990_v29 = vsel %vm12860_vm7, %v3981_v61, %v3989_v18  ;;  %v3991_v30 = vrot.slane %v3989_v18, 4  ;;  %v290_v31 = vor.u32 %v289_v19, %v285_v60 }
  0x4c   :  { %v300_v32 = vor.u32 %v299_v24, %v295_v20  ;;  %v305_v33 = vrot.slane %v303_v21, 5  ;;  %v4001_v34 = vrot.slane %v3999_v23, 4  ;;  %v4005_v35 = vrot.slane %v4003_v27, 5 }
  0x4d   :  { %11100 = vmatprep.mubr.msk.bf16.mxu1 %vm941_vm3, %v10084_v28  ;;  %v4000_v37 = vsel %vm12860_vm7, %v3991_v30, %v3999_v23  ;;  %v291_v38 = vrot.slane %v290_v31, 4  ;;  %v4006_v39 = vshll.u32 %v2847_v13, 16  ;;  %v4013_v40 = vshrl.u32 %v2848_v26, 16 }
  0x4e   :  { %v10379_v41 = vcombine.low %v3990_v29, %v4000_v37  ;;  %v301_v42 = vrot.slane %v300_v32, 4  ;;  %v4016_v43 = vshll.u32 %v2848_v26, 16  ;;  %v307_v45 = vshrl.u32 %v45_v8, 16 }
  0x4f   :  { %v296_v47 = vsel %vm12840_vm6, %v291_v38, %v295_v20  ;;  %v4008_v48 = vrot.slane %v4006_v39, 6  ;;  %v4015_v49 = vrot.slane %v4013_v40, 5  ;;  %v313_v50 = vshll.u32 %v46_v36, 16 }
  0x50   :  { %11396 = vmatprep.mubr.msk.bf16.mxu0 %vm941_vm3, %v10379_v41  ;;  %v306_v52 = vsel %vm12840_vm6, %v301_v42, %v305_v33  ;;  %v4018_v54 = vrot.slane %v4016_v43, 6  ;;  %v309_v55 = vrot.slane %v307_v45, 4  ;;  %v317_v56 = vshrl.u32 %v46_v36, 16 }
  0x51   :  { %v10085_v58 = vcombine.low %v296_v47, %v306_v52  ;;  %v4009_v59 = vor.u32 %v4008_v48, %v4005_v35  ;;  %v315_v60 = vrot.slane %v313_v50, 5  ;;  %v323_v61 = vshll.u32 %v47_v44, 16 }
  0x52   :  { %v4019_v62 = vor.u32 %v4018_v54, %v4015_v49  ;;  %v310_v63 = vor.u32 %v309_v55, %v305_v33  ;;  %v319_v0 = vrot.slane %v317_v56, 4  ;;  %v4023_v1 = vshrl.u32 %v2849_v51, 16 }
  0x53   :  { %11101 = vmatmul.mubr.msk.bf16.gmra.mrb[16].mxu1 %vm941_vm3, %v10085_v58  ;;  %v4010_v3 = vsel %vm12860_vm7, %v4001_v34, %v4009_v59  ;;  %v4011_v4 = vrot.slane %v4009_v59, 4  ;;  %v325_v5 = vrot.slane %v323_v61, 5  ;;  %v4026_v6 = vshll.u32 %v2849_v51, 16 }
  0x54   :  { %11 = vsyncpa [#allocation3], 0  ;;  %v311_v7 = vrot.slane %v310_v63, 4  ;;  %v320_v8 = vor.u32 %v319_v0, %v315_v60  ;;  %v4021_v9 = vrot.slane %v4019_v62, 4  ;;  %v4025_v10 = vrot.slane %v4023_v1, 5  ;;  %s12771_s15 = smov [#allocation2]  }
  0x55   :  { %v48_v11 = vld [vmem:[%s19263_s0 + $0x5c] sm:$0xf]  ;;  %v4020_v12 = vsel %vm12860_vm7, %v4011_v4, %v4019_v62  ;;  %v4028_v13 = vrot.slane %v4026_v6, 6  ;;  %v4033_v14 = vshrl.u32 %v2850_v57, 16  ;;  %v4036_v15 = vshll.u32 %v2850_v57, 16  ;;  %s10067_s16 = sshll.u32 %s12771_s15, 4  ;;  %s10068_s16 = int_to_ptr.vmem [resolvable:$true] %s10067_s16 }
  0x56   :  { %v49_v16 = vld [vmem:[%s19263_s0 + $0x60] sm:$0xf]  ;;  %v10380_v17 = vcombine.low %v4010_v3, %v4020_v12  ;;  %v316_v18 = vsel %vm12840_vm6, %v311_v7, %v315_v60  ;;  %v321_v19 = vrot.slane %v320_v8, 4  ;;  %v327_v20 = vshrl.u32 %v47_v44, 16  ;;  %v2851_v30 = vld [vmem:[%s19263_s0 + $0x64] sm:$0xf]  ;;  %p12749_p1 = scmp.lt.s32.totalorder %s10068_s16, %s10068_s16 }
  0x57   :  { %v4029_v21 = vor.u32 %v4028_v13, %v4025_v10  ;;  %v4035_v22 = vrot.slane %v4033_v14, 5  ;;  %v4038_v23 = vrot.slane %v4036_v15, 6  ;;  %v333_v24 = vshll.u32 %v48_v11, 16  ;;  %v2852_v35 = vld [vmem:[%s19263_s0 + $0x68] sm:$0xf]  ;;  %s12744_s17 = scalar_lea.vmem %s10068_s16, 32 }
  0x58   :  { %11397 = vmatmul.mubr.msk.bf16.gmra.mrb[16].mxu0 %vm941_vm3, %v10380_v17  ;;  %v326_v26 = vsel %vm12840_vm6, %v321_v19, %v325_v5  ;;  %v329_v27 = vrot.slane %v327_v20, 4  ;;  %v337_v28 = vshrl.u32 %v48_v11, 16  ;;  %v343_v29 = vshll.u32 %v49_v16, 16  ;;  %v50_v44 = vld [vmem:[%s19263_s0 + $0x64] sm:$0xf]  ;;  %p12745_p0 = scmp.ne.s32.totalorder %s10068_s16, %s12744_s17  ;;  %p12750_p2 = scmp.lt.s32.totalorder %s12744_s17, %s12744_s17 }
  0x59   :  { %v10086_v31 = vcombine.low %v316_v18, %v326_v26  ;;  %v4030_v32 = vsel %vm12860_vm7, %v4021_v9, %v4029_v21  ;;  %v4031_v33 = vrot.slane %v4029_v21, 4  ;;  %v4039_v34 = vor.u32 %v4038_v23, %v4035_v22  ;;  %v51_v50 = vld [vmem:[%s19263_s0 + $0x68] sm:$0xf]  ;;  %v2853_v56 = vld [vmem:[%s19263_s0 + $0x6c] sm:$0xf] }
  0x5a   :  { %v330_v36 = vor.u32 %v329_v27, %v325_v5  ;;  %v335_v37 = vrot.slane %v333_v24, 5  ;;  %v339_v38 = vrot.slane %v337_v28, 4  ;;  %v345_v39 = vrot.slane %v343_v29, 5  ;;  %v2854_v5 = vld [vmem:[%s19263_s0 + $0x70] sm:$0xf]  ;;  %p12751_p3 = por %p12750_p2, %p12749_p1 }
  0x5b   :  { %11104 = vmatprep.mubr.msk.bf16.mxu1 %vm941_vm3, %v10086_v31  ;;  %v4040_v40 = vsel %vm12860_vm7, %v4031_v33, %v4039_v34  ;;  %v4041_v41 = vrot.slane %v4039_v34, 4  ;;  %v4043_v42 = vshrl.u32 %v2851_v30, 16  ;;  %v4046_v43 = vshll.u32 %v2851_v30, 16  ;;  %v52_v15 = vld [vmem:[%s19263_s0 + $0x6c] sm:$0xf] }
  0x5c   :  { %v10381_v45 = vcombine.low %v4030_v32, %v4040_v40  ;;  %v331_v47 = vrot.slane %v330_v36, 4  ;;  %v340_v48 = vor.u32 %v339_v38, %v335_v37  ;;  %v4053_v49 = vshrl.u32 %v2852_v35, 16  ;;  %v53_v24 = vld [vmem:[%s19263_s0 + $0x70] sm:$0xf]  ;;  %v2855_v30 = vld [vmem:[%s19263_s0 + $0x74] sm:$0xf]  ;;  %p12752_p4 = pnand %p12751_p3, %p12745_p0 }
  0x5d   :  { %v4045_v51 = vrot.slane %v4043_v42, 5  ;;  %v4048_v52 = vrot.slane %v4046_v43, 6  ;;  %v4056_v54 = vshll.u32 %v2852_v35, 16  ;;  %v347_v55 = vshrl.u32 %v49_v16, 16  ;;  %v2856_v42 = vld [vmem:[%s19263_s0 + $0x78] sm:$0xf] }
  0x5e   :  { %11400 = vmatprep.mubr.msk.bf16.mxu0 %vm941_vm3, %v10381_v45  ;;  %v336_v57 = vsel %vm12840_vm6, %v331_v47, %v335_v37  ;;  %v341_v58 = vrot.slane %v340_v48, 4  ;;  %v4055_v59 = vrot.slane %v4053_v49, 5  ;;  %v353_v60 = vshll.u32 %v50_v44, 16  ;;  %v12425_v25 = vld [vmem:[%s19263_s0 + $0x98] sm:$0x3] }
  0x5f   :  { %v4049_v61 = vor.u32 %v4048_v52, %v4045_v51  ;;  %v4058_v62 = vrot.slane %v4056_v54, 6  ;;  %v349_v63 = vrot.slane %v347_v55, 4  ;;  %v357_v0 = vshrl.u32 %v50_v44, 16  ;;  %v54_v54 = vld [vmem:[%s19263_s0 + $0x74] sm:$0xf] }
  0x60   :  { %v346_v1 = vsel %vm12840_vm6, %v341_v58, %v345_v39  ;;  %v355_v3 = vrot.slane %v353_v60, 5  ;;  %v363_v4 = vshll.u32 %v51_v50, 16  ;;  %v4063_v6 = vshrl.u32 %v2853_v56, 16  ;;  %v2890_v46 = vld [vmem:[%s19263_s0 + $0x110] sm:$0xf] }
  0x61   :  { %v10087_v7 = vcombine.low %v336_v57, %v346_v1  ;;  %v4050_v8 = vsel %vm12860_vm7, %v4041_v41, %v4049_v61  ;;  %v4051_v9 = vrot.slane %v4049_v61, 4  ;;  %v4059_v10 = vor.u32 %v4058_v62, %v4055_v59  ;;  %v55_v62 = vld [vmem:[%s19263_s0 + $0x78] sm:$0xf] }
  0x62   :  { %v350_v11 = vor.u32 %v349_v63, %v345_v39  ;;  %v359_v12 = vrot.slane %v357_v0, 4  ;;  %v365_v13 = vrot.slane %v363_v4, 5  ;;  %v4065_v14 = vrot.slane %v4063_v6, 5 }
  0x63   :  { %11105 = vmatmul.mubr.msk.bf16.gmra.mrb[20].mxu1 %vm941_vm3, %v10087_v7  ;;  %v4060_v16 = vsel %vm12860_vm7, %v4051_v9, %v4059_v10  ;;  %v4061_v17 = vrot.slane %v4059_v10, 4  ;;  %v4066_v18 = vshll.u32 %v2853_v56, 16  ;;  %v4073_v19 = vshrl.u32 %v2854_v5, 16 }
  0x64   :  { %v10382_v20 = vcombine.low %v4050_v8, %v4060_v16  ;;  %v351_v21 = vrot.slane %v350_v11, 4  ;;  %v360_v22 = vor.u32 %v359_v12, %v355_v3  ;;  %v4076_v23 = vshll.u32 %v2854_v5, 16  ;;  %v2857_v5 = vld [vmem:[%s19263_s0 + $0x7c] sm:$0xf] }
  0x65   :  { %v4068_v26 = vrot.slane %v4066_v18, 6  ;;  %v4075_v27 = vrot.slane %v4073_v19, 5  ;;  %v367_v28 = vshrl.u32 %v51_v50, 16  ;;  %v373_v29 = vshll.u32 %v52_v15, 16 }
  0x66   :  { %11401 = vmatmul.mubr.msk.bf16.gmra.mrb[20].mxu0 %vm941_vm3, %v10382_v20  ;;  %v356_v31 = vsel %vm12840_vm6, %v351_v21, %v355_v3  ;;  %v361_v32 = vrot.slane %v360_v22, 4  ;;  %v4078_v33 = vrot.slane %v4076_v23, 6  ;;  %v377_v34 = vshrl.u32 %v52_v15, 16 }
  0x67   :  { %v4069_v35 = vor.u32 %v4068_v26, %v4065_v14  ;;  %v369_v36 = vrot.slane %v367_v28, 4  ;;  %v375_v37 = vrot.slane %v373_v29, 5  ;;  %v383_v38 = vshll.u32 %v53_v24, 16  ;;  %v56_v28 = vld [vmem:[%s19263_s0 + $0x7c] sm:$0xf] }
  0x68   :  { %v366_v39 = vsel %vm12840_vm6, %v361_v32, %v365_v13  ;;  %v4079_v40 = vor.u32 %v4078_v33, %v4075_v27  ;;  %v379_v41 = vrot.slane %v377_v34, 4  ;;  %v4083_v43 = vshrl.u32 %v2855_v30, 16  ;;  %v57_v33 = vld [vmem:[%s19263_s0 + $0x80] sm:$0xf] }
  0x69   :  { %v10088_v44 = vcombine.low %v356_v31, %v366_v39  ;;  %v4070_v45 = vsel %vm12860_vm7, %v4061_v17, %v4069_v35  ;;  %v4071_v47 = vrot.slane %v4069_v35, 4  ;;  %v370_v48 = vor.u32 %v369_v36, %v365_v13  ;;  %v2858_v17 = vld [vmem:[%s19263_s0 + $0x80] sm:$0xf] }
  0x6a   :  { %v380_v49 = vor.u32 %v379_v41, %v375_v37  ;;  %v385_v50 = vrot.slane %v383_v38, 5  ;;  %v4081_v51 = vrot.slane %v4079_v40, 4  ;;  %v4085_v52 = vrot.slane %v4083_v43, 5 }
  0x6b   :  { %11108 = vmatprep.mubr.msk.bf16.mxu1 %vm941_vm3, %v10088_v44  ;;  %v4080_v55 = vsel %vm12860_vm7, %v4071_v47, %v4079_v40  ;;  %v371_v56 = vrot.slane %v370_v48, 4  ;;  %v4086_v57 = vshll.u32 %v2855_v30, 16  ;;  %v4093_v58 = vshrl.u32 %v2856_v42, 16  ;;  %v2859_v47 = vld [vmem:[%s19263_s0 + $0x84] sm:$0xf] }
  0x6c   :  { %v10383_v59 = vcombine.low %v4070_v45, %v4080_v55  ;;  %v381_v60 = vrot.slane %v380_v49, 4  ;;  %v4096_v61 = vshll.u32 %v2856_v42, 16  ;;  %v387_v63 = vshrl.u32 %v53_v24, 16 }
  0x6d   :  { %v376_v0 = vsel %vm12840_vm6, %v371_v56, %v375_v37  ;;  %v4088_v1 = vrot.slane %v4086_v57, 6  ;;  %v4095_v3 = vrot.slane %v4093_v58, 5  ;;  %v393_v4 = vshll.u32 %v54_v54, 16 }
  0x6e   :  { %11404 = vmatprep.mubr.msk.bf16.mxu0 %vm941_vm3, %v10383_v59  ;;  %v386_v6 = vsel %vm12840_vm6, %v381_v60, %v385_v50  ;;  %v4098_v7 = vrot.slane %v4096_v61, 6  ;;  %v389_v8 = vrot.slane %v387_v63, 4  ;;  %v397_v9 = vshrl.u32 %v54_v54, 16 }
  0x6f   :  { %v10089_v10 = vcombine.low %v376_v0, %v386_v6  ;;  %v4089_v11 = vor.u32 %v4088_v1, %v4085_v52  ;;  %v395_v12 = vrot.slane %v393_v4, 5  ;;  %v403_v13 = vshll.u32 %v55_v62, 16  ;;  %v2860_v52 = vld [vmem:[%s19263_s0 + $0x88] sm:$0xf] }
  0x70   :  { %v4099_v14 = vor.u32 %v4098_v7, %v4095_v3  ;;  %v390_v15 = vor.u32 %v389_v8, %v385_v50  ;;  %v399_v16 = vrot.slane %v397_v9, 4  ;;  %v4103_v18 = vshrl.u32 %v2857_v5, 16  ;;  %v59_v4 = vld [vmem:[%s19263_s0 + $0x88] sm:$0xf]  ;;  %v2861_v9 = vld [vmem:[%s19263_s0 + $0x8c] sm:$0xf] }
  0x71   :  { %11109 = vmatmul.mubr.msk.bf16.gmra.mrb[24].mxu1 %vm941_vm3, %v10089_v10  ;;  %v4090_v19 = vsel %vm12860_vm7, %v4081_v51, %v4089_v11  ;;  %v4091_v20 = vrot.slane %v4089_v11, 4  ;;  %v405_v21 = vrot.slane %v403_v13, 5  ;;  %v4106_v22 = vshll.u32 %v2857_v5, 16 }
  0x72   :  { %v391_v23 = vrot.slane %v390_v15, 4  ;;  %v400_v24 = vor.u32 %v399_v16, %v395_v12  ;;  %v4101_v26 = vrot.slane %v4099_v14, 4  ;;  %v4105_v27 = vrot.slane %v4103_v18, 5 }
  0x73   :  { %v4100_v29 = vsel %vm12860_vm7, %v4091_v20, %v4099_v14  ;;  %v4108_v30 = vrot.slane %v4106_v22, 6  ;;  %v4113_v31 = vshrl.u32 %v2858_v17, 16  ;;  %v4116_v32 = vshll.u32 %v2858_v17, 16 }
  0x74   :  { %v10384_v34 = vcombine.low %v4090_v19, %v4100_v29  ;;  %v396_v35 = vsel %vm12840_vm6, %v391_v23, %v395_v12  ;;  %v401_v36 = vrot.slane %v400_v24, 4  ;;  %v407_v37 = vshrl.u32 %v55_v62, 16  ;;  %v58_v62 = vld [vmem:[%s19263_s0 + $0x84] sm:$0xf] }
  0x75   :  { %v4109_v38 = vor.u32 %v4108_v30, %v4105_v27  ;;  %v4115_v39 = vrot.slane %v4113_v31, 5  ;;  %v4118_v40 = vrot.slane %v4116_v32, 6  ;;  %v413_v41 = vshll.u32 %v56_v28, 16  ;;  %v60_v32 = vld [vmem:[%s19263_s0 + $0x8c] sm:$0xf] }
  0x76   :  { %11405 = vmatmul.mubr.msk.bf16.gmra.mrb[24].mxu0 %vm941_vm3, %v10384_v34  ;;  %v406_v42 = vsel %vm12840_vm6, %v401_v36, %v405_v21  ;;  %v409_v43 = vrot.slane %v407_v37, 4  ;;  %v417_v44 = vshrl.u32 %v56_v28, 16  ;;  %v423_v45 = vshll.u32 %v57_v33, 16 }
  0x77   :  { %v10090_v48 = vcombine.low %v396_v35, %v406_v42  ;;  %v4110_v49 = vsel %vm12860_vm7, %v4101_v26, %v4109_v38  ;;  %v4111_v50 = vrot.slane %v4109_v38, 4  ;;  %v4119_v51 = vor.u32 %v4118_v40, %v4115_v39 }
  0x78   :  { %v410_v54 = vor.u32 %v409_v43, %v405_v21  ;;  %v415_v55 = vrot.slane %v413_v41, 5  ;;  %v419_v56 = vrot.slane %v417_v44, 4  ;;  %v425_v57 = vrot.slane %v423_v45, 5  ;;  %v2862_v21 = vld [vmem:[%s19263_s0 + $0x90] sm:$0xf] }
  0x79   :  { %11112 = vmatprep.mubr.msk.bf16.mxu1 %vm941_vm3, %v10090_v48  ;;  %v4120_v58 = vsel %vm12860_vm7, %v4111_v50, %v4119_v51  ;;  %v4121_v59 = vrot.slane %v4119_v51, 4  ;;  %v4123_v60 = vshrl.u32 %v2859_v47, 16  ;;  %v4126_v61 = vshll.u32 %v2859_v47, 16  ;;  %v98_v41 = vld [vmem:[%s19263_s0 + $0x90] sm:$0x1] }
  0x7a   :  { %v10385_v63 = vcombine.low %v4110_v49, %v4120_v58  ;;  %v411_v0 = vrot.slane %v410_v54, 4  ;;  %v420_v1 = vor.u32 %v419_v56, %v415_v55  ;;  %v4133_v3 = vshrl.u32 %v2860_v52, 16  ;;  %v2863_v47 = vld [vmem:[%s19263_s0 + $0x94] sm:$0xf] }
  0x7b   :  { %v4125_v5 = vrot.slane %v4123_v60, 5  ;;  %v4128_v6 = vrot.slane %v4126_v61, 6  ;;  %v4136_v7 = vshll.u32 %v2860_v52, 16  ;;  %v427_v8 = vshrl.u32 %v57_v33, 16  ;;  %v3808_v60 = vld [vmem:[%s19263_s0 + $0x98] sm:$0x3] }
  0x7c   :  { %11408 = vmatprep.mubr.msk.bf16.mxu0 %vm941_vm3, %v10385_v63  ;;  %v416_v10 = vsel %vm12840_vm6, %v411_v0, %v415_v55  ;;  %v421_v11 = vrot.slane %v420_v1, 4  ;;  %v4135_v12 = vrot.slane %v4133_v3, 5  ;;  %v433_v13 = vshll.u32 %v58_v62, 16  ;;  %v61_v3 = vld [vmem:[%s19263_s0 + $0xa4] sm:$0xf] }
  0x7d   :  { %v4129_v14 = vor.u32 %v4128_v6, %v4125_v5  ;;  %v4138_v15 = vrot.slane %v4136_v7, 6  ;;  %v429_v16 = vrot.slane %v427_v8, 4  ;;  %v437_v17 = vshrl.u32 %v58_v62, 16  ;;  %v62_v8 = vld [vmem:[%s19263_s0 + $0xa8] sm:$0xf] }
  0x7e   :  { %v426_v18 = vsel %vm12840_vm6, %v421_v11, %v425_v57  ;;  %v435_v19 = vrot.slane %v433_v13, 5  ;;  %v443_v20 = vshll.u32 %v59_v4, 16  ;;  %v4143_v22 = vshrl.u32 %v2861_v9, 16  ;;  %v13253_v13 = vld [vmem:[%s19263_s0 + $0xac] sm:$0xf] }
  0x7f   :  { %v10091_v23 = vcombine.low %v416_v10, %v426_v18  ;;  %v4130_v24 = vsel %vm12860_vm7, %v4121_v59, %v4129_v14  ;;  %v4131_v26 = vrot.slane %v4129_v14, 4  ;;  %v4139_v27 = vor.u32 %v4138_v15, %v4135_v12  ;;  %v2865_v18 = vld [vmem:[%s19263_s0 + $0xac] sm:$0xe] }
  0x80   :  { %v430_v28 = vor.u32 %v429_v16, %v425_v57  ;;  %v439_v29 = vrot.slane %v437_v17, 4  ;;  %v445_v30 = vrot.slane %v443_v20, 5  ;;  %v4145_v31 = vrot.slane %v4143_v22, 5 }
  0x81   :  { %11113 = vmatmul.mubr.msk.bf16.gmra.mrb[28].mxu1 %vm941_vm3, %v10091_v23  ;;  %v4140_v33 = vsel %vm12860_vm7, %v4131_v26, %v4139_v27  ;;  %v4141_v34 = vrot.slane %v4139_v27, 4  ;;  %v4146_v35 = vshll.u32 %v2861_v9, 16  ;;  %v4153_v36 = vshrl.u32 %v2862_v21, 16  ;;  %v10222_v23 = vld [vmem:[%s19264_s1 + $0x4] sm:$0x3] }
  0x82   :  { %v10386_v37 = vcombine.low %v4130_v24, %v4140_v33  ;;  %v431_v38 = vrot.slane %v430_v28, 4  ;;  %v440_v39 = vor.u32 %v439_v29, %v435_v19  ;;  %v4156_v40 = vshll.u32 %v2862_v21, 16  ;;  %12336 = vmatprep.subr.msk.bf16.mxu1 %vm1050_vm0, %v10222_v23  ;;  %v2866_v33 = vld [vmem:[%s19263_s0 + $0xb0] sm:$0xf] }
  0x83   :  { %v4148_v42 = vrot.slane %v4146_v35, 6  ;;  %v4155_v43 = vrot.slane %v4153_v36, 5  ;;  %v447_v44 = vshrl.u32 %v59_v4, 16  ;;  %v453_v45 = vshll.u32 %v60_v32, 16 }
  0x84   :  { %11409 = vmatmul.mubr.msk.bf16.gmra.mrb[28].mxu0 %vm941_vm3, %v10386_v37  ;;  %v436_v48 = vsel %vm12840_vm6, %v431_v38, %v435_v19  ;;  %v441_v49 = vrot.slane %v440_v39, 4  ;;  %v4158_v50 = vrot.slane %v4156_v40, 6  ;;  %v457_v51 = vshrl.u32 %v60_v32, 16 }
  0x85   :  { %v4149_v52 = vor.u32 %v4148_v42, %v4145_v31  ;;  %v449_v54 = vrot.slane %v447_v44, 4  ;;  %v455_v55 = vrot.slane %v453_v45, 5  ;;  %v463_v56 = vshll.u32 %v98_v41, 16  ;;  %v13277_v42 = vld [vmem:[%s19263_s0 + $0xb4] sm:$0xf] }
  0x86   :  { %v446_v57 = vsel %vm12840_vm6, %v441_v49, %v445_v30  ;;  %v4159_v58 = vor.u32 %v4158_v50, %v4155_v43  ;;  %v459_v59 = vrot.slane %v457_v51, 4  ;;  %v4163_v61 = vshrl.u32 %v2863_v47, 16 }
  0x87   :  { %v10092_v62 = vcombine.low %v436_v48, %v446_v57  ;;  %v4150_v63 = vsel %vm12860_vm7, %v4141_v34, %v4149_v52  ;;  %v4151_v0 = vrot.slane %v4149_v52, 4  ;;  %v450_v1 = vor.u32 %v449_v54, %v445_v30  ;;  %v64_v52 = vld [vmem:[%s19263_s0 + $0xb0] sm:$0xf] }
  0x88   :  { %v460_v4 = vor.u32 %v459_v59, %v455_v55  ;;  %v465_v5 = vrot.slane %v463_v56, 5  ;;  %v4161_v6 = vrot.slane %v4159_v58, 4  ;;  %v4165_v7 = vrot.slane %v4163_v61, 5 }
  0x89   :  { %11116 = vmatprep.mubr.msk.bf16.mxu1 %vm941_vm3, %v10092_v62  ;;  %v4160_v9 = vsel %vm12860_vm7, %v4151_v0, %v4159_v58  ;;  %v451_v10 = vrot.slane %v450_v1, 4  ;;  %v4166_v11 = vshll.u32 %v2863_v47, 16  ;;  %v4173_v12 = vshrl.u32 %v3808_v60, 16  ;;  %v65_v0 = vld [vmem:[%s19263_s0 + $0xb4] sm:$0xf] }
  0x8a   :  { %v10387_v14 = vcombine.low %v4150_v63, %v4160_v9  ;;  %v461_v15 = vrot.slane %v460_v4, 4  ;;  %v4176_v16 = vshll.u32 %v3808_v60, 16  ;;  %v468_v17 = vshrl.u32 %v61_v3, 16 }
  0x8b   :  { %v456_v19 = vsel %vm12840_vm6, %v451_v10, %v455_v55  ;;  %v4168_v20 = vrot.slane %v4166_v11, 6  ;;  %v4175_v21 = vrot.slane %v4173_v12, 5  ;;  %v471_v22 = vshll.u32 %v61_v3, 16 }
  0x8c   :  { %11412 = vmatprep.mubr.msk.bf16.mxu0 %vm941_vm3, %v10387_v14  ;;  %v466_v24 = vsel %vm12840_vm6, %v461_v15, %v465_v5  ;;  %v4178_v26 = vrot.slane %v4176_v16, 6  ;;  %v470_v27 = vrot.slane %v468_v17, 4  ;;  %v477_v28 = vshll.u32 %v62_v8, 16 }
  0x8d   :  { %v10093_v29 = vcombine.low %v456_v19, %v466_v24  ;;  %v4169_v30 = vor.u32 %v4168_v20, %v4165_v7  ;;  %v473_v31 = vrot.slane %v471_v22, 5  ;;  %v481_v32 = vshrl.u32 %v62_v8, 16  ;;  %v13298_v8 = vld [vmem:[%s19263_s0 + $0xb8] sm:$0xf]  ;;  %v13306_v19 = vld [vmem:[%s19263_s0 + $0xbc] sm:$0xf] }
  0x8e   :  { %v4179_v34 = vor.u32 %v4178_v26, %v4175_v21  ;;  %v479_v35 = vrot.slane %v477_v28, 5  ;;  %v487_v36 = vshll.u32 %v13253_v13, 16  ;;  %v4182_v37 = vshrl.u32 %v2865_v18, 16 }
  0x8f   :  { %11117 = vmatmul.mubr.msk.bf16.gmra.mrb[32].mxu1 %vm941_vm3, %v10093_v29  ;;  %v4170_v38 = vsel %vm12860_vm7, %v4161_v6, %v4169_v30  ;;  %v4171_v39 = vrot.slane %v4169_v30, 4  ;;  %v474_v40 = vor.u32 %v473_v31, %v470_v27  ;;  %v483_v41 = vrot.slane %v481_v32, 4  ;;  %v66_v27 = vld [vmem:[%s19263_s0 + $0xb8] sm:$0xf] }
  0x90   :  { %v489_v43 = vrot.slane %v487_v36, 5  ;;  %v4184_v44 = vrot.slane %v4182_v37, 5  ;;  %v4185_v45 = vshll.u32 %v2865_v18, 16  ;;  %v4191_v47 = vshrl.u32 %v2866_v33, 16 }
  0x91   :  { %v4180_v48 = vsel %vm12860_vm7, %v4171_v39, %v4179_v34  ;;  %v475_v49 = vrot.slane %v474_v40, 4  ;;  %v484_v50 = vor.u32 %v483_v41, %v479_v35  ;;  %v4194_v51 = vshll.u32 %v2866_v33, 16 }
  0x92   :  { %v10388_v54 = vcombine.low %v4170_v38, %v4180_v48  ;;  %v4187_v55 = vrot.slane %v4185_v45, 6  ;;  %v4193_v56 = vrot.slane %v4191_v47, 5  ;;  %v4201_v57 = vshrl.u32 %v13277_v42, 16  ;;  %v67_v38 = vld [vmem:[%s19263_s0 + $0xbc] sm:$0xf] }
  0x93   :  { %v480_v58 = vsel %vm12840_vm6, %v475_v49, %v479_v35  ;;  %v485_v59 = vrot.slane %v484_v50, 4  ;;  %v4196_v60 = vrot.slane %v4194_v51, 6  ;;  %v4204_v61 = vshll.u32 %v13277_v42, 16  ;;  %v5163_v47 = vld [vmem:[%s19263_s0 + $0x8] sm:$0xc] }
  0x94   :  { %vm5170_vm8 = vcmask 1045508   ;;  %11413 = vmatmul.mubr.msk.bf16.gmra.mrb[32].mxu0 %vm941_vm3, %v10388_v54  ;;  %v4188_v62 = vor.u32 %v4187_v55, %v4184_v44  ;;  %v4203_v63 = vrot.slane %v4201_v57, 5  ;;  %v491_v1 = vshrl.u32 %v13253_v13, 16 }
  0x95   :  { %v497_v3 = vshll.u32 %v64_v52, 16  ;;  %v490_v4 = vsel %vm12840_vm6, %v485_v59, %v489_v43  ;;  %v4197_v5 = vor.u32 %v4196_v60, %v4193_v56  ;;  %v4206_v6 = vrot.slane %v4204_v61, 6  ;;  %vm13332_vm9 = vmor %vm1050_vm0, %vm5170_vm8  ;;  %v12388_v59 = vld [vmem:[%s19263_s0 + $0xc] sm:$0xf]  ;;  %v12389_v61 = vld [vmem:[%s19263_s0 + $0x10] sm:$0xf] }
  0x96   :  { %v501_v7 = vshrl.u32 %v64_v52, 16  ;;  %v10094_v9 = vcombine.low %v480_v58, %v490_v4  ;;  %v4189_v10 = vrot.slane %v4188_v62, 4  ;;  %v493_v11 = vrot.slane %v491_v1, 4 }
  0x97   :  { %v499_v12 = vrot.slane %v497_v3, 5  ;;  %v4199_v14 = vrot.slane %v4197_v5, 4  ;;  %v4207_v15 = vor.u32 %v4206_v6, %v4203_v63  ;;  %v507_v13 = vshll.u32 %v65_v0, 16  ;;  %v68_v63 = vld [vmem:[%s19263_s0 + $0xc0] sm:$0xf] }
  0x98   :  { %v503_v16 = vrot.slane %v501_v7, 4  ;;  %11120 = vmatprep.mubr.msk.bf16.mxu1 %vm941_vm3, %v10094_v9  ;;  %v4198_v17 = vsel %vm12860_vm7, %v4189_v10, %v4197_v5  ;;  %v494_v18 = vor.u32 %v493_v11, %v489_v43  ;;  %v4211_v20 = vshrl.u32 %v13298_v8, 16  ;;  %v69_v6 = vld [vmem:[%s19263_s0 + $0xc4] sm:$0xf] }
  0x99   :  { %v4214_v21 = vshll.u32 %v13298_v8, 16  ;;  %v4208_v22 = vsel %vm12860_vm7, %v4199_v14, %v4207_v15  ;;  %v509_v24 = vrot.slane %v507_v13, 5  ;;  %v4209_v26 = vrot.slane %v4207_v15, 4 }
  0x9a   :  { %v504_v23 = vor.u32 %v503_v16, %v499_v12  ;;  %v10389_v28 = vcombine.low %v4198_v17, %v4208_v22  ;;  %v495_v29 = vrot.slane %v494_v18, 4  ;;  %v4213_v30 = vrot.slane %v4211_v20, 5  ;;  %v12390_v20 = vld [vmem:[%s19263_s0 + $0x14] sm:$0xf] }
  0x9b   :  { %v4216_v31 = vrot.slane %v4214_v21, 6  ;;  %v4221_v33 = vshrl.u32 %v13306_v19, 16  ;;  %v4224_v34 = vshll.u32 %v13306_v19, 16  ;;  %v511_v35 = vshrl.u32 %v65_v0, 16 }
  0x9c   :  { %v505_v32 = vrot.slane %v504_v23, 4  ;;  %11416 = vmatprep.mubr.msk.bf16.mxu0 %vm941_vm3, %v10389_v28  ;;  %v500_v36 = vsel %vm12840_vm6, %v495_v29, %v499_v12  ;;  %v517_v39 = vshll.u32 %v66_v27, 16  ;;  %v521_v40 = vshrl.u32 %v66_v27, 16  ;;  %v70_v27 = vld [vmem:[%s19263_s0 + $0xc8] sm:$0xf] }
  0x9d   :  { %v4217_v37 = vor.u32 %v4216_v31, %v4213_v30  ;;  %v4223_v43 = vrot.slane %v4221_v33, 5  ;;  %v4226_v44 = vrot.slane %v4224_v34, 6  ;;  %v513_v45 = vrot.slane %v511_v35, 4  ;;  %v12391_v35 = vld [vmem:[%s19263_s0 + $0x18] sm:$0xf] }
  0x9e   :  { %v510_v41 = vsel %vm12840_vm6, %v505_v32, %v509_v24  ;;  %v519_v51 = vrot.slane %v517_v39, 5  ;;  %v523_v56 = vrot.slane %v521_v40, 4  ;;  %v527_v57 = vshll.u32 %v67_v38, 16  ;;  %v71_v32 = vld [vmem:[%s19263_s0 + $0xcc] sm:$0xf] }
  0x9f   :  { %v10095_v48 = vcombine.low %v500_v36, %v510_v41  ;;  %v4218_v49 = vsel %vm12860_vm7, %v4209_v26, %v4217_v37  ;;  %v4219_v50 = vrot.slane %v4217_v37, 4  ;;  %v13336_v54 = vor.u32 %v4226_v44, %v4223_v43 }
  0xa0   :  { %v514_v55 = vor.u32 %v513_v45, %v509_v24  ;;  %v10443_v58 = vrot.slane %v5163_v47, 10  ;;  %v5174_v60 = vrot.slane %v12388_v59, 6  ;;  %v5177_v62 = vrot.slane %v12389_v61, 6  ;;  %v12393_v59 = vld [vmem:[%s19263_s0 + $0x20] sm:$0xf] }
  0xa1   :  { %19470 = vst [vmem:[#allocation7_spill] sm:$0xff] %v13336_v54  ;;  %11121 = vmatmul.mubr.msk.bf16.gmra.mrb[36].mxu1 %vm941_vm3, %v10095_v48  ;;  %v531_v0 = vshrl.u32 %v67_v38, 16  ;;  %v4228_v1 = vsel %vm12860_vm7, %v4219_v50, %v13336_v54  ;;  %v524_v4 = vor.u32 %v523_v56, %v519_v51  ;;  %v529_v5 = vrot.slane %v527_v57, 5  ;;  %v72_v48 = vld [vmem:[%s19263_s0 + $0xd0] sm:$0xf] }
  0xa2   :  { %v515_v3 = vrot.slane %v514_v55, 4  ;;  %v10390_v7 = vcombine.low %v4218_v49, %v4228_v1  ;;  %v5175_v9 = vsel %vm13332_vm9, %v10443_v58, %v5174_v60  ;;  %v5176_v10 = vrot.slane %v5174_v60, 4  ;;  %v12392_v57 = vld [vmem:[%s19263_s0 + $0x1c] sm:$0xf] }
  0xa3   :  { %v5179_v11 = vrot.slane %v5177_v62, 4  ;;  %v525_v14 = vrot.slane %v524_v4, 4  ;;  %v533_v15 = vrot.slane %v531_v0, 4  ;;  %v537_v16 = vshll.u32 %v68_v63, 16 }
  0xa4   :  { %v520_v12 = vsel %vm12840_vm6, %v515_v3, %v519_v51  ;;  %11417 = vmatmul.mubr.msk.bf16.gmra.mrb[36].mxu0 %vm941_vm3, %v10390_v7  ;;  %v5178_v13 = vsel %vm13332_vm9, %v5176_v10, %v5177_v62  ;;  %v541_v17 = vshrl.u32 %v68_v63, 16  ;;  %v547_v18 = vshll.u32 %v69_v6, 16  ;;  %v73_v63 = vld [vmem:[%s19263_s0 + $0xd4] sm:$0xf] }
  0xa5   :  { %v5180_v21 = vrot.slane %v12390_v20, 6  ;;  %v530_v22 = vsel %vm12840_vm6, %v525_v14, %v529_v5  ;;  %v10446_v23 = vcombine.low %v5175_v9, %v5178_v13  ;;  %v534_v24 = vor.u32 %v533_v15, %v529_v5 }
  0xa6   :  { %v539_v26 = vrot.slane %v537_v16, 5  ;;  %v10096_v28 = vcombine.low %v520_v12, %v530_v22  ;;  %v543_v29 = vrot.slane %v541_v17, 4  ;;  %v549_v30 = vrot.slane %v547_v18, 5 }
  0xa7   :  { %v5181_v31 = vsel %vm13332_vm9, %v5179_v11, %v5180_v21  ;;  %11454 = vmatprep.mubr.msk.bf16.mxu0 %vm941_vm3, %v10446_v23  ;;  %v535_v33 = vrot.slane %v534_v24, 4  ;;  %v5182_v34 = vrot.slane %v5180_v21, 4  ;;  %v5183_v36 = vrot.slane %v12391_v35, 6  ;;  %v74_v21 = vld [vmem:[%s19263_s0 + $0xd8] sm:$0xf] }
  0xa8   :  { %v6589_v37 = vsel %vm1050_vm0, %v13037_v53, 0  ;;  %11124 = vmatprep.mubr.msk.bf16.mxu1 %vm941_vm3, %v10096_v28  ;;  %v544_v38 = vor.u32 %v543_v29, %v539_v26  ;;  %v551_v39 = vshrl.u32 %v69_v6, 16  ;;  %v557_v40 = vshll.u32 %v70_v27, 16  ;;  %v12394_v24 = vld [vmem:[%s19263_s0 + $0x24] sm:$0xf] }
  0xa9   :  { %v561_v41 = vshrl.u32 %v70_v27, 16  ;;  %v540_v43 = vsel %vm12840_vm6, %v535_v33, %v539_v26  ;;  %v5184_v44 = vsel %vm13332_vm9, %v5182_v34, %v5183_v36  ;;  %v567_v45 = vshll.u32 %v71_v32, 16  ;;  %v12395_v27 = vld [vmem:[%s19263_s0 + $0x28] sm:$0xf]  ;;  %v75_v29 = vld [vmem:[%s19263_s0 + $0xdc] sm:$0xf] }
  0xaa   :  { %v5185_v47 = vrot.slane %v5183_v36, 4  ;;  %v545_v49 = vrot.slane %v544_v38, 4  ;;  %v10447_v53 = vcombine.low %v5181_v31, %v5184_v44  ;;  %v553_v50 = vrot.slane %v551_v39, 4 }
  0xab   :  { %v559_v51 = vrot.slane %v557_v40, 5  ;;  %v563_v55 = vrot.slane %v561_v41, 4  ;;  %v569_v56 = vrot.slane %v567_v45, 5  ;;  %v5186_v58 = vrot.slane %v12392_v57, 6 }
  0xac   :  { %v5189_v60 = vrot.slane %v12393_v59, 6  ;;  %v550_v61 = vsel %vm12840_vm6, %v545_v49, %v549_v30  ;;  %11455 = vmatmul.mubr.msk.bf16.vlgmr.msra.gmra.mrb[0].mxu0 %vm941_vm3, %v10447_v53  ;;  %v554_v62 = vor.u32 %v553_v50, %v549_v30  ;;  %v571_v0 = vshrl.u32 %v71_v32, 16 }
  0xad   :  { %v577_v1 = vshll.u32 %v72_v48, 16  ;;  %v10097_v3 = vcombine.low %v540_v43, %v550_v61  ;;  %11527 = vmatpush3.bf16.msra.mxu0 %v6589_v37  ;;  %v564_v4 = vor.u32 %v563_v55, %v559_v51  ;;  %v5187_v5 = vsel %vm13332_vm9, %v5185_v47, %v5186_v58  ;;  %v77_v55 = vld [vmem:[%s19263_s0 + $0xe4] sm:$0xf] }
  0xae   :  { %v5188_v6 = vrot.slane %v5186_v58, 4  ;;  %v555_v7 = vrot.slane %v554_v62, 4  ;;  %v573_v9 = vrot.slane %v571_v0, 4  ;;  %v581_v11 = vshrl.u32 %v72_v48, 16  ;;  %v76_v48 = vld [vmem:[%s19263_s0 + $0xe0] sm:$0xf] }
  0xaf   :  { %v579_v10 = vrot.slane %v577_v1, 5  ;;  %11125 = vmatmul.mubr.msk.bf16.gmra.mrb[40].mxu1 %vm941_vm3, %v10097_v3  ;;  %v565_v12 = vrot.slane %v564_v4, 4  ;;  %v587_v15 = vshll.u32 %v73_v63, 16  ;;  %v5191_v16 = vrot.slane %v5189_v60, 4  ;;  %v12396_v58 = vld [vmem:[%s19263_s0 + $0x2c] sm:$0xf] }
  0xb0   :  { %v5190_v14 = vsel %vm13332_vm9, %v5188_v6, %v5189_v60  ;;  %v560_v13 = vsel %vm12840_vm6, %v555_v7, %v559_v51  ;;  %v574_v18 = vor.u32 %v573_v9, %v569_v56  ;;  %v583_v20 = vrot.slane %v581_v11, 4  ;;  %v12397_v60 = vld [vmem:[%s19263_s0 + $0x30] sm:$0xf] }
  0xb1   :  { %v10448_v17 = vcombine.low %v5187_v5, %v5190_v14  ;;  %v570_v22 = vsel %vm12840_vm6, %v565_v12, %v569_v56  ;;  %v589_v23 = vrot.slane %v587_v15, 5  ;;  %v5192_v26 = vrot.slane %v12394_v24, 6  ;;  %v78_v12 = vld [vmem:[%s19263_s0 + $0xe8] sm:$0xf] }
  0xb2   :  { %v5195_v28 = vrot.slane %v12395_v27, 6  ;;  %v10098_v30 = vcombine.low %v560_v13, %v570_v22  ;;  %v575_v31 = vrot.slane %v574_v18, 4  ;;  %v584_v32 = vor.u32 %v583_v20, %v579_v10 }
  0xb3   :  { %11458 = vmatprep.mubr.msk.bf16.mxu0 %vm941_vm3, %v10448_v17  ;;  %v591_v33 = vshrl.u32 %v73_v63, 16  ;;  %v5193_v34 = vsel %vm13332_vm9, %v5191_v16, %v5192_v26  ;;  %v5194_v35 = vrot.slane %v5192_v26, 4  ;;  %v597_v36 = vshll.u32 %v74_v21, 16  ;;  %v79_v17 = vld [vmem:[%s19263_s0 + $0xec] sm:$0xf] }
  0xb4   :  { %v601_v37 = vshrl.u32 %v74_v21, 16  ;;  %11128 = vmatprep.mubr.msk.bf16.mxu1 %vm941_vm3, %v10098_v30  ;;  %v580_v38 = vsel %vm12840_vm6, %v575_v31, %v579_v10  ;;  %v585_v39 = vrot.slane %v584_v32, 4  ;;  %v607_v41 = vshll.u32 %v75_v29, 16  ;;  %v12399_v26 = vld [vmem:[%s19263_s0 + $0x38] sm:$0xf] }
  0xb5   :  { %v593_v40 = vrot.slane %v591_v33, 4  ;;  %v5196_v43 = vsel %vm13332_vm9, %v5194_v35, %v5195_v28  ;;  %v599_v44 = vrot.slane %v597_v36, 5  ;;  %v5197_v47 = vrot.slane %v5195_v28, 4 }
  0xb6   :  { %v603_v45 = vrot.slane %v601_v37, 4  ;;  %v590_v49 = vsel %vm12840_vm6, %v585_v39, %v589_v23  ;;  %v10449_v53 = vcombine.low %v5193_v34, %v5196_v43  ;;  %v609_v51 = vrot.slane %v607_v41, 5  ;;  %v80_v43 = vld [vmem:[%s19263_s0 + $0xf0] sm:$0xf] }
  0xb7   :  { %v594_v50 = vor.u32 %v593_v40, %v589_v23  ;;  %v10099_v56 = vcombine.low %v580_v38, %v590_v49  ;;  %v5198_v59 = vrot.slane %v12396_v58, 6  ;;  %v5201_v61 = vrot.slane %v12397_v60, 6  ;;  %v12398_v23 = vld [vmem:[%s19263_s0 + $0x34] sm:$0xf] }
  0xb8   :  { %v604_v57 = vor.u32 %v603_v45, %v599_v44  ;;  %11459 = vmatmul.mubr.msk.bf16.gmra.mrb[4].mxu0 %vm941_vm3, %v10449_v53  ;;  %v611_v63 = vshrl.u32 %v75_v29, 16  ;;  %v617_v0 = vshll.u32 %v76_v48, 16  ;;  %v621_v1 = vshrl.u32 %v76_v48, 16  ;;  %v81_v49 = vld [vmem:[%s19263_s0 + $0xf4] sm:$0xf] }
  0xb9   :  { %v595_v62 = vrot.slane %v594_v50, 4  ;;  %11129 = vmatmul.mubr.msk.bf16.gmra.mrb[44].mxu1 %vm941_vm3, %v10099_v56  ;;  %v5199_v4 = vsel %vm13332_vm9, %v5197_v47, %v5198_v59  ;;  %v5200_v5 = vrot.slane %v5198_v59, 4  ;;  %v627_v6 = vshll.u32 %v77_v55, 16  ;;  %v12401_v56 = vld [vmem:[%s19263_s0 + $0x40] sm:$0xf] }
  0xba   :  { %v605_v3 = vrot.slane %v604_v57, 4  ;;  %v613_v9 = vrot.slane %v611_v63, 4  ;;  %v619_v10 = vrot.slane %v617_v0, 5  ;;  %v623_v11 = vrot.slane %v621_v1, 4 }
  0xbb   :  { %v600_v7 = vsel %vm12840_vm6, %v595_v62, %v599_v44  ;;  %v5202_v15 = vsel %vm13332_vm9, %v5200_v5, %v5201_v61  ;;  %v629_v16 = vrot.slane %v627_v6, 5  ;;  %v5203_v13 = vrot.slane %v5201_v61, 4 }
  0xbc   :  { %v610_v14 = vsel %vm12840_vm6, %v605_v3, %v609_v51  ;;  %v10450_v20 = vcombine.low %v5199_v4, %v5202_v15  ;;  %v614_v21 = vor.u32 %v613_v9, %v609_v51  ;;  %v624_v22 = vor.u32 %v623_v11, %v619_v10  ;;  %v12400_v51 = vld [vmem:[%s19263_s0 + $0x3c] sm:$0xf] }
  0xbd   :  { %v10100_v18 = vcombine.low %v600_v7, %v610_v14  ;;  %v5204_v24 = vrot.slane %v12398_v23, 6  ;;  %v5207_v27 = vrot.slane %v12399_v26, 6  ;;  %v631_v28 = vshrl.u32 %v77_v55, 16  ;;  %v82_v7 = vld [vmem:[%s19263_s0 + $0xf8] sm:$0xf] }
  0xbe   :  { %v637_v29 = vshll.u32 %v78_v12, 16  ;;  %11462 = vmatprep.mubr.msk.bf16.mxu0 %vm941_vm3, %v10450_v20  ;;  %v615_v30 = vrot.slane %v614_v21, 4  ;;  %v625_v31 = vrot.slane %v624_v22, 4  ;;  %v641_v32 = vshrl.u32 %v78_v12, 16  ;;  %v83_v14 = vld [vmem:[%s19263_s0 + $0xfc] sm:$0xf] }
  0xbf   :  { %11132 = vmatprep.mubr.msk.bf16.mxu1 %vm941_vm3, %v10100_v18  ;;  %v647_v33 = vshll.u32 %v79_v17, 16  ;;  %v5205_v34 = vsel %vm13332_vm9, %v5203_v13, %v5204_v24  ;;  %v5206_v35 = vrot.slane %v5204_v24, 4  ;;  %v633_v36 = vrot.slane %v631_v28, 4  ;;  %v12402_v18 = vld [vmem:[%s19263_s0 + $0x44] sm:$0xf] }
  0xc0   :  { %v639_v37 = vrot.slane %v637_v29, 5  ;;  %v620_v38 = vsel %vm12840_vm6, %v615_v30, %v619_v10  ;;  %v630_v39 = vsel %vm12840_vm6, %v625_v31, %v629_v16  ;;  %v643_v40 = vrot.slane %v641_v32, 4  ;;  %v12403_v21 = vld [vmem:[%s19263_s0 + $0x48] sm:$0xf] }
  0xc1   :  { %v649_v41 = vrot.slane %v647_v33, 5  ;;  %v10101_v44 = vcombine.low %v620_v38, %v630_v39  ;;  %v5208_v45 = vsel %vm13332_vm9, %v5206_v35, %v5207_v27  ;;  %v634_v47 = vor.u32 %v633_v36, %v629_v16  ;;  %v84_v38 = vld [vmem:[%s19263_s0 + $0x100] sm:$0xf] }
  0xc2   :  { %v5209_v48 = vrot.slane %v5207_v27, 4  ;;  %v10451_v53 = vcombine.low %v5205_v34, %v5208_v45  ;;  %v644_v50 = vor.u32 %v643_v40, %v639_v37  ;;  %v5210_v55 = vrot.slane %v12400_v51, 6  ;;  %v13528_v45 = vld [vmem:[%s19264_s1 + $0xe] sm:$0x3] }
  0xc3   :  { %v5213_v57 = vrot.slane %v12401_v56, 6  ;;  %11133 = vmatmul.mubr.msk.bf16.gmra.mrb[48].mxu1 %vm941_vm3, %v10101_v44  ;;  %v635_v58 = vrot.slane %v634_v47, 4  ;;  %v651_v59 = vshrl.u32 %v79_v17, 16  ;;  %v657_v60 = vshll.u32 %v80_v43, 16  ;;  %v85_v44 = vld [vmem:[%s19263_s0 + $0x104] sm:$0xf]  ;;  %12342 = vmatprep.subr.msk.bf16.mxu0 %vm1050_vm0, %v13528_v45 }
  0xc4   :  { %v661_v61 = vshrl.u32 %v80_v43, 16  ;;  %11463 = vmatmul.mubr.msk.bf16.gmra.mrb[8].mxu0 %vm941_vm3, %v10451_v53  ;;  %v645_v62 = vrot.slane %v644_v50, 4  ;;  %v5211_v63 = vsel %vm13332_vm9, %v5209_v48, %v5210_v55  ;;  %v5212_v0 = vrot.slane %v5210_v55, 4  ;;  %v12405_v50 = vld [vmem:[%s19263_s0 + $0x50] sm:$0xf] }
  0xc5   :  { %v667_v1 = vshll.u32 %v81_v49, 16  ;;  %v640_v3 = vsel %vm12840_vm6, %v635_v58, %v639_v37  ;;  %v653_v4 = vrot.slane %v651_v59, 4  ;;  %v659_v5 = vrot.slane %v657_v60, 5 }
  0xc6   :  { %v663_v6 = vrot.slane %v661_v61, 4  ;;  %v650_v9 = vsel %vm12840_vm6, %v645_v62, %v649_v41  ;;  %v5214_v10 = vsel %vm13332_vm9, %v5212_v0, %v5213_v57  ;;  %v5215_v12 = vrot.slane %v5213_v57, 4 }
  0xc7   :  { %v669_v11 = vrot.slane %v667_v1, 5  ;;  %v10102_v15 = vcombine.low %v640_v3, %v650_v9  ;;  %v10452_v16 = vcombine.low %v5211_v63, %v5214_v10  ;;  %v654_v13 = vor.u32 %v653_v4, %v649_v41  ;;  %v86_v4 = vld [vmem:[%s19263_s0 + $0x108] sm:$0xf]  ;;  %v87_v10 = vld [vmem:[%s19263_s0 + $0x10c] sm:$0xf] }
  0xc8   :  { %v664_v17 = vor.u32 %v663_v6, %v659_v5  ;;  %v5216_v20 = vrot.slane %v12402_v18, 6  ;;  %v5219_v22 = vrot.slane %v12403_v21, 6  ;;  %v671_v23 = vshrl.u32 %v81_v49, 16  ;;  %v12404_v49 = vld [vmem:[%s19263_s0 + $0x4c] sm:$0xf] }
  0xc9   :  { %v677_v24 = vshll.u32 %v82_v7, 16  ;;  %11136 = vmatprep.mubr.msk.bf16.mxu1 %vm941_vm3, %v10102_v15  ;;  %11466 = vmatprep.mubr.msk.bf16.mxu0 %vm941_vm3, %v10452_v16  ;;  %v655_v26 = vrot.slane %v654_v13, 4  ;;  %v681_v28 = vshrl.u32 %v82_v7, 16  ;;  %v687_v29 = vshll.u32 %v83_v14, 16  ;;  %v12406_v16 = vld [vmem:[%s19263_s0 + $0x54] sm:$0xf] }
  0xca   :  { %v665_v27 = vrot.slane %v664_v17, 4  ;;  %v5217_v30 = vsel %vm13332_vm9, %v5215_v12, %v5216_v20  ;;  %v5218_v31 = vrot.slane %v5216_v20, 4  ;;  %v673_v32 = vrot.slane %v671_v23, 4  ;;  %v12407_v17 = vld [vmem:[%s19263_s0 + $0x58] sm:$0xf] }
  0xcb   :  { %v679_v33 = vrot.slane %v677_v24, 5  ;;  %v660_v34 = vsel %vm12840_vm6, %v655_v26, %v659_v5  ;;  %v683_v36 = vrot.slane %v681_v28, 4  ;;  %v689_v37 = vrot.slane %v687_v29, 5 }
  0xcc   :  { %v670_v35 = vsel %vm12840_vm6, %v665_v27, %v669_v11  ;;  %v5220_v40 = vsel %vm13332_vm9, %v5218_v31, %v5219_v22  ;;  %v674_v41 = vor.u32 %v673_v32, %v669_v11  ;;  %v5221_v43 = vrot.slane %v5219_v22, 4 }
  0xcd   :  { %v10103_v39 = vcombine.low %v660_v34, %v670_v35  ;;  %v10453_v47 = vcombine.low %v5217_v30, %v5220_v40  ;;  %v684_v48 = vor.u32 %v683_v36, %v679_v33  ;;  %v5222_v53 = vrot.slane %v12404_v49, 6  ;;  %v13571_v35 = vld [vmem:[%s19263_s0 + $0x110] sm:$0xf]  ;;  %v89_v40 = vld [vmem:[%s19263_s0 + $0x114] sm:$0xf] }
  0xce   :  { %v5225_v51 = vrot.slane %v12405_v50, 6  ;;  %v675_v55 = vrot.slane %v674_v41, 4  ;;  %v691_v56 = vshrl.u32 %v83_v14, 16  ;;  %v697_v57 = vshll.u32 %v84_v38, 16  ;;  %19471 = vst [vmem:[#allocation8_spill] sm:$0xff] %v13571_v35 }
  0xcf   :  { %11137 = vmatmul.mubr.msk.bf16.gmra.mrb[52].mxu1 %vm941_vm3, %v10103_v39  ;;  %v701_v58 = vshrl.u32 %v84_v38, 16  ;;  %11467 = vmatmul.mubr.msk.bf16.gmra.mrb[12].mxu0 %vm941_vm3, %v10453_v47  ;;  %v685_v59 = vrot.slane %v684_v48, 4  ;;  %v5223_v60 = vsel %vm13332_vm9, %v5221_v43, %v5222_v53  ;;  %v5224_v61 = vrot.slane %v5222_v53, 4  ;;  %v12409_v48 = vld [vmem:[%s19263_s0 + $0x60] sm:$0xf] }
  0xd0   :  { %v707_v62 = vshll.u32 %v85_v44, 16  ;;  %v680_v63 = vsel %vm12840_vm6, %v675_v55, %v679_v33  ;;  %v693_v0 = vrot.slane %v691_v56, 4  ;;  %v699_v1 = vrot.slane %v697_v57, 5 }
  0xd1   :  { %v703_v3 = vrot.slane %v701_v58, 4  ;;  %v690_v5 = vsel %vm12840_vm6, %v685_v59, %v689_v37  ;;  %v5226_v6 = vsel %vm13332_vm9, %v5224_v61, %v5225_v51  ;;  %v5227_v9 = vrot.slane %v5225_v51, 4 }
  0xd2   :  { %v709_v7 = vrot.slane %v707_v62, 5  ;;  %v10104_v11 = vcombine.low %v680_v63, %v690_v5  ;;  %v10454_v12 = vcombine.low %v5223_v60, %v5226_v6  ;;  %v694_v14 = vor.u32 %v693_v0, %v689_v37  ;;  %v13595_v0 = vld [vmem:[%s19263_s0 + $0x118] sm:$0xf]  ;;  %v13604_v6 = vld [vmem:[%s19263_s0 + $0x11c] sm:$0xf] }
  0xd3   :  { %v704_v15 = vor.u32 %v703_v3, %v699_v1  ;;  %v5228_v13 = vrot.slane %v12406_v16, 6  ;;  %v5231_v18 = vrot.slane %v12407_v17, 6  ;;  %v711_v20 = vshrl.u32 %v85_v44, 16  ;;  %v12408_v44 = vld [vmem:[%s19263_s0 + $0x5c] sm:$0xf]  ;;  %19472 = vst [vmem:[#allocation9_spill] sm:$0xff] %v13595_v0 }
  0xd4   :  { %v717_v21 = vshll.u32 %v86_v4, 16  ;;  %11140 = vmatprep.mubr.msk.bf16.mxu1 %vm941_vm3, %v10104_v11  ;;  %11470 = vmatprep.mubr.msk.bf16.mxu0 %vm941_vm3, %v10454_v12  ;;  %v695_v22 = vrot.slane %v694_v14, 4  ;;  %v721_v24 = vshrl.u32 %v86_v4, 16  ;;  %v727_v26 = vshll.u32 %v87_v10, 16  ;;  %19473 = vst [vmem:[#allocation10_spill] sm:$0xff] %v13604_v6 }
  0xd5   :  { %v705_v23 = vrot.slane %v704_v15, 4  ;;  %v5229_v27 = vsel %vm13332_vm9, %v5227_v9, %v5228_v13  ;;  %v5230_v28 = vrot.slane %v5228_v13, 4  ;;  %v713_v29 = vrot.slane %v711_v20, 4  ;;  %v12410_v12 = vld [vmem:[%s19263_s0 + $0x64] sm:$0xf] }
  0xd6   :  { %v719_v30 = vrot.slane %v717_v21, 5  ;;  %v700_v31 = vsel %vm12840_vm6, %v695_v22, %v699_v1  ;;  %v723_v33 = vrot.slane %v721_v24, 4  ;;  %v729_v34 = vrot.slane %v727_v26, 5  ;;  %v12411_v15 = vld [vmem:[%s19263_s0 + $0x68] sm:$0xf] }
  0xd7   :  { %v710_v32 = vsel %vm12840_vm6, %v705_v23, %v709_v7  ;;  %v5232_v37 = vsel %vm13332_vm9, %v5230_v28, %v5231_v18  ;;  %v714_v38 = vor.u32 %v713_v29, %v709_v7  ;;  %v5233_v39 = vrot.slane %v5231_v18, 4 }
  0xd8   :  { %v10105_v36 = vcombine.low %v700_v31, %v710_v32  ;;  %v10455_v41 = vcombine.low %v5229_v27, %v5232_v37  ;;  %v724_v43 = vor.u32 %v723_v33, %v719_v30  ;;  %v5234_v47 = vrot.slane %v12408_v44, 6  ;;  %v13626_v32 = vld [vmem:[%s19263_s0 + $0x120] sm:$0xf]  ;;  %v12413_v44 = vld [vmem:[%s19263_s0 + $0x70] sm:$0xf] }
  0xd9   :  { %v5237_v49 = vrot.slane %v12409_v48, 6  ;;  %v715_v53 = vrot.slane %v714_v38, 4  ;;  %v731_v50 = vshrl.u32 %v87_v10, 16  ;;  %v737_v51 = vshll.u32 %v13571_v35, 16  ;;  %19474 = vst [vmem:[#allocation11_spill] sm:$0xff] %v13626_v32 }
  0xda   :  { %11141 = vmatmul.mubr.msk.bf16.gmra.mrb[56].mxu1 %vm941_vm3, %v10105_v36  ;;  %v741_v55 = vshrl.u32 %v13571_v35, 16  ;;  %11471 = vmatmul.mubr.msk.bf16.gmra.mrb[16].mxu0 %vm941_vm3, %v10455_v41  ;;  %v725_v56 = vrot.slane %v724_v43, 4  ;;  %v5235_v57 = vsel %vm13332_vm9, %v5233_v39, %v5234_v47  ;;  %v5236_v58 = vrot.slane %v5234_v47, 4  ;;  %v13633_v38 = vld [vmem:[%s19263_s0 + $0x124] sm:$0xf] }
  0xdb   :  { %v747_v59 = vshll.u32 %v89_v40, 16  ;;  %v720_v60 = vsel %vm12840_vm6, %v715_v53, %v719_v30  ;;  %v733_v61 = vrot.slane %v731_v50, 4  ;;  %v739_v62 = vrot.slane %v737_v51, 5  ;;  %19475 = vst [vmem:[#allocation12_spill] sm:$0xff] %v13633_v38  ;;  %v12412_v41 = vld [vmem:[%s19263_s0 + $0x6c] sm:$0xf] }
  0xdc   :  { %v743_v63 = vrot.slane %v741_v55, 4  ;;  %v730_v1 = vsel %vm12840_vm6, %v725_v56, %v729_v34  ;;  %v5238_v3 = vsel %vm13332_vm9, %v5236_v58, %v5237_v49  ;;  %v5239_v5 = vrot.slane %v5237_v49, 4 }
  0xdd   :  { %v749_v4 = vrot.slane %v747_v59, 5  ;;  %v10106_v7 = vcombine.low %v720_v60, %v730_v1  ;;  %v10456_v9 = vcombine.low %v5235_v57, %v5238_v3  ;;  %v734_v10 = vor.u32 %v733_v61, %v729_v34 }
  0xde   :  { %v744_v11 = vor.u32 %v743_v63, %v739_v62  ;;  %v5240_v14 = vrot.slane %v12410_v12, 6  ;;  %v5243_v16 = vrot.slane %v12411_v15, 6  ;;  %v751_v13 = vshrl.u32 %v89_v40, 16  ;;  %v12414_v12 = vld [vmem:[%s19263_s0 + $0x74] sm:$0xf] }
  0xdf   :  { %v757_v17 = vshll.u32 %v13595_v0, 16  ;;  %11144 = vmatprep.mubr.msk.bf16.mxu1 %vm941_vm3, %v10106_v7  ;;  %11474 = vmatprep.mubr.msk.bf16.mxu0 %vm941_vm3, %v10456_v9  ;;  %v735_v18 = vrot.slane %v734_v10, 4  ;;  %v761_v21 = vshrl.u32 %v13595_v0, 16  ;;  %v767_v22 = vshll.u32 %v13604_v6, 16  ;;  %v12415_v15 = vld [vmem:[%s19263_s0 + $0x78] sm:$0xf] }
  0xe0   :  { %v745_v20 = vrot.slane %v744_v11, 4  ;;  %v5241_v23 = vsel %vm13332_vm9, %v5239_v5, %v5240_v14  ;;  %v5242_v24 = vrot.slane %v5240_v14, 4  ;;  %v753_v26 = vrot.slane %v751_v13, 4  ;;  %v13663_v5 = vld [vmem:[%s19263_s0 + $0x12c] sm:$0xf] }
  0xe1   :  { %v759_v27 = vrot.slane %v757_v17, 5  ;;  %v740_v28 = vsel %vm12840_vm6, %v735_v18, %v739_v62  ;;  %v763_v30 = vrot.slane %v761_v21, 4  ;;  %v769_v31 = vrot.slane %v767_v22, 5  ;;  %v13654_v62 = vld [vmem:[%s19263_s0 + $0x128] sm:$0xf]  ;;  %19477 = vst [vmem:[#allocation14_spill] sm:$0xff] %v13663_v5 }
  0xe2   :  { %v750_v29 = vsel %vm12840_vm6, %v745_v20, %v749_v4  ;;  %v5244_v34 = vsel %vm13332_vm9, %v5242_v24, %v5243_v16  ;;  %v754_v36 = vor.u32 %v753_v26, %v749_v4  ;;  %v5245_v37 = vrot.slane %v5243_v16, 4  ;;  %19476 = vst [vmem:[#allocation13_spill] sm:$0xff] %v13654_v62  ;;  %v6037_v0 = vld [vmem:[%s19263_s0 + $0x94] sm:$0xf] }
  0xe3   :  { %v10107_v33 = vcombine.low %v740_v28, %v750_v29  ;;  %v10457_v39 = vcombine.low %v5241_v23, %v5244_v34  ;;  %v764_v40 = vor.u32 %v763_v30, %v759_v27  ;;  %v5246_v43 = vrot.slane %v12412_v41, 6 }
  0xe4   :  { %v5249_v47 = vrot.slane %v12413_v44, 6  ;;  %v755_v48 = vrot.slane %v754_v36, 4  ;;  %v771_v49 = vshrl.u32 %v13604_v6, 16  ;;  %v777_v53 = vshll.u32 %v13626_v32, 16  ;;  %v12416_v44 = vld [vmem:[%s19263_s0 + $0x7c] sm:$0xf] }
  0xe5   :  { %11145 = vmatmul.mubr.msk.bf16.gmra.mrb[60].mxu1 %vm941_vm3, %v10107_v33  ;;  %v781_v50 = vshrl.u32 %v13626_v32, 16  ;;  %11475 = vmatmul.mubr.msk.bf16.gmra.mrb[20].mxu0 %vm941_vm3, %v10457_v39  ;;  %v765_v51 = vrot.slane %v764_v40, 4  ;;  %v5247_v55 = vsel %vm13332_vm9, %v5245_v37, %v5246_v43  ;;  %v5248_v56 = vrot.slane %v5246_v43, 4  ;;  %v13686_v33 = vld [vmem:[%s19263_s0 + $0x130] sm:$0xf] }
  0xe6   :  { %v787_v57 = vshll.u32 %v13633_v38, 16  ;;  %v760_v58 = vsel %vm12840_vm6, %v755_v48, %v759_v27  ;;  %v773_v59 = vrot.slane %v771_v49, 4  ;;  %v779_v60 = vrot.slane %v777_v53, 5  ;;  %19478 = vst [vmem:[#allocation15_spill] sm:$0xff] %v13686_v33  ;;  %v99_v40 = vld [vmem:[%s19263_s0 + $0x134] sm:$0x1] }
  0xe7   :  { %v783_v61 = vrot.slane %v781_v50, 4  ;;  %v770_v63 = vsel %vm12840_vm6, %v765_v51, %v769_v31  ;;  %v5250_v1 = vsel %vm13332_vm9, %v5248_v56, %v5249_v47  ;;  %v5251_v4 = vrot.slane %v5249_v47, 4  ;;  %v12417_v48 = vld [vmem:[%s19263_s0 + $0x80] sm:$0xf] }
  0xe8   :  { %v789_v3 = vrot.slane %v787_v57, 5  ;;  %v10108_v7 = vcombine.low %v760_v58, %v770_v63  ;;  %v10458_v9 = vcombine.low %v5247_v55, %v5250_v1  ;;  %v774_v10 = vor.u32 %v773_v59, %v769_v31 }
  0xe9   :  { %v784_v11 = vor.u32 %v783_v61, %v779_v60  ;;  %v5252_v14 = vrot.slane %v12414_v12, 6  ;;  %v5255_v16 = vrot.slane %v12415_v15, 6  ;;  %v791_v13 = vshrl.u32 %v13633_v38, 16  ;;  %v12418_v15 = vld [vmem:[%s19263_s0 + $0x84] sm:$0xf] }
  0xea   :  { %v797_v17 = vshll.u32 %v13654_v62, 16  ;;  %11148 = vmatprep.mubr.msk.bf16.mxu1 %vm941_vm3, %v10108_v7  ;;  %11478 = vmatprep.mubr.msk.bf16.mxu0 %vm941_vm3, %v10458_v9  ;;  %v775_v18 = vrot.slane %v774_v10, 4  ;;  %v801_v21 = vshrl.u32 %v13654_v62, 16  ;;  %v807_v22 = vshll.u32 %v13663_v5, 16 }
  0xeb   :  { %v785_v20 = vrot.slane %v784_v11, 4  ;;  %v5253_v23 = vsel %vm13332_vm9, %v5251_v4, %v5252_v14  ;;  %v5254_v24 = vrot.slane %v5252_v14, 4  ;;  %v793_v26 = vrot.slane %v791_v13, 4  ;;  %v12419_v13 = vld [vmem:[%s19263_s0 + $0x88] sm:$0xf] }
  0xec   :  { %v799_v27 = vrot.slane %v797_v17, 5  ;;  %v780_v28 = vsel %vm12840_vm6, %v775_v18, %v779_v60  ;;  %v803_v30 = vrot.slane %v801_v21, 4  ;;  %v809_v31 = vrot.slane %v807_v22, 5  ;;  %v12420_v18 = vld [vmem:[%s19263_s0] sm:$0xf] }
  0xed   :  { %v790_v29 = vsel %vm12840_vm6, %v785_v20, %v789_v3  ;;  %v5256_v36 = vsel %vm13332_vm9, %v5254_v24, %v5255_v16  ;;  %v794_v37 = vor.u32 %v793_v26, %v789_v3  ;;  %v5257_v39 = vrot.slane %v5255_v16, 4  ;;  %v13724_v20 = vld [vmem:[%s19263_s0 + $0x4] sm:$0xf]  ;;  %v12422_v22 = vld [vmem:[%s19263_s0 + $0x8c] sm:$0xf] }
  0xee   :  { %v10109_v34 = vcombine.low %v780_v28, %v790_v29  ;;  %v10459_v41 = vcombine.low %v5253_v23, %v5256_v36  ;;  %v804_v43 = vor.u32 %v803_v30, %v799_v27  ;;  %v5258_v47 = vrot.slane %v12416_v44, 6  ;;  %v12424_v29 = vld [vmem:[%s19263_s0 + $0x94] sm:$0xf]  ;;  %v5164_v44 = vld [vmem:[%s19263_s0 + $0xac] sm:$0xc] }
  0xef   :  { %v5261_v49 = vrot.slane %v12417_v48, 6  ;;  %v795_v53 = vrot.slane %v794_v37, 4  ;;  %v811_v50 = vshrl.u32 %v13663_v5, 16  ;;  %v817_v51 = vshll.u32 %v13686_v33, 16 }
  0xf0   :  { %11149 = vmatmul.mubr.msk.bf16.gmra.mrb[64].mxu1 %vm941_vm3, %v10109_v34  ;;  %v821_v55 = vshrl.u32 %v13686_v33, 16  ;;  %11479 = vmatmul.mubr.msk.bf16.gmra.mrb[24].mxu0 %vm941_vm3, %v10459_v41  ;;  %v805_v56 = vrot.slane %v804_v43, 4  ;;  %v5259_v57 = vsel %vm13332_vm9, %v5257_v39, %v5258_v47  ;;  %v5260_v58 = vrot.slane %v5258_v47, 4  ;;  %v6005_v33 = vld [vmem:[%s19263_s0 + $0x14] sm:$0xf] }
  0xf1   :  { %v827_v59 = vshll.u32 %v99_v40, 16  ;;  %v800_v60 = vsel %vm12840_vm6, %v795_v53, %v799_v27  ;;  %v813_v61 = vrot.slane %v811_v50, 4  ;;  %v819_v63 = vrot.slane %v817_v51, 5  ;;  %v12423_v27 = vld [vmem:[%s19263_s0 + $0x90] sm:$0xf] }
  0xf2   :  { %v823_v1 = vrot.slane %v821_v55, 4  ;;  %v810_v3 = vsel %vm12840_vm6, %v805_v56, %v809_v31  ;;  %v5262_v4 = vsel %vm13332_vm9, %v5260_v58, %v5261_v49  ;;  %v5263_v9 = vrot.slane %v5261_v49, 4 }
  0xf3   :  { %v829_v7 = vrot.slane %v827_v59, 5  ;;  %v10110_v10 = vcombine.low %v800_v60, %v810_v3  ;;  %v10460_v11 = vcombine.low %v5259_v57, %v5262_v4  ;;  %v814_v12 = vor.u32 %v813_v61, %v809_v31  ;;  %v12426_v57 = vld [vmem:[%s19263_s0 + $0xb0] sm:$0xf]  ;;  %v2870_v60 = vld [vmem:[%s19263_s0 + $0xc0] sm:$0xf] }
  0xf4   :  { %v824_v14 = vor.u32 %v823_v1, %v819_v63  ;;  %v5264_v16 = vrot.slane %v12418_v15, 6  ;;  %v5267_v17 = vrot.slane %v12419_v13, 6  ;;  %v10148_v21 = vcombine.low %v12420_v18, %v13724_v20  ;;  %v2871_v1 = vld [vmem:[%s19263_s0 + $0xc4] sm:$0xf]  ;;  %v13795_v13 = vld [vmem:[%s19263_s0 + $0x10] sm:$0xf] }
  0xf5   :  { %v5270_v23 = vrot.slane %v12422_v22, 6  ;;  %11152 = vmatprep.mubr.msk.bf16.mxu1 %vm941_vm3, %v10110_v10  ;;  %11482 = vmatprep.mubr.msk.bf16.mxu0 %vm941_vm3, %v10460_v11  ;;  %v815_v24 = vrot.slane %v814_v12, 4  ;;  %v5273_v28 = vrot.slane %v12423_v27, 6  ;;  %v5276_v30 = vrot.slane %v12424_v29, 6  ;;  %v13786_v12 = vld [vmem:[%s19263_s0 + $0xc] sm:$0xf] }
  0xf6   :  { %v825_v26 = vrot.slane %v824_v14, 4  ;;  %v5265_v31 = vsel %vm13332_vm9, %v5263_v9, %v5264_v16  ;;  %v5266_v34 = vrot.slane %v5264_v16, 4  ;;  %v5269_v36 = vrot.slane %v5267_v17, 4  ;;  %19479 = vst [vmem:[#allocation16_spill] sm:$0xff] %v13786_v12  ;;  %19480 = vst [vmem:[#allocation17_spill] sm:$0xff] %v13795_v13 }
  0xf7   :  { %v5272_v37 = vrot.slane %v5270_v23, 4  ;;  %v820_v39 = vsel %vm12840_vm6, %v815_v24, %v819_v63  ;;  %v5275_v41 = vrot.slane %v5273_v28, 4  ;;  %v5278_v43 = vrot.slane %v5276_v30, 4  ;;  %v2872_v24 = vld [vmem:[%s19263_s0 + $0xc8] sm:$0xf] }
  0xf8   :  { %v830_v40 = vsel %vm12840_vm6, %v825_v26, %v829_v7  ;;  %v5268_v48 = vsel %vm13332_vm9, %v5266_v34, %v5267_v17  ;;  %v5271_v49 = vsel %vm13332_vm9, %v5269_v36, %v5270_v23  ;;  %v5279_v55 = vrot.slane %v12425_v25, 6  ;;  %v13811_v27 = vld [vmem:[%s19263_s0 + $0x18] sm:$0xf]  ;;  %v13831_v34 = vld [vmem:[%s19263_s0 + $0xcc] sm:$0xf] }
  0xf9   :  { %v10111_v47 = vcombine.low %v820_v39, %v830_v40  ;;  %v5274_v53 = vsel %vm13332_vm9, %v5272_v37, %v5273_v28  ;;  %v10461_v50 = vcombine.low %v5265_v31, %v5268_v48  ;;  %v10444_v56 = vrot.slane %v5164_v44, 10  ;;  %19482 = vst [vmem:[#allocation19_spill] sm:$0xff] %v13811_v27  ;;  %v13816_v28 = vld [vmem:[%s19263_s0 + $0x1c] sm:$0xf]  ;;  %19484 = vst [vmem:[#allocation21_spill] sm:$0xff] %v13831_v34 }
  0xfa   :  { %v10462_v51 = vcombine.low %v5271_v49, %v5274_v53  ;;  %v5283_v58 = vrot.slane %v12426_v57, 6  ;;  %v5286_v59 = vrot.slane %v13277_v42, 6  ;;  %v5277_v61 = vsel %vm13332_vm9, %v5275_v41, %v5276_v30  ;;  %19483 = vst [vmem:[#allocation20_spill] sm:$0xff] %v13816_v28  ;;  %v13836_v36 = vld [vmem:[%s19263_s0 + $0x20] sm:$0xf] }
  0xfb   :  { %11153 = vmatmul.mubr.msk.bf16.gmra.mrb[68].mxu1 %vm941_vm3, %v10111_v47  ;;  %11483 = vmatmul.mubr.msk.bf16.gmra.mrb[28].mxu0 %vm941_vm3, %v10461_v50  ;;  %v5289_v63 = vrot.slane %v13298_v8, 6  ;;  %v5280_v42 = vsel %vm13332_vm9, %v5278_v43, %v5279_v55  ;;  %v5292_v7 = vrot.slane %v13306_v19, 6  ;;  %v5295_v11 = vrot.slane %v2870_v60, 6  ;;  %v13781_v8 = vld [vmem:[%s19263_s0 + $0x8] sm:$0xf]  ;;  %19485 = vst [vmem:[#allocation22_spill] sm:$0xff] %v13836_v36 }
  0xfc   :  { %11158 = vmatprep.mubr.msk.bf16.mxu1 %vm941_vm3, %v10148_v21  ;;  %11486 = vmatprep.mubr.msk.bf16.mxu0 %vm941_vm3, %v10462_v51  ;;  %v5285_v3 = vrot.slane %v5283_v58, 4  ;;  %v5288_v4 = vrot.slane %v5286_v59, 4  ;;  %v5284_v9 = vsel %vm13332_vm9, %v10444_v56, %v5283_v58  ;;  %v10149_v14 = vcombine.low %v13781_v8, %v13786_v12  ;;  %v13801_v21 = vld [vmem:[%s19263_s0 + $0x14] sm:$0xf]  ;;  %v13841_v37 = vld [vmem:[%s19263_s0 + $0x24] sm:$0xf] }
  0xfd   :  { %v5291_v10 = vrot.slane %v5289_v63, 4  ;;  %v5294_v15 = vrot.slane %v5292_v7, 4  ;;  %v5298_v16 = vrot.slane %v2871_v1, 6  ;;  %v10463_v18 = vcombine.low %v5277_v61, %v5280_v42  ;;  %19481 = vst [vmem:[#allocation18_spill] sm:$0xff] %v13801_v21  ;;  %19486 = vst [vmem:[#allocation23_spill] sm:$0xff] %v13841_v37 }
  0xfe   :  { %v5287_v19 = vsel %vm13332_vm9, %v5285_v3, %v5286_v59  ;;  %v10150_v22 = vcombine.low %v13795_v13, %v13801_v21  ;;  %v5297_v23 = vrot.slane %v5295_v11, 4  ;;  %v10151_v29 = vcombine.low %v13811_v27, %v13816_v28  ;;  %v13848_v40 = vld [vmem:[%s19263_s0 + $0x28] sm:$0xf]  ;;  %v13853_v41 = vld [vmem:[%s19263_s0 + $0x2c] sm:$0xf] }
  0xff   :  { %v10464_v26 = vcombine.low %v5284_v9, %v5287_v19  ;;  %v13822_v30 = vsel %vm13332_vm9, %v5288_v4, %v5289_v63  ;;  %v13826_v31 = vsel %vm13332_vm9, %v5291_v10, %v5292_v7  ;;  %v10152_v39 = vcombine.low %v13836_v36, %v13841_v37  ;;  %19487 = vst [vmem:[#allocation24_spill] sm:$0xff] %v13848_v40  ;;  %v12437_v44 = vld [vmem:[%s19264_s1 + $0x4] sm:$0x3]  ;;  %v2874_v49 = vld [vmem:[%s19263_s0 + $0xd0] sm:$0xf] }
 0x100   :  { %19488 = vst [vmem:[#allocation25_spill] sm:$0xff] %v13853_v41  ;;  %v2433_v47 = vsel %vm1050_vm0, %v12437_v44, 0  ;;  %v4251_v48 = vshrl.u32 %v2872_v24, 16  ;;  %v2875_v53 = vld [vmem:[%s19263_s0 + $0xd4] sm:$0xf]  ;;  %v13870_v50 = vsel %vm13332_vm9, %v5294_v15, %v5295_v11  ;;  %v13874_v51 = vsel %vm13332_vm9, %v5297_v23, %v5298_v16 }
 0x101   :  { %v4254_v25 = vshll.u32 %v2872_v24, 16  ;;  %v5301_v55 = vrot.slane %v2872_v24, 6  ;;  %v2876_v56 = vld [vmem:[%s19263_s0 + $0xd8] sm:$0xf]  ;;  %v10465_v57 = vcombine.low %v13822_v30, %v13826_v31  ;;  %v5300_v59 = vrot.slane %v5298_v16, 4 }
 0x102   :  { %v5304_v60 = vrot.slane %v13831_v34, 6  ;;  %v2877_v61 = vld [vmem:[%s19263_s0 + $0xdc] sm:$0xf]  ;;  %v5307_v42 = vrot.slane %v2874_v49, 6  ;;  %v5310_v3 = vrot.slane %v2875_v53, 6  ;;  %v10466_v7 = vcombine.low %v13870_v50, %v13874_v51 }
 0x103   :  { %11159 = vmatmul.mubr.msk.bf16.vlgmr.msra.gmra.mrb[0].mxu1 %vm941_vm3, %v10149_v14  ;;  %11487 = vmatmul.mubr.msk.bf16.gmra.mrb[32].mxu0 %vm941_vm3, %v10463_v18  ;;  %v5303_v1 = vrot.slane %v5301_v55, 4  ;;  %v2878_v4 = vld [vmem:[%s19263_s0 + $0xe0] sm:$0xf]  ;;  %v13895_v9 = vrot.slane %v4251_v48, 5  ;;  %v5313_v11 = vrot.slane %v2876_v56, 6  ;;  %v13900_v19 = vrot.slane %v4254_v25, 6 }
 0x104   :  { %11162 = vmatprep.mubr.msk.bf16.mxu1 %vm941_vm3, %v10150_v22  ;;  %11490 = vmatprep.mubr.msk.bf16.mxu0 %vm941_vm3, %v10464_v26  ;;  %v5306_v10 = vrot.slane %v5304_v60, 4  ;;  %v2879_v14 = vld [vmem:[%s19263_s0 + $0xe4] sm:$0xf]  ;;  %v5309_v15 = vrot.slane %v5307_v42, 4  ;;  %v5312_v16 = vrot.slane %v5310_v3, 4  ;;  %v5316_v18 = vrot.slane %v2877_v61, 6 }
 0x105   :  { %11231 = vmatpush3.bf16.msra.mxu1 %v2433_v47  ;;  %19489 = vst [vmem:[#allocation26_spill] sm:$0xff] %v13895_v9  ;;  %19490 = vst [vmem:[#allocation27_spill] sm:$0xff] %v13900_v19  ;;  %v2880_v22 = vld [vmem:[%s19263_s0 + $0xe8] sm:$0xf]  ;;  %v13907_v23 = vsel %vm13332_vm9, %v5300_v59, %v5301_v55  ;;  %v13911_v24 = vsel %vm13332_vm9, %v5303_v1, %v5304_v60  ;;  %v5315_v30 = vrot.slane %v5313_v11, 4  ;;  %v5319_v48 = vrot.slane %v2878_v4, 6 }
 0x106   :  { %v13915_v26 = vsel %vm13332_vm9, %v5306_v10, %v5307_v42  ;;  %v2881_v31 = vld [vmem:[%s19263_s0 + $0xec] sm:$0xf]  ;;  %v13922_v44 = vsel %vm13332_vm9, %v5309_v15, %v5310_v3  ;;  %v5318_v47 = vrot.slane %v5316_v18, 4  ;;  %v5322_v49 = vrot.slane %v2879_v14, 6  ;;  %v2882_v53 = vld [vmem:[%s19263_s0 + $0xf0] sm:$0xf] }
 0x107   :  { %v13930_v50 = vld [vmem:[%s19263_s0 + $0x30] sm:$0xf]  ;;  %v13935_v51 = vld [vmem:[%s19263_s0 + $0x34] sm:$0xf]  ;;  %v13942_v55 = vld [vmem:[%s19263_s0 + $0x38] sm:$0xf]  ;;  %v10467_v4 = vcombine.low %v13907_v23, %v13911_v24  ;;  %v13974_v10 = vsel %vm13332_vm9, %v5312_v16, %v5313_v11  ;;  %v19503_v59 = vcombine.low %v13848_v40, %v13853_v41 }
 0x108   :  { %19491 = vst [vmem:[#allocation28_spill] sm:$0xff] %v13930_v50  ;;  %19492 = vst [vmem:[#allocation29_spill] sm:$0xff] %v13935_v51  ;;  %v13947_v56 = vld [vmem:[%s19263_s0 + $0x3c] sm:$0xf]  ;;  %v13954_v60 = vld [vmem:[%s19263_s0 + $0x40] sm:$0xf]  ;;  %v13996_v63 = vsel %vm13332_vm9, %v5318_v47, %v5319_v48 }
 0x109   :  { %19493 = vst [vmem:[#allocation30_spill] sm:$0xff] %v13942_v55  ;;  %19494 = vst [vmem:[#allocation31_spill] sm:$0xff] %v13947_v56  ;;  %v13959_v61 = vld [vmem:[%s19263_s0 + $0x44] sm:$0xf]  ;;  %v5325_v42 = vrot.slane %v2880_v22, 6  ;;  %v5321_v14 = vrot.slane %v5319_v48, 4 }
 0x10a   :  { %19495 = vst [vmem:[#allocation32_spill] sm:$0xff] %v13954_v60  ;;  %19496 = vst [vmem:[#allocation33_spill] sm:$0xff] %v13959_v61  ;;  %v2883_v3 = vld [vmem:[%s19263_s0 + $0xf4] sm:$0xf]  ;;  %v5324_v15 = vrot.slane %v5322_v49, 4  ;;  %v5328_v24 = vrot.slane %v2881_v31, 6 }
 0x10b   :  { %11163 = vmatmul.mubr.msk.bf16.gmra.mrb[4].mxu1 %vm941_vm3, %v10151_v29  ;;  %v2884_v22 = vld [vmem:[%s19263_s0 + $0xf8] sm:$0xf]  ;;  %11491 = vmatmul.mubr.msk.bf16.gmra.mrb[36].mxu0 %vm941_vm3, %v10465_v57  ;;  %v10468_v29 = vcombine.low %v13915_v26, %v13922_v44  ;;  %v5327_v23 = vrot.slane %v5325_v42, 4  ;;  %v5331_v11 = vrot.slane %v2882_v53, 6  ;;  %v2885_v16 = vld [vmem:[%s19263_s0 + $0xfc] sm:$0xf]  ;;  %v13992_v57 = vsel %vm13332_vm9, %v5315_v30, %v5316_v18 }
 0x10c   :  { %11166 = vmatprep.mubr.msk.bf16.mxu1 %vm941_vm3, %v10152_v39  ;;  %11494 = vmatprep.mubr.msk.bf16.mxu0 %vm941_vm3, %v10466_v7  ;;  %v14001_v39 = vld [vmem:[%s19263_s0 + $0x48] sm:$0xf]  ;;  %v14006_v26 = vld [vmem:[%s19263_s0 + $0x4c] sm:$0xf]  ;;  %v5334_v31 = vrot.slane %v2883_v3, 6  ;;  %v14015_v30 = vsel %vm13332_vm9, %v5321_v14, %v5322_v49  ;;  %v14019_v44 = vsel %vm13332_vm9, %v5324_v15, %v5325_v42  ;;  %v5330_v48 = vrot.slane %v5328_v24, 4 }
 0x10d   :  { %19497 = vst [vmem:[#allocation34_spill] sm:$0xff] %v14001_v39  ;;  %19498 = vst [vmem:[#allocation35_spill] sm:$0xff] %v14006_v26  ;;  %v2886_v18 = vld [vmem:[%s19263_s0 + $0x100] sm:$0xf]  ;;  %v14023_v47 = vsel %vm13332_vm9, %v5327_v23, %v5328_v24  ;;  %v2887_v53 = vld [vmem:[%s19263_s0 + $0x104] sm:$0xf] }
 0x10e   :  { %v5333_v3 = vrot.slane %v5331_v11, 4  ;;  %v5336_v58 = vrot.slane %v5334_v31, 4  ;;  %v5337_v17 = vrot.slane %v2884_v22, 6  ;;  %v5340_v7 = vrot.slane %v2885_v16, 6  ;;  %v2888_v49 = vld [vmem:[%s19263_s0 + $0x108] sm:$0xf] }
 0x10f   :  { %v14036_v14 = vld [vmem:[%s19263_s0 + $0x50] sm:$0xf]  ;;  %v14041_v15 = vld [vmem:[%s19263_s0 + $0x54] sm:$0xf]  ;;  %v14048_v23 = vld [vmem:[%s19263_s0 + $0x58] sm:$0xf]  ;;  %v14069_v16 = vsel %vm13332_vm9, %v5330_v48, %v5331_v11 }
 0x110   :  { %19499 = vst [vmem:[#allocation36_spill] sm:$0xff] %v14036_v14  ;;  %19500 = vst [vmem:[#allocation37_spill] sm:$0xff] %v14041_v15  ;;  %v14053_v24 = vld [vmem:[%s19263_s0 + $0x5c] sm:$0xf]  ;;  %v5343_v1 = vrot.slane %v2886_v18, 6  ;;  %v5339_v25 = vrot.slane %v5337_v17, 4  ;;  %v14080_v54 = vsel %vm13332_vm9, %v5333_v3, %v5334_v31  ;;  %v14084_v11 = vsel %vm13332_vm9, %v5336_v58, %v5337_v17 }
 0x111   :  { %19501 = vst [vmem:[#allocation38_spill] sm:$0xff] %v14048_v23  ;;  %19502 = vst [vmem:[#allocation39_spill] sm:$0xff] %v14053_v24  ;;  %v2889_v42 = vld [vmem:[%s19263_s0 + $0x10c] sm:$0xf]  ;;  %v5342_v43 = vrot.slane %v5340_v7, 4  ;;  %v5346_v19 = vrot.slane %v2887_v53, 6  ;;  %v19506_v17 = vcombine.low %v13930_v50, %v13935_v51 }
 0x112   :  { %v5345_v18 = vrot.slane %v5343_v1, 4  ;;  %v5349_v9 = vrot.slane %v2888_v49, 6  ;;  %v2891_v22 = vld [vmem:[%s19263_s0 + $0x114] sm:$0xf]  ;;  %v14089_v48 = vld [vmem:[%s19263_s0 + $0x60] sm:$0xf]  ;;  %v14108_v58 = vsel %vm13332_vm9, %v5339_v25, %v5340_v7 }
 0x113   :  { %11167 = vmatmul.mubr.msk.bf16.gmra.mrb[8].mxu1 %vm941_vm3, %v19503_v59  ;;  %19504 = vst [vmem:[#allocation40_spill] sm:$0xff] %v14089_v48  ;;  %v14094_v53 = vld [vmem:[%s19263_s0 + $0x64] sm:$0xf]  ;;  %v5352_v49 = vrot.slane %v2889_v42, 6  ;;  %v2892_v31 = vld [vmem:[%s19263_s0 + $0x118] sm:$0xf]  ;;  %11495 = vmatmul.mubr.msk.bf16.gmra.mrb[40].mxu0 %vm941_vm3, %v10467_v4  ;;  %v14112_v3 = vsel %vm13332_vm9, %v5342_v43, %v5343_v1 }
 0x114   :  { %19505 = vst [vmem:[#allocation41_spill] sm:$0xff] %v14094_v53  ;;  %11170 = vmatprep.mubr.msk.bf16.mxu1 %vm941_vm3, %v19506_v17  ;;  %v14116_v42 = vsel %vm13332_vm9, %v5345_v18, %v5346_v19  ;;  %v5348_v59 = vrot.slane %v5346_v19, 4  ;;  %v2893_v4 = vld [vmem:[%s19263_s0 + $0x11c] sm:$0xf]  ;;  %11498 = vmatprep.mubr.msk.bf16.mxu0 %vm941_vm3, %v10468_v29  ;;  %v5351_v17 = vrot.slane %v5349_v9, 4  ;;  %v5355_v34 = vrot.slane %v2890_v46, 6 }
 0x115   :  { %v5354_v2 = vrot.slane %v5352_v49, 4  ;;  %v5358_v25 = vrot.slane %v2891_v22, 6  ;;  %v2894_v43 = vld [vmem:[%s19263_s0 + $0x120] sm:$0xf]  ;;  %v14130_v19 = vld [vmem:[%s19263_s0 + $0x68] sm:$0xf] }
 0x116   :  { %19507 = vst [vmem:[#allocation42_spill] sm:$0xff] %v14130_v19  ;;  %v14135_v29 = vld [vmem:[%s19263_s0 + $0x6c] sm:$0xf]  ;;  %v14142_v7 = vld [vmem:[%s19263_s0 + $0x70] sm:$0xf]  ;;  %v5361_v1 = vrot.slane %v2892_v31, 6  ;;  %v14163_v18 = vsel %vm13332_vm9, %v5348_v59, %v5349_v9  ;;  %v14170_v50 = vsel %vm13332_vm9, %v5351_v17, %v5352_v49 }
 0x117   :  { %19508 = vst [vmem:[#allocation43_spill] sm:$0xff] %v14135_v29  ;;  %19509 = vst [vmem:[#allocation44_spill] sm:$0xff] %v14142_v7  ;;  %v14147_v22 = vld [vmem:[%s19263_s0 + $0x74] sm:$0xf]  ;;  %v2895_v51 = vld [vmem:[%s19263_s0 + $0x124] sm:$0xf]  ;;  %v14174_v27 = vsel %vm13332_vm9, %v5354_v2, %v5355_v34 }
 0x118   :  { %19510 = vst [vmem:[#allocation45_spill] sm:$0xff] %v14147_v22  ;;  %v5357_v41 = vrot.slane %v5355_v34, 4  ;;  %v5360_v40 = vrot.slane %v5358_v25, 4  ;;  %v2896_v37 = vld [vmem:[%s19263_s0 + $0x128] sm:$0xf]  ;;  %v5363_v31 = vrot.slane %v5361_v1, 4 }
 0x119   :  { %v5364_v36 = vrot.slane %v2893_v4, 6  ;;  %v5367_v28 = vrot.slane %v2894_v43, 6  ;;  %v2897_v46 = vld [vmem:[%s19263_s0 + $0x12c] sm:$0xf]  ;;  %v14179_v9 = vld [vmem:[%s19263_s0 + $0x78] sm:$0xf]  ;;  %v19511_v4 = vcombine.low %v13942_v55, %v13947_v56 }
 0x11a   :  { %v14184_v59 = vld [vmem:[%s19263_s0 + $0x7c] sm:$0xf]  ;;  %v5370_v43 = vrot.slane %v2895_v51, 6  ;;  %v2898_v49 = vld [vmem:[%s19263_s0 + $0x130] sm:$0xf]  ;;  %v14193_v2 = vsel %vm13332_vm9, %v5357_v41, %v5358_v25  ;;  %v14197_v34 = vsel %vm13332_vm9, %v5360_v40, %v5361_v1  ;;  %v5373_v21 = vrot.slane %v2896_v37, 6 }
 0x11b   :  { %v14201_v17 = vsel %vm13332_vm9, %v5363_v31, %v5364_v36  ;;  %v5366_v13 = vrot.slane %v5364_v36, 4  ;;  %v2899_v51 = vld [vmem:[%s19263_s0 + $0x134] sm:$0xf]  ;;  %11171 = vmatmul.mubr.msk.bf16.gmra.mrb[12].mxu1 %vm941_vm3, %v19511_v4  ;;  %v5369_v41 = vrot.slane %v5367_v28, 4  ;;  %v5376_v5 = vrot.slane %v2897_v46, 6 }
 0x11c   :  { %v5372_v25 = vrot.slane %v5370_v43, 4  ;;  %v2900_v40 = vld [vmem:[%s19263_s0 + $0x138] sm:$0xf]  ;;  %v19512_v36 = vcombine.low %v13974_v10, %v13992_v57  ;;  %v19513_v1 = vcombine.low %v13954_v60, %v13959_v61  ;;  %v14226_v37 = vld [vmem:[%s19263_s0 + $0x80] sm:$0xf]  ;;  %v19517_v61 = vcombine.low %v13996_v63, %v14015_v30 }
 0x11d   :  { %v14231_v46 = vld [vmem:[%s19263_s0 + $0x84] sm:$0xf]  ;;  %v14238_v57 = vld [vmem:[%s19263_s0 + $0x88] sm:$0xf]  ;;  %v14243_v4 = vld [vmem:[%s19263_s0 + $0x8c] sm:$0xf]  ;;  %v14273_v63 = vsel %vm13332_vm9, %v5366_v13, %v5367_v28  ;;  %v14280_v12 = vsel %vm13332_vm9, %v5369_v41, %v5370_v43 }
 0x11e   :  { %11499 = vmatmul.mubr.msk.bf16.gmra.mrb[44].mxu0 %vm941_vm3, %v19512_v36  ;;  %11174 = vmatprep.mubr.msk.bf16.mxu1 %vm941_vm3, %v19513_v1  ;;  %19514 = vst [vmem:[#allocation46_spill] sm:$0xff] %v14238_v57  ;;  %19515 = vst [vmem:[#allocation47_spill] sm:$0xff] %v14243_v4  ;;  %v5379_v1 = vrot.slane %v2898_v49, 6  ;;  %v3809_v31 = vld [vmem:[%s19263_s0 + $0x13c] sm:$0x3]  ;;  %v5375_v36 = vrot.slane %v5373_v21, 4  ;;  %v14284_v4 = vsel %vm13332_vm9, %v5372_v25, %v5373_v21 }
 0x11f   :  { %v14253_v10 = vld [vmem:[%s19264_s1 + $0x6] sm:$0x3]  ;;  %11502 = vmatprep.mubr.msk.bf16.mxu0 %vm941_vm3, %v19517_v61  ;;  %v5378_v56 = vrot.slane %v5376_v5, 4  ;;  %v6004_v55 = vld [vmem:[%s19263_s0 + $0x10] sm:$0xc]  ;;  %v5382_v30 = vrot.slane %v2899_v51, 6 }
 0x120   :  { %19516 = vst [vmem:[#allocation48_spill] sm:$0xff] %v14253_v10  ;;  %12337 = vmatprep.subr.msk.bf16.mxu1 %vm1050_vm0, %v14253_v10  ;;  %v5381_v61 = vrot.slane %v5379_v1, 4  ;;  %v5385_v49 = vrot.slane %v2900_v40, 6  ;;  %v6006_v60 = vld [vmem:[%s19263_s0 + $0x18] sm:$0xf]  ;;  %v5388_v40 = vrot.slane %v3809_v31, 6  ;;  %v14303_v21 = vsel %vm13332_vm9, %v5375_v36, %v5376_v5 }
 0x121   :  { %v14289_v13 = vld [vmem:[%s19263_s0 + $0xa4] sm:$0xf]  ;;  %v14294_v28 = vld [vmem:[%s19263_s0 + $0xa8] sm:$0xf]  ;;  %v6007_v43 = vld [vmem:[%s19263_s0 + $0x1c] sm:$0xf]  ;;  %v14307_v41 = vsel %vm13332_vm9, %v5378_v56, %v5379_v1  ;;  %v19523_v5 = vcombine.low %v14001_v39, %v14006_v26 }
 0x122   :  { %19518 = vst [vmem:[#allocation49_spill] sm:$0xff] %v14289_v13  ;;  %19519 = vst [vmem:[#allocation50_spill] sm:$0xff] %v14294_v28  ;;  %v5384_v25 = vrot.slane %v5382_v30, 4  ;;  %v5387_v10 = vrot.slane %v5385_v49, 4  ;;  %v14311_v57 = vsel %vm13332_vm9, %v5381_v61, %v5382_v30  ;;  %v10518_v51 = vrot.slane %v6004_v55, 10 }
 0x123   :  { %v6154_v31 = vrot.slane %v6005_v33, 6  ;;  %v6157_v28 = vrot.slane %v6006_v60, 6  ;;  %v6008_v13 = vld [vmem:[%s19263_s0 + $0x20] sm:$0xf]  ;;  %v14321_v56 = vld [vmem:[%s19263_s0 + $0xac] sm:$0xf]  ;;  %11175 = vmatmul.mubr.msk.bf16.gmra.mrb[16].mxu1 %vm941_vm3, %v19523_v5  ;;  %v19526_v5 = vcombine.low %v14036_v14, %v14041_v15 }
 0x124   :  { %v14326_v36 = vld [vmem:[%s19263_s0 + $0xb0] sm:$0xf]  ;;  %v14333_v55 = vld [vmem:[%s19263_s0 + $0xb4] sm:$0xf]  ;;  %v14338_v60 = vld [vmem:[%s19263_s0 + $0xb8] sm:$0xf]  ;;  %v14356_v1 = vsel %vm13332_vm9, %v5384_v25, %v5385_v49  ;;  %v19527_v25 = vcombine.low %v14069_v16, %v14080_v54 }
 0x125   :  { %19520 = vst [vmem:[#allocation51_spill] sm:$0xff] %v14326_v36  ;;  %19521 = vst [vmem:[#allocation52_spill] sm:$0xff] %v14333_v55  ;;  %v6160_v61 = vrot.slane %v6007_v43, 6  ;;  %v6009_v30 = vld [vmem:[%s19263_s0 + $0x24] sm:$0xf]  ;;  %v14360_v43 = vsel %vm13332_vm9, %v5387_v10, %v5388_v40  ;;  %v19525_v55 = vcombine.low %v14019_v44, %v14023_v47  ;;  %11178 = vmatprep.mubr.msk.bf16.mxu1 %vm941_vm3, %v19526_v5  ;;  %v6159_v10 = vrot.slane %v6157_v28, 4 }
 0x126   :  { %19522 = vst [vmem:[#allocation53_spill] sm:$0xff] %v14338_v60  ;;  %v6010_v33 = vld [vmem:[%s19263_s0 + $0x28] sm:$0xf]  ;;  %19524 = vst [vmem:[#allocation54_spill] sm:$0xff] %v14360_v43  ;;  %v6156_v60 = vrot.slane %v6154_v31, 4  ;;  %v14374_v49 = vsel %vm13332_vm9, %v10518_v51, %v6154_v31  ;;  %v6163_v40 = vrot.slane %v6008_v13, 6 }
 0x127   :  { %11503 = vmatmul.mubr.msk.bf16.gmra.mrb[48].mxu0 %vm941_vm3, %v19525_v55  ;;  %v6011_v44 = vld [vmem:[%s19263_s0 + $0x2c] sm:$0xf]  ;;  %v6012_v47 = vld [vmem:[%s19263_s0 + $0x30] sm:$0xf]  ;;  %v6162_v51 = vrot.slane %v6160_v61, 4  ;;  %v6166_v31 = vrot.slane %v6009_v30, 6  ;;  %v14430_v39 = vsel %vm13332_vm9, %v6159_v10, %v6160_v61 }
 0x128   :  { %11506 = vmatprep.mubr.msk.bf16.mxu0 %vm941_vm3, %v19527_v25  ;;  %v14388_v55 = vsel %vm13332_vm9, %v6156_v60, %v6157_v28  ;;  %v6169_v13 = vrot.slane %v6010_v33, 6  ;;  %v6013_v5 = vld [vmem:[%s19263_s0 + $0x34] sm:$0xf]  ;;  %v14398_v54 = vld [vmem:[%s19263_s0 + $0xbc] sm:$0xf]  ;;  %v14409_v33 = vsel %vm1050_vm0, %v13528_v45, 0 }
 0x129   :  { %19528 = vst [vmem:[#allocation55_spill] sm:$0xff] %v14398_v54  ;;  %v14403_v16 = vld [vmem:[%s19263_s0 + $0xc0] sm:$0xf]  ;;  %19530 = vst [vmem:[#allocation57_spill] sm:$0xff] %v14409_v33  ;;  %v6165_v60 = vrot.slane %v6163_v40, 4  ;;  %v6168_v45 = vrot.slane %v6166_v31, 4  ;;  %v14437_v43 = vsel %vm13332_vm9, %v6162_v51, %v6163_v40 }
 0x12a   :  { %19529 = vst [vmem:[#allocation56_spill] sm:$0xff] %v14403_v16  ;;  %v6014_v30 = vld [vmem:[%s19263_s0 + $0x38] sm:$0xf]  ;;  %v14417_v25 = vld [vmem:[%s19263_s0 + $0xc4] sm:$0xf]  ;;  %v6171_v15 = vrot.slane %v6169_v13, 4 }
 0x12b   :  { %v14422_v36 = vld [vmem:[%s19263_s0 + $0xc8] sm:$0xf]  ;;  %v6172_v14 = vrot.slane %v6011_v44, 6  ;;  %v6175_v33 = vrot.slane %v6012_v47, 6  ;;  %v6178_v16 = vrot.slane %v6013_v5, 6  ;;  %v6181_v5 = vrot.slane %v6014_v30, 6 }
 0x12c   :  { %19531 = vst [vmem:[#allocation58_spill] sm:$0xff] %v14422_v36  ;;  %v6015_v54 = vld [vmem:[%s19263_s0 + $0x3c] sm:$0xf]  ;;  %v14442_v44 = vld [vmem:[%s19263_s0 + $0xcc] sm:$0xf]  ;;  %v14459_v28 = vsel %vm13332_vm9, %v6165_v60, %v6166_v31  ;;  %v14463_v26 = vsel %vm13332_vm9, %v6168_v45, %v6169_v13  ;;  %v19534_v30 = vcombine.low %v14048_v23, %v14053_v24  ;;  %v19535_v45 = vcombine.low %v14084_v11, %v14108_v58  ;;  %v19566_v38 = vld [vmem:[#allocation46_spill] sm:$0xff] }
 0x12d   :  { %19532 = vst [vmem:[#allocation59_spill] sm:$0xff] %v14442_v44  ;;  %v14447_v61 = vld [vmem:[%s19263_s0 + $0xd0] sm:$0xf]  ;;  %v6174_v47 = vrot.slane %v6172_v14, 4  ;;  %v6016_v40 = vld [vmem:[%s19263_s0 + $0x40] sm:$0xf] }
 0x12e   :  { %19533 = vst [vmem:[#allocation60_spill] sm:$0xff] %v14447_v61  ;;  %v6017_v51 = vld [vmem:[%s19263_s0 + $0x44] sm:$0xf]  ;;  %v6177_v36 = vrot.slane %v6175_v33, 4  ;;  %v6180_v10 = vrot.slane %v6178_v16, 4  ;;  %11179 = vmatmul.mubr.msk.bf16.gmra.mrb[20].mxu1 %vm941_vm3, %v19534_v30  ;;  %v14471_v61 = vsel %vm13332_vm9, %v6171_v15, %v6172_v14  ;;  %v6183_v31 = vrot.slane %v6181_v5, 4 }
 0x12f   :  { %v14475_v44 = vsel %vm13332_vm9, %v6174_v47, %v6175_v33  ;;  %v6184_v60 = vrot.slane %v6015_v54, 6  ;;  %v6018_v13 = vld [vmem:[%s19263_s0 + $0x48] sm:$0xf]  ;;  %11507 = vmatmul.mubr.msk.bf16.gmra.mrb[52].mxu0 %vm941_vm3, %v19535_v45  ;;  %v19536_v30 = vcombine.low %v14089_v48, %v14094_v53  ;;  %v6187_v54 = vrot.slane %v6016_v40, 6  ;;  %v6019_v11 = vld [vmem:[%s19263_s0 + $0x4c] sm:$0xf] }
 0x130   :  { %v14490_v14 = vsel %vm13332_vm9, %v6177_v36, %v6178_v16  ;;  %v14494_v15 = vsel %vm13332_vm9, %v6180_v10, %v6181_v5  ;;  %v6190_v33 = vrot.slane %v6017_v51, 6  ;;  %v6020_v58 = vld [vmem:[%s19263_s0 + $0x50] sm:$0xf]  ;;  %v19539_v47 = vcombine.low %v14112_v3, %v14116_v42  ;;  %v14513_v10 = vld [vmem:[%s19263_s0 + $0xd4] sm:$0xf] }
 0x131   :  { %11182 = vmatprep.mubr.msk.bf16.mxu1 %vm941_vm3, %v19536_v30  ;;  %19537 = vst [vmem:[#allocation61_spill] sm:$0xff] %v14490_v14  ;;  %19538 = vst [vmem:[#allocation62_spill] sm:$0xff] %v14494_v15  ;;  %v14518_v5 = vld [vmem:[%s19263_s0 + $0xd8] sm:$0xf]  ;;  %v6186_v42 = vrot.slane %v6184_v60, 4  ;;  %v6189_v30 = vrot.slane %v6187_v54, 4  ;;  %v14549_v45 = vsel %vm13332_vm9, %v6183_v31, %v6184_v60 }
 0x132   :  { %11510 = vmatprep.mubr.msk.bf16.mxu0 %vm941_vm3, %v19539_v47  ;;  %v14525_v40 = vld [vmem:[%s19263_s0 + $0xdc] sm:$0xf]  ;;  %v14530_v51 = vld [vmem:[%s19263_s0 + $0xe0] sm:$0xf]  ;;  %v6192_v47 = vrot.slane %v6190_v33, 4  ;;  %v6193_v16 = vrot.slane %v6018_v13, 6 }
 0x133   :  { %19540 = vst [vmem:[#allocation63_spill] sm:$0xff] %v14525_v40  ;;  %19541 = vst [vmem:[#allocation64_spill] sm:$0xff] %v14530_v51  ;;  %v6021_v3 = vld [vmem:[%s19263_s0 + $0x54] sm:$0xf]  ;;  %v6196_v48 = vrot.slane %v6019_v11, 6  ;;  %v6199_v24 = vrot.slane %v6020_v58, 6  ;;  %v14577_v40 = vsel %vm13332_vm9, %v6186_v42, %v6187_v54  ;;  %v14581_v58 = vsel %vm13332_vm9, %v6189_v30, %v6190_v33 }
 0x134   :  { %v6022_v23 = vld [vmem:[%s19263_s0 + $0x58] sm:$0xf]  ;;  %v6023_v13 = vld [vmem:[%s19263_s0 + $0x5c] sm:$0xf]  ;;  %v14554_v36 = vld [vmem:[%s19263_s0 + $0xe4] sm:$0xf]  ;;  %v14591_v60 = vsel %vm13332_vm9, %v6192_v47, %v6193_v16 }
 0x135   :  { %19542 = vst [vmem:[#allocation65_spill] sm:$0xff] %v14554_v36  ;;  %v14559_v11 = vld [vmem:[%s19263_s0 + $0xe8] sm:$0xf]  ;;  %v14566_v53 = vld [vmem:[%s19263_s0 + $0xec] sm:$0xf]  ;;  %v6195_v51 = vrot.slane %v6193_v16, 4 }
 0x136   :  { %19543 = vst [vmem:[#allocation66_spill] sm:$0xff] %v14559_v11  ;;  %v14571_v31 = vld [vmem:[%s19263_s0 + $0xf0] sm:$0xf]  ;;  %v6198_v11 = vrot.slane %v6196_v48, 4  ;;  %v6202_v36 = vrot.slane %v6021_v3, 6  ;;  %v6201_v54 = vrot.slane %v6199_v24, 4  ;;  %v19545_v3 = vcombine.low %v14130_v19, %v14135_v29 }
 0x137   :  { %19544 = vst [vmem:[#allocation67_spill] sm:$0xff] %v14571_v31  ;;  %v6024_v15 = vld [vmem:[%s19263_s0 + $0x60] sm:$0xf]  ;;  %v6025_v14 = vld [vmem:[%s19263_s0 + $0x64] sm:$0xf]  ;;  %v6205_v42 = vrot.slane %v6022_v23, 6  ;;  %v14602_v30 = vsel %vm13332_vm9, %v6195_v51, %v6196_v48  ;;  %v19549_v48 = vcombine.low %v14163_v18, %v14170_v50  ;;  %v19551_v50 = vcombine.low %v14174_v27, %v14193_v2 }
 0x138   :  { %v6208_v31 = vrot.slane %v6023_v13, 6  ;;  %v6026_v33 = vld [vmem:[%s19263_s0 + $0x68] sm:$0xf]  ;;  %11183 = vmatmul.mubr.msk.bf16.gmra.mrb[24].mxu1 %vm941_vm3, %v19545_v3  ;;  %v14606_v16 = vsel %vm13332_vm9, %v6198_v11, %v6199_v24  ;;  %v14611_v23 = vld [vmem:[%s19263_s0 + $0xf4] sm:$0xf]  ;;  %v6204_v3 = vrot.slane %v6202_v36, 4  ;;  %v19550_v24 = vcombine.low %v14142_v7, %v14147_v22 }
 0x139   :  { %19546 = vst [vmem:[#allocation68_spill] sm:$0xff] %v14606_v16  ;;  %19547 = vst [vmem:[#allocation69_spill] sm:$0xff] %v14611_v23  ;;  %v14616_v47 = vld [vmem:[%s19263_s0 + $0xf8] sm:$0xf]  ;;  %11511 = vmatmul.mubr.msk.bf16.gmra.mrb[56].mxu0 %vm941_vm3, %v19549_v48  ;;  %v6207_v11 = vrot.slane %v6205_v42, 4  ;;  %v6211_v19 = vrot.slane %v6024_v15, 6  ;;  %v14661_v22 = vsel %vm13332_vm9, %v6201_v54, %v6202_v36 }
 0x13a   :  { %19548 = vst [vmem:[#allocation70_spill] sm:$0xff] %v14616_v47  ;;  %11186 = vmatprep.mubr.msk.bf16.mxu1 %vm941_vm3, %v19550_v24  ;;  %v6210_v29 = vrot.slane %v6208_v31, 4  ;;  %v6027_v13 = vld [vmem:[%s19263_s0 + $0x6c] sm:$0xf]  ;;  %11514 = vmatprep.mubr.msk.bf16.mxu0 %vm941_vm3, %v19551_v50  ;;  %v14642_v48 = vld [vmem:[%s19263_s0 + $0xfc] sm:$0xf]  ;;  %v14665_v24 = vsel %vm13332_vm9, %v6204_v3, %v6205_v42 }
 0x13b   :  { %19552 = vst [vmem:[#allocation71_spill] sm:$0xff] %v14642_v48  ;;  %v14647_v15 = vld [vmem:[%s19263_s0 + $0x100] sm:$0xf]  ;;  %v6214_v51 = vrot.slane %v6025_v14, 6  ;;  %v6217_v27 = vrot.slane %v6026_v33, 6  ;;  %v6213_v14 = vrot.slane %v6211_v19, 4  ;;  %v14675_v18 = vsel %vm13332_vm9, %v6207_v11, %v6208_v31 }
 0x13c   :  { %19553 = vst [vmem:[#allocation72_spill] sm:$0xff] %v14647_v15  ;;  %v6028_v2 = vld [vmem:[%s19263_s0 + $0x70] sm:$0xf]  ;;  %v6029_v50 = vld [vmem:[%s19263_s0 + $0x74] sm:$0xf]  ;;  %v14691_v7 = vsel %vm13332_vm9, %v6210_v29, %v6211_v19  ;;  %v6220_v31 = vrot.slane %v6027_v13, 6 }
 0x13d   :  { %v6030_v33 = vld [vmem:[%s19263_s0 + $0x78] sm:$0xf]  ;;  %v6031_v15 = vld [vmem:[%s19263_s0 + $0x7c] sm:$0xf]  ;;  %v14680_v36 = vld [vmem:[%s19263_s0 + $0x104] sm:$0xf] }
 0x13e   :  { %v14685_v54 = vld [vmem:[%s19263_s0 + $0x108] sm:$0xf]  ;;  %v6216_v3 = vrot.slane %v6214_v51, 4  ;;  %v6219_v48 = vrot.slane %v6217_v27, 4  ;;  %v6223_v11 = vrot.slane %v6028_v2, 6  ;;  %v6226_v47 = vrot.slane %v6029_v50, 6 }
 0x13f   :  { %19554 = vst [vmem:[#allocation73_spill] sm:$0xff] %v14685_v54  ;;  %v14698_v16 = vld [vmem:[%s19263_s0 + $0x10c] sm:$0xf]  ;;  %v6229_v54 = vrot.slane %v6030_v33, 6  ;;  %v6032_v19 = vld [vmem:[%s19263_s0 + $0x80] sm:$0xf]  ;;  %v14710_v2 = vsel %vm13332_vm9, %v6213_v14, %v6214_v51  ;;  %v19555_v33 = vcombine.low %v14179_v9, %v14184_v59 }
 0x140   :  { %v6232_v29 = vrot.slane %v6031_v15, 6  ;;  %v6033_v13 = vld [vmem:[%s19263_s0 + $0x84] sm:$0xf]  ;;  %v14714_v50 = vsel %vm13332_vm9, %v6216_v3, %v6217_v27  ;;  %v6222_v23 = vrot.slane %v6220_v31, 4  ;;  %v6225_v42 = vrot.slane %v6223_v11, 4 }
 0x141   :  { %11187 = vmatmul.mubr.msk.bf16.gmra.mrb[28].mxu1 %vm941_vm3, %v19555_v33  ;;  %v14724_v35 = vsel %vm13332_vm9, %v6219_v48, %v6220_v31  ;;  %v6228_v51 = vrot.slane %v6226_v47, 4  ;;  %v6231_v14 = vrot.slane %v6229_v54, 4  ;;  %v19556_v27 = vcombine.low %v14197_v34, %v14201_v17  ;;  %v14741_v48 = vld [vmem:[%s19263_s0 + $0x114] sm:$0xf]  ;;  %v6034_v17 = vld [vmem:[%s19263_s0 + $0x88] sm:$0xf] }
 0x142   :  { %v19557_v3 = vcombine.low %v14226_v37, %v14231_v46  ;;  %v14736_v33 = vsel %vm13332_vm9, %v6222_v23, %v6223_v11  ;;  %19558 = vst [vmem:[#allocation74_spill] sm:$0xff] %v14741_v48  ;;  %v6235_v34 = vrot.slane %v6032_v19, 6  ;;  %v19559_v23 = vcombine.low %v14273_v63, %v14280_v12  ;;  %v6036_v15 = vld [vmem:[%s19263_s0 + $0x90] sm:$0xf]  ;;  %v1987_v12 = vld [vmem:[%s19263_s0] sm:$0xe] }
 0x143   :  { %11515 = vmatmul.mubr.msk.bf16.gmra.mrb[60].mxu0 %vm941_vm3, %v19556_v27  ;;  %v6238_v27 = vrot.slane %v6033_v13, 6  ;;  %v14759_v19 = vsel %vm13332_vm9, %v6225_v42, %v6226_v47  ;;  %v6234_v13 = vrot.slane %v6232_v29, 4  ;;  %v14779_v31 = vsel %vm13332_vm9, %v6231_v14, %v6232_v29  ;;  %v9362_v29 = vld [vmem:[%s19266_s3 + $0xf8] sm:$0xff] }
 0x144   :  { %11190 = vmatprep.mubr.msk.bf16.mxu1 %vm941_vm3, %v19557_v3  ;;  %v6035_v3 = vld [vmem:[%s19263_s0 + $0x8c] sm:$0xf]  ;;  %11518 = vmatprep.mubr.msk.bf16.mxu0 %vm941_vm3, %v19559_v23  ;;  %19560 = vst [vmem:[#allocation75_spill] sm:$0xff] %v14759_v19  ;;  %v14773_v23 = vsel %vm13332_vm9, %v6228_v51, %v6229_v54  ;;  %v6237_v42 = vrot.slane %v6235_v34, 4  ;;  %v6241_v32 = vrot.slane %v6034_v17, 6  ;;  %v6247_v63 = vrot.slane %v6036_v15, 6 }
 0x145   :  { %19561 = vst [vmem:[#allocation76_spill] sm:$0xff] %v14773_v23  ;;  %v6240_v11 = vrot.slane %v6238_v27, 4  ;;  %v6244_v6 = vrot.slane %v6035_v3, 6  ;;  %vm1993_vm10 = vcmask 1042432   ;;  %vm1994_vm11 = vcmask 1046532   ;;  %v19572_v23 = vld [vmem:[#allocation49_spill] sm:$0xff] }
 0x146   :  { %v10220_v54 = vrot.slane %v1987_v12, 9  ;;  %v14786_v51 = vsel %vm13332_vm9, %v6234_v13, %v6235_v34  ;;  %v6243_v47 = vrot.slane %v6241_v32, 4  ;;  %vm14788_vm12 = vmor %vm1993_vm10, %vm1994_vm11  ;;  %v1998_v14 = vrot.slane %v13724_v20, 5  ;;  %v6038_v34 = vld [vmem:[%s19263_s0 + $0x98] sm:$0xf] }
 0x147   :  { %19562 = vst [vmem:[#allocation77_spill] sm:$0xff] %v14786_v51  ;;  %v6246_v62 = vrot.slane %v6244_v6, 4  ;;  %v14797_v15 = vsel %vm13332_vm9, %v6237_v42, %v6238_v27  ;;  %v2001_v3 = vrot.slane %v13781_v8, 5  ;;  %v6250_v13 = vrot.slane %v6037_v0, 6  ;;  %v6039_v12 = vld [vmem:[%s19263_s0 + $0x9c] sm:$0xf] }
 0x148   :  { %19565 = vst [vmem:[#allocation78_spill] sm:$0xff] %v14797_v15  ;;  %v19567_v20 = vld [vmem:[#allocation47_spill] sm:$0xff]  ;;  %v14812_v27 = vsel %vm13332_vm9, %v6240_v11, %v6241_v32  ;;  %v14816_v8 = vsel %vm13332_vm9, %v6243_v47, %v6244_v6  ;;  %v2000_v42 = vrot.slane %v1998_v14, 4  ;;  %v6249_v17 = vrot.slane %v6247_v63, 4  ;;  %v19573_v19 = vld [vmem:[#allocation50_spill] sm:$0xff]  ;;  %v19579_v47 = vld [vmem:[#allocation16_spill] sm:$0xff] }
 0x149   :  { %v19568_v48 = vcombine.low %v19566_v38, %v19567_v20  ;;  %19569 = vst [vmem:[#allocation46_spill] sm:$0xff] %v14812_v27  ;;  %19570 = vst [vmem:[#allocation79_spill] sm:$0xff] %v14816_v8  ;;  %v19571_v0 = vcombine.low %v14284_v4, %v14303_v21  ;;  %v19574_v20 = vcombine.low %v19572_v23, %v19573_v19  ;;  %v6252_v11 = vrot.slane %v6250_v13, 4 }
 0x14a   :  { %v14828_v32 = vsel %vm13332_vm9, %v6246_v62, %v6247_v63  ;;  %v14832_v6 = vsel %vm14788_vm12, %v10220_v54, %v1998_v14  ;;  %v19577_v4 = vcombine.low %v14307_v41, %v14311_v57  ;;  %v14840_v21 = vsel %vm14788_vm12, %v2000_v42, %v2001_v3  ;;  %v6040_v62 = vld [vmem:[%s19263_s0 + $0xa0] sm:$0x3]  ;;  %v6042_v57 = vld [vmem:[%s19263_s0 + $0xb8] sm:$0xf] }
 0x14b   :  { %11191 = vmatmul.mubr.msk.bf16.gmra.mrb[32].mxu1 %vm941_vm3, %v19568_v48  ;;  %11519 = vmatmul.mubr.msk.bf16.gmra.mrb[64].mxu0 %vm941_vm3, %v19571_v0  ;;  %19575 = vst [vmem:[#allocation49_spill] sm:$0xff] %v14828_v32  ;;  %19576 = vst [vmem:[#allocation80_spill] sm:$0xff] %v14832_v6  ;;  %v2003_v48 = vrot.slane %v2001_v3, 4  ;;  %v6253_v23 = vrot.slane %v6038_v34, 6  ;;  %v6256_v63 = vrot.slane %v6039_v12, 6  ;;  %v14855_v34 = vsel %vm13332_vm9, %v6249_v17, %v6250_v13  ;;  %v19590_v32 = vld [vmem:[#allocation19_spill] sm:$0xff] }
 0x14c   :  { %11194 = vmatprep.mubr.msk.bf16.mxu1 %vm941_vm3, %v19574_v20  ;;  %11522 = vmatprep.mubr.msk.bf16.mxu0 %vm941_vm3, %v19577_v4  ;;  %19578 = vst [vmem:[#allocation81_spill] sm:$0xff] %v14840_v21  ;;  %v2004_v20 = vrot.slane %v19579_v47, 5  ;;  %v19582_v4 = vld [vmem:[#allocation18_spill] sm:$0xff]  ;;  %19583 = vst [vmem:[#allocation16_spill] sm:$0xff] %v14855_v34  ;;  %v19585_v47 = vld [vmem:[#allocation17_spill] sm:$0xff]  ;;  %v6259_v0 = vrot.slane %v6040_v62, 6 }
 0x14d   :  { %v2010_v3 = vrot.slane %v19582_v4, 5  ;;  %v14859_v42 = vsel %vm13332_vm9, %v6252_v11, %v6253_v23  ;;  %v19586_v19 = vrot.slane %v19585_v47, 5  ;;  %v6043_v4 = vld [vmem:[%s19263_s0 + $0xbc] sm:$0xf]  ;;  %v6255_v11 = vrot.slane %v6253_v23, 4  ;;  %v19593_v6 = vld [vmem:[#allocation20_spill] sm:$0xff] }
 0x14e   :  { %19584 = vst [vmem:[#allocation18_spill] sm:$0xff] %v14859_v42  ;;  %v2006_v12 = vrot.slane %v2004_v20, 4  ;;  %v14878_v41 = vsel %vm14788_vm12, %v2003_v48, %v2004_v20  ;;  %v19588_v14 = vrot.slane %v19585_v47, 5  ;;  %v6258_v17 = vrot.slane %v6256_v63, 4  ;;  %v6044_v48 = vld [vmem:[%s19263_s0 + $0xc0] sm:$0xf] }
 0x14f   :  { %v2009_v54 = vrot.slane %v19586_v19, 4  ;;  %v6041_v19 = vld [vmem:[%s19263_s0 + $0xb4] sm:$0xc]  ;;  %19587 = vst [vmem:[#allocation17_spill] sm:$0xff] %v14878_v41  ;;  %v2013_v8 = vrot.slane %v19590_v32, 5  ;;  %v2012_v62 = vrot.slane %v2010_v3, 4 }
 0x150   :  { %v14884_v27 = vsel %vm14788_vm12, %v2006_v12, %v19588_v14  ;;  %v6263_v13 = vrot.slane %v6042_v57, 6  ;;  %v6266_v21 = vrot.slane %v6043_v4, 6  ;;  %v19591_v20 = vld [vmem:[#allocation51_spill] sm:$0xff]  ;;  %v10519_v32 = vrot.slane %v6041_v19, 10  ;;  %v6045_v57 = vld [vmem:[%s19263_s0 + $0xc4] sm:$0xf] }
 0x151   :  { %19589 = vst [vmem:[#allocation82_spill] sm:$0xff] %v14884_v27  ;;  %v19592_v47 = vcombine.low %v14321_v56, %v19591_v20  ;;  %v14898_v14 = vsel %vm14788_vm12, %v2009_v54, %v2010_v3  ;;  %v2015_v12 = vrot.slane %v2013_v8, 4  ;;  %v2016_v23 = vrot.slane %v19593_v6, 5  ;;  %v19594_v4 = vld [vmem:[#allocation54_spill] sm:$0xff]  ;;  %v19596_v20 = vld [vmem:[#allocation52_spill] sm:$0xff]  ;;  %v19597_v34 = vld [vmem:[#allocation53_spill] sm:$0xff] }
 0x152   :  { %v19595_v42 = vcombine.low %v14356_v1, %v19594_v4  ;;  %v14916_v6 = vsel %vm13332_vm9, %v6255_v11, %v6256_v63  ;;  %v6265_v3 = vrot.slane %v6263_v13, 4  ;;  %v19599_v19 = vld [vmem:[#allocation22_spill] sm:$0xff]  ;;  %v19600_v1 = vcombine.low %v14374_v49, %v14388_v55  ;;  %v6046_v63 = vld [vmem:[%s19263_s0 + $0xc8] sm:$0xf]  ;;  %v19601_v49 = vld [vmem:[#allocation23_spill] sm:$0xff] }
 0x153   :  { %11195 = vmatmul.mubr.msk.bf16.gmra.mrb[36].mxu1 %vm941_vm3, %v19592_v47  ;;  %v19598_v47 = vcombine.low %v19596_v20, %v19597_v34  ;;  %v2019_v15 = vrot.slane %v19599_v19, 5  ;;  %v14925_v34 = vsel %vm13332_vm9, %v6258_v17, %v6259_v0  ;;  %v6268_v4 = vrot.slane %v6266_v21, 4  ;;  %v6047_v0 = vld [vmem:[%s19263_s0 + $0xcc] sm:$0xf]  ;;  %v19614_v41 = vld [vmem:[#allocation58_spill] sm:$0xff] }
 0x154   :  { %11523 = vmatmul.mubr.msk.bf16.gmra.mrb[68].mxu0 %vm941_vm3, %v19595_v42  ;;  %v2018_v42 = vrot.slane %v2016_v23, 4  ;;  %v6269_v20 = vrot.slane %v6044_v48, 6  ;;  %v14932_v11 = vsel %vm14788_vm12, %v2012_v62, %v2013_v8  ;;  %v2022_v55 = vrot.slane %v19601_v49, 5 }
 0x155   :  { %11198 = vmatprep.mubr.msk.bf16.mxu1 %vm941_vm3, %v19598_v47  ;;  %11528 = vmatprep.mubr.msk.bf16.mxu0 %vm941_vm3, %v19600_v1  ;;  %v6272_v47 = vrot.slane %v6045_v57, 6  ;;  %v2021_v19 = vrot.slane %v2019_v15, 4  ;;  %v14940_v17 = vsel %vm13332_vm9, %v10519_v32, %v6263_v13  ;;  %v14944_v48 = vsel %vm13332_vm9, %v6265_v3, %v6266_v21  ;;  %v19604_v13 = vld [vmem:[#allocation24_spill] sm:$0xff] }
 0x156   :  { %v14948_v8 = vsel %vm14788_vm12, %v2015_v12, %v2016_v23  ;;  %v6271_v62 = vrot.slane %v6269_v20, 4  ;;  %v14952_v57 = vsel %vm14788_vm12, %v2018_v42, %v2019_v15  ;;  %v14956_v1 = vsel %vm13332_vm9, %v6268_v4, %v6269_v20  ;;  %v6048_v15 = vld [vmem:[%s19263_s0 + $0xd0] sm:$0xf] }
 0x157   :  { %19602 = vst [vmem:[#allocation19_spill] sm:$0xff] %v14952_v57  ;;  %19603 = vst [vmem:[#allocation51_spill] sm:$0xff] %v14956_v1  ;;  %v2024_v49 = vrot.slane %v2022_v55, 4  ;;  %v2025_v32 = vrot.slane %v19604_v13, 5  ;;  %v14965_v23 = vsel %vm14788_vm12, %v2021_v19, %v2022_v55  ;;  %v6275_v12 = vrot.slane %v6046_v63, 6  ;;  %v19608_v13 = vld [vmem:[#allocation25_spill] sm:$0xff] }
 0x158   :  { %v14961_v21 = vsel %vm13332_vm9, %v6271_v62, %v6272_v47  ;;  %19606 = vst [vmem:[#allocation54_spill] sm:$0xff] %v14965_v23  ;;  %v6278_v3 = vrot.slane %v6047_v0, 6  ;;  %v6274_v4 = vrot.slane %v6272_v47, 4  ;;  %v2028_v54 = vrot.slane %v19608_v13, 5  ;;  %v6049_v62 = vld [vmem:[%s19263_s0 + $0xd4] sm:$0xf] }
 0x159   :  { %19605 = vst [vmem:[#allocation20_spill] sm:$0xff] %v14961_v21  ;;  %v14972_v42 = vsel %vm14788_vm12, %v2024_v49, %v2025_v32  ;;  %v2027_v20 = vrot.slane %v2025_v32, 4  ;;  %v19609_v19 = vld [vmem:[#allocation55_spill] sm:$0xff]  ;;  %v19610_v55 = vld [vmem:[#allocation56_spill] sm:$0xff]  ;;  %v6277_v27 = vrot.slane %v6275_v12, 4  ;;  %v19613_v13 = vcombine.low %v14430_v39, %v14437_v43  ;;  %v19616_v0 = vld [vmem:[#allocation57_spill] sm:$0xff] }
 0x15a   :  { %19607 = vst [vmem:[#allocation52_spill] sm:$0xff] %v14972_v42  ;;  %v19611_v63 = vcombine.low %v19609_v19, %v19610_v55  ;;  %v19612_v47 = vld [vmem:[#allocation28_spill] sm:$0xff]  ;;  %v19615_v51 = vcombine.low %v14417_v25, %v19614_v41  ;;  %v6280_v49 = vrot.slane %v6278_v3, 4  ;;  %v19617_v39 = vcombine.low %v14459_v28, %v14463_v26 }
 0x15b   :  { %v2031_v32 = vrot.slane %v19612_v47, 5  ;;  %v6284_v41 = vrot.slane %v6049_v62, 6  ;;  %v6050_v47 = vld [vmem:[%s19263_s0 + $0xd8] sm:$0xf]  ;;  %v15016_v26 = vsel %vm13332_vm9, %v6274_v4, %v6275_v12  ;;  %v15020_v28 = vsel %vm14788_vm12, %v2027_v20, %v2028_v54  ;;  %v19628_v23 = vld [vmem:[#allocation32_spill] sm:$0xff] }
 0x15c   :  { %11199 = vmatmul.mubr.msk.bf16.gmra.mrb[40].mxu1 %vm941_vm3, %v19611_v63  ;;  %11529 = vmatmul.mubr.msk.bf16.vlgmr.msra.gmra.mrb[0].mxu0 %vm941_vm3, %v19613_v13  ;;  %v2030_v63 = vrot.slane %v2028_v54, 4  ;;  %19618 = vst [vmem:[#allocation53_spill] sm:$0xff] %v15016_v26  ;;  %19619 = vst [vmem:[#allocation22_spill] sm:$0xff] %v15020_v28  ;;  %v19620_v13 = vld [vmem:[#allocation29_spill] sm:$0xff]  ;;  %v15026_v25 = vsel %vm13332_vm9, %v6277_v27, %v6278_v3  ;;  %v6287_v4 = vrot.slane %v6050_v47, 6  ;;  %v2043_v21 = vrot.slane %v19628_v23, 5 }
 0x15d   :  { %11202 = vmatprep.mubr.msk.bf16.mxu1 %vm941_vm3, %v19615_v51  ;;  %11601 = vmatpush3.bf16.msra.mxu0 %v19616_v0  ;;  %v6281_v51 = vrot.slane %v6048_v15, 6  ;;  %v6051_v0 = vld [vmem:[%s19263_s0 + $0xdc] sm:$0xf]  ;;  %v19621_v15 = vld [vmem:[#allocation30_spill] sm:$0xff]  ;;  %19622 = vst [vmem:[#allocation23_spill] sm:$0xff] %v15026_v25  ;;  %v2033_v19 = vrot.slane %v2031_v32, 4  ;;  %v19633_v23 = vcombine.low %v14513_v10, %v14518_v5 }
 0x15e   :  { %11532 = vmatprep.mubr.msk.bf16.mxu0 %vm941_vm3, %v19617_v39  ;;  %v2034_v39 = vrot.slane %v19620_v13, 5  ;;  %v2037_v62 = vrot.slane %v19621_v15, 5  ;;  %v15030_v43 = vsel %vm14788_vm12, %v2030_v63, %v2031_v32  ;;  %v6290_v20 = vrot.slane %v6051_v0, 6  ;;  %v6052_v13 = vld [vmem:[%s19263_s0 + $0xe0] sm:$0xf]  ;;  %v19634_v10 = vld [vmem:[#allocation61_spill] sm:$0xff] }
 0x15f   :  { %19623 = vst [vmem:[#allocation24_spill] sm:$0xff] %v15030_v43  ;;  %v6283_v55 = vrot.slane %v6281_v51, 4  ;;  %v15034_v12 = vsel %vm13332_vm9, %v6280_v49, %v6281_v51  ;;  %v6286_v3 = vrot.slane %v6284_v41, 4  ;;  %v19626_v15 = vld [vmem:[#allocation31_spill] sm:$0xff]  ;;  %v6053_v49 = vld [vmem:[%s19263_s0 + $0xe4] sm:$0xf] }
 0x160   :  { %19624 = vst [vmem:[#allocation25_spill] sm:$0xff] %v15034_v12  ;;  %v2036_v54 = vrot.slane %v2034_v39, 4  ;;  %v2039_v63 = vrot.slane %v2037_v62, 4  ;;  %v2040_v42 = vrot.slane %v19626_v15, 5  ;;  %v19627_v51 = vld [vmem:[#allocation48_spill] sm:$0xff]  ;;  %v6289_v0 = vrot.slane %v6287_v4, 4 }
 0x161   :  { %v15041_v27 = vsel %vm13332_vm9, %v6283_v55, %v6284_v41  ;;  %v15051_v47 = vsel %vm1050_vm0, %v19627_v51, 0  ;;  %v19629_v55 = vld [vmem:[#allocation59_spill] sm:$0xff]  ;;  %v19630_v1 = vld [vmem:[#allocation60_spill] sm:$0xff]  ;;  %v15062_v57 = vsel %vm14788_vm12, %v2033_v19, %v2034_v39  ;;  %v6292_v25 = vrot.slane %v6290_v20, 4  ;;  %v19635_v5 = vld [vmem:[#allocation62_spill] sm:$0xff] }
 0x162   :  { %19625 = vst [vmem:[#allocation55_spill] sm:$0xff] %v15041_v27  ;;  %v19631_v41 = vcombine.low %v19629_v55, %v19630_v1  ;;  %v2042_v32 = vrot.slane %v2040_v42, 4  ;;  %v19632_v51 = vcombine.low %v14471_v61, %v14475_v44  ;;  %v15076_v55 = vsel %vm14788_vm12, %v2036_v54, %v2037_v62  ;;  %v6054_v44 = vld [vmem:[%s19263_s0 + $0xe8] sm:$0xf]  ;;  %v6055_v61 = vld [vmem:[%s19263_s0 + $0xec] sm:$0xf] }
 0x163   :  { %v6293_v19 = vrot.slane %v6052_v13, 6  ;;  %v6296_v39 = vrot.slane %v6053_v49, 6  ;;  %v15094_v62 = vsel %vm14788_vm12, %v2039_v63, %v2040_v42  ;;  %v19637_v54 = vld [vmem:[#allocation33_spill] sm:$0xff]  ;;  %v19638_v49 = vld [vmem:[#allocation34_spill] sm:$0xff]  ;;  %v2045_v42 = vrot.slane %v2043_v21, 4  ;;  %v19644_v43 = vld [vmem:[#allocation63_spill] sm:$0xff] }
 0x164   :  { %11203 = vmatmul.mubr.msk.bf16.gmra.mrb[44].mxu1 %vm941_vm3, %v19631_v41  ;;  %11533 = vmatmul.mubr.msk.bf16.gmra.mrb[4].mxu0 %vm941_vm3, %v19632_v51  ;;  %v19636_v41 = vcombine.low %v19634_v10, %v19635_v5  ;;  %v15090_v51 = vsel %vm13332_vm9, %v6286_v3, %v6287_v4  ;;  %v2046_v13 = vrot.slane %v19637_v54, 5  ;;  %v15101_v1 = vld [vmem:[%s19264_s1 + $0x10] sm:$0x3]  ;;  %v15105_v10 = vsel %vm13332_vm9, %v6289_v0, %v6290_v20  ;;  %v19645_v28 = vld [vmem:[#allocation64_spill] sm:$0xff] }
 0x165   :  { %11206 = vmatprep.mubr.msk.bf16.mxu1 %vm941_vm3, %v19633_v23  ;;  %v2049_v23 = vrot.slane %v19638_v49, 5  ;;  %19639 = vst [vmem:[#allocation56_spill] sm:$0xff] %v15101_v1  ;;  %v15109_v4 = vsel %vm14788_vm12, %v2042_v32, %v2043_v21  ;;  %v6295_v3 = vrot.slane %v6293_v19, 4  ;;  %12343 = vmatprep.subr.msk.bf16.mxu0 %vm1050_vm0, %v15101_v1  ;;  %v15115_v63 = vsel %vm13332_vm9, %v6292_v25, %v6293_v19  ;;  %v6056_v20 = vld [vmem:[%s19263_s0 + $0xf0] sm:$0xf]  ;;  %v19642_v49 = vld [vmem:[#allocation35_spill] sm:$0xff] }
 0x166   :  { %11536 = vmatprep.mubr.msk.bf16.mxu0 %vm941_vm3, %v19636_v41  ;;  %19640 = vst [vmem:[#allocation28_spill] sm:$0xff] %v15115_v63  ;;  %v2048_v5 = vrot.slane %v2046_v13, 4  ;;  %v6299_v41 = vrot.slane %v6054_v44, 6  ;;  %v6302_v54 = vrot.slane %v6055_v61, 6  ;;  %v6298_v0 = vrot.slane %v6296_v39, 4  ;;  %v19643_v1 = vld [vmem:[#allocation36_spill] sm:$0xff] }
 0x167   :  { %v15122_v32 = vsel %vm13332_vm9, %v6295_v3, %v6296_v39  ;;  %v2051_v21 = vrot.slane %v2049_v23, 4  ;;  %v2052_v15 = vrot.slane %v19642_v49, 5  ;;  %v6057_v25 = vld [vmem:[%s19263_s0 + $0xf4] sm:$0xf]  ;;  %v2055_v27 = vrot.slane %v19643_v1, 5 }
 0x168   :  { %19641 = vst [vmem:[#allocation58_spill] sm:$0xff] %v15122_v32  ;;  %v6301_v61 = vrot.slane %v6299_v41, 4  ;;  %v15137_v39 = vsel %vm14788_vm12, %v2045_v42, %v2046_v13  ;;  %v6304_v12 = vrot.slane %v6302_v54, 4  ;;  %v19646_v26 = vcombine.low %v19644_v43, %v19645_v28  ;;  %v6058_v13 = vld [vmem:[%s19263_s0 + $0xf8] sm:$0xf] }
 0x169   :  { %v2054_v49 = vrot.slane %v2052_v15, 4  ;;  %v15147_v1 = vsel %vm14788_vm12, %v2048_v5, %v2049_v23  ;;  %v6305_v19 = vrot.slane %v6056_v20, 6  ;;  %v6308_v3 = vrot.slane %v6057_v25, 6  ;;  %v6059_v42 = vld [vmem:[%s19263_s0 + $0xfc] sm:$0xf]  ;;  %v19649_v28 = vld [vmem:[#allocation66_spill] sm:$0xff] }
 0x16a   :  { %v19647_v43 = vcombine.low %v14549_v45, %v14577_v40  ;;  %v15165_v23 = vsel %vm13332_vm9, %v6298_v0, %v6299_v41  ;;  %v15169_v5 = vsel %vm14788_vm12, %v2051_v21, %v2052_v15  ;;  %v19651_v20 = vld [vmem:[#allocation37_spill] sm:$0xff]  ;;  %v19652_v32 = vld [vmem:[#allocation38_spill] sm:$0xff]  ;;  %v19653_v40 = vcombine.low %v14581_v58, %v14591_v60  ;;  %v6060_v58 = vld [vmem:[%s19263_s0 + $0x100] sm:$0xf] }
 0x16b   :  { %v2058_v25 = vrot.slane %v19651_v20, 5  ;;  %v2061_v63 = vrot.slane %v19652_v32, 5  ;;  %v15179_v45 = vsel %vm13332_vm9, %v6301_v61, %v6302_v54  ;;  %v15183_v41 = vsel %vm14788_vm12, %v2054_v49, %v2055_v27  ;;  %v19658_v49 = vld [vmem:[#allocation39_spill] sm:$0xff] }
 0x16c   :  { %11207 = vmatmul.mubr.msk.bf16.gmra.mrb[48].mxu1 %vm941_vm3, %v19646_v26  ;;  %11537 = vmatmul.mubr.msk.bf16.gmra.mrb[8].mxu0 %vm941_vm3, %v19647_v43  ;;  %v19648_v26 = vld [vmem:[#allocation65_spill] sm:$0xff]  ;;  %19654 = vst [vmem:[#allocation57_spill] sm:$0xff] %v15179_v45  ;;  %19655 = vst [vmem:[#allocation29_spill] sm:$0xff] %v15183_v41  ;;  %v6307_v0 = vrot.slane %v6305_v19, 4  ;;  %v2057_v15 = vrot.slane %v2055_v27, 4  ;;  %v15187_v21 = vsel %vm13332_vm9, %v6304_v12, %v6305_v19  ;;  %v6314_v43 = vrot.slane %v6059_v42, 6 }
 0x16d   :  { %v19650_v44 = vcombine.low %v19648_v26, %v19649_v28  ;;  %11540 = vmatprep.mubr.msk.bf16.mxu0 %vm941_vm3, %v19653_v40  ;;  %19656 = vst [vmem:[#allocation30_spill] sm:$0xff] %v15187_v21  ;;  %v2060_v32 = vrot.slane %v2058_v25, 4  ;;  %v6310_v54 = vrot.slane %v6308_v3, 4  ;;  %v2063_v61 = vrot.slane %v2061_v63, 4  ;;  %v6061_v12 = vld [vmem:[%s19263_s0 + $0x104] sm:$0xf] }
 0x16e   :  { %v15194_v60 = vsel %vm13332_vm9, %v6307_v0, %v6308_v3  ;;  %v2064_v26 = vrot.slane %v19658_v49, 5  ;;  %v19659_v42 = vld [vmem:[#allocation40_spill] sm:$0xff]  ;;  %v15209_v3 = vsel %vm14788_vm12, %v2057_v15, %v2058_v25  ;;  %v6316_v0 = vrot.slane %v6314_v43, 4  ;;  %v6063_v25 = vld [vmem:[%s19263_s0 + $0x10c] sm:$0xf]  ;;  %v19660_v15 = vld [vmem:[#allocation67_spill] sm:$0xff] }
 0x16f   :  { %11210 = vmatprep.mubr.msk.bf16.mxu1 %vm941_vm3, %v19650_v44  ;;  %v6311_v44 = vrot.slane %v6058_v13, 6  ;;  %19657 = vst [vmem:[#allocation31_spill] sm:$0xff] %v15194_v60  ;;  %v2067_v28 = vrot.slane %v19659_v42, 5  ;;  %v15215_v27 = vsel %vm14788_vm12, %v2060_v32, %v2061_v63  ;;  %v6317_v19 = vrot.slane %v6060_v58, 6  ;;  %v6062_v42 = vld [vmem:[%s19263_s0 + $0x108] sm:$0xf] }
 0x170   :  { %v2066_v40 = vrot.slane %v2064_v26, 4  ;;  %v6320_v45 = vrot.slane %v6061_v12, 6  ;;  %v19661_v20 = vcombine.low %v14566_v53, %v19660_v15  ;;  %v15233_v63 = vsel %vm14788_vm12, %v2063_v61, %v2064_v26  ;;  %v19662_v32 = vld [vmem:[#allocation41_spill] sm:$0xff]  ;;  %v19663_v12 = vld [vmem:[#allocation42_spill] sm:$0xff]  ;;  %v19664_v21 = vld [vmem:[#allocation68_spill] sm:$0xff] }
 0x171   :  { %v6313_v13 = vrot.slane %v6311_v44, 4  ;;  %v15229_v49 = vsel %vm13332_vm9, %v6310_v54, %v6311_v44  ;;  %v2070_v58 = vrot.slane %v19662_v32, 5  ;;  %v2073_v60 = vrot.slane %v19663_v12, 5  ;;  %v19666_v53 = vld [vmem:[#allocation69_spill] sm:$0xff]  ;;  %v19667_v15 = vld [vmem:[#allocation70_spill] sm:$0xff] }
 0x172   :  { %v19665_v41 = vcombine.low %v14602_v30, %v19664_v21  ;;  %v15251_v54 = vsel %vm14788_vm12, %v2066_v40, %v2067_v28  ;;  %v6319_v61 = vrot.slane %v6317_v19, 4  ;;  %v2069_v26 = vrot.slane %v2067_v28, 4 }
 0x173   :  { %v15247_v44 = vsel %vm13332_vm9, %v6313_v13, %v6314_v43  ;;  %v19670_v30 = vcombine.low %v14661_v22, %v14665_v24  ;;  %v2072_v21 = vrot.slane %v2070_v58, 4  ;;  %v6323_v32 = vrot.slane %v6062_v42, 6  ;;  %v6064_v43 = vld [vmem:[%s19263_s0 + $0x110] sm:$0xf]  ;;  %v19673_v22 = vld [vmem:[#allocation43_spill] sm:$0xff] }
 0x174   :  { %11211 = vmatmul.mubr.msk.bf16.gmra.mrb[52].mxu1 %vm941_vm3, %v19661_v20  ;;  %11541 = vmatmul.mubr.msk.bf16.gmra.mrb[12].mxu0 %vm941_vm3, %v19665_v41  ;;  %v19668_v20 = vcombine.low %v19666_v53, %v19667_v15  ;;  %19669 = vst [vmem:[#allocation48_spill] sm:$0xff] %v15247_v44  ;;  %v15259_v41 = vsel %vm13332_vm9, %v6316_v0, %v6317_v19  ;;  %v6326_v12 = vrot.slane %v6063_v25, 6  ;;  %v6322_v28 = vrot.slane %v6320_v45, 4  ;;  %v6065_v19 = vld [vmem:[%s19263_s0 + $0x114] sm:$0xf]  ;;  %v19674_v53 = vld [vmem:[#allocation44_spill] sm:$0xff] }
 0x175   :  { %11544 = vmatprep.mubr.msk.bf16.mxu0 %vm941_vm3, %v19670_v30  ;;  %19671 = vst [vmem:[#allocation32_spill] sm:$0xff] %v15259_v41  ;;  %v15266_v13 = vsel %vm13332_vm9, %v6319_v61, %v6320_v45  ;;  %v2075_v40 = vrot.slane %v2073_v60, 4  ;;  %v2076_v24 = vrot.slane %v19673_v22, 5  ;;  %v6325_v25 = vrot.slane %v6323_v32, 4 }
 0x176   :  { %11214 = vmatprep.mubr.msk.bf16.mxu1 %vm941_vm3, %v19668_v20  ;;  %19672 = vst [vmem:[#allocation59_spill] sm:$0xff] %v15266_v13  ;;  %v2079_v15 = vrot.slane %v19674_v53, 5  ;;  %v15281_v45 = vsel %vm14788_vm12, %v2069_v26, %v2070_v58  ;;  %v6328_v30 = vrot.slane %v6326_v12, 4  ;;  %v15287_v0 = vsel %vm14788_vm12, %v2072_v21, %v2073_v60  ;;  %v6066_v53 = vld [vmem:[%s19263_s0 + $0x118] sm:$0xf]  ;;  %v19675_v60 = vld [vmem:[#allocation45_spill] sm:$0xff] }
 0x177   :  { %v2078_v61 = vrot.slane %v2076_v24, 4  ;;  %v6329_v42 = vrot.slane %v6064_v43, 6  ;;  %v6332_v44 = vrot.slane %v6065_v19, 6  ;;  %v6067_v58 = vld [vmem:[%s19263_s0 + $0x11c] sm:$0xf]  ;;  %v15297_v26 = vsel %vm13332_vm9, %v6322_v28, %v6323_v32  ;;  %v19677_v20 = vld [vmem:[#allocation72_spill] sm:$0xff] }
 0x178   :  { %v15301_v22 = vsel %vm14788_vm12, %v2075_v40, %v2076_v24  ;;  %v2082_v21 = vrot.slane %v19675_v60, 5  ;;  %v2085_v43 = vrot.slane %v14179_v9, 5  ;;  %v19676_v19 = vld [vmem:[#allocation71_spill] sm:$0xff]  ;;  %v15311_v41 = vsel %vm13332_vm9, %v6325_v25, %v6326_v12  ;;  %v19680_v9 = vld [vmem:[#allocation73_spill] sm:$0xff] }
 0x179   :  { %v19678_v13 = vcombine.low %v19676_v19, %v19677_v20  ;;  %v15315_v32 = vsel %vm14788_vm12, %v2078_v61, %v2079_v15  ;;  %v6331_v28 = vrot.slane %v6329_v42, 4  ;;  %v2081_v40 = vrot.slane %v2079_v15, 4  ;;  %v6068_v15 = vld [vmem:[%s19263_s0 + $0x120] sm:$0xf] }
 0x17a   :  { %v19679_v24 = vcombine.low %v14675_v18, %v14691_v7  ;;  %v19681_v20 = vcombine.low %v14680_v36, %v19680_v9  ;;  %v15327_v12 = vsel %vm13332_vm9, %v6328_v30, %v6329_v42  ;;  %v6335_v25 = vrot.slane %v6066_v53, 6  ;;  %v6069_v30 = vld [vmem:[%s19263_s0 + $0x124] sm:$0xf] }
 0x17b   :  { %v6338_v61 = vrot.slane %v6067_v58, 6  ;;  %v19682_v7 = vcombine.low %v14710_v2, %v14714_v50  ;;  %v15338_v18 = vsel %vm13332_vm9, %v6331_v28, %v6332_v44  ;;  %v6334_v36 = vrot.slane %v6332_v44, 4 }
 0x17c   :  { %11215 = vmatmul.mubr.msk.bf16.gmra.mrb[56].mxu1 %vm941_vm3, %v19678_v13  ;;  %11545 = vmatmul.mubr.msk.bf16.gmra.mrb[16].mxu0 %vm941_vm3, %v19679_v24  ;;  %v2084_v13 = vrot.slane %v2082_v21, 4  ;;  %v2087_v60 = vrot.slane %v2085_v43, 4  ;;  %v2088_v42 = vrot.slane %v14184_v59, 5  ;;  %v6337_v50 = vrot.slane %v6335_v25, 4 }
 0x17d   :  { %11218 = vmatprep.mubr.msk.bf16.mxu1 %vm941_vm3, %v19681_v20  ;;  %11548 = vmatprep.mubr.msk.bf16.mxu0 %vm941_vm3, %v19682_v7  ;;  %v2091_v58 = vrot.slane %v14226_v37, 5  ;;  %v15353_v44 = vsel %vm14788_vm12, %v2081_v40, %v2082_v21  ;;  %v6340_v28 = vrot.slane %v6338_v61, 4  ;;  %v6341_v20 = vrot.slane %v6068_v15, 6  ;;  %v6070_v37 = vld [vmem:[%s19263_s0 + $0x128] sm:$0xf] }
 0x17e   :  { %19683 = vst [vmem:[#allocation60_spill] sm:$0xff] %v15353_v44  ;;  %v2090_v59 = vrot.slane %v2088_v42, 4  ;;  %v15359_v9 = vsel %vm14788_vm12, %v2084_v13, %v2085_v43  ;;  %v6344_v7 = vrot.slane %v6069_v30, 6  ;;  %v6071_v21 = vld [vmem:[%s19263_s0 + $0x12c] sm:$0xf]  ;;  %v15369_v40 = vsel %vm13332_vm9, %v6334_v36, %v6335_v25  ;;  %v19689_v25 = vld [vmem:[#allocation8_spill] sm:$0xff] }
 0x17f   :  { %19684 = vst [vmem:[#allocation61_spill] sm:$0xff] %v15359_v9  ;;  %19685 = vst [vmem:[#allocation62_spill] sm:$0xff] %v15369_v40  ;;  %v15373_v24 = vsel %vm14788_vm12, %v2087_v60, %v2088_v42  ;;  %v2094_v43 = vrot.slane %v14231_v46, 5  ;;  %v2097_v13 = vrot.slane %v19566_v38, 5  ;;  %v15379_v15 = vsel %vm13332_vm9, %v6337_v50, %v6338_v61  ;;  %v6072_v42 = vld [vmem:[%s19263_s0 + $0x130] sm:$0xf] }
 0x180   :  { %19686 = vst [vmem:[#allocation33_spill] sm:$0xff] %v15373_v24  ;;  %19687 = vst [vmem:[#allocation34_spill] sm:$0xff] %v15379_v15  ;;  %v15383_v30 = vsel %vm14788_vm12, %v2090_v59, %v2091_v58  ;;  %v6343_v19 = vrot.slane %v6341_v20, 4  ;;  %v2093_v2 = vrot.slane %v2091_v58, 4  ;;  %v19690_v36 = vcombine.low %v14698_v16, %v19689_v25  ;;  %v6073_v50 = vld [vmem:[%s19263_s0 + $0x134] sm:$0xf] }
 0x181   :  { %19688 = vst [vmem:[#allocation35_spill] sm:$0xff] %v15383_v30  ;;  %v15393_v38 = vsel %vm13332_vm9, %v6340_v28, %v6341_v20  ;;  %v6347_v61 = vrot.slane %v6070_v37, 6  ;;  %v6350_v60 = vrot.slane %v6071_v21, 6  ;;  %v19692_v16 = vcombine.low %v14724_v35, %v14736_v33  ;;  %v19693_v58 = vld [vmem:[#allocation74_spill] sm:$0xff]  ;;  %v19694_v59 = vld [vmem:[#allocation9_spill] sm:$0xff]  ;;  %v19697_v21 = vld [vmem:[#allocation47_spill] sm:$0xff] }
 0x182   :  { %19691 = vst [vmem:[#allocation36_spill] sm:$0xff] %v15393_v38  ;;  %v19695_v25 = vcombine.low %v19693_v58, %v19694_v59  ;;  %v15411_v28 = vsel %vm13332_vm9, %v6343_v19, %v6344_v7  ;;  %v2096_v20 = vrot.slane %v2094_v43, 4  ;;  %v6346_v37 = vrot.slane %v6344_v7, 4  ;;  %v1988_v46 = vld [vmem:[%s19263_s0 + $0xa4] sm:$0xe]  ;;  %v19698_v35 = vld [vmem:[#allocation75_spill] sm:$0xff] }
 0x183   :  { %19696 = vst [vmem:[#allocation63_spill] sm:$0xff] %v15411_v28  ;;  %v19699_v33 = vld [vmem:[#allocation76_spill] sm:$0xff]  ;;  %v6349_v59 = vrot.slane %v6347_v61, 4  ;;  %v6352_v19 = vrot.slane %v6350_v60, 4  ;;  %v6353_v58 = vrot.slane %v6072_v42, 6  ;;  %v6356_v30 = vrot.slane %v6073_v50, 6 }
 0x184   :  { %11219 = vmatmul.mubr.msk.bf16.gmra.mrb[60].mxu1 %vm941_vm3, %v19690_v36  ;;  %11549 = vmatmul.mubr.msk.bf16.gmra.mrb[20].mxu0 %vm941_vm3, %v19692_v16  ;;  %v2100_v36 = vrot.slane %v19697_v21, 5  ;;  %v19700_v16 = vcombine.low %v19698_v35, %v19699_v33  ;;  %v15429_v21 = vsel %vm14788_vm12, %v2093_v2, %v2094_v43  ;;  %v12490_v35 = vld [vmem:[%s19263_s0 + $0x90] sm:$0x1]  ;;  %v10221_v24 = vrot.slane %v1988_v46, 9  ;;  %v6075_v7 = vld [vmem:[%s19263_s0 + $0x13c] sm:$0xf] }
 0x185   :  { %11222 = vmatprep.mubr.msk.bf16.mxu1 %vm941_vm3, %v19695_v25  ;;  %v2099_v25 = vrot.slane %v2097_v13, 4  ;;  %19701 = vst [vmem:[#allocation64_spill] sm:$0xff] %v15429_v21  ;;  %v2103_v33 = vrot.slane %v12490_v35, 5  ;;  %v15442_v2 = vsel %vm14788_vm12, %v2096_v20, %v2097_v13  ;;  %v15446_v43 = vsel %vm13332_vm9, %v6346_v37, %v6347_v61  ;;  %v19704_v35 = vld [vmem:[#allocation50_spill] sm:$0xff]  ;;  %v19709_v40 = vld [vmem:[#allocation11_spill] sm:$0xff] }
 0x186   :  { %11552 = vmatprep.mubr.msk.bf16.mxu0 %vm941_vm3, %v19700_v16  ;;  %v2102_v53 = vrot.slane %v2100_v36, 4  ;;  %v6074_v16 = vld [vmem:[%s19263_s0 + $0x138] sm:$0xf]  ;;  %19702 = vst [vmem:[#allocation65_spill] sm:$0xff] %v15442_v2  ;;  %19703 = vst [vmem:[#allocation66_spill] sm:$0xff] %v15446_v43  ;;  %v2107_v28 = vrot.slane %v19704_v35, 5  ;;  %v15452_v42 = vsel %vm13332_vm9, %v6349_v59, %v6350_v60  ;;  %v15468_v60 = vsel %vm13332_vm9, %v6352_v19, %v6353_v58 }
 0x187   :  { %v2110_v38 = vrot.slane %v14321_v56, 5  ;;  %19705 = vst [vmem:[#allocation37_spill] sm:$0xff] %v15452_v42  ;;  %v15456_v46 = vsel %vm14788_vm12, %v2099_v25, %v2100_v36  ;;  %v6355_v50 = vrot.slane %v6353_v58, 4  ;;  %v6358_v15 = vrot.slane %v6356_v30, 4  ;;  %v19708_v35 = vld [vmem:[#allocation10_spill] sm:$0xff]  ;;  %19711 = vst [vmem:[#allocation40_spill] sm:$0xff] %v15468_v60 }
 0x188   :  { %19706 = vst [vmem:[#allocation38_spill] sm:$0xff] %v15456_v46  ;;  %v15460_v13 = vsel %vm14788_vm12, %v2102_v53, %v2103_v33  ;;  %v2109_v61 = vrot.slane %v2107_v28, 4  ;;  %v6359_v20 = vrot.slane %v6074_v16, 6  ;;  %v6362_v37 = vrot.slane %v6075_v7, 6  ;;  %v12491_v59 = vld [vmem:[%s19263_s0 + $0xb0] sm:$0xf] }
 0x189   :  { %19707 = vst [vmem:[#allocation39_spill] sm:$0xff] %v15460_v13  ;;  %v19710_v56 = vcombine.low %v19708_v35, %v19709_v40  ;;  %v15472_v36 = vsel %vm13332_vm9, %v6355_v50, %v6356_v30  ;;  %v15476_v53 = vsel %vm14788_vm12, %v10221_v24, %v2107_v28  ;;  %v2113_v25 = vrot.slane %v12491_v59, 5  ;;  %v6076_v40 = vld [vmem:[%s19263_s0 + $0x140] sm:$0xf]  ;;  %v19714_v58 = vld [vmem:[#allocation77_spill] sm:$0xff]  ;;  %v19735_v46 = vld [vmem:[#allocation18_spill] sm:$0xff] }
 0x18a   :  { %19712 = vst [vmem:[#allocation67_spill] sm:$0xff] %v15472_v36  ;;  %19713 = vst [vmem:[#allocation41_spill] sm:$0xff] %v15476_v53  ;;  %v19715_v19 = vcombine.low %v14779_v31, %v19714_v58  ;;  %v19716_v30 = vld [vmem:[#allocation12_spill] sm:$0xff]  ;;  %v19717_v7 = vld [vmem:[#allocation13_spill] sm:$0xff]  ;;  %v15494_v24 = vsel %vm14788_vm12, %v2109_v61, %v2110_v38  ;;  %v6361_v28 = vrot.slane %v6359_v20, 4  ;;  %v2112_v16 = vrot.slane %v2110_v38, 4 }
 0x18b   :  { %v19718_v33 = vcombine.low %v19716_v30, %v19717_v7  ;;  %19719 = vst [vmem:[#allocation42_spill] sm:$0xff] %v15494_v24  ;;  %v12492_v50 = vld [vmem:[%s19263_s0 + $0xb4] sm:$0xf]  ;;  %v2115_v61 = vrot.slane %v2113_v25, 4  ;;  %v6077_v38 = vld [vmem:[%s19263_s0 + $0x144] sm:$0x3] }
 0x18c   :  { %11223 = vmatmul.mubr.msk.bf16.gmra.mrb[64].mxu1 %vm941_vm3, %v19710_v56  ;;  %11553 = vmatmul.mubr.msk.bf16.gmra.mrb[24].mxu0 %vm941_vm3, %v19715_v19  ;;  %v2116_v35 = vrot.slane %v12492_v50, 5  ;;  %v19720_v56 = vld [vmem:[#allocation78_spill] sm:$0xff]  ;;  %v15507_v19 = vsel %vm13332_vm9, %v6358_v15, %v6359_v20  ;;  %v6364_v30 = vrot.slane %v6362_v37, 4  ;;  %v15518_v50 = vsel %vm13332_vm9, %v6361_v28, %v6362_v37  ;;  %v19728_v36 = vld [vmem:[#allocation79_spill] sm:$0xff]  ;;  %v19729_v60 = vld [vmem:[#allocation49_spill] sm:$0xff] }
 0x18d   :  { %11226 = vmatprep.mubr.msk.bf16.mxu1 %vm941_vm3, %v19718_v33  ;;  %v19721_v31 = vld [vmem:[#allocation46_spill] sm:$0xff]  ;;  %19723 = vst [vmem:[#allocation68_spill] sm:$0xff] %v15507_v19  ;;  %19724 = vst [vmem:[#allocation69_spill] sm:$0xff] %v15518_v50  ;;  %v15531_v37 = vsel %vm14788_vm12, %v2112_v16, %v2113_v25  ;;  %v6368_v28 = vrot.slane %v6077_v38, 6  ;;  %vm6986_vm13 = vsmask.f32 1280  ;;  %v19730_v13 = vcombine.low %v19728_v36, %v19729_v60 }
 0x18e   :  { %v19722_v59 = vcombine.low %v19720_v56, %v19721_v31  ;;  %v6365_v56 = vrot.slane %v6076_v40, 6  ;;  %v2118_v31 = vrot.slane %v2116_v35, 4  ;;  %v15535_v40 = vsel %vm14788_vm12, %v2115_v61, %v2116_v35  ;;  %v12495_v25 = vld [vmem:[%s19263_s0 + $0x10] sm:$0xc]  ;;  %v12496_v35 = vld [vmem:[%s19263_s0 + $0x14] sm:$0xf] }
 0x18f   :  { %v6990_v16 = vshrl.u32 %v12495_v25, 16  ;;  %v6993_v33 = vshll.u32 %v12495_v25, 16  ;;  %v6999_v61 = vshrl.u32 %v12496_v35, 16  ;;  %v7002_v38 = vshll.u32 %v12496_v35, 16  ;;  %v12497_v25 = vld [vmem:[%s19263_s0 + $0x18] sm:$0xf] }
 0x190   :  { %11556 = vmatprep.mubr.msk.bf16.mxu0 %vm941_vm3, %v19722_v59  ;;  %v12493_v59 = vld [vmem:[%s19263_s0 + $0xb8] sm:$0xf]  ;;  %v15539_v20 = vsel %vm13332_vm9, %v6364_v30, %v6365_v56  ;;  %v6367_v15 = vrot.slane %v6365_v56, 4  ;;  %v7009_v53 = vshrl.u32 %v12497_v25, 16  ;;  %v19731_v35 = vld [vmem:[#allocation80_spill] sm:$0xff]  ;;  %v7012_v2 = vshll.u32 %v12497_v25, 16 }
 0x191   :  { %v2119_v7 = vrot.slane %v12493_v59, 5  ;;  %v12494_v59 = vld [vmem:[%s19263_s0 + $0xbc] sm:$0xf]  ;;  %v19725_v30 = vld [vmem:[#allocation14_spill] sm:$0xff]  ;;  %v6992_v24 = vrot.slane %v6990_v16, 6  ;;  %v19734_v16 = vld [vmem:[#allocation16_spill] sm:$0xff] }
 0x192   :  { %v2122_v58 = vrot.slane %v12494_v59, 5  ;;  %v19726_v56 = vld [vmem:[#allocation15_spill] sm:$0xff]  ;;  %vm6987_vm14 = vsmask.f32 5392  ;;  %v19736_v42 = vcombine.low %v19734_v16, %v19735_v46  ;;  %v7011_v43 = vrot.slane %v7009_v53, 6  ;;  %v19740_v9 = vld [vmem:[#allocation82_spill] sm:$0xff] }
 0x193   :  { %v19727_v50 = vcombine.low %v19725_v30, %v19726_v56  ;;  %v15556_v59 = vsel %vm14788_vm12, %v2118_v31, %v2119_v7  ;;  %v2121_v19 = vrot.slane %v2119_v7, 4  ;;  %v19732_v30 = vld [vmem:[#allocation81_spill] sm:$0xff]  ;;  %v7001_v31 = vrot.slane %v6999_v61, 6  ;;  %v12500_v46 = vld [vmem:[%s19263_s0 + $0x1c] sm:$0xf]  ;;  %vm15588_vm15 = vmor %vm6986_vm13, %vm6987_vm14 }
 0x194   :  { %11557 = vmatmul.mubr.msk.bf16.gmra.mrb[28].mxu0 %vm941_vm3, %v19730_v13  ;;  %v19733_v56 = vcombine.low %v19731_v35, %v19732_v30  ;;  %v7004_v7 = vrot.slane %v7002_v38, 7  ;;  %v2124_v21 = vrot.slane %v2122_v58, 4  ;;  %v12498_v13 = vld [vmem:[%s19263_s0 + $0xc0] sm:$0xf]  ;;  %v15584_v53 = vsel %vm13332_vm9, %v6367_v15, %v6368_v28  ;;  %v9384_v38 = vld [vmem:[%s19266_s3 + $0x1a8] sm:$0xff] }
 0x195   :  { %11227 = vmatmul.mubr.msk.bf16.gmra.mrb[68].mxu1 %vm941_vm3, %v19727_v50  ;;  %v6995_v50 = vrot.slane %v6993_v33, 7  ;;  %11560 = vmatprep.mubr.msk.bf16.mxu0 %vm941_vm3, %v19736_v42  ;;  %v2125_v60 = vrot.slane %v12498_v13, 5  ;;  %v12499_v33 = vld [vmem:[%s19263_s0 + $0xc4] sm:$0xf]  ;;  %v7019_v42 = vshrl.u32 %v12500_v46, 16  ;;  %v7022_v30 = vshll.u32 %v12500_v46, 16 }
 0x196   :  { %11232 = vmatprep.mubr.msk.bf16.mxu1 %vm941_vm3, %v19733_v56  ;;  %v7005_v35 = vor.u32 %v7004_v7, %v7001_v31  ;;  %v2128_v61 = vrot.slane %v12499_v33, 5  ;;  %v12501_v7 = vld [vmem:[%s19263_s0 + $0x20] sm:$0xf]  ;;  %v15597_v52 = vsel %vm14788_vm12, %v2121_v19, %v2122_v58  ;;  %vm8346_vm1 = vcmask 1044484  }
 0x197   :  { %v6996_v36 = vor.u32 %v6995_v50, %v6992_v24  ;;  %v7014_v24 = vrot.slane %v7012_v2, 7  ;;  %v2127_v25 = vrot.slane %v2125_v60, 4  ;;  %v7021_v31 = vrot.slane %v7019_v42, 6  ;;  %v19739_v42 = vld [vmem:[#allocation17_spill] sm:$0xff] }
 0x198   :  { %v7007_v50 = vrot.slane %v7005_v35, 4  ;;  %v7029_v16 = vshrl.u32 %v12501_v7, 16  ;;  %v7024_v28 = vrot.slane %v7022_v30, 7  ;;  %v7032_v13 = vshll.u32 %v12501_v7, 16  ;;  %v12503_v30 = vld [vmem:[%s19263_s0 + $0xcc] sm:$0xf] }
 0x199   :  { %v6997_v56 = vrot.slane %v6996_v36, 4  ;;  %v7015_v15 = vor.u32 %v7014_v24, %v7011_v43  ;;  %v15603_v36 = vsel %vm14788_vm12, %v2124_v21, %v2125_v60  ;;  %v15607_v33 = vsel %vm14788_vm12, %v2127_v25, %v2128_v61  ;;  %v19754_v24 = vld [vmem:[#allocation23_spill] sm:$0xff] }
 0x19a   :  { %v7031_v46 = vrot.slane %v7029_v16, 6  ;;  %v19741_v44 = vcombine.low %v19739_v42, %v19740_v9  ;;  %v7025_v19 = vor.u32 %v7024_v28, %v7021_v31  ;;  %v19742_v21 = vcombine.low %v14916_v6, %v14925_v34  ;;  %v12502_v6 = vld [vmem:[%s19263_s0 + $0xc8] sm:$0xf] }
 0x19b   :  { %v7006_v2 = vsel %vm15588_vm15, %v6997_v56, %v7005_v35  ;;  %v7016_v43 = vsel %vm15588_vm15, %v7007_v50, %v7015_v15  ;;  %v7017_v58 = vrot.slane %v7015_v15, 4  ;;  %v7034_v35 = vrot.slane %v7032_v13, 7  ;;  %v12504_v50 = vld [vmem:[%s19263_s0 + $0x24] sm:$0xf]  ;;  %v12506_v15 = vld [vmem:[%s19264_s1 + $0x8] sm:$0x3] }
 0x19c   :  { %11561 = vmatmul.mubr.msk.bf16.gmra.mrb[32].mxu0 %vm941_vm3, %v19742_v21  ;;  %v19743_v60 = vcombine.low %v14898_v14, %v14932_v11  ;;  %v2131_v34 = vrot.slane %v12502_v6, 5  ;;  %v19744_v25 = vcombine.low %v14940_v17, %v14944_v48  ;;  %v7027_v14 = vrot.slane %v7025_v19, 4 }
 0x19d   :  { %11233 = vmatmul.mubr.msk.bf16.vlgmr.msra.gmra.mrb[0].mxu1 %vm941_vm3, %v19741_v44  ;;  %v7035_v11 = vor.u32 %v7034_v35, %v7031_v46  ;;  %v2134_v56 = vrot.slane %v12503_v30, 5  ;;  %v7039_v31 = vshrl.u32 %v12504_v50, 16  ;;  %v15643_v7 = vcombine.low %v7006_v2, %v7016_v43  ;;  %v12507_v30 = vld [vmem:[%s19263_s0 + $0xd0] sm:$0xf] }
 0x19e   :  { %11236 = vmatprep.mubr.msk.bf16.mxu1 %vm941_vm3, %v19743_v60  ;;  %11564 = vmatprep.mubr.msk.bf16.mxu0 %vm941_vm3, %v19744_v25  ;;  %v7042_v48 = vshll.u32 %v12504_v50, 16  ;;  %v15656_v28 = vsel %vm15588_vm15, %v7017_v58, %v7025_v19  ;;  %v2130_v13 = vrot.slane %v2128_v61, 4  ;;  %v2133_v43 = vrot.slane %v2131_v34, 4  ;;  %v12508_v61 = vld [vmem:[%s19263_s0 + $0xd4] sm:$0xf] }
 0x19f   :  { %11305 = vmatpush3.bf16.msra.mxu1 %v15051_v47  ;;  %v12505_v47 = vld [vmem:[%s19263_s0 + $0x28] sm:$0xf]  ;;  %v7041_v2 = vrot.slane %v7039_v31, 6  ;;  %v15660_v42 = vsel %vm15588_vm15, %v7027_v14, %v7035_v11  ;;  %v7037_v60 = vrot.slane %v7035_v11, 4  ;;  %v2136_v25 = vrot.slane %v2134_v56, 4  ;;  %v19745_v11 = vld [vmem:[#allocation19_spill] sm:$0xff] }
 0x1a0   :  { %v7049_v16 = vshrl.u32 %v12505_v47, 16  ;;  %12339 = vmatprep.subr.msk.bf16.mxu1 %vm1050_vm0, %v12506_v15  ;;  %v7052_v46 = vshll.u32 %v12505_v47, 16  ;;  %v7044_v35 = vrot.slane %v7042_v48, 7  ;;  %v2137_v50 = vrot.slane %v12507_v30, 5  ;;  %v12509_v14 = vld [vmem:[%s19263_s0 + $0x2c] sm:$0xf] }
 0x1a1   :  { %v2140_v19 = vrot.slane %v12508_v61, 5  ;;  %v7059_v31 = vshrl.u32 %v12509_v14, 16  ;;  %v7062_v48 = vshll.u32 %v12509_v14, 16  ;;  %v19746_v47 = vcombine.low %v14948_v8, %v19745_v11  ;;  %v19747_v30 = vld [vmem:[#allocation51_spill] sm:$0xff]  ;;  %v19748_v61 = vld [vmem:[#allocation20_spill] sm:$0xff]  ;;  %v19750_v14 = vld [vmem:[#allocation54_spill] sm:$0xff] }
 0x1a2   :  { %v7051_v21 = vrot.slane %v7049_v16, 6  ;;  %v7054_v6 = vrot.slane %v7052_v46, 7  ;;  %v7045_v58 = vor.u32 %v7044_v35, %v7041_v2  ;;  %v15677_v16 = vsel %vm14788_vm12, %v2130_v13, %v2131_v34  ;;  %v12510_v46 = vld [vmem:[%s19263_s0 + $0x30] sm:$0xf]  ;;  %v19751_v8 = vld [vmem:[#allocation52_spill] sm:$0xff] }
 0x1a3   :  { %v2139_v2 = vrot.slane %v2137_v50, 4  ;;  %v7069_v35 = vshrl.u32 %v12510_v46, 16  ;;  %v19749_v17 = vcombine.low %v19747_v30, %v19748_v61  ;;  %v19752_v11 = vcombine.low %v19750_v14, %v19751_v8  ;;  %v19758_v34 = vld [vmem:[#allocation24_spill] sm:$0xff] }
 0x1a4   :  { %v7055_v15 = vor.u32 %v7054_v6, %v7051_v21  ;;  %v7047_v13 = vrot.slane %v7045_v58, 4  ;;  %v7061_v21 = vrot.slane %v7059_v31, 6  ;;  %v7064_v6 = vrot.slane %v7062_v48, 7 }
 0x1a5   :  { %11237 = vmatmul.mubr.msk.bf16.gmra.mrb[4].mxu1 %vm941_vm3, %v19746_v47  ;;  %11565 = vmatmul.mubr.msk.bf16.gmra.mrb[36].mxu0 %vm941_vm3, %v19749_v17  ;;  %v19753_v47 = vld [vmem:[#allocation53_spill] sm:$0xff]  ;;  %v15698_v30 = vsel %vm14788_vm12, %v2133_v43, %v2134_v56  ;;  %v15702_v17 = vsel %vm14788_vm12, %v2136_v25, %v2137_v50  ;;  %v7071_v61 = vrot.slane %v7069_v35, 6  ;;  %v7072_v14 = vshll.u32 %v12510_v46, 16  ;;  %v12511_v25 = vld [vmem:[%s19263_s0 + $0xd8] sm:$0xf] }
 0x1a6   :  { %11240 = vmatprep.mubr.msk.bf16.mxu1 %vm941_vm3, %v19752_v11  ;;  %v19755_v44 = vcombine.low %v19753_v47, %v19754_v24  ;;  %v15706_v8 = vsel %vm15588_vm15, %v7037_v60, %v7045_v58  ;;  %v15710_v31 = vsel %vm14788_vm12, %v2139_v2, %v2140_v19  ;;  %v7057_v24 = vrot.slane %v7055_v15, 4  ;;  %v12512_v58 = vld [vmem:[%s19263_s0 + $0xdc] sm:$0xf]  ;;  %v19757_v60 = vld [vmem:[#allocation22_spill] sm:$0xff] }
 0x1a7   :  { %19756 = vst [vmem:[#allocation70_spill] sm:$0xff] %v15710_v31  ;;  %v15714_v56 = vsel %vm15588_vm15, %v7047_v13, %v7055_v15  ;;  %v7074_v43 = vrot.slane %v7072_v14, 7  ;;  %v2142_v48 = vrot.slane %v2140_v19, 4  ;;  %v2143_v50 = vrot.slane %v12511_v25, 5  ;;  %v12513_v15 = vld [vmem:[%s19263_s0 + $0x34] sm:$0xf] }
 0x1a8   :  { %11568 = vmatprep.mubr.msk.bf16.mxu0 %vm941_vm3, %v19755_v44  ;;  %v7065_v44 = vor.u32 %v7064_v6, %v7061_v21  ;;  %v2146_v2 = vrot.slane %v12512_v58, 5  ;;  %v7079_v46 = vshrl.u32 %v12513_v15, 16  ;;  %v7082_v35 = vshll.u32 %v12513_v15, 16  ;;  %v12514_v21 = vld [vmem:[%s19263_s0 + $0x38] sm:$0xf]  ;;  %v19760_v31 = vld [vmem:[#allocation25_spill] sm:$0xff] }
 0x1a9   :  { %v7075_v13 = vor.u32 %v7074_v43, %v7071_v61  ;;  %v7089_v6 = vshrl.u32 %v12514_v21, 16  ;;  %v7092_v58 = vshll.u32 %v12514_v21, 16  ;;  %v19759_v9 = vcombine.low %v19757_v60, %v19758_v34  ;;  %v19761_v47 = vld [vmem:[#allocation55_spill] sm:$0xff] }
 0x1aa   :  { %v7067_v11 = vrot.slane %v7065_v44, 4  ;;  %v7081_v14 = vrot.slane %v7079_v46, 6  ;;  %v7084_v25 = vrot.slane %v7082_v35, 7  ;;  %v15740_v15 = vsel %vm15588_vm15, %v7057_v24, %v7065_v44 }
 0x1ab   :  { %v15744_v61 = vsel %vm14788_vm12, %v2142_v48, %v2143_v50  ;;  %v2145_v43 = vrot.slane %v2143_v50, 4  ;;  %v7091_v19 = vrot.slane %v7089_v6, 6  ;;  %v19762_v46 = vcombine.low %v19760_v31, %v19761_v47  ;;  %v12515_v31 = vld [vmem:[%s19263_s0 + $0xe0] sm:$0xf] }
 0x1ac   :  { %v19763_v34 = vcombine.low %v15062_v57, %v15076_v55  ;;  %v7085_v60 = vor.u32 %v7084_v25, %v7081_v14  ;;  %v7094_v24 = vrot.slane %v7092_v58, 7  ;;  %v2148_v44 = vrot.slane %v2146_v2, 4  ;;  %v12516_v55 = vld [vmem:[%s19263_s0 + $0x3c] sm:$0xf] }
 0x1ad   :  { %11241 = vmatmul.mubr.msk.bf16.gmra.mrb[8].mxu1 %vm941_vm3, %v19759_v9  ;;  %11569 = vmatmul.mubr.msk.bf16.gmra.mrb[40].mxu0 %vm941_vm3, %v19762_v46  ;;  %v7077_v9 = vrot.slane %v7075_v13, 4  ;;  %v19764_v48 = vcombine.low %v15090_v51, %v15105_v10  ;;  %v15760_v50 = vsel %vm15588_vm15, %v7067_v11, %v7075_v13  ;;  %v2149_v57 = vrot.slane %v12515_v31, 5  ;;  %v12517_v51 = vld [vmem:[%s19263_s0 + $0xe4] sm:$0xf]  ;;  %v12518_v11 = vld [vmem:[%s19263_s0 + $0x40] sm:$0xf] }
 0x1ae   :  { %11244 = vmatprep.mubr.msk.bf16.mxu1 %vm941_vm3, %v19763_v34  ;;  %v7099_v35 = vshrl.u32 %v12516_v55, 16  ;;  %v7102_v21 = vshll.u32 %v12516_v55, 16  ;;  %v7087_v6 = vrot.slane %v7085_v60, 4  ;;  %v7095_v47 = vor.u32 %v7094_v24, %v7091_v19 }
 0x1af   :  { %11572 = vmatprep.mubr.msk.bf16.mxu0 %vm941_vm3, %v19764_v48  ;;  %v2152_v10 = vrot.slane %v12517_v51, 5  ;;  %v7109_v13 = vshrl.u32 %v12518_v11, 16  ;;  %v15776_v14 = vsel %vm14788_vm12, %v2145_v43, %v2146_v2  ;;  %v2151_v25 = vrot.slane %v2149_v57, 4 }
 0x1b0   :  { %v7101_v58 = vrot.slane %v7099_v35, 6  ;;  %v7104_v46 = vrot.slane %v7102_v21, 7  ;;  %v15782_v34 = vsel %vm15588_vm15, %v7077_v9, %v7085_v60  ;;  %v7112_v48 = vshll.u32 %v12518_v11, 16  ;;  %v12519_v9 = vld [vmem:[%s19263_s0 + $0xe8] sm:$0xf] }
 0x1b1   :  { %v7111_v24 = vrot.slane %v7109_v13, 6  ;;  %v15786_v31 = vsel %vm15588_vm15, %v7087_v6, %v7095_v47  ;;  %v15790_v2 = vsel %vm14788_vm12, %v2148_v44, %v2149_v57  ;;  %v7097_v43 = vrot.slane %v7095_v47, 4  ;;  %v12520_v57 = vld [vmem:[%s19263_s0 + $0xec] sm:$0xf] }
 0x1b2   :  { %19765 = vst [vmem:[#allocation43_spill] sm:$0xff] %v15786_v31  ;;  %19766 = vst [vmem:[#allocation44_spill] sm:$0xff] %v15790_v2  ;;  %v7105_v55 = vor.u32 %v7104_v46, %v7101_v58  ;;  %v15794_v35 = vsel %vm14788_vm12, %v2151_v25, %v2152_v10  ;;  %v7114_v21 = vrot.slane %v7112_v48, 7  ;;  %v2154_v51 = vrot.slane %v2152_v10, 4  ;;  %v12521_v10 = vld [vmem:[%s19263_s0 + $0x44] sm:$0xf] }
 0x1b3   :  { %19767 = vst [vmem:[#allocation45_spill] sm:$0xff] %v15794_v35  ;;  %v2155_v60 = vrot.slane %v12519_v9, 5  ;;  %v19768_v6 = vcombine.low %v15094_v62, %v15109_v4  ;;  %v2158_v47 = vrot.slane %v12520_v57, 5  ;;  %v7119_v11 = vshrl.u32 %v12521_v10, 16  ;;  %v19769_v25 = vld [vmem:[#allocation28_spill] sm:$0xff]  ;;  %v19770_v58 = vld [vmem:[#allocation58_spill] sm:$0xff] }
 0x1b4   :  { %v7122_v13 = vshll.u32 %v12521_v10, 16  ;;  %v19771_v46 = vcombine.low %v19769_v25, %v19770_v58  ;;  %v19772_v62 = vcombine.low %v15137_v39, %v15147_v1  ;;  %v7107_v48 = vrot.slane %v7105_v55, 4  ;;  %v19773_v10 = vld [vmem:[#allocation57_spill] sm:$0xff]  ;;  %v19777_v31 = vld [vmem:[#allocation30_spill] sm:$0xff] }
 0x1b5   :  { %11245 = vmatmul.mubr.msk.bf16.gmra.mrb[12].mxu1 %vm941_vm3, %v19768_v6  ;;  %v7115_v9 = vor.u32 %v7114_v21, %v7111_v24  ;;  %v12522_v6 = vld [vmem:[%s19263_s0 + $0x48] sm:$0xf]  ;;  %v19774_v25 = vcombine.low %v15165_v23, %v19773_v10  ;;  %v7121_v1 = vrot.slane %v7119_v11, 6  ;;  %v15836_v24 = vsel %vm14788_vm12, %v2154_v51, %v2155_v60  ;;  %v12523_v11 = vld [vmem:[%s19263_s0 + $0xf0] sm:$0xf] }
 0x1b6   :  { %11573 = vmatmul.mubr.msk.bf16.gmra.mrb[44].mxu0 %vm941_vm3, %v19771_v46  ;;  %11248 = vmatprep.mubr.msk.bf16.mxu1 %vm941_vm3, %v19772_v62  ;;  %v7129_v57 = vshrl.u32 %v12522_v6, 16  ;;  %v7124_v58 = vrot.slane %v7122_v13, 7  ;;  %v7132_v46 = vshll.u32 %v12522_v6, 16  ;;  %v15832_v62 = vsel %vm15588_vm15, %v7097_v43, %v7105_v55  ;;  %v12524_v55 = vld [vmem:[%s19263_s0 + $0x4c] sm:$0xf] }
 0x1b7   :  { %11576 = vmatprep.mubr.msk.bf16.mxu0 %vm941_vm3, %v19774_v25  ;;  %v2157_v21 = vrot.slane %v2155_v60, 4  ;;  %v7117_v44 = vrot.slane %v7115_v9, 4  ;;  %v2160_v25 = vrot.slane %v2158_v47, 4  ;;  %v15840_v39 = vsel %vm15588_vm15, %v7107_v48, %v7115_v9  ;;  %v12526_v48 = vld [vmem:[%s19263_s0 + $0x50] sm:$0xf] }
 0x1b8   :  { %v7131_v4 = vrot.slane %v7129_v57, 6  ;;  %v7125_v23 = vor.u32 %v7124_v58, %v7121_v1  ;;  %v7134_v10 = vrot.slane %v7132_v46, 7  ;;  %v2161_v43 = vrot.slane %v12523_v11, 5  ;;  %v12525_v57 = vld [vmem:[%s19263_s0 + $0xf4] sm:$0xf] }
 0x1b9   :  { %v7139_v51 = vshrl.u32 %v12524_v55, 16  ;;  %v7142_v60 = vshll.u32 %v12524_v55, 16  ;;  %v2164_v1 = vrot.slane %v12525_v57, 5  ;;  %v7149_v9 = vshrl.u32 %v12526_v48, 16  ;;  %v19775_v55 = vld [vmem:[#allocation29_spill] sm:$0xff] }
 0x1ba   :  { %v7127_v13 = vrot.slane %v7125_v23, 4  ;;  %v7135_v6 = vor.u32 %v7134_v10, %v7131_v4  ;;  %v15856_v58 = vsel %vm14788_vm12, %v2157_v21, %v2158_v47  ;;  %v2163_v46 = vrot.slane %v2161_v43, 4  ;;  %v19778_v47 = vld [vmem:[#allocation31_spill] sm:$0xff] }
 0x1bb   :  { %v7141_v11 = vrot.slane %v7139_v51, 6  ;;  %v7144_v19 = vrot.slane %v7142_v60, 7  ;;  %v19776_v4 = vcombine.low %v15169_v5, %v19775_v55  ;;  %v15866_v57 = vsel %vm15588_vm15, %v7117_v44, %v7125_v23  ;;  %v19781_v5 = vld [vmem:[#allocation56_spill] sm:$0xff] }
 0x1bc   :  { %v7151_v35 = vrot.slane %v7149_v9, 6  ;;  %v7152_v2 = vshll.u32 %v12526_v48, 16  ;;  %v19779_v21 = vcombine.low %v19777_v31, %v19778_v47  ;;  %v19780_v51 = vcombine.low %v15209_v3, %v15215_v27  ;;  %v19783_v48 = vld [vmem:[#allocation48_spill] sm:$0xff] }
 0x1bd   :  { %11249 = vmatmul.mubr.msk.bf16.gmra.mrb[16].mxu1 %vm941_vm3, %v19776_v4  ;;  %v15878_v60 = vsel %vm1050_vm0, %v19781_v5, 0  ;;  %v15882_v44 = vsel %vm15588_vm15, %v7127_v13, %v7135_v6  ;;  %v15886_v23 = vsel %vm14788_vm12, %v2160_v25, %v2161_v43  ;;  %v7145_v31 = vor.u32 %v7144_v19, %v7141_v11  ;;  %v12527_v13 = vld [vmem:[%s19263_s0 + $0xf8] sm:$0xf]  ;;  %v12528_v19 = vld [vmem:[%s19263_s0 + $0xfc] sm:$0xf] }
 0x1be   :  { %11577 = vmatmul.mubr.msk.bf16.gmra.mrb[48].mxu0 %vm941_vm3, %v19779_v21  ;;  %11252 = vmatprep.mubr.msk.bf16.mxu1 %vm941_vm3, %v19780_v51  ;;  %19782 = vst [vmem:[#allocation71_spill] sm:$0xff] %v15882_v44  ;;  %v19784_v9 = vcombine.low %v15229_v49, %v19783_v48  ;;  %v15894_v27 = vsel %vm14788_vm12, %v2163_v46, %v2164_v1  ;;  %v7137_v3 = vrot.slane %v7135_v6, 4  ;;  %v7154_v55 = vrot.slane %v7152_v2, 7  ;;  %v12529_v49 = vld [vmem:[%s19263_s0 + $0x54] sm:$0xf] }
 0x1bf   :  { %v2167_v4 = vrot.slane %v12527_v13, 5  ;;  %v7147_v47 = vrot.slane %v7145_v31, 4  ;;  %v2170_v25 = vrot.slane %v12528_v19, 5  ;;  %v7159_v43 = vshrl.u32 %v12529_v49, 16  ;;  %v12530_v21 = vld [vmem:[%s19263_s0 + $0x58] sm:$0xf] }
 0x1c0   :  { %11580 = vmatprep.mubr.msk.bf16.mxu0 %vm941_vm3, %v19784_v9  ;;  %v7162_v46 = vshll.u32 %v12529_v49, 16  ;;  %v7155_v11 = vor.u32 %v7154_v55, %v7151_v35  ;;  %v7169_v51 = vshrl.u32 %v12530_v21, 16  ;;  %v2166_v5 = vrot.slane %v2164_v1, 4 }
 0x1c1   :  { %v7161_v48 = vrot.slane %v7159_v43, 6  ;;  %v7172_v13 = vshll.u32 %v12530_v21, 16  ;;  %v15916_v49 = vsel %vm15588_vm15, %v7137_v3, %v7145_v31  ;;  %v2169_v2 = vrot.slane %v2167_v4, 4  ;;  %v12531_v31 = vld [vmem:[%s19263_s0 + $0x100] sm:$0xf] }
 0x1c2   :  { %v7164_v9 = vrot.slane %v7162_v46, 7  ;;  %v7171_v10 = vrot.slane %v7169_v51, 6  ;;  %v15920_v35 = vsel %vm15588_vm15, %v7147_v47, %v7155_v11  ;;  %v2172_v44 = vrot.slane %v2170_v25, 4  ;;  %v12532_v46 = vld [vmem:[%s19263_s0 + $0x5c] sm:$0xf]  ;;  %v19786_v51 = vld [vmem:[#allocation32_spill] sm:$0xff] }
 0x1c3   :  { %v7174_v6 = vrot.slane %v7172_v13, 7  ;;  %v19785_v1 = vcombine.low %v15233_v63, %v15251_v54  ;;  %v7157_v43 = vrot.slane %v7155_v11, 4  ;;  %v2173_v3 = vrot.slane %v12531_v31, 5  ;;  %v12533_v13 = vld [vmem:[%s19263_s0 + $0x104] sm:$0xf] }
 0x1c4   :  { %v7165_v55 = vor.u32 %v7164_v9, %v7161_v48  ;;  %v7179_v47 = vshrl.u32 %v12532_v46, 16  ;;  %v7182_v21 = vshll.u32 %v12532_v46, 16  ;;  %v19787_v48 = vld [vmem:[#allocation59_spill] sm:$0xff]  ;;  %v19789_v63 = vcombine.low %v15281_v45, %v15287_v0 }
 0x1c5   :  { %11253 = vmatmul.mubr.msk.bf16.gmra.mrb[20].mxu1 %vm941_vm3, %v19785_v1  ;;  %v19788_v9 = vcombine.low %v19786_v51, %v19787_v48  ;;  %v7175_v11 = vor.u32 %v7174_v6, %v7171_v10  ;;  %v2176_v1 = vrot.slane %v12533_v13, 5  ;;  %v12534_v31 = vld [vmem:[%s19263_s0 + $0x60] sm:$0xf]  ;;  %v19790_v51 = vcombine.low %v15297_v26, %v15311_v41 }
 0x1c6   :  { %11256 = vmatprep.mubr.msk.bf16.mxu1 %vm941_vm3, %v19789_v63  ;;  %v7167_v54 = vrot.slane %v7165_v55, 4  ;;  %v7189_v46 = vshrl.u32 %v12534_v31, 16  ;;  %v15952_v0 = vsel %vm14788_vm12, %v2166_v5, %v2167_v4  ;;  %v2175_v45 = vrot.slane %v2173_v3, 4 }
 0x1c7   :  { %11581 = vmatmul.mubr.msk.bf16.gmra.mrb[52].mxu0 %vm941_vm3, %v19788_v9  ;;  %v7181_v10 = vrot.slane %v7179_v47, 6  ;;  %v7184_v6 = vrot.slane %v7182_v21, 7  ;;  %v15958_v9 = vsel %vm14788_vm12, %v2169_v2, %v2170_v25  ;;  %v7192_v13 = vshll.u32 %v12534_v31, 16 }
 0x1c8   :  { %11584 = vmatprep.mubr.msk.bf16.mxu0 %vm941_vm3, %v19790_v51  ;;  %19791 = vst [vmem:[#allocation72_spill] sm:$0xff] %v15958_v9  ;;  %v7191_v63 = vrot.slane %v7189_v46, 6  ;;  %v15962_v41 = vsel %vm15588_vm15, %v7157_v43, %v7165_v55  ;;  %v15966_v26 = vsel %vm15588_vm15, %v7167_v54, %v7175_v11  ;;  %v15970_v4 = vsel %vm14788_vm12, %v2172_v44, %v2173_v3  ;;  %v12535_v55 = vld [vmem:[%s19263_s0 + $0x108] sm:$0xf]  ;;  %v12536_v54 = vld [vmem:[%s19263_s0 + $0x10c] sm:$0xf] }
 0x1c9   :  { %19792 = vst [vmem:[#allocation73_spill] sm:$0xff] %v15962_v41  ;;  %19793 = vst [vmem:[#allocation8_spill] sm:$0xff] %v15966_v26  ;;  %v7185_v5 = vor.u32 %v7184_v6, %v7181_v10  ;;  %v15974_v47 = vsel %vm14788_vm12, %v2175_v45, %v2176_v1  ;;  %v7177_v25 = vrot.slane %v7175_v11, 4  ;;  %v7194_v2 = vrot.slane %v7192_v13, 7  ;;  %v12537_v44 = vld [vmem:[%s19263_s0 + $0x64] sm:$0xf] }
 0x1ca   :  { %19794 = vst [vmem:[#allocation74_spill] sm:$0xff] %v15970_v4  ;;  %19795 = vst [vmem:[#allocation9_spill] sm:$0xff] %v15974_v47  ;;  %v2179_v43 = vrot.slane %v12535_v55, 5  ;;  %v2182_v31 = vrot.slane %v12536_v54, 5  ;;  %v7199_v3 = vshrl.u32 %v12537_v44, 16  ;;  %v7202_v46 = vshll.u32 %v12537_v44, 16 }
 0x1cb   :  { %v7187_v21 = vrot.slane %v7185_v5, 4  ;;  %v7195_v45 = vor.u32 %v7194_v2, %v7191_v63  ;;  %v12538_v10 = vld [vmem:[%s19263_s0 + $0x68] sm:$0xf]  ;;  %v19796_v13 = vcombine.low %v15301_v22, %v15315_v32  ;;  %v2178_v55 = vrot.slane %v2176_v1, 4  ;;  %v19831_v41 = vld [vmem:[#allocation42_spill] sm:$0xff] }
 0x1cc   :  { %v7209_v6 = vshrl.u32 %v12538_v10, 16  ;;  %v7201_v54 = vrot.slane %v7199_v3, 6  ;;  %v7204_v44 = vrot.slane %v7202_v46, 7  ;;  %v7212_v48 = vshll.u32 %v12538_v10, 16  ;;  %v19798_v63 = vld [vmem:[#allocation60_spill] sm:$0xff]  ;;  %v19799_v2 = vld [vmem:[#allocation61_spill] sm:$0xff] }
 0x1cd   :  { %11257 = vmatmul.mubr.msk.bf16.gmra.mrb[24].mxu1 %vm941_vm3, %v19796_v13  ;;  %v19797_v11 = vcombine.low %v15327_v12, %v15338_v18  ;;  %v19800_v51 = vcombine.low %v19798_v63, %v19799_v2  ;;  %v16008_v22 = vsel %vm15588_vm15, %v7177_v25, %v7185_v5  ;;  %v2181_v32 = vrot.slane %v2179_v43, 4  ;;  %v19802_v3 = vld [vmem:[#allocation62_spill] sm:$0xff] }
 0x1ce   :  { %19801 = vst [vmem:[#allocation47_spill] sm:$0xff] %v16008_v22  ;;  %v7211_v1 = vrot.slane %v7209_v6, 6  ;;  %v19803_v46 = vld [vmem:[#allocation34_spill] sm:$0xff]  ;;  %v16016_v12 = vsel %vm15588_vm15, %v7187_v21, %v7195_v45  ;;  %v7205_v18 = vor.u32 %v7204_v44, %v7201_v54  ;;  %v7197_v13 = vrot.slane %v7195_v45, 4  ;;  %v12540_v6 = vld [vmem:[%s19263_s0 + $0x6c] sm:$0xf] }
 0x1cf   :  { %11585 = vmatmul.mubr.msk.bf16.gmra.mrb[56].mxu0 %vm941_vm3, %v19797_v11  ;;  %11260 = vmatprep.mubr.msk.bf16.mxu1 %vm941_vm3, %v19800_v51  ;;  %v19804_v10 = vcombine.low %v19802_v3, %v19803_v46  ;;  %19805 = vst [vmem:[#allocation75_spill] sm:$0xff] %v16016_v12  ;;  %v7214_v11 = vrot.slane %v7212_v48, 7  ;;  %v2184_v51 = vrot.slane %v2182_v31, 4  ;;  %v12539_v5 = vld [vmem:[%s19263_s0 + $0x110] sm:$0xf]  ;;  %v7219_v63 = vshrl.u32 %v12540_v6, 16 }
 0x1d0   :  { %v2185_v25 = vrot.slane %v12539_v5, 5  ;;  %v7222_v2 = vshll.u32 %v12540_v6, 16  ;;  %v7207_v3 = vrot.slane %v7205_v18, 4  ;;  %v12541_v21 = vld [vmem:[%s19263_s0 + $0x114] sm:$0xf]  ;;  %v16032_v44 = vsel %vm14788_vm12, %v2178_v55, %v2179_v43 }
 0x1d1   :  { %11588 = vmatprep.mubr.msk.bf16.mxu0 %vm941_vm3, %v19804_v10  ;;  %v7215_v46 = vor.u32 %v7214_v11, %v7211_v1  ;;  %v2188_v48 = vrot.slane %v12541_v21, 5  ;;  %v12542_v45 = vld [vmem:[%s19263_s0 + $0x70] sm:$0xf]  ;;  %19806 = vst [vmem:[#allocation76_spill] sm:$0xff] %v16032_v44  ;;  %v7221_v5 = vrot.slane %v7219_v63, 6  ;;  %v16038_v11 = vsel %vm14788_vm12, %v2181_v32, %v2182_v31  ;;  %v19812_v1 = vld [vmem:[#allocation35_spill] sm:$0xff] }
 0x1d2   :  { %v7229_v54 = vshrl.u32 %v12542_v45, 16  ;;  %v2187_v10 = vrot.slane %v2185_v25, 4  ;;  %v7224_v19 = vrot.slane %v7222_v2, 7  ;;  %19807 = vst [vmem:[#allocation50_spill] sm:$0xff] %v16038_v11  ;;  %v7232_v21 = vshll.u32 %v12542_v45, 16  ;;  %v19811_v2 = vld [vmem:[#allocation33_spill] sm:$0xff] }
 0x1d3   :  { %v16042_v47 = vsel %vm15588_vm15, %v7197_v13, %v7205_v18  ;;  %v16046_v43 = vsel %vm15588_vm15, %v7207_v3, %v7215_v46  ;;  %v16050_v55 = vsel %vm14788_vm12, %v2184_v51, %v2185_v25  ;;  %v19813_v12 = vcombine.low %v19811_v2, %v19812_v1  ;;  %v12543_v13 = vld [vmem:[%s19263_s0 + $0x118] sm:$0xf]  ;;  %v19815_v45 = vld [vmem:[#allocation36_spill] sm:$0xff]  ;;  %v12545_v1 = vld [vmem:[%s19263_s0 + $0x74] sm:$0xf] }
 0x1d4   :  { %v7231_v6 = vrot.slane %v7229_v54, 6  ;;  %19808 = vst [vmem:[#allocation10_spill] sm:$0xff] %v16042_v47  ;;  %19809 = vst [vmem:[#allocation11_spill] sm:$0xff] %v16046_v43  ;;  %v7225_v63 = vor.u32 %v7224_v19, %v7221_v5  ;;  %v16058_v31 = vsel %vm14788_vm12, %v2187_v10, %v2188_v48  ;;  %v7217_v32 = vrot.slane %v7215_v46, 4  ;;  %v19816_v51 = vld [vmem:[#allocation63_spill] sm:$0xff]  ;;  %v19818_v19 = vld [vmem:[#allocation64_spill] sm:$0xff] }
 0x1d5   :  { %19810 = vst [vmem:[#allocation77_spill] sm:$0xff] %v16050_v55  ;;  %11261 = vmatmul.mubr.msk.bf16.gmra.mrb[28].mxu1 %vm941_vm3, %v19813_v12  ;;  %19814 = vst [vmem:[#allocation12_spill] sm:$0xff] %v16058_v31  ;;  %v7234_v18 = vrot.slane %v7232_v21, 7  ;;  %v2191_v3 = vrot.slane %v12543_v13, 5  ;;  %v19817_v25 = vcombine.low %v19815_v45, %v19816_v51  ;;  %v19819_v54 = vld [vmem:[#allocation65_spill] sm:$0xff]  ;;  %v7239_v21 = vshrl.u32 %v12545_v1, 16 }
 0x1d6   :  { %v19820_v5 = vcombine.low %v19818_v19, %v19819_v54  ;;  %v7227_v12 = vrot.slane %v7225_v63, 4  ;;  %v12544_v46 = vld [vmem:[%s19263_s0 + $0x11c] sm:$0xf]  ;;  %v7242_v2 = vshll.u32 %v12545_v1, 16  ;;  %v19821_v13 = vld [vmem:[#allocation66_spill] sm:$0xff]  ;;  %v19822_v45 = vld [vmem:[#allocation37_spill] sm:$0xff] }
 0x1d7   :  { %11589 = vmatmul.mubr.msk.bf16.gmra.mrb[60].mxu0 %vm941_vm3, %v19817_v25  ;;  %v2194_v10 = vrot.slane %v12544_v46, 5  ;;  %v19823_v51 = vcombine.low %v19821_v13, %v19822_v45  ;;  %v7235_v54 = vor.u32 %v7234_v18, %v7231_v6  ;;  %v2190_v22 = vrot.slane %v2188_v48, 4  ;;  %v19827_v47 = vld [vmem:[#allocation40_spill] sm:$0xff]  ;;  %v19828_v11 = vld [vmem:[#allocation67_spill] sm:$0xff]  ;;  %v19830_v44 = vld [vmem:[#allocation41_spill] sm:$0xff] }
 0x1d8   :  { %11264 = vmatprep.mubr.msk.bf16.mxu1 %vm941_vm3, %v19820_v5  ;;  %v12546_v5 = vld [vmem:[%s19263_s0 + $0x78] sm:$0xf]  ;;  %v7241_v4 = vrot.slane %v7239_v21, 6  ;;  %v7244_v1 = vrot.slane %v7242_v2, 7  ;;  %v16092_v45 = vsel %vm15588_vm15, %v7217_v32, %v7225_v63  ;;  %v12547_v21 = vld [vmem:[%s19263_s0 + $0x120] sm:$0xf]  ;;  %v19832_v9 = vcombine.low %v19830_v44, %v19831_v41 }
 0x1d9   :  { %11592 = vmatprep.mubr.msk.bf16.mxu0 %vm941_vm3, %v19823_v51  ;;  %v7249_v46 = vshrl.u32 %v12546_v5, 16  ;;  %v7252_v26 = vshll.u32 %v12546_v5, 16  ;;  %v2193_v51 = vrot.slane %v2191_v3, 4  ;;  %v16096_v6 = vsel %vm15588_vm15, %v7227_v12, %v7235_v54  ;;  %v12548_v63 = vld [vmem:[%s19263_s0 + $0x7c] sm:$0xf] }
 0x1da   :  { %v7245_v18 = vor.u32 %v7244_v1, %v7241_v4  ;;  %v2196_v43 = vrot.slane %v2194_v10, 4  ;;  %v7237_v48 = vrot.slane %v7235_v54, 4  ;;  %v2197_v2 = vrot.slane %v12547_v21, 5  ;;  %v12549_v4 = vld [vmem:[%s19263_s0 + $0x124] sm:$0xf]  ;;  %v19824_v1 = vld [vmem:[#allocation38_spill] sm:$0xff] }
 0x1db   :  { %v7251_v25 = vrot.slane %v7249_v46, 6  ;;  %v7254_v19 = vrot.slane %v7252_v26, 7  ;;  %v7259_v32 = vshrl.u32 %v12548_v63, 16  ;;  %v7262_v5 = vshll.u32 %v12548_v63, 16  ;;  %v12550_v12 = vld [vmem:[%s19263_s0 + $0x80] sm:$0xf] }
 0x1dc   :  { %v7247_v46 = vrot.slane %v7245_v18, 4  ;;  %v2200_v26 = vrot.slane %v12549_v4, 5  ;;  %v7269_v54 = vshrl.u32 %v12550_v12, 16  ;;  %v19825_v21 = vld [vmem:[#allocation39_spill] sm:$0xff]  ;;  %v16116_v63 = vsel %vm14788_vm12, %v2190_v22, %v2191_v3 }
 0x1dd   :  { %v7255_v13 = vor.u32 %v7254_v19, %v7251_v25  ;;  %v19826_v31 = vcombine.low %v19824_v1, %v19825_v21  ;;  %v2199_v25 = vrot.slane %v2197_v2, 4  ;;  %v7261_v19 = vrot.slane %v7259_v32, 6  ;;  %v19834_v1 = vld [vmem:[#allocation69_spill] sm:$0xff] }
 0x1de   :  { %v7264_v55 = vrot.slane %v7262_v5, 7  ;;  %v19829_v4 = vcombine.low %v19827_v47, %v19828_v11  ;;  %v16130_v22 = vsel %vm14788_vm12, %v2193_v51, %v2194_v10  ;;  %v7271_v3 = vrot.slane %v7269_v54, 6  ;;  %v19833_v5 = vld [vmem:[#allocation68_spill] sm:$0xff] }
 0x1df   :  { %11265 = vmatmul.mubr.msk.bf16.gmra.mrb[32].mxu1 %vm941_vm3, %v19826_v31  ;;  %v7272_v32 = vshll.u32 %v12550_v12, 16  ;;  %v19835_v21 = vcombine.low %v19833_v5, %v19834_v1  ;;  %v16138_v47 = vsel %vm15588_vm15, %v7237_v48, %v7245_v18  ;;  %v16146_v41 = vsel %vm14788_vm12, %v2196_v43, %v2197_v2  ;;  %v12551_v18 = vld [vmem:[%s19263_s0 + $0x128] sm:$0xf]  ;;  %v12553_v43 = vld [vmem:[%s19263_s0 + $0x84] sm:$0xf] }
 0x1e0   :  { %11593 = vmatmul.mubr.msk.bf16.gmra.mrb[64].mxu0 %vm941_vm3, %v19829_v4  ;;  %11268 = vmatprep.mubr.msk.bf16.mxu1 %vm941_vm3, %v19832_v9  ;;  %v16142_v9 = vsel %vm15588_vm15, %v7247_v46, %v7255_v13  ;;  %v7265_v44 = vor.u32 %v7264_v55, %v7261_v19  ;;  %v16150_v11 = vsel %vm14788_vm12, %v2199_v25, %v2200_v26  ;;  %v7257_v10 = vrot.slane %v7255_v13, 4  ;;  %v12552_v46 = vld [vmem:[%s19263_s0 + $0x12c] sm:$0xf] }
 0x1e1   :  { %11596 = vmatprep.mubr.msk.bf16.mxu0 %vm941_vm3, %v19835_v21  ;;  %v7274_v51 = vrot.slane %v7272_v32, 7  ;;  %v2203_v48 = vrot.slane %v12551_v18, 5  ;;  %v2202_v12 = vrot.slane %v2200_v26, 4  ;;  %v2206_v54 = vrot.slane %v12552_v46, 5  ;;  %v12554_v26 = vld [vmem:[%s19263_s0 + $0x88] sm:$0xf] }
 0x1e2   :  { %v7279_v55 = vshrl.u32 %v12553_v43, 16  ;;  %v7282_v2 = vshll.u32 %v12553_v43, 16  ;;  %v7267_v25 = vrot.slane %v7265_v44, 4  ;;  %v7289_v4 = vshrl.u32 %v12554_v26, 16 }
 0x1e3   :  { %v7275_v19 = vor.u32 %v7274_v51, %v7271_v3  ;;  %v2205_v32 = vrot.slane %v2203_v48, 4  ;;  %v7292_v21 = vshll.u32 %v12554_v26, 16  ;;  %v16172_v43 = vsel %vm15588_vm15, %v7257_v10, %v7265_v44 }
 0x1e4   :  { %v7281_v5 = vrot.slane %v7279_v55, 6  ;;  %v7284_v1 = vrot.slane %v7282_v2, 7  ;;  %v7291_v3 = vrot.slane %v7289_v4, 6  ;;  %v19836_v51 = vcombine.low %v15531_v37, %v15535_v40  ;;  %v12555_v40 = vld [vmem:[%s19263_s0 + $0x130] sm:$0xf] }
 0x1e5   :  { %v16180_v55 = vsel %vm14788_vm12, %v2202_v12, %v2203_v48  ;;  %v7294_v26 = vrot.slane %v7292_v21, 7  ;;  %v2208_v18 = vrot.slane %v2206_v54, 4  ;;  %v19837_v46 = vcombine.low %v15539_v20, %v15584_v53  ;;  %v12556_v48 = vld [vmem:[%s19263_s0 + $0x8c] sm:$0xf]  ;;  %v12558_v21 = vld [vmem:[%s19263_s0 + $0x134] sm:$0x1] }
 0x1e6   :  { %v7285_v2 = vor.u32 %v7284_v1, %v7281_v5  ;;  %v19838_v44 = vcombine.low %v15556_v59, %v15597_v52  ;;  %v7277_v37 = vrot.slane %v7275_v19, 4  ;;  %v2209_v10 = vrot.slane %v12555_v40, 5  ;;  %v12557_v52 = vld [vmem:[%s19263_s0 + $0x90] sm:$0xf] }
 0x1e7   :  { %11269 = vmatmul.mubr.msk.bf16.gmra.mrb[36].mxu1 %vm941_vm3, %v19836_v51  ;;  %v7299_v12 = vshrl.u32 %v12556_v48, 16  ;;  %v7302_v4 = vshll.u32 %v12556_v48, 16  ;;  %v16200_v20 = vsel %vm15588_vm15, %v7267_v25, %v7275_v19  ;;  %v16204_v59 = vsel %vm14788_vm12, %v2205_v32, %v2206_v54 }
 0x1e8   :  { %11597 = vmatmul.mubr.msk.bf16.gmra.mrb[68].mxu0 %vm941_vm3, %v19837_v46  ;;  %11272 = vmatprep.mubr.msk.bf16.mxu1 %vm941_vm3, %v19838_v44  ;;  %v7295_v53 = vor.u32 %v7294_v26, %v7291_v3  ;;  %v7309_v5 = vshrl.u32 %v12557_v52, 16  ;;  %v7287_v1 = vrot.slane %v7285_v2, 4  ;;  %v2211_v25 = vrot.slane %v2209_v10, 4 }
 0x1e9   :  { %11602 = vmatprep.mubr.msk.bf16.mxu0 %vm941_vm3, %v15643_v7  ;;  %v2212_v7 = vrot.slane %v12558_v21, 5  ;;  %v7301_v46 = vrot.slane %v7299_v12, 6  ;;  %v7304_v51 = vrot.slane %v7302_v4, 7  ;;  %v7312_v40 = vshll.u32 %v12557_v52, 16  ;;  %v12559_v12 = vld [vmem:[%s19263_s0 + $0x8] sm:$0xe] }
 0x1ea   :  { %v7297_v19 = vrot.slane %v7295_v53, 4  ;;  %v7311_v44 = vrot.slane %v7309_v5, 6  ;;  %v16216_v32 = vsel %vm15588_vm15, %v7277_v37, %v7285_v2  ;;  %v16220_v3 = vsel %vm14788_vm12, %v2208_v18, %v2209_v10  ;;  %v12560_v52 = vld [vmem:[%s19263_s0 + $0xc] sm:$0xf]  ;;  %v12561_v2 = vld [vmem:[%s19263_s0 + $0x10] sm:$0xf] }
 0x1eb   :  { %v7305_v26 = vor.u32 %v7304_v51, %v7301_v46  ;;  %v7314_v48 = vrot.slane %v7312_v40, 7  ;;  %v10295_v4 = vrot.slane %v12559_v12, 9  ;;  %v2978_v5 = vrot.slane %v12560_v52, 5  ;;  %v12562_v21 = vld [vmem:[%s19263_s0 + $0x94] sm:$0xf] }
 0x1ec   :  { %v2981_v37 = vrot.slane %v12561_v2, 5  ;;  %v16233_v18 = vsel %vm15588_vm15, %v7287_v1, %v7295_v53  ;;  %v7319_v46 = vshrl.u32 %v12562_v21, 16  ;;  %v7322_v51 = vshll.u32 %v12562_v21, 16 }
 0x1ed   :  { %v7307_v10 = vrot.slane %v7305_v26, 4  ;;  %v19839_v40 = vcombine.low %v15603_v36, %v15607_v33  ;;  %v16244_v12 = vsel %vm14788_vm12, %v2211_v25, %v2212_v7  ;;  %v16248_v53 = vsel %vm15588_vm15, %v7297_v19, %v7305_v26  ;;  %v12563_v7 = vld [vmem:[%s19263_s0 + $0x98] sm:$0xf]  ;;  %v12564_v26 = vld [vmem:[%s19263_s0 + $0x14] sm:$0xf] }
 0x1ee   :  { %v7315_v1 = vor.u32 %v7314_v48, %v7311_v44  ;;  %v2980_v52 = vrot.slane %v2978_v5, 4  ;;  %v19840_v2 = vcombine.low %v15656_v28, %v15660_v42  ;;  %v19841_v36 = vcombine.low %v15677_v16, %v15698_v30 }
 0x1ef   :  { %11273 = vmatmul.mubr.msk.bf16.gmra.mrb[40].mxu1 %vm941_vm3, %v19839_v40  ;;  %v7321_v33 = vrot.slane %v7319_v46, 6  ;;  %v7324_v21 = vrot.slane %v7322_v51, 7  ;;  %v7329_v25 = vshrl.u32 %v12563_v7, 16  ;;  %v7332_v19 = vshll.u32 %v12563_v7, 16  ;;  %v19843_v51 = vld [vmem:[#allocation70_spill] sm:$0xff] }
 0x1f0   :  { %11603 = vmatmul.mubr.msk.bf16.vlgmr.msra.gmra.mrb[0].mxu0 %vm941_vm3, %v19840_v2  ;;  %11276 = vmatprep.mubr.msk.bf16.mxu1 %vm941_vm3, %v19841_v36  ;;  %v19842_v28 = vcombine.low %v15706_v8, %v15714_v56  ;;  %v16268_v42 = vsel %vm15588_vm15, %v7307_v10, %v7315_v1  ;;  %v16272_v16 = vsel %vm14788_vm12, %v10295_v4, %v2978_v5  ;;  %v2983_v44 = vrot.slane %v2981_v37, 4  ;;  %v6984_v4 = vld [vmem:[%s19263_s0 + $0xa0] sm:$0x7] }
 0x1f1   :  { %11675 = vmatpush3.bf16.msra.mxu0 %v15878_v60  ;;  %v16276_v30 = vsel %vm14788_vm12, %v2980_v52, %v2981_v37  ;;  %v7331_v56 = vrot.slane %v7329_v25, 6  ;;  %v2984_v48 = vrot.slane %v12564_v26, 5  ;;  %v7317_v37 = vrot.slane %v7315_v1, 4  ;;  %v12565_v52 = vld [vmem:[%s19263_s0 + $0x9c] sm:$0xf] }
 0x1f2   :  { %11606 = vmatprep.mubr.msk.bf16.mxu0 %vm941_vm3, %v19842_v28  ;;  %v7325_v10 = vor.u32 %v7324_v21, %v7321_v33  ;;  %v7334_v46 = vrot.slane %v7332_v19, 7  ;;  %v7339_v2 = vshrl.u32 %v12565_v52, 16  ;;  %v7342_v36 = vshll.u32 %v12565_v52, 16  ;;  %v12566_v19 = vld [vmem:[%s19263_s0 + $0x18] sm:$0xf] }
 0x1f3   :  { %v16299_v25 = vsel %vm14788_vm12, %v2983_v44, %v2984_v48  ;;  %v7349_v1 = vshrl.u32 %v6984_v4, 16  ;;  %v7352_v33 = vshll.u32 %v6984_v4, 16  ;;  %v2986_v21 = vrot.slane %v2984_v48, 4 }
 0x1f4   :  { %v7335_v7 = vor.u32 %v7334_v46, %v7331_v56  ;;  %v2987_v28 = vrot.slane %v12566_v19, 5  ;;  %v7341_v26 = vrot.slane %v7339_v2, 6  ;;  %v7344_v40 = vrot.slane %v7342_v36, 7  ;;  %v19847_v2 = vld [vmem:[#allocation43_spill] sm:$0xff] }
 0x1f5   :  { %v19844_v5 = vcombine.low %v15702_v17, %v19843_v51  ;;  %v16310_v56 = vsel %vm15588_vm15, %v7317_v37, %v7325_v10  ;;  %v7327_v44 = vrot.slane %v7325_v10, 4  ;;  %v7351_v46 = vrot.slane %v7349_v1, 6  ;;  %v12567_v37 = vld [vmem:[%s19263_s0 + $0x1c] sm:$0xf] }
 0x1f6   :  { %v7354_v4 = vrot.slane %v7352_v33, 7  ;;  %v19845_v48 = vcombine.low %v15740_v15, %v15760_v50  ;;  %v19846_v52 = vcombine.low %v15744_v61, %v15776_v14  ;;  %v7337_v17 = vrot.slane %v7335_v7, 4  ;;  %v12568_v61 = vld [vmem:[%s19263_s0 + $0xb4] sm:$0xc] }
 0x1f7   :  { %11277 = vmatmul.mubr.msk.bf16.gmra.mrb[44].mxu1 %vm941_vm3, %v19844_v5  ;;  %v7345_v51 = vor.u32 %v7344_v40, %v7341_v26  ;;  %v2989_v5 = vrot.slane %v2987_v28, 4  ;;  %v2990_v10 = vrot.slane %v12567_v37, 5  ;;  %v19848_v36 = vcombine.low %v15782_v34, %v19847_v2  ;;  %v12569_v40 = vld [vmem:[%s19263_s0 + $0xb8] sm:$0xf]  ;;  %v12570_v26 = vld [vmem:[%s19263_s0 + $0x20] sm:$0xf] }
 0x1f8   :  { %11607 = vmatmul.mubr.msk.bf16.gmra.mrb[4].mxu0 %vm941_vm3, %v19845_v48  ;;  %11280 = vmatprep.mubr.msk.bf16.mxu1 %vm941_vm3, %v19846_v52  ;;  %v7355_v15 = vor.u32 %v7354_v4, %v7351_v46  ;;  %v7358_v50 = vshrl.u32 %v12568_v61, 16  ;;  %v7361_v14 = vshll.u32 %v12568_v61, 16  ;;  %v7367_v1 = vshrl.u32 %v12569_v40, 16 }
 0x1f9   :  { %11610 = vmatprep.mubr.msk.bf16.mxu0 %vm941_vm3, %v19848_v36  ;;  %v16335_v33 = vsel %vm14788_vm12, %v2986_v21, %v2987_v28  ;;  %v7347_v19 = vrot.slane %v7345_v51, 4  ;;  %v2992_v34 = vrot.slane %v2990_v10, 4  ;;  %v2993_v46 = vrot.slane %v12570_v26, 5  ;;  %v12571_v21 = vld [vmem:[%s19263_s0 + $0xbc] sm:$0xf] }
 0x1fa   :  { %v7360_v4 = vrot.slane %v7358_v50, 6  ;;  %v7363_v48 = vrot.slane %v7361_v14, 7  ;;  %v7369_v52 = vrot.slane %v7367_v1, 6  ;;  %v7370_v37 = vshll.u32 %v12569_v40, 16  ;;  %v12572_v1 = vld [vmem:[%s19263_s0 + $0x24] sm:$0xf] }
 0x1fb   :  { %v16342_v2 = vsel %vm15588_vm15, %v7327_v44, %v7335_v7  ;;  %v16346_v36 = vsel %vm15588_vm15, %v7337_v17, %v7345_v51  ;;  %v7377_v28 = vshrl.u32 %v12571_v21, 16  ;;  %v7380_v61 = vshll.u32 %v12571_v21, 16  ;;  %v19849_v21 = vld [vmem:[#allocation44_spill] sm:$0xff] }
 0x1fc   :  { %v16353_v50 = vsel %vm15588_vm15, %v7347_v19, %v7355_v15  ;;  %v16357_v14 = vsel %vm14788_vm12, %v2989_v5, %v2990_v10  ;;  %v7364_v7 = vor.u32 %v7363_v48, %v7360_v4  ;;  %v7372_v44 = vrot.slane %v7370_v37, 7  ;;  %v19850_v15 = vld [vmem:[#allocation45_spill] sm:$0xff] }
 0x1fd   :  { %v16361_v17 = vsel %vm14788_vm12, %v2992_v34, %v2993_v46  ;;  %v7379_v51 = vrot.slane %v7377_v28, 6  ;;  %v7382_v40 = vrot.slane %v7380_v61, 7  ;;  %v2996_v26 = vrot.slane %v12572_v1, 5  ;;  %v12573_v34 = vld [vmem:[%s19263_s0 + $0xc0] sm:$0xf] }
 0x1fe   :  { %v19851_v19 = vcombine.low %v19849_v21, %v19850_v15  ;;  %v16372_v10 = vor.u32 %v7372_v44, %v7369_v52  ;;  %v2995_v4 = vrot.slane %v2993_v46, 4  ;;  %v7387_v48 = vshrl.u32 %v12573_v34, 16  ;;  %v19854_v1 = vld [vmem:[#allocation71_spill] sm:$0xff]  ;;  %v12576_v46 = vld [vmem:[%s19263_s0 + $0x2c] sm:$0xf] }
 0x1ff   :  { %v19852_v37 = vcombine.low %v15832_v62, %v15840_v39  ;;  %v19853_v28 = vcombine.low %v15836_v24, %v15856_v58  ;;  %v7383_v61 = vor.u32 %v7382_v40, %v7379_v51  ;;  %v7390_v44 = vshll.u32 %v12573_v34, 16  ;;  %v12574_v58 = vld [vmem:[%s19263_s0 + $0xc4] sm:$0xf]  ;;  %v12575_v51 = vld [vmem:[%s19263_s0 + $0x28] sm:$0xf] }
 0x200   :  { %11281 = vmatmul.mubr.msk.bf16.gmra.mrb[48].mxu1 %vm941_vm3, %v19851_v19  ;;  %v19855_v21 = vcombine.low %v15866_v57, %v19854_v1  ;;  %v7365_v62 = vrot.slane %v7364_v7, 4  ;;  %v7389_v24 = vrot.slane %v7387_v48, 6  ;;  %v7397_v15 = vshrl.u32 %v12574_v58, 16 }
 0x201   :  { %11611 = vmatmul.mubr.msk.bf16.gmra.mrb[8].mxu0 %vm941_vm3, %v19852_v37  ;;  %11284 = vmatprep.mubr.msk.bf16.mxu1 %vm941_vm3, %v19853_v28  ;;  %v2998_v19 = vrot.slane %v2996_v26, 4  ;;  %v2999_v40 = vrot.slane %v12575_v51, 5  ;;  %v7392_v34 = vrot.slane %v7390_v44, 7  ;;  %v7400_v57 = vshll.u32 %v12574_v58, 16  ;;  %v12577_v44 = vld [vmem:[%s19263_s0 + $0x30] sm:$0xf] }
 0x202   :  { %11614 = vmatprep.mubr.msk.bf16.mxu0 %vm941_vm3, %v19855_v21  ;;  %v7375_v37 = vrot.slane %v16372_v10, 4  ;;  %v16404_v28 = vsel %vm14788_vm12, %v2995_v4, %v2996_v26  ;;  %v7385_v7 = vrot.slane %v7383_v61, 4  ;;  %v7399_v48 = vrot.slane %v7397_v15, 6  ;;  %v12578_v26 = vld [vmem:[%s19263_s0 + $0xc8] sm:$0xf] }
 0x203   :  { %v7393_v1 = vor.u32 %v7392_v34, %v7389_v24  ;;  %v7402_v21 = vrot.slane %v7400_v57, 7  ;;  %v3001_v39 = vrot.slane %v2999_v40, 4  ;;  %v3002_v5 = vrot.slane %v12576_v46, 5  ;;  %v12579_v24 = vld [vmem:[%s19263_s0 + $0xcc] sm:$0xf] }
 0x204   :  { %v3005_v58 = vrot.slane %v12577_v44, 5  ;;  %v7407_v4 = vshrl.u32 %v12578_v26, 16  ;;  %v7410_v51 = vshll.u32 %v12578_v26, 16  ;;  %v7417_v15 = vshrl.u32 %v12579_v24, 16 }
 0x205   :  { %v7374_v46 = vsel %vm15588_vm15, %v7365_v62, %v16372_v10  ;;  %v16423_v34 = vsel %vm14788_vm12, %v2998_v19, %v2999_v40  ;;  %v7395_v57 = vrot.slane %v7393_v1, 4  ;;  %v7403_v44 = vor.u32 %v7402_v21, %v7399_v48  ;;  %v19858_v62 = vld [vmem:[#allocation72_spill] sm:$0xff]  ;;  %v19860_v40 = vld [vmem:[#allocation73_spill] sm:$0xff]  ;;  %v12581_v21 = vld [vmem:[%s19263_s0 + $0x38] sm:$0xf] }
 0x206   :  { %v19856_v52 = vcombine.low %v15886_v23, %v15894_v27  ;;  %v7384_v26 = vsel %vm15588_vm15, %v7375_v37, %v7383_v61  ;;  %v3004_v8 = vrot.slane %v3002_v5, 4  ;;  %v7409_v60 = vrot.slane %v7407_v4, 6  ;;  %v19861_v37 = vld [vmem:[#allocation8_spill] sm:$0xff] }
 0x207   :  { %v7412_v54 = vrot.slane %v7410_v51, 7  ;;  %v19857_v10 = vcombine.low %v15916_v49, %v15920_v35  ;;  %v19859_v19 = vcombine.low %v15952_v0, %v19858_v62  ;;  %v16441_v23 = vsel %vm15588_vm15, %v7385_v7, %v7393_v1  ;;  %v12582_v51 = vld [vmem:[%s19263_s0 + $0xd0] sm:$0xf]  ;;  %v12583_v62 = vld [vmem:[%s19263_s0 + $0xd4] sm:$0xf] }
 0x208   :  { %11285 = vmatmul.mubr.msk.bf16.gmra.mrb[52].mxu1 %vm941_vm3, %v19856_v52  ;;  %v16445_v27 = vsel %vm14788_vm12, %v3001_v39, %v3002_v5  ;;  %v7419_v52 = vrot.slane %v7417_v15, 6  ;;  %v7420_v61 = vshll.u32 %v12579_v24, 16  ;;  %v19862_v49 = vcombine.low %v19860_v40, %v19861_v37  ;;  %v12580_v5 = vld [vmem:[%s19263_s0 + $0x34] sm:$0xf] }
 0x209   :  { %11615 = vmatmul.mubr.msk.bf16.gmra.mrb[12].mxu0 %vm941_vm3, %v19857_v10  ;;  %11288 = vmatprep.mubr.msk.bf16.mxu1 %vm941_vm3, %v19859_v19  ;;  %v16453_v35 = vsel %vm15588_vm15, %v7395_v57, %v7403_v44  ;;  %v16457_v0 = vsel %vm14788_vm12, %v3004_v8, %v3005_v58  ;;  %v3007_v7 = vrot.slane %v3005_v58, 4  ;;  %v3008_v39 = vrot.slane %v12580_v5, 5  ;;  %v19868_v58 = vld [vmem:[#allocation75_spill] sm:$0xff] }
 0x20a   :  { %11618 = vmatprep.mubr.msk.bf16.mxu0 %vm941_vm3, %v19862_v49  ;;  %v7413_v48 = vor.u32 %v7412_v54, %v7409_v60  ;;  %v7422_v1 = vrot.slane %v7420_v61, 7  ;;  %v3011_v4 = vrot.slane %v12581_v21, 5  ;;  %v7427_v24 = vshrl.u32 %v12582_v51, 16  ;;  %v19865_v21 = vld [vmem:[#allocation9_spill] sm:$0xff] }
 0x20b   :  { %v16468_v8 = vcombine.low %v7374_v46, %v7384_v26  ;;  %v7405_v15 = vrot.slane %v7403_v44, 4  ;;  %v3010_v57 = vrot.slane %v3008_v39, 4  ;;  %v7430_v60 = vshll.u32 %v12582_v51, 16  ;;  %v12584_v44 = vld [vmem:[%s19263_s0 + $0x3c] sm:$0xf] }
 0x20c   :  { %v7423_v10 = vor.u32 %v7422_v1, %v7419_v52  ;;  %v7429_v54 = vrot.slane %v7427_v24, 6  ;;  %v7437_v19 = vshrl.u32 %v12583_v62, 16  ;;  %v7440_v26 = vshll.u32 %v12583_v62, 16  ;;  %v19864_v1 = vld [vmem:[#allocation74_spill] sm:$0xff] }
 0x20d   :  { %v3014_v40 = vrot.slane %v12584_v44, 5  ;;  %v7415_v52 = vrot.slane %v7413_v48, 4  ;;  %v16484_v37 = vsel %vm14788_vm12, %v3007_v7, %v3008_v39  ;;  %v16488_v49 = vsel %vm14788_vm12, %v3010_v57, %v3011_v4  ;;  %v19867_v44 = vld [vmem:[#allocation47_spill] sm:$0xff]  ;;  %v19870_v7 = vld [vmem:[#allocation76_spill] sm:$0xff]  ;;  %v19871_v39 = vld [vmem:[#allocation50_spill] sm:$0xff] }
 0x20e   :  { %19863 = vst [vmem:[#allocation13_spill] sm:$0xff] %v16488_v49  ;;  %v7432_v5 = vrot.slane %v7430_v60, 7  ;;  %v19866_v51 = vcombine.low %v19864_v1, %v19865_v21  ;;  %v7425_v24 = vrot.slane %v7423_v10, 4  ;;  %v7439_v62 = vrot.slane %v7437_v19, 6  ;;  %v12585_v1 = vld [vmem:[%s19263_s0 + $0x40] sm:$0xf] }
 0x20f   :  { %v7442_v46 = vrot.slane %v7440_v26, 7  ;;  %v3013_v61 = vrot.slane %v3011_v4, 4  ;;  %v19869_v13 = vcombine.low %v19867_v44, %v19868_v58  ;;  %v19872_v31 = vcombine.low %v19870_v7, %v19871_v39  ;;  %v12586_v4 = vld [vmem:[%s19263_s0 + $0xd8] sm:$0xf] }
 0x210   :  { %11289 = vmatmul.mubr.msk.bf16.gmra.mrb[56].mxu1 %vm941_vm3, %v19866_v51  ;;  %v7433_v57 = vor.u32 %v7432_v5, %v7429_v54  ;;  %v3016_v60 = vrot.slane %v3014_v40, 4  ;;  %v3017_v21 = vrot.slane %v12585_v1, 5  ;;  %v7447_v19 = vshrl.u32 %v12586_v4, 16  ;;  %v19873_v58 = vld [vmem:[#allocation10_spill] sm:$0xff]  ;;  %v19874_v26 = vld [vmem:[#allocation11_spill] sm:$0xff] }
 0x211   :  { %11619 = vmatmul.mubr.msk.bf16.gmra.mrb[16].mxu0 %vm941_vm3, %v19869_v13  ;;  %11292 = vmatprep.mubr.msk.bf16.mxu1 %vm941_vm3, %v19872_v31  ;;  %v19875_v13 = vcombine.low %v19873_v58, %v19874_v26  ;;  %v16514_v31 = vsel %vm15588_vm15, %v7405_v15, %v7413_v48  ;;  %v7450_v54 = vshll.u32 %v12586_v4, 16  ;;  %v12587_v5 = vld [vmem:[%s19263_s0 + $0xdc] sm:$0xf]  ;;  %v16521_v7 = vsel %vm15588_vm15, %v7415_v52, %v7423_v10 }
 0x212   :  { %v7457_v51 = vshrl.u32 %v12587_v5, 16  ;;  %v7460_v44 = vshll.u32 %v12587_v5, 16  ;;  %v7435_v39 = vrot.slane %v7433_v57, 4  ;;  %v7443_v1 = vor.u32 %v7442_v46, %v7439_v62  ;;  %v12588_v46 = vld [vmem:[%s19263_s0 + $0x44] sm:$0xf] }
 0x213   :  { %11622 = vmatprep.mubr.msk.bf16.mxu0 %vm941_vm3, %v19875_v13  ;;  %v7449_v58 = vrot.slane %v7447_v19, 6  ;;  %v16527_v48 = vsel %vm14788_vm12, %v3013_v61, %v3014_v40  ;;  %v7452_v15 = vrot.slane %v7450_v54, 7  ;;  %v16531_v13 = vsel %vm15588_vm15, %v7425_v24, %v7433_v57  ;;  %v12589_v61 = vld [vmem:[%s19263_s0 + $0x48] sm:$0xf]  ;;  %v12590_v24 = vld [vmem:[%s19263_s0 + $0xe0] sm:$0xf] }
 0x214   :  { %19876 = vst [vmem:[#allocation78_spill] sm:$0xff] %v16527_v48  ;;  %v7459_v4 = vrot.slane %v7457_v51, 6  ;;  %v16535_v10 = vsel %vm14788_vm12, %v3016_v60, %v3017_v21  ;;  %v7462_v52 = vrot.slane %v7460_v44, 7  ;;  %v3020_v62 = vrot.slane %v12588_v46, 5  ;;  %v19879_v46 = vld [vmem:[#allocation77_spill] sm:$0xff] }
 0x215   :  { %19877 = vst [vmem:[#allocation46_spill] sm:$0xff] %v16535_v10  ;;  %v7453_v19 = vor.u32 %v7452_v15, %v7449_v58  ;;  %v3019_v5 = vrot.slane %v3017_v21, 4  ;;  %v3023_v40 = vrot.slane %v12589_v61, 5  ;;  %v7467_v57 = vshrl.u32 %v12590_v24, 16  ;;  %v19880_v58 = vld [vmem:[#allocation12_spill] sm:$0xff] }
 0x216   :  { %v16548_v60 = vsel %vm15588_vm15, %v7435_v39, %v7443_v1  ;;  %v7463_v54 = vor.u32 %v7462_v52, %v7459_v4  ;;  %v3022_v51 = vrot.slane %v3020_v62, 4  ;;  %v7470_v44 = vshll.u32 %v12590_v24, 16  ;;  %v12591_v39 = vld [vmem:[%s19263_s0 + $0xe4] sm:$0xf] }
 0x217   :  { %19878 = vst [vmem:[#allocation14_spill] sm:$0xff] %v16548_v60  ;;  %v19881_v21 = vcombine.low %v19879_v46, %v19880_v58  ;;  %v7469_v26 = vrot.slane %v7467_v57, 6  ;;  %v7477_v49 = vshrl.u32 %v12591_v39, 16  ;;  %v19882_v4 = vcombine.low %v16092_v45, %v16096_v6 }
 0x218   :  { %v19883_v52 = vcombine.low %v16116_v63, %v16130_v22  ;;  %v7445_v24 = vrot.slane %v7443_v1, 4  ;;  %v7455_v46 = vrot.slane %v7453_v19, 4  ;;  %v7472_v58 = vrot.slane %v7470_v44, 7 }
 0x219   :  { %11293 = vmatmul.mubr.msk.bf16.gmra.mrb[60].mxu1 %vm941_vm3, %v19881_v21  ;;  %11623 = vmatmul.mubr.msk.bf16.gmra.mrb[20].mxu0 %vm941_vm3, %v19882_v4  ;;  %v7480_v21 = vshll.u32 %v12591_v39, 16  ;;  %v19884_v57 = vcombine.low %v16138_v47, %v16142_v9  ;;  %v16577_v45 = vsel %vm14788_vm12, %v3019_v5, %v3020_v62  ;;  %v16581_v6 = vsel %vm14788_vm12, %v3022_v51, %v3023_v40  ;;  %v12592_v47 = vld [vmem:[%s19263_s0 + $0x4c] sm:$0xf]  ;;  %v12593_v4 = vld [vmem:[%s19263_s0 + $0xe8] sm:$0xf] }
 0x21a   :  { %11296 = vmatprep.mubr.msk.bf16.mxu1 %vm941_vm3, %v19883_v52  ;;  %v7479_v63 = vrot.slane %v7477_v49, 6  ;;  %v7465_v22 = vrot.slane %v7463_v54, 4  ;;  %v7473_v1 = vor.u32 %v7472_v58, %v7469_v26  ;;  %v3026_v9 = vrot.slane %v12592_v47, 5  ;;  %v12594_v51 = vld [vmem:[%s19263_s0 + $0xec] sm:$0xf] }
 0x21b   :  { %11626 = vmatprep.mubr.msk.bf16.mxu0 %vm941_vm3, %v19884_v57  ;;  %v7482_v44 = vrot.slane %v7480_v21, 7  ;;  %v3025_v39 = vrot.slane %v3023_v40, 4  ;;  %v7487_v62 = vshrl.u32 %v12593_v4, 16  ;;  %v7490_v5 = vshll.u32 %v12593_v4, 16  ;;  %v12595_v57 = vld [vmem:[%s19263_s0 + $0x50] sm:$0xf] }
 0x21c   :  { %v7497_v49 = vshrl.u32 %v12594_v51, 16  ;;  %v16594_v26 = vsel %vm15588_vm15, %v7445_v24, %v7453_v19  ;;  %v16598_v52 = vsel %vm15588_vm15, %v7455_v46, %v7463_v54  ;;  %v7475_v40 = vrot.slane %v7473_v1, 4  ;;  %v19885_v24 = vld [vmem:[#allocation21_spill] sm:$0xff] }
 0x21d   :  { %v7483_v58 = vor.u32 %v7482_v44, %v7479_v63  ;;  %v3028_v21 = vrot.slane %v3026_v9, 4  ;;  %v3029_v47 = vrot.slane %v12595_v57, 5  ;;  %v7489_v4 = vrot.slane %v7487_v62, 6 }
 0x21e   :  { %v7492_v61 = vrot.slane %v7490_v5, 7  ;;  %v10305_v15 = vcombine.low %v16577_v45, %v16581_v6  ;;  %v7499_v10 = vrot.slane %v7497_v49, 6  ;;  %v7500_v19 = vshll.u32 %v12594_v51, 16 }
 0x21f   :  { %v19886_v48 = vshrl.u32 %v19885_v24, 16  ;;  %v19887_v54 = vcombine.low %v16146_v41, %v16150_v11  ;;  %v16615_v46 = vsel %vm15588_vm15, %v7465_v22, %v7473_v1  ;;  %v16619_v63 = vsel %vm14788_vm12, %v3025_v39, %v3026_v9  ;;  %v9331_v41 = vld [vmem:[%s19266_s3] sm:$0xff]  ;;  %v12596_v39 = vld [vmem:[%s19263_s0 + $0x54] sm:$0xf] }
 0x220   :  { %v7493_v44 = vor.u32 %v7492_v61, %v7489_v4  ;;  %v12768_v62 = vmov 0   ;;  %v19888_v11 = vcombine.low %v16172_v43, %v16200_v20  ;;  %v19889_v22 = vcombine.low %v16180_v55, %v16204_v59  ;;  %v12597_v59 = vld [vmem:[%s19263_s0 + $0xf0] sm:$0xf] }
 0x221   :  { %v16607_v60 = vrot.slane %v19886_v48, 5  ;;  %11297 = vmatmul.mubr.msk.bf16.gmra.mrb[64].mxu1 %vm941_vm3, %v19887_v54  ;;  %12349 = vset.pattern.permute.xlu1 %v12768_v62  ;;  %v9367_v48 = vld [vmem:[%s19266_s3 + $0x120] sm:$0xff]  ;;  %v16637_v61 = vsel %vm15588_vm15, %v7475_v40, %v7483_v58  ;;  %v7485_v1 = vrot.slane %v7483_v58, 4  ;;  %v7502_v9 = vrot.slane %v7500_v19, 7 }
 0x222   :  { %11627 = vmatmul.mubr.msk.bf16.gmra.mrb[24].mxu0 %vm941_vm3, %v19888_v11  ;;  %11300 = vmatprep.mubr.msk.bf16.mxu1 %vm941_vm3, %v19889_v22  ;;  %v3032_v5 = vrot.slane %v12596_v39, 5  ;;  %v19890_v43 = vcombine.low %v16216_v32, %v16233_v18  ;;  %v16648_v55 = vsel %vm14788_vm12, %v3028_v21, %v3029_v47  ;;  %v7495_v20 = vrot.slane %v7493_v44, 4  ;;  %v12598_v32 = vld [vmem:[%s19263_s0 + $0x58] sm:$0xf]  ;;  %v12599_v21 = vld [vmem:[%s19263_s0 + $0xf4] sm:$0xf] }
 0x223   :  { %12348 = vset.pattern.permute.xlu0 %v12768_v62  ;;  %v7507_v51 = vshrl.u32 %v12597_v59, 16  ;;  %v7510_v49 = vshll.u32 %v12597_v59, 16  ;;  %v7503_v40 = vor.u32 %v7502_v9, %v7499_v10  ;;  %v3031_v58 = vrot.slane %v3029_v47, 4  ;;  %9585 = vperm.xlu1 %12349, %v9367_v48   ;;  %v9368_v10 = vld [vmem:[%s19266_s3 + $0x128] sm:$0xff] }
 0x224   :  { %11630 = vmatprep.mubr.msk.bf16.mxu0 %vm941_vm3, %v19890_v43  ;;  %v3035_v18 = vrot.slane %v12598_v32, 5  ;;  %v7517_v57 = vshrl.u32 %v12599_v21, 16  ;;  %9405 = vperm.xlu0 %12348, %v9331_v41   ;;  %v3034_v4 = vrot.slane %v3032_v5, 4  ;;  %v7520_v62 = vshll.u32 %v12599_v21, 16  ;;  %v9332_v47 = vld [vmem:[%s19266_s3 + $0x8] sm:$0xff] }
 0x225   :  { %v7509_v19 = vrot.slane %v7507_v51, 6  ;;  %v7512_v54 = vrot.slane %v7510_v49, 7  ;;  %v10616_v11 = vcombine.low %v16594_v26, %v16598_v52  ;;  %v10617_v22 = vcombine.low %v16615_v46, %v16637_v61  ;;  %v12600_v49 = vld [vmem:[%s19263_s0 + $0x5c] sm:$0xf]  ;;  %v12621_v26 = vld [vmem:[%s19263_s0 + $0x120] sm:$0xf] }
 0x226   :  { %v16673_v41 = vsel %vm15588_vm15, %v7485_v1, %v7493_v44  ;;  %v16677_v9 = vsel %vm15588_vm15, %v7495_v20, %v7503_v40  ;;  %v7519_v43 = vrot.slane %v7517_v57, 6  ;;  %v7522_v59 = vrot.slane %v7520_v62, 7  ;;  %v12601_v44 = vld [vmem:[%s19263_s0 + $0xf8] sm:$0xf]  ;;  %v12603_v62 = vld [vmem:[%s19263_s0 + $0xfc] sm:$0xf] }
 0x227   :  { %v7513_v39 = vor.u32 %v7512_v54, %v7509_v19  ;;  %v7505_v51 = vrot.slane %v7503_v40, 4  ;;  %9590 = vperm.xlu1 %12349, %v9368_v10   ;;  %v3038_v32 = vrot.slane %v12600_v49, 5  ;;  %v7527_v1 = vshrl.u32 %v12601_v44, 16  ;;  %v12602_v19 = vld [vmem:[%s19263_s0 + $0x60] sm:$0xf] }
 0x228   :  { %9410 = vperm.xlu0 %12348, %v9332_v47   ;;  %v7530_v21 = vshll.u32 %v12601_v44, 16  ;;  %v19891_v20 = vcombine.low %v16220_v3, %v16244_v12  ;;  %v16691_v40 = vsel %vm14788_vm12, %v3031_v58, %v3032_v5  ;;  %v16695_v57 = vsel %vm14788_vm12, %v3034_v4, %v3035_v18  ;;  %v9369_v12 = vld [vmem:[%s19266_s3 + $0x130] sm:$0xff]  ;;  %v12626_v61 = vld [vmem:[%s19263_s0 + $0x12c] sm:$0xf] }
 0x229   :  { %v3041_v54 = vrot.slane %v12602_v19, 5  ;;  %v7537_v3 = vshrl.u32 %v12603_v62, 16  ;;  %v9333_v5 = vld [vmem:[%s19266_s3 + $0x10] sm:$0xff]  ;;  %v19892_v58 = vcombine.low %v16248_v53, %v16268_v42  ;;  %v19893_v4 = vcombine.low %v16272_v16, %v16276_v30 }
 0x22a   :  { %11301 = vmatmul.mubr.msk.bf16.gmra.mrb[68].mxu1 %vm941_vm3, %v19891_v20  ;;  %v3037_v47 = vrot.slane %v3035_v18, 4  ;;  %v7529_v49 = vrot.slane %v7527_v1, 6  ;;  %v7532_v44 = vrot.slane %v7530_v21, 7  ;;  %v19894_v20 = vcombine.low %v16310_v56, %v16342_v2  ;;  %v12604_v2 = vld [vmem:[%s19263_s0 + $0x64] sm:$0xf] }
 0x22b   :  { %11631 = vmatmul.mubr.msk.bf16.gmra.mrb[28].mxu0 %vm941_vm3, %v19892_v58  ;;  %11306 = vmatprep.mubr.msk.bf16.mxu1 %vm941_vm3, %v19893_v4  ;;  %v7515_v19 = vrot.slane %v7513_v39, 4  ;;  %v7523_v53 = vor.u32 %v7522_v59, %v7519_v43  ;;  %v7539_v42 = vrot.slane %v7537_v3, 6  ;;  %v7540_v58 = vshll.u32 %v12603_v62, 16  ;;  %v9370_v59 = vld [vmem:[%s19266_s3 + $0x138] sm:$0xff]  ;;  %v12605_v3 = vld [vmem:[%s19263_s0 + $0x100] sm:$0xf] }
 0x22c   :  { %11634 = vmatprep.mubr.msk.bf16.mxu0 %vm941_vm3, %v19894_v20  ;;  %v16727_v30 = vsel %vm15588_vm15, %v7505_v51, %v7513_v39  ;;  %v3040_v4 = vrot.slane %v3038_v32, 4  ;;  %v7533_v18 = vor.u32 %v7532_v44, %v7529_v49  ;;  %9595 = vperm.xlu1 %12349, %v9369_v12   ;;  %v3043_v56 = vrot.slane %v3041_v54, 4  ;;  %v9334_v39 = vld [vmem:[%s19266_s3 + $0x18] sm:$0xff]  ;;  %v12606_v20 = vld [vmem:[%s19263_s0 + $0x68] sm:$0xf] }
 0x22d   :  { %9415 = vperm.xlu0 %12348, %v9333_v5   ;;  %v7525_v1 = vrot.slane %v7523_v53, 4  ;;  %v7542_v21 = vrot.slane %v7540_v58, 7  ;;  %v3044_v43 = vrot.slane %v12604_v2, 5  ;;  %v16740_v51 = vsel %vm14788_vm12, %v3037_v47, %v3038_v32  ;;  %v12607_v32 = vld [vmem:[%s19263_s0 + $0x104] sm:$0xf] }
 0x22e   :  { %v7535_v62 = vrot.slane %v7533_v18, 4  ;;  %v7547_v12 = vshrl.u32 %v12605_v3, 16  ;;  %v7550_v5 = vshll.u32 %v12605_v3, 16  ;;  %v16747_v49 = vsel %vm15588_vm15, %v7515_v19, %v7523_v53 }
 0x22f   :  { %v7543_v44 = vor.u32 %v7542_v21, %v7539_v42  ;;  %v3047_v58 = vrot.slane %v12606_v20, 5  ;;  %v7557_v47 = vshrl.u32 %v12607_v32, 16  ;;  %v3046_v2 = vrot.slane %v3044_v43, 4 }
 0x230   :  { %v7549_v16 = vrot.slane %v7547_v12, 6  ;;  %v7552_v10 = vrot.slane %v7550_v5, 7  ;;  %v7560_v48 = vshll.u32 %v12607_v32, 16  ;;  %9600 = vperm.xlu1 %12349, %v9370_v59   ;;  %v19895_v19 = vcombine.low %v16299_v25, %v16335_v33  ;;  %v9371_v59 = vld [vmem:[%s19266_s3 + $0x140] sm:$0xff] }
 0x231   :  { %9420 = vperm.xlu0 %12348, %v9334_v39   ;;  %v16761_v53 = vsel %vm14788_vm12, %v3040_v4, %v3041_v54  ;;  %v16765_v42 = vsel %vm15588_vm15, %v7525_v1, %v7533_v18  ;;  %v16769_v21 = vsel %vm14788_vm12, %v3043_v56, %v3044_v43  ;;  %v7559_v3 = vrot.slane %v7557_v47, 6  ;;  %v9335_v25 = vld [vmem:[%s19266_s3 + $0x20] sm:$0xff]  ;;  %v19898_v43 = vld [vmem:[#allocation5_spill] sm:$0xff] }
 0x232   :  { %11307 = vmatmul.mubr.msk.bf16.vlgmr.msra.gmra.mrb[0].mxu1 %vm941_vm3, %v19895_v19  ;;  %v19896_v33 = vcombine.low %v16346_v36, %v16353_v50  ;;  %v19897_v54 = vcombine.low %v16357_v14, %v16361_v17  ;;  %v16787_v4 = vsel %vm15588_vm15, %v7535_v62, %v7543_v44  ;;  %v7553_v18 = vor.u32 %v7552_v10, %v7549_v16  ;;  %v12608_v50 = vld [vmem:[%s19263_s0 + $0x6c] sm:$0xf]  ;;  %v12609_v17 = vld [vmem:[%s19263_s0 + $0x108] sm:$0xf] }
 0x233   :  { %v7562_v1 = vrot.slane %v7560_v48, 7  ;;  %v3049_v56 = vrot.slane %v3047_v58, 4  ;;  %11757 = vmatpush3.bf16.msra.mxu1 %v19898_v43  ;;  %v7545_v36 = vrot.slane %v7543_v44, 4  ;;  %v3050_v14 = vrot.slane %v12608_v50, 5  ;;  %v12610_v16 = vld [vmem:[%s19263_s0 + $0x10c] sm:$0xf] }
 0x234   :  { %11635 = vmatmul.mubr.msk.bf16.gmra.mrb[32].mxu0 %vm941_vm3, %v19896_v33  ;;  %11310 = vmatprep.mubr.msk.bf16.mxu1 %vm941_vm3, %v19897_v54  ;;  %v7567_v39 = vshrl.u32 %v12609_v17, 16  ;;  %v7570_v62 = vshll.u32 %v12609_v17, 16  ;;  %v16800_v48 = vsel %vm14788_vm12, %v3046_v2, %v3047_v58  ;;  %v7555_v10 = vrot.slane %v7553_v18, 4  ;;  %v12611_v44 = vld [vmem:[%s19263_s0 + $0x70] sm:$0xf]  ;;  %v9372_v58 = vld [vmem:[%s19266_s3 + $0x148] sm:$0xff] }
 0x235   :  { %11638 = vmatprep.mubr.msk.bf16.mxu0 %vm941_vm3, %v16468_v8  ;;  %v7563_v8 = vor.u32 %v7562_v1, %v7559_v3  ;;  %v7577_v12 = vshrl.u32 %v12610_v16, 16  ;;  %9605 = vperm.xlu1 %12349, %v9371_v59   ;;  %v3052_v5 = vrot.slane %v3050_v14, 4  ;;  %v3053_v20 = vrot.slane %v12611_v44, 5  ;;  %v9336_v2 = vld [vmem:[%s19266_s3 + $0x28] sm:$0xff] }
 0x236   :  { %9425 = vperm.xlu0 %12348, %v9335_v25   ;;  %v7569_v32 = vrot.slane %v7567_v39, 6  ;;  %v7572_v47 = vrot.slane %v7570_v62, 7  ;;  %v10619_v19 = vcombine.low %v16727_v30, %v16747_v49  ;;  %v10308_v3 = vcombine.low %v16740_v51, %v16761_v53 }
 0x237   :  { %v7579_v59 = vrot.slane %v7577_v12, 6  ;;  %v7580_v25 = vshll.u32 %v12610_v16, 16  ;;  %v16824_v1 = vsel %vm15588_vm15, %v7545_v36, %v7553_v18  ;;  %v16828_v43 = vsel %vm15588_vm15, %v7555_v10, %v7563_v8  ;;  %v12612_v36 = vld [vmem:[%s19263_s0 + $0x74] sm:$0xf] }
 0x238   :  { %v16832_v50 = vsel %vm14788_vm12, %v3049_v56, %v3050_v14  ;;  %v7565_v17 = vrot.slane %v7563_v8, 4  ;;  %v7573_v39 = vor.u32 %v7572_v47, %v7569_v32  ;;  %v19899_v16 = vcombine.low %v16404_v28, %v16423_v34  ;;  %v12613_v14 = vld [vmem:[%s19263_s0 + $0x110] sm:$0xf] }
 0x239   :  { %v7582_v62 = vrot.slane %v7580_v25, 7  ;;  %9610 = vperm.xlu1 %12349, %v9372_v58   ;;  %v16840_v18 = vsel %vm14788_vm12, %v3052_v5, %v3053_v20  ;;  %v3056_v56 = vrot.slane %v12612_v36, 5  ;;  %v7587_v10 = vshrl.u32 %v12613_v14, 16  ;;  %v9373_v28 = vld [vmem:[%s19266_s3 + $0x150] sm:$0xff] }
 0x23a   :  { %9430 = vperm.xlu0 %12348, %v9336_v2   ;;  %11311 = vmatmul.mubr.msk.bf16.gmra.mrb[4].mxu1 %vm941_vm3, %v19899_v16  ;;  %v7590_v8 = vshll.u32 %v12613_v14, 16  ;;  %v9337_v34 = vld [vmem:[%s19266_s3 + $0x30] sm:$0xff]  ;;  %v19900_v12 = vcombine.low %v16441_v23, %v16453_v35  ;;  %v19901_v5 = vcombine.low %v16445_v27, %v16457_v0  ;;  %v3055_v47 = vrot.slane %v3053_v20, 4  ;;  %v12615_v27 = vld [vmem:[%s19263_s0 + $0x78] sm:$0xf] }
 0x23b   :  { %v7583_v32 = vor.u32 %v7582_v62, %v7579_v59  ;;  %v12614_v58 = vld [vmem:[%s19263_s0 + $0x114] sm:$0xf]  ;;  %v19902_v23 = vcombine.low %v16514_v31, %v16521_v7  ;;  %v3059_v35 = vrot.slane %v12615_v27, 5  ;;  %v7589_v0 = vrot.slane %v7587_v10, 6  ;;  %v9374_v10 = vld [vmem:[%s19266_s3 + $0x158] sm:$0xff] }
 0x23c   :  { %11639 = vmatmul.mubr.msk.bf16.gmra.mrb[36].mxu0 %vm941_vm3, %v19900_v12  ;;  %11314 = vmatprep.mubr.msk.bf16.mxu1 %vm941_vm3, %v19901_v5  ;;  %v7597_v2 = vshrl.u32 %v12614_v58, 16  ;;  %v7592_v25 = vrot.slane %v7590_v8, 7  ;;  %v7600_v16 = vshll.u32 %v12614_v58, 16  ;;  %v16878_v59 = vsel %vm15588_vm15, %v7565_v17, %v7573_v39  ;;  %v9338_v8 = vld [vmem:[%s19266_s3 + $0x38] sm:$0xff] }
 0x23d   :  { %11642 = vmatprep.mubr.msk.bf16.mxu0 %vm941_vm3, %v19902_v23  ;;  %v7575_v62 = vrot.slane %v7573_v39, 4  ;;  %9615 = vperm.xlu1 %12349, %v9373_v28   ;;  %v3058_v31 = vrot.slane %v3056_v56, 4  ;;  %v3061_v12 = vrot.slane %v3059_v35, 4  ;;  %v7585_v5 = vrot.slane %v7583_v32, 4  ;;  %v12616_v17 = vld [vmem:[%s19263_s0 + $0x7c] sm:$0xf] }
 0x23e   :  { %v7599_v36 = vrot.slane %v7597_v2, 6  ;;  %9435 = vperm.xlu0 %12348, %v9337_v34   ;;  %v7593_v7 = vor.u32 %v7592_v25, %v7589_v0  ;;  %v7602_v14 = vrot.slane %v7600_v16, 7  ;;  %v3062_v39 = vrot.slane %v12616_v17, 5  ;;  %v12617_v28 = vld [vmem:[%s19263_s0 + $0x118] sm:$0xf] }
 0x23f   :  { %v7607_v34 = vshrl.u32 %v12617_v28, 16  ;;  %v7610_v58 = vshll.u32 %v12617_v28, 16  ;;  %v16894_v2 = vsel %vm14788_vm12, %v3055_v47, %v3056_v56  ;;  %v12618_v0 = vld [vmem:[%s19263_s0 + $0x11c] sm:$0xf]  ;;  %v12619_v17 = vld [vmem:[%s19263_s0 + $0x80] sm:$0xf]  ;;  %v19914_v49 = vcombine.low %v16765_v42, %v16787_v4 }
 0x240   :  { %v7595_v23 = vrot.slane %v7593_v7, 4  ;;  %v7603_v27 = vor.u32 %v7602_v14, %v7599_v36  ;;  %v7617_v25 = vshrl.u32 %v12618_v0, 16  ;;  %v3064_v16 = vrot.slane %v3062_v39, 4  ;;  %v19903_v56 = vld [vmem:[#allocation13_spill] sm:$0xff]  ;;  %v12631_v42 = vld [vmem:[%s19263_s0 + $0x138] sm:$0xf] }
 0x241   :  { %v3065_v20 = vrot.slane %v12619_v17, 5  ;;  %v7609_v44 = vrot.slane %v7607_v34, 6  ;;  %v7612_v54 = vrot.slane %v7610_v58, 7  ;;  %9620 = vperm.xlu1 %12349, %v9374_v10   ;;  %v19904_v47 = vcombine.low %v16484_v37, %v19903_v56  ;;  %v9375_v10 = vld [vmem:[%s19266_s3 + $0x160] sm:$0xff] }
 0x242   :  { %9440 = vperm.xlu0 %12348, %v9338_v8   ;;  %v16908_v36 = vsel %vm15588_vm15, %v7575_v62, %v7583_v32  ;;  %v16912_v14 = vsel %vm14788_vm12, %v3058_v31, %v3059_v35  ;;  %v7619_v28 = vrot.slane %v7617_v25, 6  ;;  %v7620_v33 = vshll.u32 %v12618_v0, 16  ;;  %v9339_v37 = vld [vmem:[%s19266_s3 + $0x40] sm:$0xff]  ;;  %v19906_v32 = vld [vmem:[#allocation14_spill] sm:$0xff] }
 0x243   :  { %11315 = vmatmul.mubr.msk.bf16.gmra.mrb[8].mxu1 %vm941_vm3, %v19904_v47  ;;  %v19905_v8 = vshll.u32 %v19885_v24, 16  ;;  %v19907_v62 = vcombine.low %v16531_v13, %v19906_v32  ;;  %v19908_v35 = vld [vmem:[#allocation78_spill] sm:$0xff]  ;;  %v16934_v0 = vsel %vm15588_vm15, %v7585_v5, %v7593_v7  ;;  %v16938_v25 = vsel %vm14788_vm12, %v3061_v12, %v3062_v39  ;;  %v12620_v7 = vld [vmem:[%s19263_s0 + $0x84] sm:$0xf]  ;;  %v12622_v39 = vld [vmem:[%s19263_s0 + $0x88] sm:$0xf] }
 0x244   :  { %v19909_v31 = vld [vmem:[#allocation46_spill] sm:$0xff]  ;;  %v7613_v24 = vor.u32 %v7612_v54, %v7609_v44  ;;  %v16946_v13 = vsel %vm15588_vm15, %v7595_v23, %v7603_v27  ;;  %v7605_v17 = vrot.slane %v7603_v27, 4  ;;  %v7622_v56 = vrot.slane %v7620_v33, 7  ;;  %v12623_v27 = vld [vmem:[%s19263_s0 + $0x124] sm:$0xf]  ;;  %v9376_v47 = vld [vmem:[%s19266_s3 + $0x168] sm:$0xff] }
 0x245   :  { %v16922_v34 = vrot.slane %v19905_v8, 6  ;;  %11643 = vmatmul.mubr.msk.bf16.gmra.mrb[40].mxu0 %vm941_vm3, %v19907_v62  ;;  %v19910_v58 = vcombine.low %v19908_v35, %v19909_v31  ;;  %v3068_v5 = vrot.slane %v12620_v7, 5  ;;  %v16953_v12 = vsel %vm14788_vm12, %v3064_v16, %v3065_v20  ;;  %9625 = vperm.xlu1 %12349, %v9375_v10   ;;  %v9340_v10 = vld [vmem:[%s19266_s3 + $0x48] sm:$0xff] }
 0x246   :  { %11646 = vmatprep.mubr.msk.bf16.mxu0 %vm941_vm3, %v10616_v11  ;;  %v7615_v54 = vrot.slane %v7613_v24, 4  ;;  %v7627_v52 = vshrl.u32 %v12621_v26, 16  ;;  %v7630_v11 = vshll.u32 %v12621_v26, 16  ;;  %9445 = vperm.xlu0 %12348, %v9339_v37   ;;  %v7623_v44 = vor.u32 %v7622_v56, %v7619_v28 }
 0x247   :  { %11318 = vmatprep.mubr.msk.bf16.mxu1 %vm941_vm3, %v19910_v58  ;;  %v3067_v33 = vrot.slane %v3065_v20, 4  ;;  %v3071_v23 = vrot.slane %v12622_v39, 5  ;;  %v7637_v16 = vshrl.u32 %v12623_v27, 16  ;;  %v3070_v28 = vrot.slane %v3068_v5, 4 }
 0x248   :  { %v7629_v20 = vrot.slane %v7627_v52, 6  ;;  %v7632_v37 = vrot.slane %v7630_v11, 7  ;;  %v7640_v8 = vshll.u32 %v12623_v27, 16  ;;  %v10622_v32 = vcombine.low %v16878_v59, %v16908_v36  ;;  %v9341_v27 = vld [vmem:[%s19266_s3 + $0x50] sm:$0xff] }
 0x249   :  { %v10311_v62 = vcombine.low %v16894_v2, %v16912_v14  ;;  %v10623_v35 = vcombine.low %v16934_v0, %v16946_v13  ;;  %v10312_v31 = vcombine.low %v16938_v25, %v16953_v12  ;;  %v16980_v58 = vsel %vm15588_vm15, %v7605_v17, %v7613_v24  ;;  %9630 = vperm.xlu1 %12349, %v9376_v47   ;;  %v12624_v24 = vld [vmem:[%s19263_s0 + $0x128] sm:$0xf]  ;;  %v9347_v2 = vld [vmem:[%s19266_s3 + $0x80] sm:$0xff] }
 0x24a   :  { %v16984_v56 = vsel %vm15588_vm15, %v7615_v54, %v7623_v44  ;;  %v7639_v7 = vrot.slane %v7637_v16, 6  ;;  %v7642_v26 = vrot.slane %v7640_v8, 7  ;;  %9450 = vperm.xlu0 %12348, %v9340_v10   ;;  %v7625_v52 = vrot.slane %v7623_v44, 4  ;;  %v9377_v54 = vld [vmem:[%s19266_s3 + $0x170] sm:$0xff]  ;;  %v12625_v44 = vld [vmem:[%s19263_s0 + $0x8c] sm:$0xf] }
 0x24b   :  { %11319 = vmatmul.mubr.msk.bf16.gmra.mrb[12].mxu1 %vm941_vm3, %v10305_v15  ;;  %v7633_v11 = vor.u32 %v7632_v37, %v7629_v20  ;;  %v7647_v17 = vshrl.u32 %v12624_v24, 16  ;;  %v7650_v39 = vshll.u32 %v12624_v24, 16  ;;  %v19911_v15 = vcombine.low %v16619_v63, %v16648_v55  ;;  %v2864_v24 = vld [vmem:[%s19263_s0 + $0x98] sm:$0x1] }
 0x24c   :  { %v17009_v45 = vsel %vm14788_vm12, %v3067_v33, %v3068_v5  ;;  %v17013_v6 = vsel %vm14788_vm12, %v3070_v28, %v3071_v23  ;;  %v3074_v46 = vrot.slane %v12625_v44, 5  ;;  %v7657_v63 = vshrl.u32 %v12626_v61, 16  ;;  %v12627_v5 = vld [vmem:[%s19263_s0 + $0x90] sm:$0xf] }
 0x24d   :  { %11647 = vmatmul.mubr.msk.bf16.gmra.mrb[44].mxu0 %vm941_vm3, %v10617_v22  ;;  %11322 = vmatprep.mubr.msk.bf16.mxu1 %vm941_vm3, %v19911_v15  ;;  %v19912_v55 = vcombine.low %v16673_v41, %v16677_v9  ;;  %v3073_v22 = vrot.slane %v3071_v23, 4  ;;  %v3077_v33 = vrot.slane %v12627_v5, 5  ;;  %v7649_v16 = vrot.slane %v7647_v17, 6  ;;  %v12629_v44 = vld [vmem:[%s19263_s0 + $0x130] sm:$0xf] }
 0x24e   :  { %v7652_v47 = vrot.slane %v7650_v39, 7  ;;  %v10624_v10 = vcombine.low %v16980_v58, %v16984_v56  ;;  %v7643_v28 = vor.u32 %v7642_v26, %v7639_v7  ;;  %v7659_v20 = vrot.slane %v7657_v63, 6  ;;  %9635 = vperm.xlu1 %12349, %v9377_v54   ;;  %9455 = vperm.xlu0 %12348, %v9341_v27   ;;  %v9378_v7 = vld [vmem:[%s19266_s3 + $0x178] sm:$0xff] }
 0x24f   :  { %11650 = vmatprep.mubr.msk.bf16.mxu0 %vm941_vm3, %v19912_v55  ;;  %v7660_v37 = vshll.u32 %v12626_v61, 16  ;;  %v17034_v9 = vsel %vm15588_vm15, %v7625_v52, %v7633_v11  ;;  %v7635_v23 = vrot.slane %v7633_v11, 4  ;;  %v9342_v26 = vld [vmem:[%s19266_s3 + $0x58] sm:$0xff]  ;;  %v3076_v17 = vrot.slane %v3074_v46, 4  ;;  %v12628_v52 = vld [vmem:[%s19263_s0 + $0x94] sm:$0xf] }
 0x250   :  { %v7653_v8 = vor.u32 %v7652_v47, %v7649_v16  ;;  %v7645_v39 = vrot.slane %v7643_v28, 4  ;;  %v3080_v11 = vrot.slane %v12628_v52, 5  ;;  %v3079_v15 = vrot.slane %v3077_v33, 4  ;;  %v12630_v47 = vld [vmem:[%s19263_s0 + $0x134] sm:$0xf] }
 0x251   :  { %v7662_v54 = vrot.slane %v7660_v37, 7  ;;  %v7667_v61 = vshrl.u32 %v12629_v44, 16  ;;  %v7670_v63 = vshll.u32 %v12629_v44, 16  ;;  %v3083_v16 = vrot.slane %v2864_v24, 5  ;;  %v9379_v24 = vld [vmem:[%s19266_s3 + $0x180] sm:$0xff] }
 0x252   :  { %v7655_v27 = vrot.slane %v7653_v8, 4  ;;  %v3082_v5 = vrot.slane %v3080_v11, 4  ;;  %v7677_v37 = vshrl.u32 %v12630_v47, 16  ;;  %9640 = vperm.xlu1 %12349, %v9378_v7   ;;  %9460 = vperm.xlu0 %12348, %v9342_v26   ;;  %v19913_v52 = vcombine.low %v16691_v40, %v16695_v57  ;;  %v9343_v7 = vld [vmem:[%s19266_s3 + $0x60] sm:$0xff]  ;;  %v12632_v26 = vld [vmem:[%s19263_s0 + $0xb0] sm:$0xf] }
 0x253   :  { %v7663_v55 = vor.u32 %v7662_v54, %v7659_v20  ;;  %v17060_v41 = vsel %vm14788_vm12, %v3073_v22, %v3074_v46  ;;  %v7669_v44 = vrot.slane %v7667_v61, 6  ;;  %v7672_v20 = vrot.slane %v7670_v63, 7  ;;  %v12634_v63 = vld [vmem:[%s19263_s0 + $0xb4] sm:$0xf] }
 0x254   :  { %11323 = vmatmul.mubr.msk.bf16.gmra.mrb[16].mxu1 %vm941_vm3, %v19913_v52  ;;  %v7680_v54 = vshll.u32 %v12630_v47, 16  ;;  %v17078_v40 = vsel %vm15588_vm15, %v7635_v23, %v7643_v28  ;;  %v17082_v57 = vsel %vm14788_vm12, %v3076_v17, %v3077_v33  ;;  %v17086_v46 = vsel %vm15588_vm15, %v7645_v39, %v7653_v8  ;;  %v12633_v39 = vld [vmem:[%s19263_s0 + $0x13c] sm:$0xf] }
 0x255   :  { %11651 = vmatmul.mubr.msk.bf16.gmra.mrb[48].mxu0 %vm941_vm3, %v10619_v19  ;;  %11326 = vmatprep.mubr.msk.bf16.mxu1 %vm941_vm3, %v10308_v3  ;;  %v7679_v30 = vrot.slane %v7677_v37, 6  ;;  %v17094_v51 = vsel %vm15588_vm15, %v7655_v27, %v7663_v55  ;;  %v17098_v53 = vsel %vm14788_vm12, %v3079_v15, %v3080_v11  ;;  %v7673_v19 = vor.u32 %v7672_v20, %v7669_v44  ;;  %v9380_v27 = vld [vmem:[%s19266_s3 + $0x188] sm:$0xff] }
 0x256   :  { %11654 = vmatprep.mubr.msk.bf16.mxu0 %vm941_vm3, %v19914_v49  ;;  %v7682_v3 = vrot.slane %v7680_v54, 7  ;;  %v17102_v22 = vsel %vm14788_vm12, %v3082_v5, %v3083_v16  ;;  %v7665_v33 = vrot.slane %v7663_v55, 4  ;;  %v7687_v4 = vshrl.u32 %v12631_v42, 16  ;;  %9645 = vperm.xlu1 %12349, %v9379_v24   ;;  %v9344_v15 = vld [vmem:[%s19266_s3 + $0x68] sm:$0xff]  ;;  %v6985_v49 = vld [vmem:[%s19263_s0 + $0x144] sm:$0x7] }
 0x257   :  { %v7690_v28 = vshll.u32 %v12631_v42, 16  ;;  %9465 = vperm.xlu0 %12348, %v9343_v7   ;;  %v7675_v23 = vrot.slane %v7673_v19, 4  ;;  %v3087_v17 = vrot.slane %v12632_v26, 5  ;;  %v7697_v11 = vshrl.u32 %v12633_v39, 16  ;;  %v12635_v24 = vld [vmem:[%s19263_s0 + $0xac] sm:$0xe] }
 0x258   :  { %v7683_v8 = vor.u32 %v7682_v3, %v7679_v30  ;;  %v10625_v61 = vcombine.low %v17034_v9, %v17078_v40  ;;  %v3090_v55 = vrot.slane %v12634_v63, 5  ;;  %v7689_v5 = vrot.slane %v7687_v4, 6  ;;  %v12636_v4 = vld [vmem:[%s19263_s0 + $0xb8] sm:$0xf]  ;;  %v9381_v26 = vld [vmem:[%s19266_s3 + $0x190] sm:$0xff] }
 0x259   :  { %v7692_v16 = vrot.slane %v7690_v28, 7  ;;  %v10314_v47 = vcombine.low %v17060_v41, %v17082_v57  ;;  %v10626_v37 = vcombine.low %v17086_v46, %v17094_v51  ;;  %v7699_v52 = vrot.slane %v7697_v11, 6  ;;  %v17367_v9 = vld [vmem:[%s19263_s0 + $0xdc] sm:$0xf]  ;;  %v12653_v51 = vld [vmem:[%s19263_s0 + $0x2c] sm:$0xf] }
 0x25a   :  { %v7700_v44 = vshll.u32 %v12633_v39, 16  ;;  %v10315_v20 = vcombine.low %v17098_v53, %v17102_v22  ;;  %v17132_v54 = vsel %vm15588_vm15, %v7665_v33, %v7673_v19  ;;  %v10296_v7 = vrot.slane %v12635_v24, 9  ;;  %9650 = vperm.xlu1 %12349, %v9380_v27   ;;  %v12637_v27 = vld [vmem:[%s19263_s0 + $0x140] sm:$0xf] }
 0x25b   :  { %v7693_v30 = vor.u32 %v7692_v16, %v7689_v5  ;;  %9470 = vperm.xlu0 %12348, %v9344_v15   ;;  %v19915_v3 = vcombine.low %v16769_v21, %v16800_v48  ;;  %v17146_v19 = vsel %vm15588_vm15, %v7675_v23, %v7683_v8  ;;  %v3089_v33 = vrot.slane %v3087_v17, 4  ;;  %v9345_v21 = vld [vmem:[%s19266_s3 + $0x70] sm:$0xff]  ;;  %v9387_v41 = vld [vmem:[%s19266_s3 + $0x1c0] sm:$0xff] }
 0x25c   :  { %v7702_v42 = vrot.slane %v7700_v44, 7  ;;  %v3093_v28 = vrot.slane %v12636_v4, 5  ;;  %v19916_v48 = vcombine.low %v16824_v1, %v16828_v43  ;;  %v19917_v23 = vcombine.low %v16832_v50, %v16840_v18  ;;  %v12638_v50 = vld [vmem:[%s19263_s0 + $0xbc] sm:$0xf] }
 0x25d   :  { %11327 = vmatmul.mubr.msk.bf16.gmra.mrb[20].mxu1 %vm941_vm3, %v19915_v3  ;;  %v7685_v39 = vrot.slane %v7683_v8, 4  ;;  %v3092_v11 = vrot.slane %v3090_v55, 4  ;;  %v7707_v15 = vshrl.u32 %v12637_v27, 16  ;;  %v7710_v63 = vshll.u32 %v12637_v27, 16 }
 0x25e   :  { %11655 = vmatmul.mubr.msk.bf16.gmra.mrb[52].mxu0 %vm941_vm3, %v19916_v48  ;;  %11330 = vmatprep.mubr.msk.bf16.mxu1 %vm941_vm3, %v19917_v23  ;;  %v7695_v1 = vrot.slane %v7693_v30, 4  ;;  %v7703_v43 = vor.u32 %v7702_v42, %v7699_v52  ;;  %v3096_v18 = vrot.slane %v12638_v50, 5  ;;  %v7717_v8 = vshrl.u32 %v6985_v49, 16  ;;  %v9382_v52 = vld [vmem:[%s19266_s3 + $0x198] sm:$0xff]  ;;  %v8339_v48 = vld [vmem:[%s19263_s0 + $0x10] sm:$0x8] }
 0x25f   :  { %11658 = vmatprep.mubr.msk.bf16.mxu0 %vm941_vm3, %v10622_v32  ;;  %v3095_v5 = vrot.slane %v3093_v28, 4  ;;  %v7709_v16 = vrot.slane %v7707_v15, 6  ;;  %v7712_v44 = vrot.slane %v7710_v63, 7  ;;  %v7720_v24 = vshll.u32 %v6985_v49, 16  ;;  %9655 = vperm.xlu1 %12349, %v9381_v26   ;;  %v9346_v49 = vld [vmem:[%s19266_s3 + $0x78] sm:$0xff]  ;;  %v9383_v50 = vld [vmem:[%s19266_s3 + $0x1a0] sm:$0xff] }
 0x260   :  { %9475 = vperm.xlu0 %12348, %v9345_v21   ;;  %v10627_v3 = vcombine.low %v17132_v54, %v17146_v19  ;;  %v17179_v59 = vsel %vm14788_vm12, %v10296_v7, %v3087_v17  ;;  %v17183_v36 = vsel %vm14788_vm12, %v3089_v33, %v3090_v55  ;;  %v7719_v32 = vrot.slane %v7717_v8, 6  ;;  %v17206_v26 = vld [vmem:[%s19263_s0 + $0xc0] sm:$0xf]  ;;  %v12641_v15 = vld [vmem:[%s19263_s0 + $0x14] sm:$0xf] }
 0x261   :  { %v17193_v42 = vsel %vm15588_vm15, %v7685_v39, %v7693_v30  ;;  %v17197_v17 = vsel %vm14788_vm12, %v3092_v11, %v3093_v28  ;;  %v7713_v7 = vor.u32 %v7712_v44, %v7709_v16  ;;  %v7722_v55 = vrot.slane %v7720_v24, 7  ;;  %v17212_v30 = vld [vmem:[%s19263_s0 + $0xc4] sm:$0xf]  ;;  %v12643_v8 = vld [vmem:[%s19263_s0 + $0xc8] sm:$0xf] }
 0x262   :  { %v17201_v33 = vsel %vm15588_vm15, %v7695_v1, %v7703_v43  ;;  %v3098_v4 = vrot.slane %v3096_v18, 4  ;;  %v3099_v21 = vrot.slane %v17206_v26, 5  ;;  %v3102_v28 = vrot.slane %v17212_v30, 5  ;;  %v12642_v1 = vld [vmem:[%s19263_s0 + $0x18] sm:$0xf] }
 0x263   :  { %v17220_v23 = vsel %vm14788_vm12, %v3095_v5, %v3096_v18  ;;  %v7705_v39 = vrot.slane %v7703_v43, 4  ;;  %vm8345_vm0 = vcmask 1040384   ;;  %9660 = vperm.xlu1 %12349, %v9382_v52   ;;  %v7715_v11 = vrot.slane %v7713_v7, 4 }
 0x264   :  { %9480 = vperm.xlu0 %12348, %v9346_v49   ;;  %v7723_v27 = vor.u32 %v7722_v55, %v7719_v32  ;;  %v8350_v63 = vrot.slane %v12641_v15, 7  ;;  %v8353_v43 = vrot.slane %v12642_v1, 7  ;;  %v10316_v14 = vcombine.low %v17179_v59, %v17183_v36  ;;  %vm17261_vm2 = vmor %vm8345_vm0, %vm8346_vm1  ;;  %v12645_v32 = vld [vmem:[%s19263_s0 + $0x1c] sm:$0xf]  ;;  %v12646_v49 = vld [vmem:[%s19263_s0 + $0x20] sm:$0xf] }
 0x265   :  { %11331 = vmatmul.mubr.msk.bf16.gmra.mrb[24].mxu1 %vm941_vm3, %v10311_v62  ;;  %v3101_v62 = vrot.slane %v3099_v21, 4  ;;  %v10666_v18 = vrot.slane %v8339_v48, 11  ;;  %v3105_v5 = vrot.slane %v12643_v8, 5  ;;  %v10628_v0 = vcombine.low %v17193_v42, %v17201_v33  ;;  %v9348_v55 = vld [vmem:[%s19266_s3 + $0x88] sm:$0xff]  ;;  %v17303_v48 = vld [vmem:[%s19263_s0 + $0xd0] sm:$0xf] }
 0x266   :  { %11659 = vmatmul.mubr.msk.bf16.gmra.mrb[56].mxu0 %vm941_vm3, %v10623_v35  ;;  %11334 = vmatprep.mubr.msk.bf16.mxu1 %vm941_vm3, %v10312_v31  ;;  %v10317_v25 = vcombine.low %v17197_v17, %v17220_v23  ;;  %v8352_v12 = vrot.slane %v8350_v63, 4  ;;  %v3104_v35 = vrot.slane %v3102_v28, 4  ;;  %v17267_v31 = vsel %vm15588_vm15, %v7705_v39, %v7713_v7  ;;  %v12661_v59 = vld [vmem:[%s19263_s0 + $0x3c] sm:$0xf]  ;;  %v9353_v17 = vld [vmem:[%s19266_s3 + $0xb0] sm:$0xff] }
 0x267   :  { %11662 = vmatprep.mubr.msk.bf16.mxu0 %vm941_vm3, %v10624_v10  ;;  %v8355_v58 = vrot.slane %v8353_v43, 4  ;;  %v3107_v56 = vrot.slane %v3105_v5, 4  ;;  %v12644_v10 = vld [vmem:[%s19263_s0 + $0xcc] sm:$0xf]  ;;  %9665 = vperm.xlu1 %12349, %v9383_v50   ;;  %v17274_v44 = vsel %vm15588_vm15, %v7715_v11, %v7723_v27  ;;  %v17278_v24 = vsel %vm14788_vm12, %v3098_v4, %v3099_v21  ;;  %v17309_v11 = vld [vmem:[%s19263_s0 + $0xd4] sm:$0xf] }
 0x268   :  { %v3108_v16 = vrot.slane %v12644_v10, 5  ;;  %9485 = vperm.xlu0 %12348, %v9347_v2   ;;  %v8356_v52 = vrot.slane %v12645_v32, 7  ;;  %v8359_v7 = vrot.slane %v12646_v49, 7  ;;  %v17294_v4 = vsel %vm14788_vm12, %v3101_v62, %v3102_v28  ;;  %v9385_v10 = vld [vmem:[%s19266_s3 + $0x1b0] sm:$0xff]  ;;  %v12651_v32 = vld [vmem:[%s19263_s0 + $0x28] sm:$0xf] }
 0x269   :  { %v17298_v21 = vsel %vm17261_vm2, %v10666_v18, %v8350_v63  ;;  %v3111_v39 = vrot.slane %v17303_v48, 5  ;;  %v3114_v27 = vrot.slane %v17309_v11, 5  ;;  %v17314_v28 = vsel %vm17261_vm2, %v8352_v12, %v8353_v43  ;;  %v12649_v43 = vld [vmem:[%s19263_s0 + $0x24] sm:$0xf] }
 0x26a   :  { %v17318_v15 = vsel %vm14788_vm12, %v3104_v35, %v3105_v5  ;;  %v8358_v63 = vrot.slane %v8356_v52, 4  ;;  %v3110_v1 = vrot.slane %v3108_v16, 4  ;;  %v17322_v50 = vsel %vm14788_vm12, %v3107_v56, %v3108_v16 }
 0x26b   :  { %v17326_v2 = vsel %vm17261_vm2, %v8355_v58, %v8356_v52  ;;  %v3113_v62 = vrot.slane %v3111_v39, 4  ;;  %v8362_v18 = vrot.slane %v12649_v43, 7  ;;  %9670 = vperm.xlu1 %12349, %v9384_v38   ;;  %v19920_v8 = vcombine.low %v17009_v45, %v17013_v6  ;;  %v17342_v58 = vld [vmem:[%s19263_s0 + $0xd8] sm:$0xf]  ;;  %v9349_v45 = vld [vmem:[%s19266_s3 + $0x90] sm:$0xff] }
 0x26c   :  { %9490 = vperm.xlu0 %12348, %v9348_v55   ;;  %v17337_v5 = vsel %vm17261_vm2, %v8358_v63, %v8359_v7  ;;  %v8361_v12 = vrot.slane %v8359_v7, 4  ;;  %v3116_v35 = vrot.slane %v3114_v27, 4  ;;  %v3117_v56 = vrot.slane %v17342_v58, 5  ;;  %v17410_v63 = vld [vmem:[%s19263_s0 + $0xe4] sm:$0xf]  ;;  %v9350_v43 = vld [vmem:[%s19266_s3 + $0x98] sm:$0xff] }
 0x26d   :  { %11335 = vmatmul.mubr.msk.bf16.gmra.mrb[28].mxu1 %vm941_vm3, %v19920_v8  ;;  %v8364_v16 = vrot.slane %v8362_v18, 4  ;;  %v8365_v52 = vrot.slane %v12651_v32, 7  ;;  %v3120_v40 = vrot.slane %v17367_v9, 5  ;;  %v17384_v7 = vsel %vm14788_vm12, %v3110_v1, %v3111_v39  ;;  %v17404_v39 = vld [vmem:[%s19263_s0 + $0xe0] sm:$0xf] }
 0x26e   :  { %11663 = vmatmul.mubr.msk.bf16.gmra.mrb[60].mxu0 %vm941_vm3, %v10625_v61  ;;  %11338 = vmatprep.mubr.msk.bf16.mxu1 %vm941_vm3, %v10314_v47  ;;  %v3119_v47 = vrot.slane %v3117_v56, 4  ;;  %v17388_v46 = vsel %vm14788_vm12, %v3113_v62, %v3114_v27  ;;  %v17395_v38 = vsel %vm17261_vm2, %v8361_v12, %v8362_v18  ;;  %v17399_v55 = vsel %vm14788_vm12, %v3116_v35, %v3117_v56  ;;  %v9386_v62 = vld [vmem:[%s19266_s3 + $0x1b8] sm:$0xff]  ;;  %v12656_v35 = vld [vmem:[%s19263_s0 + $0x30] sm:$0xf]  ;;  %v12657_v32 = vld [vmem:[%s19263_s0 + $0x34] sm:$0xf] }
 0x26f   :  { %11666 = vmatprep.mubr.msk.bf16.mxu0 %vm941_vm3, %v10626_v37  ;;  %v8368_v37 = vrot.slane %v12653_v51, 7  ;;  %9675 = vperm.xlu1 %12349, %v9385_v10   ;;  %v3123_v27 = vrot.slane %v17404_v39, 5  ;;  %v3126_v1 = vrot.slane %v17410_v63, 5  ;;  %v17421_v18 = vsel %vm17261_vm2, %v8364_v16, %v8365_v52  ;;  %v12658_v16 = vld [vmem:[%s19263_s0 + $0x38] sm:$0xf] }
 0x270   :  { %9495 = vperm.xlu0 %12348, %v9349_v45   ;;  %v17425_v8 = vsel %vm14788_vm12, %v3119_v47, %v3120_v40  ;;  %v8367_v12 = vrot.slane %v8365_v52, 4  ;;  %v8371_v56 = vrot.slane %v12656_v35, 7  ;;  %v3122_v45 = vrot.slane %v3120_v40, 4  ;;  %v17441_v35 = vld [vmem:[%s19263_s0 + $0xe8] sm:$0xf] }
 0x271   :  { %v8370_v10 = vrot.slane %v8368_v37, 4  ;;  %v8374_v51 = vrot.slane %v12657_v32, 7  ;;  %v8377_v49 = vrot.slane %v12658_v16, 7  ;;  %v3125_v47 = vrot.slane %v3123_v27, 4 }
 0x272   :  { %v8373_v61 = vrot.slane %v8371_v56, 4  ;;  %v3129_v40 = vrot.slane %v17441_v35, 5  ;;  %v3128_v57 = vrot.slane %v3126_v1, 4  ;;  %v17468_v53 = vsel %vm17261_vm2, %v8367_v12, %v8368_v37  ;;  %v17505_v37 = vld [vmem:[%s19263_s0 + $0xf0] sm:$0xf] }
 0x273   :  { %9680 = vperm.xlu1 %12349, %v9386_v62   ;;  %v8376_v52 = vrot.slane %v8374_v51, 4  ;;  %v9351_v62 = vld [vmem:[%s19266_s3 + $0xa0] sm:$0xff]  ;;  %v8379_v54 = vrot.slane %v8377_v49, 4  ;;  %v17482_v19 = vsel %vm17261_vm2, %v8370_v10, %v8371_v56  ;;  %v8380_v36 = vrot.slane %v12661_v59, 7  ;;  %19922 = vst [vmem:[#allocation79_spill] sm:$0xff] %v17505_v37 }
 0x274   :  { %9500 = vperm.xlu0 %12348, %v9350_v43   ;;  %v3131_v22 = vrot.slane %v3129_v40, 4  ;;  %v17496_v33 = vsel %vm14788_vm12, %v3125_v47, %v3126_v1  ;;  %v17511_v12 = vld [vmem:[%s19263_s0 + $0xf4] sm:$0xf]  ;;  %v17520_v1 = vsel %vm14788_vm12, %v3128_v57, %v3129_v40  ;;  %v9352_v47 = vld [vmem:[%s19266_s3 + $0xa8] sm:$0xff]  ;;  %v19926_v23 = vcombine.low %v17267_v31, %v17274_v44 }
 0x275   :  { %11339 = vmatmul.mubr.msk.bf16.gmra.mrb[32].mxu1 %vm941_vm3, %v10315_v20  ;;  %v17473_v20 = vld [vmem:[%s19263_s0 + $0xec] sm:$0xf]  ;;  %19923 = vst [vmem:[#allocation49_spill] sm:$0xff] %v17511_v12  ;;  %v3138_v56 = vrot.slane %v17511_v12, 5  ;;  %v8382_v10 = vrot.slane %v8380_v36, 4  ;;  %vm12770_vm4 = vmmov 0  }
 0x276   :  { %11667 = vmatmul.mubr.msk.bf16.gmra.mrb[64].mxu0 %vm941_vm3, %v10627_v3  ;;  %11342 = vmatprep.mubr.msk.bf16.mxu1 %vm941_vm3, %v10316_v14  ;;  %19921 = vst [vmem:[#allocation15_spill] sm:$0xff] %v17473_v20  ;;  %v3132_v43 = vrot.slane %v17473_v20, 5  ;;  %v17486_v3 = vsel %vm14788_vm12, %v3122_v45, %v3123_v27  ;;  %v12662_v14 = vld [vmem:[%s19263_s0 + $0x40] sm:$0xf]  ;;  %v3135_v27 = vrot.slane %v17505_v37, 5 }
 0x277   :  { %11670 = vmatprep.mubr.msk.bf16.mxu0 %vm941_vm3, %v10628_v0  ;;  %v8383_v42 = vrot.slane %v12662_v14, 7  ;;  %v17500_v0 = vsel %vm17261_vm2, %v8373_v61, %v8374_v51  ;;  %9685 = vperm.xlu1 %12349, %v9387_v41   ;;  %v17516_v61 = vsel %vm17261_vm2, %v8376_v52, %v8377_v49  ;;  %v9388_v51 = vld [vmem:[%s19266_s3 + $0x1c8] sm:$0xff]  ;;  %v17534_v49 = vsel %vm17261_vm2, %v8379_v54, %v8380_v36  ;;  %v12665_v52 = vld [vmem:[%s19263_s0 + $0x44] sm:$0xf] }
 0x278   :  { %9505 = vperm.xlu0 %12348, %v9351_v62   ;;  %v3134_v45 = vrot.slane %v3132_v43, 4  ;;  %v17530_v41 = vsel %vm14788_vm12, %v3131_v22, %v3132_v43  ;;  %v3137_v57 = vrot.slane %v3135_v27, 4  ;;  %v8386_v40 = vrot.slane %v12665_v52, 7  ;;  %v17546_v22 = vld [vmem:[%s19263_s0 + $0xf8] sm:$0xf] }
 0x279   :  { %v17541_v62 = vsel %vm17261_vm2, %v8382_v10, %v8383_v42  ;;  %v8385_v59 = vrot.slane %v8383_v42, 4  ;;  %v3140_v14 = vrot.slane %v3138_v56, 4  ;;  %19924 = vst [vmem:[#allocation80_spill] sm:$0xff] %v17546_v22  ;;  %v3141_v43 = vrot.slane %v17546_v22, 5  ;;  %v12667_v52 = vld [vmem:[%s19263_s0 + $0x48] sm:$0xf] }
 0x27a   :  { %v8388_v36 = vrot.slane %v8386_v40, 4  ;;  %v8389_v16 = vrot.slane %v12667_v52, 7  ;;  %v17557_v42 = vld [vmem:[%s19263_s0 + $0xfc] sm:$0xf]  ;;  %v17588_v32 = vsel %vm14788_vm12, %v3134_v45, %v3135_v27  ;;  %v17592_v52 = vsel %vm14788_vm12, %v3137_v57, %v3138_v56  ;;  %v12669_v31 = vld [vmem:[%s19263_s0 + $0x4c] sm:$0xf] }
 0x27b   :  { %19925 = vst [vmem:[#allocation81_spill] sm:$0xff] %v17557_v42  ;;  %v3144_v10 = vrot.slane %v17557_v42, 5  ;;  %9690 = vperm.xlu1 %12349, %v9388_v51   ;;  %v3143_v6 = vrot.slane %v3141_v43, 4  ;;  %v9389_v51 = vld [vmem:[%s19266_s3 + $0x1d0] sm:$0xff]  ;;  %v8392_v44 = vrot.slane %v12669_v31, 7  ;;  %v17607_v27 = vsel %vm14788_vm12, %v3140_v14, %v3141_v43 }
 0x27c   :  { %9510 = vperm.xlu0 %12348, %v9352_v47   ;;  %v17612_v56 = vld [vmem:[%s19263_s0 + $0x100] sm:$0xf]  ;;  %v17623_v57 = vsel %vm17261_vm2, %v8388_v36, %v8389_v16  ;;  %v12672_v14 = vld [vmem:[%s19263_s0 + $0x50] sm:$0xf]  ;;  %v12673_v31 = vld [vmem:[%s19263_s0 + $0x54] sm:$0xf]  ;;  %v19933_v54 = vcombine.low %v17318_v15, %v17322_v50 }
 0x27d   :  { %11343 = vmatmul.mubr.msk.bf16.gmra.mrb[36].mxu1 %vm941_vm3, %v10317_v25  ;;  %v19927_v25 = vcombine.low %v17278_v24, %v17294_v4  ;;  %v19928_v24 = vcombine.low %v17298_v21, %v17314_v28  ;;  %v17603_v4 = vsel %vm17261_vm2, %v8385_v59, %v8386_v40  ;;  %19929 = vst [vmem:[#allocation16_spill] sm:$0xff] %v17612_v56  ;;  %v3147_v45 = vrot.slane %v17612_v56, 5  ;;  %v17618_v21 = vld [vmem:[%s19263_s0 + $0x104] sm:$0xf]  ;;  %v17663_v22 = vld [vmem:[%s19263_s0 + $0x10c] sm:$0xf] }
 0x27e   :  { %11671 = vmatmul.mubr.msk.bf16.gmra.mrb[68].mxu0 %vm941_vm3, %v19926_v23  ;;  %19930 = vst [vmem:[#allocation18_spill] sm:$0xff] %v17618_v21  ;;  %v3150_v28 = vrot.slane %v17618_v21, 5  ;;  %v17627_v40 = vsel %vm14788_vm12, %v3143_v6, %v3144_v10  ;;  %v8391_v59 = vrot.slane %v8389_v16, 4  ;;  %v8395_v43 = vrot.slane %v12672_v14, 7  ;;  %v12674_v6 = vld [vmem:[%s19263_s0 + $0x58] sm:$0xf] }
 0x27f   :  { %11346 = vmatprep.mubr.msk.bf16.mxu1 %vm941_vm3, %v19927_v25  ;;  %11676 = vmatprep.mubr.msk.bf16.mxu0 %vm941_vm3, %v19928_v24  ;;  %v8394_v23 = vrot.slane %v8392_v44, 4  ;;  %v3146_v25 = vrot.slane %v3144_v10, 4  ;;  %v8398_v36 = vrot.slane %v12673_v31, 7  ;;  %v8401_v24 = vrot.slane %v12674_v6, 7  ;;  %v9390_v16 = vld [vmem:[%s19266_s3 + $0x1d8] sm:$0xff]  ;;  %19932 = vst [vmem:[#allocation82_spill] sm:$0xff] %v17663_v22 }
 0x280   :  { %9695 = vperm.xlu1 %12349, %v9389_v51   ;;  %9515 = vperm.xlu0 %12348, %v9353_v17   ;;  %v9354_v51 = vld [vmem:[%s19266_s3 + $0xb8] sm:$0xff]  ;;  %v3149_v17 = vrot.slane %v3147_v45, 4  ;;  %v8397_v14 = vrot.slane %v8395_v43, 4  ;;  %v17649_v31 = vld [vmem:[%s19263_s0 + $0x108] sm:$0xf]  ;;  %v3152_v56 = vrot.slane %v3150_v28, 4  ;;  %v17658_v10 = vsel %vm17261_vm2, %v8391_v59, %v8392_v44 }
 0x281   :  { %19931 = vst [vmem:[#allocation17_spill] sm:$0xff] %v17649_v31  ;;  %v3153_v6 = vrot.slane %v17649_v31, 5  ;;  %v8400_v21 = vrot.slane %v8398_v36, 4  ;;  %v3156_v31 = vrot.slane %v17663_v22, 5  ;;  %v8403_v12 = vrot.slane %v8401_v24, 4  ;;  %v9391_v50 = vld [vmem:[%s19266_s3 + $0x1e0] sm:$0xff] }
 0x282   :  { %v17672_v44 = vsel %vm17261_vm2, %v8394_v23, %v8395_v43  ;;  %v17676_v59 = vsel %vm14788_vm12, %v3146_v25, %v3147_v45  ;;  %v12677_v47 = vld [vmem:[%s19263_s0 + $0x5c] sm:$0xf]  ;;  %v19934_v45 = vcombine.low %v17326_v2, %v17337_v5  ;;  %v17700_v43 = vsel %vm14788_vm12, %v3149_v17, %v3150_v28  ;;  %v17709_v25 = vld [vmem:[%s19263_s0 + $0x110] sm:$0xf]  ;;  %v17715_v5 = vld [vmem:[%s19263_s0 + $0x114] sm:$0xf] }
 0x283   :  { %v3155_v42 = vrot.slane %v3153_v6, 4  ;;  %v8404_v22 = vrot.slane %v12677_v47, 7  ;;  %v19935_v47 = vcombine.low %v17384_v7, %v17388_v46  ;;  %v17704_v23 = vsel %vm17261_vm2, %v8397_v14, %v8398_v36  ;;  %19936 = vst [vmem:[#allocation19_spill] sm:$0xff] %v17709_v25  ;;  %19937 = vst [vmem:[#allocation51_spill] sm:$0xff] %v17715_v5 }
 0x284   :  { %9700 = vperm.xlu1 %12349, %v9390_v16   ;;  %9520 = vperm.xlu0 %12348, %v9354_v51   ;;  %v12678_v16 = vld [vmem:[%s19263_s0 + $0x60] sm:$0xf]  ;;  %v3159_v2 = vrot.slane %v17709_v25, 5  ;;  %v3162_v7 = vrot.slane %v17715_v5, 5  ;;  %v19938_v46 = vcombine.low %v17395_v38, %v17421_v18  ;;  %v17724_v28 = vsel %vm17261_vm2, %v8400_v21, %v8401_v24  ;;  %v12681_v18 = vld [vmem:[%s19263_s0 + $0x64] sm:$0xf] }
 0x285   :  { %11347 = vmatmul.mubr.msk.bf16.gmra.mrb[40].mxu1 %vm941_vm3, %v19933_v54  ;;  %v8407_v15 = vrot.slane %v12678_v16, 7  ;;  %v9355_v54 = vld [vmem:[%s19266_s3 + $0xc0] sm:$0xff]  ;;  %v17728_v36 = vsel %vm14788_vm12, %v3152_v56, %v3153_v6  ;;  %v8406_v51 = vrot.slane %v8404_v22, 4  ;;  %v3158_v17 = vrot.slane %v3156_v31, 4  ;;  %v9392_v6 = vld [vmem:[%s19266_s3 + $0x1e8] sm:$0xff] }
 0x286   :  { %11677 = vmatmul.mubr.msk.bf16.vlgmr.msra.gmra.mrb[0].mxu0 %vm941_vm3, %v19934_v45  ;;  %11350 = vmatprep.mubr.msk.bf16.mxu1 %vm941_vm3, %v19935_v47  ;;  %v17732_v14 = vsel %vm14788_vm12, %v3155_v42, %v3156_v31  ;;  %v17736_v16 = vsel %vm17261_vm2, %v8403_v12, %v8404_v22  ;;  %v3161_v38 = vrot.slane %v3159_v2, 4  ;;  %v8410_v21 = vrot.slane %v12681_v18, 7  ;;  %v12682_v42 = vld [vmem:[%s19263_s0 + $0x68] sm:$0xf]  ;;  %v17751_v12 = vld [vmem:[%s19263_s0 + $0x118] sm:$0xf] }
 0x287   :  { %11680 = vmatprep.mubr.msk.bf16.mxu0 %vm941_vm3, %v19938_v46  ;;  %v17743_v56 = vsel %vm17261_vm2, %v8406_v51, %v8407_v15  ;;  %v8409_v24 = vrot.slane %v8407_v15, 4  ;;  %v8413_v31 = vrot.slane %v12682_v42, 7  ;;  %19939 = vst [vmem:[#allocation20_spill] sm:$0xff] %v17751_v12  ;;  %v3165_v22 = vrot.slane %v17751_v12, 5  ;;  %v9356_v15 = vld [vmem:[%s19266_s3 + $0xc8] sm:$0xff] }
 0x288   :  { %9705 = vperm.xlu1 %12349, %v9391_v50   ;;  %9525 = vperm.xlu0 %12348, %v9355_v54   ;;  %v8412_v54 = vrot.slane %v8410_v21, 4  ;;  %v3164_v45 = vrot.slane %v3162_v7, 4  ;;  %v17765_v47 = vld [vmem:[%s19263_s0 + $0x11c] sm:$0xf]  ;;  %v17778_v5 = vsel %vm14788_vm12, %v3158_v17, %v3159_v2  ;;  %v12685_v51 = vld [vmem:[%s19263_s0 + $0x6c] sm:$0xf]  ;;  %v19941_v42 = vcombine.low %v17399_v55, %v17425_v8 }
 0x289   :  { %19940 = vst [vmem:[#allocation54_spill] sm:$0xff] %v17765_v47  ;;  %v3168_v46 = vrot.slane %v17765_v47, 5  ;;  %v3167_v12 = vrot.slane %v3165_v22, 4  ;;  %v17782_v47 = vsel %vm14788_vm12, %v3161_v38, %v3162_v7  ;;  %v8416_v18 = vrot.slane %v12685_v51, 7  ;;  %v17802_v17 = vld [vmem:[%s19263_s0 + $0x120] sm:$0xf] }
 0x28a   :  { %v17793_v2 = vsel %vm17261_vm2, %v8409_v24, %v8410_v21  ;;  %v17797_v7 = vsel %vm17261_vm2, %v8412_v54, %v8413_v31  ;;  %19942 = vst [vmem:[#allocation52_spill] sm:$0xff] %v17802_v17  ;;  %v3171_v38 = vrot.slane %v17802_v17, 5  ;;  %v17808_v55 = vld [vmem:[%s19263_s0 + $0x124] sm:$0xf]  ;;  %v9393_v21 = vld [vmem:[%s19266_s3 + $0x1f0] sm:$0xff]  ;;  %v17827_v54 = vsel %vm14788_vm12, %v3164_v45, %v3165_v22 }
 0x28b   :  { %19943 = vst [vmem:[#allocation53_spill] sm:$0xff] %v17808_v55  ;;  %v3174_v8 = vrot.slane %v17808_v55, 5  ;;  %v9357_v24 = vld [vmem:[%s19266_s3 + $0xd0] sm:$0xff]  ;;  %v17831_v51 = vsel %vm14788_vm12, %v3167_v12, %v3168_v46  ;;  %v3170_v50 = vrot.slane %v3168_v46, 4 }
 0x28c   :  { %9710 = vperm.xlu1 %12349, %v9392_v6   ;;  %9530 = vperm.xlu0 %12348, %v9356_v15   ;;  %v19944_v6 = vcombine.low %v17468_v53, %v17482_v19  ;;  %v19945_v15 = vcombine.low %v17486_v3, %v17496_v33  ;;  %v19946_v53 = vcombine.low %v17500_v0, %v17516_v61  ;;  %v8418_v19 = vrot.slane %v8416_v18, 4  ;;  %v12688_v3 = vld [vmem:[%s19263_s0 + $0x70] sm:$0xf]  ;;  %v12689_v22 = vld [vmem:[%s19263_s0 + $0x74] sm:$0xf]  ;;  %v9394_v61 = vld [vmem:[%s19266_s3 + $0x1f8] sm:$0xff] }
 0x28d   :  { %11351 = vmatmul.mubr.msk.bf16.gmra.mrb[44].mxu1 %vm941_vm3, %v19941_v42  ;;  %v8415_v42 = vrot.slane %v8413_v31, 4  ;;  %v8419_v33 = vrot.slane %v12688_v3, 7  ;;  %v8422_v45 = vrot.slane %v12689_v22, 7  ;;  %v12690_v31 = vld [vmem:[%s19263_s0 + $0x78] sm:$0xf]  ;;  %v3173_v46 = vrot.slane %v3171_v38, 4 }
 0x28e   :  { %11681 = vmatmul.mubr.msk.bf16.gmra.mrb[4].mxu0 %vm941_vm3, %v19944_v6  ;;  %11354 = vmatprep.mubr.msk.bf16.mxu1 %vm941_vm3, %v19945_v15  ;;  %v8425_v12 = vrot.slane %v12690_v31, 7  ;;  %v17853_v6 = vld [vmem:[%s19263_s0 + $0x128] sm:$0xf]  ;;  %v3176_v31 = vrot.slane %v3174_v8, 4  ;;  %v9358_v0 = vld [vmem:[%s19266_s3 + $0xd8] sm:$0xff] }
 0x28f   :  { %11684 = vmatprep.mubr.msk.bf16.mxu0 %vm941_vm3, %v19946_v53  ;;  %19947 = vst [vmem:[#allocation23_spill] sm:$0xff] %v17853_v6  ;;  %v3177_v15 = vrot.slane %v17853_v6, 5  ;;  %v8421_v3 = vrot.slane %v8419_v33, 4  ;;  %v8424_v22 = vrot.slane %v8422_v45, 4  ;;  %v17866_v55 = vsel %vm17261_vm2, %v8415_v42, %v8416_v18  ;;  %v17875_v53 = vld [vmem:[%s19263_s0 + $0x12c] sm:$0xf] }
 0x290   :  { %9715 = vperm.xlu1 %12349, %v9393_v21   ;;  %9535 = vperm.xlu0 %12348, %v9357_v24   ;;  %v17870_v21 = vsel %vm14788_vm12, %v3170_v50, %v3171_v38  ;;  %19948 = vst [vmem:[#allocation22_spill] sm:$0xff] %v17875_v53  ;;  %v3180_v6 = vrot.slane %v17875_v53, 5  ;;  %v17880_v17 = vsel %vm17261_vm2, %v8418_v19, %v8419_v33  ;;  %v8427_v25 = vrot.slane %v8425_v12, 4  ;;  %v12693_v18 = vld [vmem:[%s19263_s0 + $0x7c] sm:$0xf] }
 0x291   :  { %v3179_v24 = vrot.slane %v3177_v15, 4  ;;  %v8428_v42 = vrot.slane %v12693_v18, 7  ;;  %v12694_v50 = vld [vmem:[%s19263_s0 + $0x80] sm:$0xf]  ;;  %v17890_v37 = vsel %vm14788_vm12, %v3173_v46, %v3174_v8  ;;  %v17895_v19 = vld [vmem:[%s19263_s0 + $0x130] sm:$0xf]  ;;  %v19951_v8 = vcombine.low %v17520_v1, %v17530_v41 }
 0x292   :  { %v8431_v38 = vrot.slane %v12694_v50, 7  ;;  %v3182_v53 = vrot.slane %v3180_v6, 4  ;;  %19949 = vst [vmem:[#allocation24_spill] sm:$0xff] %v17895_v19  ;;  %v3183_v33 = vrot.slane %v17895_v19, 5  ;;  %v17901_v18 = vld [vmem:[%s19263_s0 + $0x134] sm:$0xf]  ;;  %v17910_v46 = vsel %vm17261_vm2, %v8421_v3, %v8422_v45 }
 0x293   :  { %19950 = vst [vmem:[#allocation25_spill] sm:$0xff] %v17901_v18  ;;  %v3186_v20 = vrot.slane %v17901_v18, 5  ;;  %v17914_v50 = vsel %vm17261_vm2, %v8424_v22, %v8425_v12  ;;  %v17918_v19 = vsel %vm14788_vm12, %v3176_v31, %v3177_v15  ;;  %v8430_v18 = vrot.slane %v8428_v42, 4  ;;  %v9359_v1 = vld [vmem:[%s19266_s3 + $0xe0] sm:$0xff] }
 0x294   :  { %9720 = vperm.xlu1 %12349, %v9394_v61   ;;  %9540 = vperm.xlu0 %12348, %v9358_v0   ;;  %v9395_v0 = vld [vmem:[%s19266_s3 + $0x200] sm:$0xff]  ;;  %v19952_v41 = vcombine.low %v17534_v49, %v17541_v62  ;;  %v19953_v45 = vcombine.low %v17588_v32, %v17592_v52  ;;  %v17936_v12 = vsel %vm14788_vm12, %v3179_v24, %v3180_v6  ;;  %v3185_v61 = vrot.slane %v3183_v33, 4  ;;  %v2901_v6 = vld [vmem:[%s19263_s0 + $0x13c] sm:$0x1] }
 0x295   :  { %11355 = vmatmul.mubr.msk.bf16.gmra.mrb[48].mxu1 %vm941_vm3, %v19951_v8  ;;  %v8433_v15 = vrot.slane %v8431_v38, 4  ;;  %v12697_v3 = vld [vmem:[%s19263_s0 + $0x84] sm:$0xf]  ;;  %v19954_v49 = vcombine.low %v17603_v4, %v17623_v57  ;;  %v17949_v62 = vsel %vm17261_vm2, %v8427_v25, %v8428_v42  ;;  %v17953_v52 = vsel %vm17261_vm2, %v8430_v18, %v8431_v38  ;;  %v17961_v4 = vld [vmem:[%s19263_s0 + $0x138] sm:$0xf] }
 0x296   :  { %11685 = vmatmul.mubr.msk.bf16.gmra.mrb[8].mxu0 %vm941_vm3, %v19952_v41  ;;  %11358 = vmatprep.mubr.msk.bf16.mxu1 %vm941_vm3, %v19953_v45  ;;  %v8434_v22 = vrot.slane %v12697_v3, 7  ;;  %19955 = vst [vmem:[#allocation55_spill] sm:$0xff] %v17961_v4  ;;  %v3189_v57 = vrot.slane %v17961_v4, 5  ;;  %v17966_v31 = vsel %vm14788_vm12, %v3182_v53, %v3183_v33  ;;  %v17970_v25 = vsel %vm14788_vm12, %v3185_v61, %v3186_v20  ;;  %v12699_v42 = vld [vmem:[%s19263_s0 + $0x88] sm:$0xf] }
 0x297   :  { %11688 = vmatprep.mubr.msk.bf16.mxu0 %vm941_vm3, %v19954_v49  ;;  %v8437_v38 = vrot.slane %v12699_v42, 7  ;;  %v3188_v33 = vrot.slane %v3186_v20, 4  ;;  %v9396_v41 = vld [vmem:[%s19266_s3 + $0x208] sm:$0xff]  ;;  %v3192_v61 = vrot.slane %v2901_v6, 5  ;;  %v4231_v53 = vshrl.u32 %v17206_v26, 16 }
 0x298   :  { %v8436_v24 = vrot.slane %v8434_v22, 4  ;;  %9725 = vperm.xlu1 %12349, %v9395_v0   ;;  %9545 = vperm.xlu0 %12348, %v9359_v1   ;;  %v9360_v45 = vld [vmem:[%s19266_s3 + $0xe8] sm:$0xff]  ;;  %v17991_v1 = vsel %vm17261_vm2, %v8433_v15, %v8434_v22  ;;  %v3191_v42 = vrot.slane %v3189_v57, 4  ;;  %v4234_v8 = vshll.u32 %v17206_v26, 16  ;;  %v12701_v22 = vld [vmem:[%s19263_s0 + $0x90] sm:$0xf] }
 0x299   :  { %v12700_v20 = vld [vmem:[%s19263_s0 + $0x8c] sm:$0xf]  ;;  %v8439_v15 = vrot.slane %v8437_v38, 4  ;;  %v8443_v6 = vrot.slane %v12701_v22, 7  ;;  %v19956_v49 = vcombine.low %v17607_v27, %v17627_v40  ;;  %v4233_v18 = vrot.slane %v4231_v53, 5  ;;  %v9361_v22 = vld [vmem:[%s19266_s3 + $0xf0] sm:$0xff] }
 0x29a   :  { %v8440_v3 = vrot.slane %v12700_v20, 7  ;;  %v18002_v0 = vsel %vm17261_vm2, %v8436_v24, %v8437_v38  ;;  %v4241_v20 = vshrl.u32 %v17212_v30, 16  ;;  %v4236_v32 = vrot.slane %v4234_v8, 6  ;;  %v9397_v38 = vld [vmem:[%s19266_s3 + $0x210] sm:$0xff]  ;;  %v19959_v40 = vld [vmem:[#allocation7_spill] sm:$0xff] }
 0x29b   :  { %v4244_v24 = vshll.u32 %v17212_v30, 16  ;;  %v19958_v27 = vcombine.low %v17676_v59, %v17700_v43  ;;  %v4229_v30 = vrot.slane %v19959_v40, 4  ;;  %v12702_v53 = vld [vmem:[%s19263_s0 + $0x94] sm:$0xf]  ;;  %v10683_v4 = vcombine.low %v17991_v1, %v18002_v0 }
 0x29c   :  { %9730 = vperm.xlu1 %12349, %v9396_v41   ;;  %9550 = vperm.xlu0 %12348, %v9360_v45   ;;  %v8442_v26 = vrot.slane %v8440_v3, 4  ;;  %v19957_v41 = vcombine.low %v17658_v10, %v17672_v44  ;;  %v4243_v8 = vrot.slane %v4241_v20, 5  ;;  %v8446_v45 = vrot.slane %v12702_v53, 7  ;;  %v19962_v20 = vld [vmem:[#allocation27_spill] sm:$0xff] }
 0x29d   :  { %11359 = vmatmul.mubr.msk.bf16.gmra.mrb[52].mxu1 %vm941_vm3, %v19956_v49  ;;  %v12703_v49 = vld [vmem:[%s19263_s0 + $0x98] sm:$0xf]  ;;  %v19960_v44 = vcombine.low %v17704_v23, %v17724_v28  ;;  %v4237_v59 = vor.u32 %v4236_v32, %v4233_v18  ;;  %v4246_v43 = vrot.slane %v4244_v24, 6  ;;  %v18044_v53 = vsel %vm14788_vm12, %v3188_v33, %v3189_v57 }
 0x29e   :  { %11689 = vmatmul.mubr.msk.bf16.gmra.mrb[12].mxu0 %vm941_vm3, %v19957_v41  ;;  %11362 = vmatprep.mubr.msk.bf16.mxu1 %vm941_vm3, %v19958_v27  ;;  %v8449_v10 = vrot.slane %v12703_v49, 7  ;;  %v8445_v41 = vrot.slane %v8443_v6, 4  ;;  %v19961_v27 = vld [vmem:[#allocation26_spill] sm:$0xff]  ;;  %v18048_v49 = vsel %vm14788_vm12, %v3191_v42, %v3192_v61  ;;  %v8448_v23 = vrot.slane %v8446_v45, 4  ;;  %v12704_v42 = vld [vmem:[%s19263_s0 + $0x9c] sm:$0xf] }
 0x29f   :  { %11692 = vmatprep.mubr.msk.bf16.mxu0 %vm941_vm3, %v19960_v44  ;;  %v4257_v40 = vor.u32 %v19962_v20, %v19961_v27  ;;  %v18052_v28 = vsel %vm17261_vm2, %v8439_v15, %v8440_v3  ;;  %v18056_v32 = vsel %vm17261_vm2, %v8442_v26, %v8443_v6  ;;  %v4239_v18 = vrot.slane %v4237_v59, 4  ;;  %v9398_v57 = vld [vmem:[%s19266_s3 + $0x218] sm:$0xff] }
 0x2a0   :  { %9735 = vperm.xlu1 %12349, %v9397_v38   ;;  %9555 = vperm.xlu0 %12348, %v9361_v22   ;;  %v4247_v24 = vor.u32 %v4246_v43, %v4243_v8  ;;  %v18066_v61 = vor.u32 %v16922_v34, %v16607_v60  ;;  %v8451_v3 = vrot.slane %v8449_v10, 4  ;;  %v8452_v15 = vrot.slane %v12704_v42, 7  ;;  %v12705_v60 = vld [vmem:[%s19263_s0 + $0xa0] sm:$0x7] }
 0x2a1   :  { %v4259_v33 = vrot.slane %v4257_v40, 4  ;;  %v18073_v26 = vsel %vm12860_vm7, %v4229_v30, %v4237_v59  ;;  %v18077_v22 = vsel %vm17261_vm2, %v8445_v41, %v8446_v45  ;;  %v8455_v34 = vrot.slane %v12705_v60, 7  ;;  %v8340_v59 = vld [vmem:[%s19263_s0 + $0xb4] sm:$0x8] }
 0x2a2   :  { %v4249_v38 = vrot.slane %v4247_v24, 4  ;;  %v18084_v8 = vsel %vm17261_vm2, %v8448_v23, %v8449_v10  ;;  %v8454_v44 = vrot.slane %v8452_v15, 4  ;;  %v4269_v43 = vrot.slane %v18066_v61, 4  ;;  %v9399_v23 = vld [vmem:[%s19266_s3 + $0x220] sm:$0xff] }
 0x2a3   :  { %v4271_v30 = vshrl.u32 %v17303_v48, 16  ;;  %v19964_v45 = vcombine.low %v17728_v36, %v17732_v14  ;;  %v18097_v10 = vsel %vm12860_vm7, %v4239_v18, %v4247_v24  ;;  %v4274_v41 = vshll.u32 %v17303_v48, 16  ;;  %v9363_v36 = vld [vmem:[%s19266_s3 + $0x100] sm:$0xff] }
 0x2a4   :  { %9740 = vperm.xlu1 %12349, %v9398_v57   ;;  %9560 = vperm.xlu0 %12348, %v9362_v29   ;;  %v4281_v27 = vshrl.u32 %v17309_v11, 16  ;;  %v4284_v20 = vshll.u32 %v17309_v11, 16  ;;  %v19965_v14 = vcombine.low %v17736_v16, %v17743_v56  ;;  %v19966_v48 = vcombine.low %v17778_v5, %v17782_v47 }
 0x2a5   :  { %11363 = vmatmul.mubr.msk.bf16.gmra.mrb[56].mxu1 %vm941_vm3, %v19964_v45  ;;  %v18118_v11 = vsel %vm12860_vm7, %v4249_v38, %v4257_v40  ;;  %v18123_v18 = vsel %vm12860_vm7, %v4259_v33, %v18066_v61  ;;  %v18127_v24 = vsel %vm17261_vm2, %v8451_v3, %v8452_v15  ;;  %v4273_v16 = vrot.slane %v4271_v30, 5  ;;  %v12706_v33 = vld [vmem:[%s19263_s0 + $0xb8] sm:$0xf] }
 0x2a6   :  { %11693 = vmatmul.mubr.msk.bf16.gmra.mrb[16].mxu0 %vm941_vm3, %v19965_v14  ;;  %11366 = vmatprep.mubr.msk.bf16.mxu1 %vm941_vm3, %v19966_v48  ;;  %v19967_v56 = vcombine.low %v17793_v2, %v17797_v7  ;;  %v18135_v5 = vsel %vm17261_vm2, %v8454_v44, %v8455_v34  ;;  %v4276_v47 = vrot.slane %v4274_v41, 6  ;;  %v4283_v40 = vrot.slane %v4281_v27, 5  ;;  %v12707_v7 = vld [vmem:[%s19263_s0 + $0xbc] sm:$0xf]  ;;  %v9400_v34 = vld [vmem:[%s19266_s3 + $0x228] sm:$0xff] }
 0x2a7   :  { %v4286_v57 = vrot.slane %v4284_v20, 6  ;;  %v10667_v29 = vrot.slane %v8340_v59, 11  ;;  %v8459_v61 = vrot.slane %v12706_v33, 7  ;;  %v4291_v3 = vshrl.u32 %v17342_v58, 16 }
 0x2a8   :  { %11696 = vmatprep.mubr.msk.bf16.mxu0 %vm941_vm3, %v19967_v56  ;;  %v4294_v42 = vshll.u32 %v17342_v58, 16  ;;  %9745 = vperm.xlu1 %12349, %v9399_v23   ;;  %v4277_v2 = vor.u32 %v4276_v47, %v4273_v16  ;;  %v8462_v15 = vrot.slane %v12707_v7, 7  ;;  %v4301_v38 = vshrl.u32 %v17367_v9, 16  ;;  %v9364_v58 = vld [vmem:[%s19266_s3 + $0x108] sm:$0xff] }
 0x2a9   :  { %9565 = vperm.xlu0 %12348, %v9363_v36   ;;  %v4304_v60 = vshll.u32 %v17367_v9, 16  ;;  %v18153_v44 = vor.u32 %v4286_v57, %v4283_v40  ;;  %v8461_v30 = vrot.slane %v8459_v61, 4  ;;  %v4293_v59 = vrot.slane %v4291_v3, 5  ;;  %v9401_v57 = vld [vmem:[%s19266_s3 + $0x230] sm:$0xff] }
 0x2aa   :  { %v4296_v45 = vrot.slane %v4294_v42, 6  ;;  %v10333_v41 = vcombine.low %v18044_v53, %v18048_v49  ;;  %v10684_v27 = vcombine.low %v18052_v28, %v18056_v32  ;;  %v10685_v9 = vcombine.low %v18077_v22, %v18084_v8  ;;  %v12714_v32 = vld [vmem:[%s19263_s0 + $0xd8] sm:$0xf]  ;;  %v12715_v22 = vld [vmem:[%s19263_s0 + $0xdc] sm:$0xf] }
 0x2ab   :  { %v4279_v20 = vrot.slane %v4277_v2, 4  ;;  %v10391_v23 = vcombine.low %v18073_v26, %v18097_v10  ;;  %v10392_v36 = vcombine.low %v18118_v11, %v18123_v18  ;;  %v10686_v14 = vcombine.low %v18127_v24, %v18135_v5 }
 0x2ac   :  { %9750 = vperm.xlu1 %12349, %v9400_v34   ;;  %v19968_v48 = vcombine.low %v17827_v54, %v17831_v51  ;;  %v18173_v16 = vsel %vm17261_vm2, %v10667_v29, %v8459_v61  ;;  %v18177_v56 = vsel %vm17261_vm2, %v8461_v30, %v8462_v15  ;;  %v4303_v47 = vrot.slane %v4301_v38, 5  ;;  %v9365_v54 = vld [vmem:[%s19266_s3 + $0x110] sm:$0xff]  ;;  %v12709_v38 = vld [vmem:[%s19263_s0 + $0xc4] sm:$0xf]  ;;  %v9366_v30 = vld [vmem:[%s19266_s3 + $0x118] sm:$0xff] }
 0x2ad   :  { %9570 = vperm.xlu0 %12348, %v9364_v58   ;;  %v4306_v40 = vrot.slane %v4304_v60, 6  ;;  %v19969_v51 = vcombine.low %v17866_v55, %v17880_v17  ;;  %v19970_v29 = vcombine.low %v17870_v21, %v17890_v37  ;;  %v18195_v33 = vsel %vm12860_vm7, %v4269_v43, %v4277_v2  ;;  %v12708_v17 = vld [vmem:[%s19263_s0 + $0xc0] sm:$0xf] }
 0x2ae   :  { %11367 = vmatmul.mubr.msk.bf16.gmra.mrb[60].mxu1 %vm941_vm3, %v19968_v48  ;;  %v18200_v61 = vsel %vm12860_vm7, %v4279_v20, %v18153_v44  ;;  %v4297_v3 = vor.u32 %v4296_v45, %v4293_v59  ;;  %v8465_v55 = vrot.slane %v12708_v17, 7  ;;  %v19971_v37 = vcombine.low %v17910_v46, %v17914_v50  ;;  %v19972_v17 = vld [vmem:[#allocation15_spill] sm:$0xff] }
 0x2af   :  { %11697 = vmatmul.mubr.msk.bf16.gmra.mrb[20].mxu0 %vm941_vm3, %v19969_v51  ;;  %11370 = vmatprep.mubr.msk.bf16.mxu1 %vm941_vm3, %v19970_v29  ;;  %v4289_v21 = vrot.slane %v18153_v44, 4  ;;  %v8464_v43 = vrot.slane %v8462_v15, 4  ;;  %v4311_v42 = vshrl.u32 %v17404_v39, 16  ;;  %v4314_v2 = vshll.u32 %v17404_v39, 16  ;;  %v9402_v44 = vld [vmem:[%s19266_s3 + $0x238] sm:$0xff] }
 0x2b0   :  { %11700 = vmatprep.mubr.msk.bf16.mxu0 %vm941_vm3, %v19971_v37  ;;  %v10687_v7 = vcombine.low %v18173_v16, %v18177_v56  ;;  %v8468_v60 = vrot.slane %v12709_v38, 7  ;;  %v4321_v34 = vshrl.u32 %v17410_v63, 16  ;;  %v4324_v46 = vshll.u32 %v17410_v63, 16  ;;  %9755 = vperm.xlu1 %12349, %v9401_v57  }
 0x2b1   :  { %9575 = vperm.xlu0 %12348, %v9365_v54   ;;  %v10393_v50 = vcombine.low %v18195_v33, %v18200_v61  ;;  %v4307_v15 = vor.u32 %v4306_v40, %v4303_v47  ;;  %v4313_v58 = vrot.slane %v4311_v42, 5  ;;  %v4316_v39 = vrot.slane %v4314_v2, 6  ;;  %v12710_v47 = vld [vmem:[%s19263_s0 + $0xc8] sm:$0xf] }
 0x2b2   :  { %v4299_v59 = vrot.slane %v4297_v3, 4  ;;  %v8467_v45 = vrot.slane %v8465_v55, 4  ;;  %v4323_v20 = vrot.slane %v4321_v34, 5  ;;  %v4326_v63 = vrot.slane %v4324_v46, 6  ;;  %v12711_v46 = vld [vmem:[%s19263_s0 + $0xcc] sm:$0xf] }
 0x2b3   :  { %v4309_v48 = vrot.slane %v4307_v15, 4  ;;  %v4317_v57 = vor.u32 %v4316_v39, %v4313_v58  ;;  %v8471_v40 = vrot.slane %v12710_v47, 7  ;;  %v4331_v54 = vshrl.u32 %v17441_v35, 16 }
 0x2b4   :  { %v4327_v51 = vor.u32 %v4326_v63, %v4323_v20  ;;  %v4334_v29 = vshll.u32 %v17441_v35, 16  ;;  %v4341_v37 = vshrl.u32 %v19972_v17, 16  ;;  %v4344_v42 = vshll.u32 %v19972_v17, 16  ;;  %9760 = vperm.xlu1 %12349, %v9402_v44  }
 0x2b5   :  { %9580 = vperm.xlu0 %12348, %v9366_v30   ;;  %v19973_v2 = vcombine.low %v17918_v19, %v17936_v12  ;;  %v18240_v38 = vsel %vm12860_vm7, %v4289_v21, %v4297_v3  ;;  %v18244_v34 = vsel %vm17261_vm2, %v8464_v43, %v8465_v55  ;;  %v4319_v35 = vrot.slane %v4317_v57, 4  ;;  %v12712_v30 = vld [vmem:[%s19263_s0 + $0xd0] sm:$0xf] }
 0x2b6   :  { %v8474_v58 = vrot.slane %v12711_v46, 7  ;;  %v19974_v39 = vcombine.low %v17949_v62, %v17953_v52  ;;  %v19975_v19 = vcombine.low %v17966_v31, %v17970_v25  ;;  %v18259_v12 = vsel %vm12860_vm7, %v4299_v59, %v4307_v15  ;;  %v19976_v59 = vld [vmem:[#allocation79_spill] sm:$0xff] }
 0x2b7   :  { %11371 = vmatmul.mubr.msk.bf16.gmra.mrb[64].mxu1 %vm941_vm3, %v19973_v2  ;;  %v4333_v3 = vrot.slane %v4331_v54, 5  ;;  %v4336_v55 = vrot.slane %v4334_v29, 6  ;;  %v4343_v21 = vrot.slane %v4341_v37, 5  ;;  %v18267_v62 = vsel %vm17261_vm2, %v8467_v45, %v8468_v60 }
 0x2b8   :  { %11701 = vmatmul.mubr.msk.bf16.gmra.mrb[24].mxu0 %vm941_vm3, %v19974_v39  ;;  %11374 = vmatprep.mubr.msk.bf16.mxu1 %vm941_vm3, %v19975_v19  ;;  %v18271_v52 = vsel %vm12860_vm7, %v4309_v48, %v4317_v57  ;;  %v8470_v31 = vrot.slane %v8468_v60, 4  ;;  %v4346_v25 = vrot.slane %v4344_v42, 6  ;;  %v8473_v43 = vrot.slane %v8471_v40, 4  ;;  %v12713_v57 = vld [vmem:[%s19263_s0 + $0xd4] sm:$0xf] }
 0x2b9   :  { %11704 = vmatprep.mubr.msk.bf16.mxu0 %vm941_vm3, %v10683_v4  ;;  %v4329_v15 = vrot.slane %v4327_v51, 4  ;;  %v4337_v44 = vor.u32 %v4336_v55, %v4333_v3  ;;  %v8477_v0 = vrot.slane %v12712_v30, 7  ;;  %v18278_v4 = vsel %vm12860_vm7, %v4319_v35, %v4327_v51  ;;  %v19977_v51 = vld [vmem:[#allocation49_spill] sm:$0xff]  ;;  %v19978_v3 = vld [vmem:[#allocation80_spill] sm:$0xff] }
 0x2ba   :  { %v8476_v1 = vrot.slane %v8474_v58, 4  ;;  %v4351_v45 = vshrl.u32 %v19976_v59, 16  ;;  %v4354_v20 = vshll.u32 %v19976_v59, 16  ;;  %v4347_v60 = vor.u32 %v4346_v25, %v4343_v21  ;;  %v12716_v59 = vld [vmem:[%s19263_s0 + $0xe0] sm:$0xf] }
 0x2bb   :  { %v4339_v63 = vrot.slane %v4337_v44, 4  ;;  %v8479_v48 = vrot.slane %v8477_v0, 4  ;;  %v8480_v47 = vrot.slane %v12713_v57, 7  ;;  %v10394_v54 = vcombine.low %v18240_v38, %v18259_v12 }
 0x2bc   :  { %v4353_v29 = vrot.slane %v4351_v45, 5  ;;  %v4356_v17 = vrot.slane %v4354_v20, 6  ;;  %v4361_v37 = vshrl.u32 %v19977_v51, 16  ;;  %v10688_v42 = vcombine.low %v18244_v34, %v18267_v62 }
 0x2bd   :  { %v18292_v2 = vsel %vm17261_vm2, %v8470_v31, %v8471_v40  ;;  %v18296_v35 = vsel %vm17261_vm2, %v8473_v43, %v8474_v58  ;;  %v4364_v46 = vshll.u32 %v19977_v51, 16  ;;  %v10395_v39 = vcombine.low %v18271_v52, %v18278_v4  ;;  %v19980_v51 = vld [vmem:[#allocation16_spill] sm:$0xff] }
 0x2be   :  { %v18307_v19 = vsel %vm12860_vm7, %v4329_v15, %v4337_v44  ;;  %v18311_v40 = vsel %vm17261_vm2, %v8476_v1, %v8477_v0  ;;  %v4363_v58 = vrot.slane %v4361_v37, 5  ;;  %v18323_v53 = vsel %vm12860_vm7, %v4339_v63, %v4347_v60 }
 0x2bf   :  { %11375 = vmatmul.mubr.msk.bf16.gmra.mrb[68].mxu1 %vm941_vm3, %v10333_v41  ;;  %v18327_v49 = vsel %vm17261_vm2, %v8479_v48, %v8480_v47  ;;  %v4366_v41 = vrot.slane %v4364_v46, 6  ;;  %v4371_v55 = vshrl.u32 %v19978_v3, 16  ;;  %v4357_v28 = vor.u32 %v4356_v17, %v4353_v29 }
 0x2c0   :  { %11705 = vmatmul.mubr.msk.bf16.gmra.mrb[28].mxu0 %vm941_vm3, %v10684_v27  ;;  %11420 = vmatprep.mubr.msk.bf16.mxu1 %vm941_vm3, %v10391_v23  ;;  %v8483_v26 = vrot.slane %v12714_v32, 7  ;;  %v4374_v10 = vshll.u32 %v19978_v3, 16  ;;  %v19979_v27 = vld [vmem:[#allocation81_spill] sm:$0xff]  ;;  %v10689_v21 = vcombine.low %v18292_v2, %v18296_v35  ;;  %v8486_v8 = vrot.slane %v12715_v22, 7 }
 0x2c1   :  { %11708 = vmatprep.mubr.msk.bf16.mxu0 %vm941_vm3, %v10685_v9  ;;  %v4381_v23 = vshrl.u32 %v19979_v27, 16  ;;  %v4367_v31 = vor.u32 %v4366_v41, %v4363_v58  ;;  %v4373_v9 = vrot.slane %v4371_v55, 5  ;;  %v4349_v25 = vrot.slane %v4347_v60, 4  ;;  %v12717_v58 = vld [vmem:[%s19263_s0 + $0xe4] sm:$0xf] }
 0x2c2   :  { %v4376_v43 = vrot.slane %v4374_v10, 6  ;;  %v4384_v44 = vshll.u32 %v19979_v27, 16  ;;  %v10396_v30 = vcombine.low %v18307_v19, %v18323_v53  ;;  %v10690_v0 = vcombine.low %v18311_v40, %v18327_v49  ;;  %v19982_v10 = vld [vmem:[#allocation17_spill] sm:$0xff] }
 0x2c3   :  { %v4383_v15 = vrot.slane %v4381_v23, 5  ;;  %v8482_v1 = vrot.slane %v8480_v47, 4  ;;  %v8489_v45 = vrot.slane %v12716_v59, 7  ;;  %v4359_v20 = vrot.slane %v4357_v28, 4  ;;  %v12718_v23 = vld [vmem:[%s19263_s0 + $0xe8] sm:$0xf] }
 0x2c4   :  { %v8485_v63 = vrot.slane %v8483_v26, 4  ;;  %v4377_v48 = vor.u32 %v4376_v43, %v4373_v9  ;;  %v4386_v60 = vrot.slane %v4384_v44, 6  ;;  %v4369_v57 = vrot.slane %v4367_v31, 4 }
 0x2c5   :  { %v8488_v29 = vrot.slane %v8486_v8, 4  ;;  %v8491_v17 = vrot.slane %v8489_v45, 4  ;;  %v4391_v37 = vshrl.u32 %v19980_v51, 16  ;;  %v8492_v41 = vrot.slane %v12717_v58, 7  ;;  %v12721_v58 = vld [vmem:[%s19263_s0 + $0xf4] sm:$0xf] }
 0x2c6   :  { %v4379_v47 = vrot.slane %v4377_v48, 4  ;;  %v4387_v46 = vor.u32 %v4386_v60, %v4383_v15  ;;  %v4394_v3 = vshll.u32 %v19980_v51, 16  ;;  %v18371_v11 = vsel %vm12860_vm7, %v4349_v25, %v4357_v28  ;;  %v12720_v51 = vld [vmem:[%s19263_s0 + $0xf0] sm:$0xf] }
 0x2c7   :  { %11421 = vmatmul.mubr.msk.bf16.vlgmr.msra.gmra.mrb[40].mxu1 %vm941_vm3, %v10392_v36  ;;  %v4393_v18 = vrot.slane %v4391_v37, 5  ;;  %v19981_v36 = vld [vmem:[#allocation18_spill] sm:$0xff]  ;;  %v18381_v24 = vsel %vm12860_vm7, %v4359_v20, %v4367_v31  ;;  %v18385_v5 = vsel %vm17261_vm2, %v8482_v1, %v8483_v26  ;;  %v18393_v61 = vsel %vm12860_vm7, %v4369_v57, %v4377_v48  ;;  %v12719_v1 = vld [vmem:[%s19263_s0 + $0xec] sm:$0xf] }
 0x2c8   :  { %11709 = vmatmul.mubr.msk.bf16.gmra.mrb[32].mxu0 %vm941_vm3, %v10686_v14  ;;  %11424 = vmatprep.mubr.msk.bf16.mxu1 %vm941_vm3, %v10393_v50  ;;  %v4401_v55 = vshrl.u32 %v19981_v36, 16  ;;  %v4404_v32 = vshll.u32 %v19981_v36, 16  ;;  %v18389_v14 = vsel %vm17261_vm2, %v8485_v63, %v8486_v8  ;;  %v4396_v33 = vrot.slane %v4394_v3, 6  ;;  %v19983_v8 = vld [vmem:[#allocation82_spill] sm:$0xff]  ;;  %v19985_v3 = vld [vmem:[#allocation51_spill] sm:$0xff] }
 0x2c9   :  { %11712 = vmatprep.mubr.msk.bf16.mxu0 %vm941_vm3, %v10687_v7  ;;  %v18397_v16 = vsel %vm17261_vm2, %v8488_v29, %v8489_v45  ;;  %v18401_v50 = vsel %vm12860_vm7, %v4379_v47, %v4387_v46  ;;  %v18405_v28 = vsel %vm17261_vm2, %v8491_v17, %v8492_v41  ;;  %v4411_v27 = vshrl.u32 %v19982_v10, 16 }
 0x2ca   :  { %v4403_v56 = vrot.slane %v4401_v55, 5  ;;  %v4406_v7 = vrot.slane %v4404_v32, 6  ;;  %v4397_v26 = vor.u32 %v4396_v33, %v4393_v18  ;;  %v8495_v31 = vrot.slane %v12718_v23, 7  ;;  %v18454_v18 = vpop.permute.xlu0 %9405  ;;  %v19986_v23 = vld [vmem:[#allocation20_spill] sm:$0xff] }
 0x2cb   :  { %v4414_v22 = vshll.u32 %v19982_v10, 16  ;;  %v4421_v9 = vshrl.u32 %v19983_v8, 16  ;;  %v4424_v25 = vshll.u32 %v19983_v8, 16  ;;  %v10397_v43 = vcombine.low %v18371_v11, %v18381_v24  ;;  %v12722_v10 = vld [vmem:[%s19263_s0 + $0xf8] sm:$0xf] }
 0x2cc   :  { %v10691_v15 = vcombine.low %v18385_v5, %v18389_v14  ;;  %v4407_v44 = vor.u32 %v4406_v7, %v4403_v56  ;;  %v8498_v59 = vrot.slane %v12719_v1, 7  ;;  %v4389_v45 = vrot.slane %v4387_v46, 4 }
 0x2cd   :  { %v4413_v20 = vrot.slane %v4411_v27, 5  ;;  %v4416_v63 = vrot.slane %v4414_v22, 6  ;;  %v4423_v48 = vrot.slane %v4421_v9, 5  ;;  %v10398_v60 = vcombine.low %v18393_v61, %v18401_v50  ;;  %v12726_v50 = vld [vmem:[%s19263_s0 + $0x108] sm:$0xf] }
 0x2ce   :  { %v10692_v57 = vcombine.low %v18397_v16, %v18405_v28  ;;  %v8494_v29 = vrot.slane %v8492_v41, 4  ;;  %v4426_v17 = vrot.slane %v4424_v25, 6  ;;  %v4399_v38 = vrot.slane %v4397_v26, 4  ;;  %v19987_v25 = vld [vmem:[#allocation54_spill] sm:$0xff]  ;;  %v18503_v40 = vpop.permute.xlu0 %9410  ;;  %v12727_v16 = vld [vmem:[%s19263_s0 + $0x10c] sm:$0xf] }
 0x2cf   :  { %11425 = vmatmul.mubr.msk.bf16.gmra.mrb[44].mxu1 %vm941_vm3, %v10394_v54  ;;  %v8497_v12 = vrot.slane %v8495_v31, 4  ;;  %v4417_v54 = vor.u32 %v4416_v63, %v4413_v20  ;;  %v8501_v37 = vrot.slane %v12720_v51, 7  ;;  %v4409_v34 = vrot.slane %v4407_v44, 4 }
 0x2d0   :  { %11713 = vmatmul.mubr.msk.bf16.gmra.mrb[36].mxu0 %vm941_vm3, %v10688_v42  ;;  %11428 = vmatprep.mubr.msk.bf16.mxu1 %vm941_vm3, %v10395_v39  ;;  %v8500_v62 = vrot.slane %v8498_v59, 4  ;;  %v19984_v42 = vld [vmem:[#allocation19_spill] sm:$0xff]  ;;  %v18448_v4 = vsel %vm12860_vm7, %v4389_v45, %v4397_v26  ;;  %v4427_v46 = vor.u32 %v4426_v17, %v4423_v48  ;;  %v8504_v41 = vrot.slane %v12721_v58, 7 }
 0x2d1   :  { %11716 = vmatprep.mubr.msk.bf16.mxu0 %vm941_vm3, %v10689_v21  ;;  %v4431_v47 = vshrl.u32 %v19984_v42, 16  ;;  %v4434_v52 = vshll.u32 %v19984_v42, 16  ;;  %v4419_v39 = vrot.slane %v4417_v54, 4  ;;  %v8503_v2 = vrot.slane %v8501_v37, 4 }
 0x2d2   :  { %v4441_v11 = vshrl.u32 %v19985_v3, 16  ;;  %v4408_v36 = vsel %vm12860_vm7, %v4399_v38, %v4407_v44  ;;  %v18460_v55 = vsel %vm17261_vm2, %v8494_v29, %v8495_v31  ;;  %v18464_v32 = vsel %vm17261_vm2, %v8497_v12, %v8498_v59  ;;  %v12724_v12 = vld [vmem:[%s19263_s0 + $0x100] sm:$0xf] }
 0x2d3   :  { %v4433_v35 = vrot.slane %v4431_v47, 5  ;;  %v4436_v21 = vrot.slane %v4434_v52, 6  ;;  %v4444_v24 = vshll.u32 %v19985_v3, 16  ;;  %v18469_v5 = vsel %vm12860_vm7, %v4409_v34, %v4417_v54 }
 0x2d4   :  { %v18473_v14 = vsel %vm17261_vm2, %v8500_v62, %v8501_v37  ;;  %v4443_v56 = vrot.slane %v4441_v11, 5  ;;  %v4429_v7 = vrot.slane %v4427_v46, 4  ;;  %v8507_v27 = vrot.slane %v12722_v10, 7  ;;  %v19988_v62 = vld [vmem:[#allocation52_spill] sm:$0xff] }
 0x2d5   :  { %v4437_v33 = vor.u32 %v4436_v21, %v4433_v35  ;;  %v4446_v26 = vrot.slane %v4444_v24, 6  ;;  %v4451_v31 = vshrl.u32 %v19986_v23, 16  ;;  %v18485_v22 = vsel %vm12860_vm7, %v4419_v39, %v4427_v46 }
 0x2d6   :  { %v18489_v8 = vsel %vm17261_vm2, %v8503_v2, %v8504_v41  ;;  %v4454_v9 = vshll.u32 %v19986_v23, 16  ;;  %v4461_v44 = vshrl.u32 %v19987_v25, 16  ;;  %v8506_v53 = vrot.slane %v8504_v41, 4  ;;  %v19989_v2 = vld [vmem:[#allocation53_spill] sm:$0xff] }
 0x2d7   :  { %11429 = vmatmul.mubr.msk.bf16.gmra.mrb[48].mxu1 %vm941_vm3, %v10396_v30  ;;  %v4439_v19 = vrot.slane %v4437_v33, 4  ;;  %v12723_v30 = vld [vmem:[%s19263_s0 + $0xfc] sm:$0xf]  ;;  %v4453_v59 = vrot.slane %v4451_v31, 5  ;;  %v4447_v45 = vor.u32 %v4446_v26, %v4443_v56  ;;  %v8509_v20 = vrot.slane %v8507_v27, 4 }
 0x2d8   :  { %11717 = vmatmul.mubr.msk.bf16.gmra.mrb[40].mxu0 %vm941_vm3, %v10690_v0  ;;  %11432 = vmatprep.mubr.msk.bf16.mxu1 %vm941_vm3, %v10397_v43  ;;  %v8510_v1 = vrot.slane %v12723_v30, 7  ;;  %v4456_v63 = vrot.slane %v4454_v9, 6  ;;  %v4464_v48 = vshll.u32 %v19987_v25, 16  ;;  %v10399_v49 = vcombine.low %v18448_v4, %v4408_v36  ;;  %v12725_v4 = vld [vmem:[%s19263_s0 + $0x104] sm:$0xf] }
 0x2d9   :  { %11720 = vmatprep.mubr.msk.bf16.mxu0 %vm941_vm3, %v10691_v15  ;;  %v10693_v0 = vcombine.low %v18460_v55, %v18464_v32  ;;  %v10400_v43 = vcombine.low %v18469_v5, %v18485_v22  ;;  %v4463_v29 = vrot.slane %v4461_v44, 5  ;;  %v10694_v17 = vcombine.low %v18473_v14, %v18489_v8  ;;  %v18536_v32 = vpop.permute.xlu0 %9415  ;;  %v12729_v14 = vld [vmem:[%s19263_s0 + $0x114] sm:$0xf] }
 0x2da   :  { %v4457_v15 = vor.u32 %v4456_v63, %v4453_v59  ;;  %v4466_v38 = vrot.slane %v4464_v48, 6  ;;  %v8513_v54 = vrot.slane %v12724_v12, 7  ;;  %v4438_v51 = vsel %vm12860_vm7, %v4429_v7, %v4437_v33  ;;  %v12728_v12 = vld [vmem:[%s19263_s0 + $0x110] sm:$0xf] }
 0x2db   :  { %v18519_v37 = vsel %vm17261_vm2, %v8506_v53, %v8507_v27  ;;  %v8512_v34 = vrot.slane %v8510_v1, 4  ;;  %v4471_v42 = vshrl.u32 %v19988_v62, 16  ;;  %v4448_v47 = vsel %vm12860_vm7, %v4439_v19, %v4447_v45  ;;  %v19991_v27 = vld [vmem:[#allocation22_spill] sm:$0xff] }
 0x2dc   :  { %v8511_v52 = vsel %vm17261_vm2, %v8509_v20, %v8510_v1  ;;  %v8516_v39 = vrot.slane %v12725_v4, 7  ;;  %v4474_v46 = vshll.u32 %v19988_v62, 16  ;;  %v4467_v58 = vor.u32 %v4466_v38, %v4463_v29 }
 0x2dd   :  { %v4473_v41 = vrot.slane %v4471_v42, 5  ;;  %v4481_v35 = vshrl.u32 %v19989_v2, 16  ;;  %v4484_v21 = vshll.u32 %v19989_v2, 16  ;;  %v4449_v3 = vrot.slane %v4447_v45, 4  ;;  %v18569_v48 = vpop.permute.xlu0 %9420 }
 0x2de   :  { %v4459_v11 = vrot.slane %v4457_v15, 4  ;;  %v8515_v36 = vrot.slane %v8513_v54, 4  ;;  %v4476_v55 = vrot.slane %v4474_v46, 6  ;;  %v4469_v24 = vrot.slane %v4467_v58, 4  ;;  %v19993_v46 = vld [vmem:[#allocation25_spill] sm:$0xff] }
 0x2df   :  { %11433 = vmatmul.mubr.msk.bf16.gmra.mrb[52].mxu1 %vm941_vm3, %v10398_v60  ;;  %v4483_v5 = vrot.slane %v4481_v35, 5  ;;  %v4486_v33 = vrot.slane %v4484_v21, 6  ;;  %v8518_v56 = vrot.slane %v8516_v39, 4  ;;  %v8519_v60 = vrot.slane %v12726_v50, 7 }
 0x2e0   :  { %11721 = vmatmul.mubr.msk.bf16.gmra.mrb[44].mxu0 %vm941_vm3, %v10692_v57  ;;  %11436 = vmatprep.mubr.msk.bf16.mxu1 %vm941_vm3, %v10399_v49  ;;  %v4477_v61 = vor.u32 %v4476_v55, %v4473_v41  ;;  %v8522_v28 = vrot.slane %v12727_v16, 7  ;;  %v19990_v57 = vld [vmem:[#allocation23_spill] sm:$0xff]  ;;  %v4501_v23 = vshrl.u32 %v19991_v27, 16  ;;  %v4504_v31 = vshll.u32 %v19991_v27, 16 }
 0x2e1   :  { %11724 = vmatprep.mubr.msk.bf16.mxu0 %vm941_vm3, %v10693_v0  ;;  %v4491_v7 = vshrl.u32 %v19990_v57, 16  ;;  %v18551_v26 = vor.u32 %v4486_v33, %v4483_v5  ;;  %v4494_v10 = vshll.u32 %v19990_v57, 16  ;;  %v10401_v22 = vcombine.low %v4438_v51, %v4448_v47  ;;  %v19992_v51 = vld [vmem:[#allocation24_spill] sm:$0xff]  ;;  %v12730_v5 = vld [vmem:[%s19263_s0 + $0x118] sm:$0xf] }
 0x2e2   :  { %v10695_v9 = vcombine.low %v18519_v37, %v8511_v52  ;;  %v4479_v25 = vrot.slane %v4477_v61, 4  ;;  %v8521_v44 = vrot.slane %v8519_v60, 4  ;;  %v4458_v19 = vsel %vm12860_vm7, %v4449_v3, %v4457_v15 }
 0x2e3   :  { %v8514_v53 = vsel %vm17261_vm2, %v8512_v34, %v8513_v54  ;;  %v4493_v30 = vrot.slane %v4491_v7, 5  ;;  %v4496_v1 = vrot.slane %v4494_v10, 6  ;;  %v4468_v59 = vsel %vm12860_vm7, %v4459_v11, %v4467_v58  ;;  %v12732_v10 = vld [vmem:[%s19263_s0 + $0x11c] sm:$0xf] }
 0x2e4   :  { %v8517_v45 = vsel %vm17261_vm2, %v8515_v36, %v8516_v39  ;;  %v4478_v20 = vsel %vm12860_vm7, %v4469_v24, %v4477_v61  ;;  %v8520_v63 = vsel %vm17261_vm2, %v8518_v56, %v8519_v60  ;;  %v4488_v49 = vsel %vm12860_vm7, %v4479_v25, %v18551_v26  ;;  %v18594_v36 = vpop.permute.xlu0 %9425  ;;  %v19994_v56 = vld [vmem:[#allocation55_spill] sm:$0xff] }
 0x2e5   :  { %v8523_v0 = vsel %vm17261_vm2, %v8521_v44, %v8522_v28  ;;  %v4503_v29 = vrot.slane %v4501_v23, 5  ;;  %v4506_v15 = vrot.slane %v4504_v31, 6  ;;  %v4497_v38 = vor.u32 %v4496_v1, %v4493_v30 }
 0x2e6   :  { %v8525_v54 = vrot.slane %v12728_v12, 7  ;;  %v4511_v37 = vshrl.u32 %v19992_v51, 16  ;;  %v4514_v34 = vshll.u32 %v19992_v51, 16  ;;  %v10402_v62 = vcombine.low %v4458_v19, %v4468_v59 }
 0x2e7   :  { %11437 = vmatmul.mubr.msk.bf16.gmra.mrb[56].mxu1 %vm941_vm3, %v10400_v43  ;;  %v10696_v42 = vcombine.low %v8514_v53, %v8517_v45  ;;  %v4489_v43 = vrot.slane %v18551_v26, 4  ;;  %v8524_v47 = vrot.slane %v8522_v28, 4  ;;  %v10403_v52 = vcombine.low %v4478_v20, %v4488_v49  ;;  %v12731_v28 = vld [vmem:[%s19263_s0 + $0x13c] sm:$0x3]  ;;  %v12733_v20 = vld [vmem:[%s19263_s0 + $0x120] sm:$0xf] }
 0x2e8   :  { %11725 = vmatmul.mubr.msk.bf16.gmra.mrb[48].mxu0 %vm941_vm3, %v10694_v17  ;;  %11440 = vmatprep.mubr.msk.bf16.mxu1 %vm941_vm3, %v10401_v22  ;;  %v4513_v4 = vrot.slane %v4511_v37, 5  ;;  %v4516_v39 = vrot.slane %v4514_v34, 6  ;;  %v4521_v58 = vshrl.u32 %v19993_v46, 16  ;;  %v10697_v41 = vcombine.low %v8520_v63, %v8523_v0  ;;  %v18626_v49 = vpop.permute.xlu0 %9430 }
 0x2e9   :  { %11728 = vmatprep.mubr.msk.bf16.mxu0 %vm941_vm3, %v10695_v9  ;;  %v4507_v2 = vor.u32 %v4506_v15, %v4503_v29  ;;  %v8528_v8 = vrot.slane %v12729_v14, 7  ;;  %v4524_v17 = vshll.u32 %v19993_v46, 16  ;;  %v4499_v35 = vrot.slane %v4497_v38, 4  ;;  %v12734_v15 = vld [vmem:[%s19263_s0 + $0x128] sm:$0xf] }
 0x2ea   :  { %v8527_v21 = vrot.slane %v8525_v54, 4  ;;  %v4517_v3 = vor.u32 %v4516_v39, %v4513_v4  ;;  %v4523_v11 = vrot.slane %v4521_v58, 5  ;;  %v8531_v33 = vrot.slane %v12730_v5, 7  ;;  %v12736_v58 = vld [vmem:[%s19263_s0 + $0x12c] sm:$0xf] }
 0x2eb   :  { %v4509_v55 = vrot.slane %v4507_v2, 4  ;;  %v4526_v24 = vrot.slane %v4524_v17, 6  ;;  %v4531_v61 = vshrl.u32 %v19994_v56, 16  ;;  %v8530_v60 = vrot.slane %v8528_v8, 4 }
 0x2ec   :  { %v4519_v50 = vrot.slane %v4517_v3, 4  ;;  %v4534_v16 = vshll.u32 %v19994_v56, 16  ;;  %v4541_v57 = vshrl.u32 %v12731_v28, 16  ;;  %v8533_v26 = vrot.slane %v8531_v33, 4  ;;  %v12739_v56 = vld [vmem:[%s19263_s0 + $0x134] sm:$0xf] }
 0x2ed   :  { %v4527_v7 = vor.u32 %v4526_v24, %v4523_v11  ;;  %v8534_v27 = vrot.slane %v12732_v10, 7  ;;  %v4533_v23 = vrot.slane %v4531_v61, 5  ;;  %v4498_v31 = vsel %vm12860_vm7, %v4489_v43, %v4497_v38 }
 0x2ee   :  { %v8526_v22 = vsel %vm17261_vm2, %v8524_v47, %v8525_v54  ;;  %v4536_v9 = vrot.slane %v4534_v16, 6  ;;  %v4544_v25 = vshll.u32 %v12731_v28, 16  ;;  %v4508_v44 = vsel %vm12860_vm7, %v4499_v35, %v4507_v2  ;;  %v18642_v2 = vpop.permute.xlu0 %9435 }
 0x2ef   :  { %11441 = vmatmul.mubr.msk.bf16.gmra.mrb[60].mxu1 %vm941_vm3, %v10402_v62  ;;  %v8529_v19 = vsel %vm17261_vm2, %v8527_v21, %v8528_v8  ;;  %v4518_v53 = vsel %vm12860_vm7, %v4509_v55, %v4517_v3  ;;  %v4543_v30 = vrot.slane %v4541_v57, 5  ;;  %v4528_v1 = vsel %vm12860_vm7, %v4519_v50, %v4527_v7  ;;  %v12737_v21 = vld [vmem:[%s19263_s0 + $0x130] sm:$0xf]  ;;  %v12738_v55 = vld [vmem:[%s19263_s0 + $0x138] sm:$0xf] }
 0x2f0   :  { %11729 = vmatmul.mubr.msk.bf16.gmra.mrb[52].mxu0 %vm941_vm3, %v10696_v42  ;;  %11444 = vmatprep.mubr.msk.bf16.mxu1 %vm941_vm3, %v10403_v52  ;;  %v4537_v59 = vor.u32 %v4536_v9, %v4533_v23  ;;  %v4546_v45 = vrot.slane %v4544_v25, 6  ;;  %v8537_v63 = vrot.slane %v12733_v20, 7  ;;  %v8532_v0 = vsel %vm17261_vm2, %v8530_v60, %v8531_v33  ;;  %v12735_v42 = vld [vmem:[%s19263_s0 + $0x124] sm:$0xf] }
 0x2f1   :  { %11732 = vmatprep.mubr.msk.bf16.mxu0 %vm941_vm3, %v10697_v41  ;;  %v8535_v29 = vsel %vm17261_vm2, %v8533_v26, %v8534_v27  ;;  %v8543_v38 = vrot.slane %v12734_v15, 7  ;;  %v10404_v12 = vcombine.low %v4498_v31, %v4508_v44  ;;  %v10698_v54 = vcombine.low %v8526_v22, %v8529_v19  ;;  %v12740_v26 = vld [vmem:[%s19263_s0 + $0x13c] sm:$0xf]  ;;  %v12741_v31 = vld [vmem:[%s19263_s0 + $0x140] sm:$0xf] }
 0x2f2   :  { %v4529_v51 = vrot.slane %v4527_v7, 4  ;;  %v10405_v37 = vcombine.low %v4518_v53, %v4528_v1  ;;  %v4539_v34 = vrot.slane %v4537_v59, 4  ;;  %v4547_v62 = vor.u32 %v4546_v45, %v4543_v30  ;;  %v18668_v28 = vpop.permute.xlu0 %9440 }
 0x2f3   :  { %v8540_v43 = vrot.slane %v12735_v42, 7  ;;  %v10699_v47 = vcombine.low %v8532_v0, %v8535_v29  ;;  %v8536_v52 = vrot.slane %v8534_v27, 4  ;;  %v8539_v4 = vrot.slane %v8537_v63, 4 }
 0x2f4   :  { %v8545_v46 = vrot.slane %v8543_v38, 4  ;;  %v8546_v41 = vrot.slane %v12736_v58, 7  ;;  %v4538_v14 = vsel %vm12860_vm7, %v4529_v51, %v4537_v59  ;;  %v4548_v8 = vsel %vm12860_vm7, %v4539_v34, %v4547_v62  ;;  %v12742_v59 = vld [vmem:[%s19263_s0 + $0x144] sm:$0x7]  ;;  %v18708_v51 = vpop.permute.xlu1 %9585 }
 0x2f5   :  { %v8542_v39 = vrot.slane %v8540_v43, 4  ;;  %v8538_v17 = vsel %vm17261_vm2, %v8536_v52, %v8537_v63  ;;  %v8541_v35 = vsel %vm17261_vm2, %v8539_v4, %v8540_v43  ;;  %v8549_v3 = vrot.slane %v12737_v21, 7  ;;  %19995 = vst [vmem:[#allocation28_spill] sm:$0xff] %v18708_v51 }
 0x2f6   :  { %v8547_v6 = vsel %vm17261_vm2, %v8545_v46, %v8546_v41  ;;  %v8555_v24 = vrot.slane %v12738_v55, 7  ;;  %v10406_v5 = vcombine.low %v4538_v14, %v4548_v8  ;;  %v10700_v33 = vcombine.low %v8538_v17, %v8541_v35  ;;  %v18687_v44 = vpop.permute.xlu0 %9445 }
 0x2f7   :  { %11445 = vmatmul.mubr.msk.bf16.gmra.mrb[64].mxu1 %vm941_vm3, %v10404_v12  ;;  %v8544_v11 = vsel %vm17261_vm2, %v8542_v39, %v8543_v38  ;;  %v8552_v61 = vrot.slane %v12739_v56, 7  ;;  %v8548_v60 = vrot.slane %v8546_v41, 4  ;;  %v8551_v16 = vrot.slane %v8549_v3, 4 }
 0x2f8   :  { %11733 = vmatmul.mubr.msk.bf16.gmra.mrb[56].mxu0 %vm941_vm3, %v10698_v54  ;;  %11448 = vmatprep.mubr.msk.bf16.mxu1 %vm941_vm3, %v10405_v37  ;;  %v10701_v50 = vcombine.low %v8544_v11, %v8547_v6  ;;  %v8557_v7 = vrot.slane %v8555_v24, 4  ;;  %v8558_v10 = vrot.slane %v12740_v26, 7  ;;  %v8561_v22 = vrot.slane %v12741_v31, 7  ;;  %v18719_v42 = vpop.permute.xlu1 %9590 }
 0x2f9   :  { %11736 = vmatprep.mubr.msk.bf16.mxu0 %vm941_vm3, %v10699_v47  ;;  %v8554_v57 = vrot.slane %v8552_v61, 4  ;;  %v8550_v27 = vsel %vm17261_vm2, %v8548_v60, %v8549_v3  ;;  %v8553_v23 = vsel %vm17261_vm2, %v8551_v16, %v8552_v61  ;;  %v8564_v45 = vrot.slane %v12742_v59, 7  ;;  %19996 = vst [vmem:[#allocation58_spill] sm:$0xff] %v18719_v42 }
 0x2fa   :  { %v8559_v25 = vsel %vm17261_vm2, %v8557_v7, %v8558_v10  ;;  %v10702_v19 = vcombine.low %v8550_v27, %v8553_v23  ;;  %v8560_v30 = vrot.slane %v8558_v10, 4  ;;  %v8563_v1 = vrot.slane %v8561_v22, 4  ;;  %v18698_v0 = vpop.permute.xlu0 %9450 }
 0x2fb   :  { %v8556_v9 = vsel %vm17261_vm2, %v8554_v57, %v8555_v24 }
 0x2fc   :  { %v10703_v53 = vcombine.low %v8556_v9, %v8559_v25  ;;  %v8562_v20 = vsel %vm17261_vm2, %v8560_v30, %v8561_v22  ;;  %v8565_v63 = vsel %vm17261_vm2, %v8563_v1, %v8564_v45  ;;  %v18727_v4 = vpop.permute.xlu1 %9595 }
 0x2fd   :  { %v10704_v12 = vcombine.low %v8562_v20, %v8565_v63  ;;  %19997 = vst [vmem:[#allocation57_spill] sm:$0xff] %v18727_v4 }
 0x2fe   :  { %v18710_v37 = vpop.permute.xlu0 %9455 }
 0x2ff   :  { %11449 = vmatmul.mubr.msk.bf16.gmra.mrb[68].mxu1 %vm941_vm3, %v10406_v5 }
 0x300   :  { %11737 = vmatmul.mubr.msk.bf16.gmra.mrb[60].mxu0 %vm941_vm3, %v10700_v33  ;;  %v18737_v14 = vpop.permute.xlu1 %9600 }
 0x301   :  { %11740 = vmatprep.mubr.msk.bf16.mxu0 %vm941_vm3, %v10701_v50  ;;  %19998 = vst [vmem:[#allocation29_spill] sm:$0xff] %v18737_v14  ;;  %v12386_v14 = vld [vmem:[%s19267_s4] sm:$0xff]  }
 0x302   :  { %v18723_v47 = vpop.permute.xlu0 %9460 }
 0x304   :  { %v18749_v11 = vpop.permute.xlu1 %9605 }
 0x305   :  { %v18700_v29 = vpop.f32.mrb[0].mxu1  ;;  %19999 = vst [vmem:[#allocation30_spill] sm:$0xff] %v18749_v11 }
 0x306   :  { %v18702_v15 = vpop.f32.mrb[1].mxu1  ;;  %v18731_v46 = vpop.permute.xlu0 %9465 }
 0x307   :  { %v18704_v38 = vpop.f32.mrb[2].mxu1 }
 0x308   :  { %11741 = vmatmul.mubr.msk.bf16.gmra.mrb[64].mxu0 %vm941_vm3, %v10702_v19  ;;  %v18706_v54 = vpop.f32.mrb[3].mxu1  ;;  %v18759_v33 = vpop.permute.xlu1 %9610 }
 0x309   :  { %11744 = vmatprep.mubr.msk.bf16.mxu0 %vm941_vm3, %v10703_v53  ;;  %20000 = vst [vmem:[#allocation31_spill] sm:$0xff] %v18759_v33 }
 0x30a   :  { %v18739_v8 = vpop.permute.xlu0 %9470 }
 0x30c   :  { %v18767_v60 = vpop.permute.xlu1 %9615 }
 0x30d   :  { %v18713_v34 = vpop.f32.mrb[4].mxu1  ;;  %20001 = vst [vmem:[#allocation56_spill] sm:$0xff] %v18767_v60 }
 0x30e   :  { %v18715_v13 = vpop.f32.mrb[5].mxu1  ;;  %v18751_v6 = vpop.permute.xlu0 %9475 }
 0x30f   :  { %v18717_v62 = vpop.f32.mrb[6].mxu1 }
 0x310   :  { %11745 = vmatmul.mubr.msk.bf16.gmra.mrb[68].mxu0 %vm941_vm3, %v10704_v12  ;;  %v18721_v43 = vpop.f32.mrb[7].mxu1  ;;  %v18777_v10 = vpop.permute.xlu1 %9620  ;;  %vm9835_vm3 = vcmask 261120  }
 0x311   :  { %20002 = vst [vmem:[#allocation48_spill] sm:$0xff] %v18777_v10 }
 0x312   :  { %v18763_v61 = vpop.permute.xlu0 %9480 }
 0x314   :  { %v18789_v25 = vpop.permute.xlu1 %9625 }
 0x315   :  { %20005 = vst [vmem:[#allocation60_spill] sm:$0xff] %v18789_v25 }
 0x316   :  { %v18725_v52 = vpop.f32.mrb[8].mxu1  ;;  %v18771_v57 = vpop.permute.xlu0 %9485 }
 0x317   :  { %v18729_v39 = vpop.f32.mrb[9].mxu1 }
 0x318   :  { %v18733_v58 = vpop.f32.mrb[10].mxu1  ;;  %v18799_v59 = vpop.permute.xlu1 %9630 }
 0x319   :  { %v18735_v41 = vpop.f32.mrb[11].mxu1  ;;  %20009 = vst [vmem:[#allocation33_spill] sm:$0xff] %v18799_v59 }
 0x31a   :  { %v18779_v27 = vpop.permute.xlu0 %9490 }
 0x31c   :  { %v18807_v12 = vpop.permute.xlu1 %9635 }
 0x31d   :  { %20012 = vst [vmem:[#allocation63_spill] sm:$0xff] %v18807_v12  ;;  %v19461_v12 = vmov 0.0  }
 0x31e   :  { %v18741_v17 = vpop.f32.mrb[12].mxu1  ;;  %v18791_v19 = vpop.permute.xlu0 %9495  ;;  %11748 = vmatprep.subr.bf16.mxu1 %v19461_v12 }
 0x31f   :  { %v18743_v35 = vpop.f32.mrb[13].mxu1  ;;  %11749 = vmatpush3.bf16.msra.mxu1 %v12386_v14 }
 0x320   :  { %v18745_v21 = vpop.f32.mrb[14].mxu1  ;;  %v18817_v11 = vpop.permute.xlu1 %9640  ;;  %11750 = vmatprep.subr.bf16.mxu1 %v19461_v12 }
 0x321   :  { %v18747_v3 = vpop.f32.mrb[15].mxu1  ;;  %20016 = vst [vmem:[#allocation37_spill] sm:$0xff] %v18817_v11 }
 0x322   :  { %v18803_v20 = vpop.permute.xlu0 %9500 }
 0x324   :  { %v18834_v11 = vpop.permute.xlu1 %9645 }
 0x325   :  { %20021 = vst [vmem:[#allocation41_spill] sm:$0xff] %v18834_v11 }
 0x326   :  { %v18811_v25 = vpop.permute.xlu0 %9505 }
 0x327   :  { %v18753_v55 = vpop.f32.mrb[16].mxu1 }
 0x328   :  { %v18755_v24 = vpop.f32.mrb[17].mxu1 }
 0x329   :  { %v18757_v5 = vpop.f32.mrb[18].mxu1 }
 0x32a   :  { %v18761_v56 = vpop.f32.mrb[19].mxu1  ;;  %v18819_v42 = vpop.permute.xlu0 %9510 }
 0x330   :  { %v18765_v50 = vpop.f32.mrb[20].mxu1 }
 0x331   :  { %v18769_v16 = vpop.f32.mrb[21].mxu1 }
 0x332   :  { %v18773_v7 = vpop.f32.mrb[22].mxu1 }
 0x333   :  { %v18775_v26 = vpop.f32.mrb[23].mxu1 }
 0x338   :  { %v18781_v23 = vpop.f32.mrb[24].mxu1 }
 0x339   :  { %v18783_v31 = vpop.f32.mrb[25].mxu1 }
 0x33a   :  { %v18785_v22 = vpop.f32.mrb[26].mxu1 }
 0x33b   :  { %20003 = vst [vmem:[#allocation32_spill] sm:$0xff] %v18785_v22  ;;  %v18787_v9 = vpop.f32.mrb[27].mxu1 }
 0x33c   :  { %20004 = vst [vmem:[#allocation59_spill] sm:$0xff] %v18787_v9 }
 0x340   :  { %v18793_v53 = vpop.f32.mrb[28].mxu1 }
 0x341   :  { %20006 = vst [vmem:[#allocation61_spill] sm:$0xff] %v18793_v53  ;;  %v18795_v30 = vpop.f32.mrb[29].mxu1 }
 0x342   :  { %20007 = vst [vmem:[#allocation62_spill] sm:$0xff] %v18795_v30  ;;  %v18797_v1 = vpop.f32.mrb[30].mxu1 }
 0x343   :  { %20008 = vst [vmem:[#allocation34_spill] sm:$0xff] %v18797_v1  ;;  %v18801_v45 = vpop.f32.mrb[31].mxu1 }
 0x344   :  { %20010 = vst [vmem:[#allocation35_spill] sm:$0xff] %v18801_v45  ;;  %v18844_v45 = vpop.permute.xlu1 %9650 }
 0x345   :  { %20022 = vst [vmem:[#allocation42_spill] sm:$0xff] %v18844_v45 }
 0x348   :  { %v18805_v63 = vpop.f32.mrb[32].mxu1  ;;  %v18856_v22 = vpop.permute.xlu1 %9655 }
 0x349   :  { %20011 = vst [vmem:[#allocation36_spill] sm:$0xff] %v18805_v63  ;;  %v18809_v10 = vpop.f32.mrb[33].mxu1 }
 0x34a   :  { %20013 = vst [vmem:[#allocation64_spill] sm:$0xff] %v18809_v10  ;;  %v18813_v33 = vpop.f32.mrb[34].mxu1  ;;  %v18841_v10 = vld [vmem:[%s19265_s2] ss:$0 sm:$0xff] }
 0x34b   :  { %20014 = vst [vmem:[#allocation65_spill] sm:$0xff] %v18813_v33  ;;  %v18815_v60 = vpop.f32.mrb[35].mxu1 }
 0x34c   :  { %20015 = vst [vmem:[#allocation66_spill] sm:$0xff] %v18815_v60  ;;  %v18836_v60 = vpop.permute.xlu0 %9515 }
 0x350   :  { %v18821_v59 = vpop.f32.mrb[36].mxu1 }
 0x351   :  { %20017 = vst [vmem:[#allocation38_spill] sm:$0xff] %v18821_v59  ;;  %v18826_v51 = vpop.f32.mrb[37].mxu1 }
 0x352   :  { %20018 = vst [vmem:[#allocation39_spill] sm:$0xff] %v18826_v51  ;;  %v18829_v4 = vpop.f32.mrb[38].mxu1 }
 0x353   :  { %20019 = vst [vmem:[#allocation40_spill] sm:$0xff] %v18829_v4  ;;  %v18831_v33 = vpop.f32.mrb[39].mxu1  ;;  %v18847_v4 = vpop.permute.xlu0 %9520 }
 0x354   :  { %20020 = vst [vmem:[#allocation67_spill] sm:$0xff] %v18831_v33  ;;  %20023 = vst [vmem:[#allocation68_spill] sm:$0xff] %v18847_v4 }
 0x359   :  { %v11678_v59 = vpop.f32.mrb[0].mxu0 }
 0x35a   :  { %v11758_v51 = vadd.f32 %v11678_v59, %v18700_v29  ;;  %v8821_v63 = vpop.f32.mrb[1].mxu0 }
 0x35b   :  { %v11759_v14 = vadd.f32 %v8821_v63, %v18702_v15  ;;  %v11679_v33 = vpop.f32.mrb[2].mxu0 }
 0x35c   :  { %v9189_v12 = vadd.f32 %v11758_v51, %v18841_v10  ;;  %v11760_v11 = vadd.f32 %v11679_v33, %v18704_v38  ;;  %v8824_v1 = vpop.f32.mrb[3].mxu0  ;;  %v18859_v33 = vpop.permute.xlu0 %9525 }
 0x35d   :  { %v9187_v30 = vadd.f32 %v11759_v14, %v18841_v10  ;;  %v11761_v53 = vadd.f32 %v8824_v1, %v18706_v54 }
 0x35e   :  { %v9261_v9 = vmax.f32 %v9189_v12, 0.0  ;;  %v9190_v29 = vadd.f32 %v11760_v11, %v18841_v10 }
 0x35f   :  { %v9259_v59 = vmax.f32 %v9187_v30, 0.0  ;;  %v9188_v45 = vadd.f32 %v11761_v53, %v18841_v10 }
 0x360   :  { %v9765_v15 = vmul.f32 %v18536_v32, %v9261_v9  ;;  %v9262_v63 = vmax.f32 %v9190_v29, 0.0 }
 0x361   :  { %v9763_v51 = vmul.f32 %v18454_v18, %v9259_v59  ;;  %v9260_v4 = vmax.f32 %v9188_v45, 0.0  ;;  %v11682_v38 = vpop.f32.mrb[4].mxu0 }
 0x362   :  { %v9766_v54 = vmul.f32 %v18569_v48, %v9262_v63  ;;  %v11762_v1 = vadd.f32 %v11682_v38, %v18713_v34  ;;  %v8837_v11 = vpop.f32.mrb[5].mxu0  ;;  %v18876_v38 = vpop.permute.xlu0 %9530 }
 0x363   :  { %v9764_v30 = vmul.f32 %v18503_v40, %v9260_v4  ;;  %v11763_v53 = vadd.f32 %v8837_v11, %v18715_v13  ;;  %v11683_v32 = vpop.f32.mrb[6].mxu0  ;;  %v9836_v45 = vsel %vm9835_vm3, %v9763_v51, 0.0  ;;  %v18872_v40 = vpop.permute.xlu1 %9660  ;;  %v9839_v13 = vsel %vm9835_vm3, %v9765_v15, 0.0 }
 0x364   :  { %v9193_v9 = vadd.f32 %v11762_v1, %v18841_v10  ;;  %v11764_v12 = vadd.f32 %v11683_v32, %v18717_v62  ;;  %v8840_v18 = vpop.f32.mrb[7].mxu0  ;;  %v9841_v1 = vsel %vm9835_vm3, %v9766_v54, 0.0 }
 0x365   :  { %v9837_v14 = vsel %vm9835_vm3, %v9764_v30, 0.0  ;;  %v9191_v29 = vadd.f32 %v11763_v53, %v18841_v10  ;;  %v11765_v48 = vadd.f32 %v8840_v18, %v18721_v43 }
 0x366   :  { %v9838_v34 = vadd.f32 %v9837_v14, %v9836_v45  ;;  %v9194_v59 = vadd.f32 %v11764_v12, %v18841_v10  ;;  %v9265_v4 = vmax.f32 %v9193_v9, 0.0 }
 0x367   :  { %v9263_v63 = vmax.f32 %v9191_v29, 0.0  ;;  %v9192_v62 = vadd.f32 %v11765_v48, %v18841_v10 }
 0x368   :  { %v9840_v51 = vadd.f32 %v9839_v13, %v9838_v34  ;;  %v9266_v30 = vmax.f32 %v9194_v59, 0.0  ;;  %v9769_v15 = vmul.f32 %v18642_v2, %v9265_v4  ;;  %v18887_v59 = vpop.permute.xlu1 %9665 }
 0x369   :  { %v9767_v11 = vmul.f32 %v18594_v36, %v9263_v63  ;;  %v9264_v43 = vmax.f32 %v9192_v62, 0.0  ;;  %v11686_v53 = vpop.f32.mrb[8].mxu0 }
 0x36a   :  { %v9842_v32 = vadd.f32 %v9841_v1, %v9840_v51  ;;  %v11766_v12 = vadd.f32 %v11686_v53, %v18725_v52  ;;  %v8853_v18 = vpop.f32.mrb[9].mxu0  ;;  %v9770_v52 = vmul.f32 %v18668_v28, %v9266_v30  ;;  %v9847_v62 = vsel %vm9835_vm3, %v9769_v15, 0.0 }
 0x36b   :  { %v9843_v9 = vsel %vm9835_vm3, %v9767_v11, 0.0  ;;  %v9768_v45 = vmul.f32 %v18626_v49, %v9264_v43  ;;  %v11767_v14 = vadd.f32 %v8853_v18, %v18729_v39  ;;  %v11687_v29 = vpop.f32.mrb[10].mxu0  ;;  %v18893_v49 = vpop.permute.xlu0 %9535 }
 0x36c   :  { %v9844_v48 = vadd.f32 %v9843_v9, %v9842_v32  ;;  %v9197_v54 = vadd.f32 %v11766_v12, %v18841_v10  ;;  %v11768_v36 = vadd.f32 %v11687_v29, %v18733_v58  ;;  %v8856_v34 = vpop.f32.mrb[11].mxu0  ;;  %v9849_v28 = vsel %vm9835_vm3, %v9770_v52, 0.0  ;;  %v18901_v9 = vpop.permute.xlu1 %9670 }
 0x36d   :  { %v9845_v13 = vsel %vm9835_vm3, %v9768_v45, 0.0  ;;  %v9195_v2 = vadd.f32 %v11767_v14, %v18841_v10  ;;  %v11769_v4 = vadd.f32 %v8856_v34, %v18735_v41 }
 0x36e   :  { %v9846_v39 = vadd.f32 %v9845_v13, %v9844_v48  ;;  %v9198_v63 = vadd.f32 %v11768_v36, %v18841_v10  ;;  %v9269_v51 = vmax.f32 %v9197_v54, 0.0 }
 0x36f   :  { %v9267_v58 = vmax.f32 %v9195_v2, 0.0  ;;  %v9196_v1 = vadd.f32 %v11769_v4, %v18841_v10  ;;  %v18907_v54 = vpop.permute.xlu0 %9540 }
 0x370   :  { %v9848_v11 = vadd.f32 %v9847_v62, %v9846_v39  ;;  %v9270_v43 = vmax.f32 %v9198_v63, 0.0  ;;  %v9773_v15 = vmul.f32 %v18710_v37, %v9269_v51 }
 0x371   :  { %v9771_v30 = vmul.f32 %v18687_v44, %v9267_v58  ;;  %v9268_v53 = vmax.f32 %v9196_v1, 0.0  ;;  %v11690_v32 = vpop.f32.mrb[12].mxu0 }
 0x372   :  { %v9850_v41 = vadd.f32 %v9849_v28, %v9848_v11  ;;  %v11770_v12 = vadd.f32 %v11690_v32, %v18741_v17  ;;  %v8869_v18 = vpop.f32.mrb[13].mxu0  ;;  %v9774_v52 = vmul.f32 %v18723_v47, %v9270_v43  ;;  %v9855_v4 = vsel %vm9835_vm3, %v9773_v15, 0.0 }
 0x373   :  { %v9851_v45 = vsel %vm9835_vm3, %v9771_v30, 0.0  ;;  %v9772_v14 = vmul.f32 %v18698_v0, %v9268_v53  ;;  %v11771_v29 = vadd.f32 %v8869_v18, %v18743_v35  ;;  %v11691_v48 = vpop.f32.mrb[14].mxu0 }
 0x374   :  { %v9852_v44 = vadd.f32 %v9851_v45, %v9850_v41  ;;  %v9201_v36 = vadd.f32 %v11770_v12, %v18841_v10  ;;  %v11772_v34 = vadd.f32 %v11691_v48, %v18745_v21  ;;  %v8872_v17 = vpop.f32.mrb[15].mxu0  ;;  %v18918_v21 = vpop.permute.xlu1 %9675  ;;  %v9857_v47 = vsel %vm9835_vm3, %v9774_v52, 0.0 }
 0x375   :  { %v9853_v13 = vsel %vm9835_vm3, %v9772_v14, 0.0  ;;  %v9199_v37 = vadd.f32 %v11771_v29, %v18841_v10  ;;  %v11773_v2 = vadd.f32 %v8872_v17, %v18747_v3  ;;  %v18922_v3 = vpop.permute.xlu0 %9545 }
 0x376   :  { %v9854_v0 = vadd.f32 %v9853_v13, %v9852_v44  ;;  %v9202_v35 = vadd.f32 %v11772_v34, %v18841_v10  ;;  %v9273_v39 = vmax.f32 %v9201_v36, 0.0  ;;  %v20024_v13 = vmov 0.0  }
 0x377   :  { %v9271_v63 = vmax.f32 %v9199_v37, 0.0  ;;  %v9200_v62 = vadd.f32 %v11773_v2, %v18841_v10  ;;  %11752 = vmatprep.mubr.msk.bf16.mxu1 %vm12770_vm4, %v20024_v13 }
 0x378   :  { %v9856_v51 = vadd.f32 %v9855_v4, %v9854_v0  ;;  %v9274_v1 = vmax.f32 %v9202_v35, 0.0  ;;  %v9777_v32 = vmul.f32 %v18751_v6, %v9273_v39  ;;  %v18939_v34 = vpop.permute.xlu1 %9680 }
 0x379   :  { %v9775_v58 = vmul.f32 %v18731_v46, %v9271_v63  ;;  %v9272_v11 = vmax.f32 %v9200_v62, 0.0  ;;  %v11694_v28 = vpop.f32.mrb[16].mxu0  ;;  %v18944_v37 = vpop.permute.xlu0 %9550 }
 0x37a   :  { %v9858_v30 = vadd.f32 %v9857_v47, %v9856_v51  ;;  %v11774_v43 = vadd.f32 %v11694_v28, %v18753_v55  ;;  %v8885_v53 = vpop.f32.mrb[17].mxu0  ;;  %v9778_v48 = vmul.f32 %v18763_v61, %v9274_v1 }
 0x37b   :  { %v9859_v41 = vsel %vm9835_vm3, %v9775_v58, 0.0  ;;  %v9776_v12 = vmul.f32 %v18739_v8, %v9272_v11  ;;  %v11775_v18 = vadd.f32 %v8885_v53, %v18755_v24  ;;  %v11695_v15 = vpop.f32.mrb[18].mxu0  ;;  %v12387_v24 = vld [vmem:[%s19267_s4 + $0x8] sm:$0xff]  }
 0x37c   :  { %v9860_v45 = vadd.f32 %v9859_v41, %v9858_v30  ;;  %v9205_v46 = vadd.f32 %v11774_v43, %v18841_v10  ;;  %v11776_v14 = vadd.f32 %v11695_v15, %v18757_v5  ;;  %v8888_v29 = vpop.f32.mrb[19].mxu0  ;;  %v9863_v5 = vsel %vm9835_vm3, %v9777_v32, 0.0  ;;  %11751 = vmatpush3.bf16.msra.mxu1 %v12387_v24  ;;  %v18955_v32 = vpop.permute.xlu1 %9685 }
 0x37d   :  { %v9861_v55 = vsel %vm9835_vm3, %v9776_v12, 0.0  ;;  %v9203_v44 = vadd.f32 %v11775_v18, %v18841_v10  ;;  %v11777_v6 = vadd.f32 %v8888_v29, %v18761_v56  ;;  %v9865_v2 = vsel %vm9835_vm3, %v9778_v48, 0.0 }
 0x37e   :  { %v9862_v36 = vadd.f32 %v9861_v55, %v9860_v45  ;;  %v9206_v8 = vadd.f32 %v11776_v14, %v18841_v10  ;;  %v9277_v17 = vmax.f32 %v9205_v46, 0.0 }
 0x37f   :  { %v9275_v52 = vmax.f32 %v9203_v44, 0.0  ;;  %v9204_v61 = vadd.f32 %v11777_v6, %v18841_v10 }
 0x380   :  { %v9864_v56 = vadd.f32 %v9863_v5, %v9862_v36  ;;  %v9278_v35 = vmax.f32 %v9206_v8, 0.0  ;;  %v9781_v47 = vmul.f32 %v18791_v19, %v9277_v17  ;;  %v18969_v8 = vpop.permute.xlu1 %9690 }
 0x381   :  { %v9779_v0 = vmul.f32 %v18771_v57, %v9275_v52  ;;  %v9276_v4 = vmax.f32 %v9204_v61, 0.0 }
 0x382   :  { %v11698_v39 = vpop.f32.mrb[20].mxu0  ;;  %v9866_v63 = vadd.f32 %v9865_v2, %v9864_v56  ;;  %v9871_v15 = vsel %vm9835_vm3, %v9781_v47, 0.0  ;;  %v20025_v2 = vld [vmem:[#allocation32_spill] sm:$0xff] }
 0x383   :  { %v11778_v62 = vadd.f32 %v11698_v39, %v18765_v50  ;;  %v8901_v51 = vpop.f32.mrb[21].mxu0  ;;  %v9867_v58 = vsel %vm9835_vm3, %v9779_v0, 0.0  ;;  %v9780_v1 = vmul.f32 %v18779_v27, %v9276_v4  ;;  %v9782_v50 = vmul.f32 %v18803_v20, %v9278_v35  ;;  %v18961_v27 = vpop.permute.xlu0 %9555  ;;  %v20026_v35 = vld [vmem:[#allocation68_spill] sm:$0xff] }
 0x384   :  { %v11779_v11 = vadd.f32 %v8901_v51, %v18769_v16  ;;  %v11699_v28 = vpop.f32.mrb[22].mxu0  ;;  %v9868_v30 = vadd.f32 %v9867_v58, %v9866_v63  ;;  %v20027_v63 = vld [vmem:[#allocation59_spill] sm:$0xff] }
 0x385   :  { %v9209_v43 = vadd.f32 %v11778_v62, %v18841_v10  ;;  %v11780_v57 = vadd.f32 %v11699_v28, %v18773_v7  ;;  %v8904_v53 = vpop.f32.mrb[23].mxu0  ;;  %v9869_v41 = vsel %vm9835_vm3, %v9780_v1, 0.0  ;;  %v9873_v20 = vsel %vm9835_vm3, %v9782_v50, 0.0  ;;  %v18986_v28 = vpop.permute.xlu1 %9695 }
 0x386   :  { %v9207_v19 = vadd.f32 %v11779_v11, %v18841_v10  ;;  %v11781_v12 = vadd.f32 %v8904_v53, %v18775_v26  ;;  %v9870_v16 = vadd.f32 %v9869_v41, %v9868_v30 }
 0x387   :  { %v9210_v18 = vadd.f32 %v11780_v57, %v18841_v10  ;;  %v9281_v45 = vmax.f32 %v9209_v43, 0.0  ;;  %v18975_v13 = vpop.permute.xlu0 %9560 }
 0x388   :  { %v9279_v7 = vmax.f32 %v9207_v19, 0.0  ;;  %v9208_v46 = vadd.f32 %v11781_v12, %v18841_v10  ;;  %v9872_v14 = vadd.f32 %v9871_v15, %v9870_v16  ;;  %v20028_v12 = vld [vmem:[#allocation61_spill] sm:$0xff] }
 0x389   :  { %v9282_v48 = vmax.f32 %v9210_v18, 0.0  ;;  %v9785_v24 = vmul.f32 %v18836_v60, %v9281_v45 }
 0x38a   :  { %v9783_v29 = vmul.f32 %v18811_v25, %v9279_v7  ;;  %v9280_v55 = vmax.f32 %v9208_v46, 0.0  ;;  %v9874_v26 = vadd.f32 %v9873_v20, %v9872_v14  ;;  %v20029_v46 = vld [vmem:[#allocation62_spill] sm:$0xff] }
 0x38b   :  { %v11702_v44 = vpop.f32.mrb[24].mxu0  ;;  %v9786_v4 = vmul.f32 %v20026_v35, %v9282_v48  ;;  %v9879_v51 = vsel %vm9835_vm3, %v9785_v24, 0.0  ;;  %v9566_v41 = vpop.permute.xlu0 %9565  ;;  %v20030_v48 = vld [vmem:[#allocation34_spill] sm:$0xff] }
 0x38c   :  { %v11782_v6 = vadd.f32 %v11702_v44, %v18781_v23  ;;  %v8917_v36 = vpop.f32.mrb[25].mxu0  ;;  %v9875_v5 = vsel %vm9835_vm3, %v9783_v29, 0.0  ;;  %v9784_v17 = vmul.f32 %v18819_v42, %v9280_v55 }
 0x38d   :  { %v11783_v52 = vadd.f32 %v8917_v36, %v18783_v31  ;;  %v11703_v61 = vpop.f32.mrb[26].mxu0  ;;  %v9876_v25 = vadd.f32 %v9875_v5, %v9874_v26  ;;  %v9881_v30 = vsel %vm9835_vm3, %v9786_v4, 0.0 }
 0x38e   :  { %v9213_v56 = vadd.f32 %v11782_v6, %v18841_v10  ;;  %v11784_v0 = vadd.f32 %v11703_v61, %v20025_v2  ;;  %v8920_v23 = vpop.f32.mrb[27].mxu0  ;;  %v9877_v39 = vsel %vm9835_vm3, %v9784_v17, 0.0  ;;  %v19002_v17 = vpop.permute.xlu1 %9700 }
 0x38f   :  { %v9211_v60 = vadd.f32 %v11783_v52, %v18841_v10  ;;  %v11785_v62 = vadd.f32 %v8920_v23, %v20027_v63  ;;  %v9878_v42 = vadd.f32 %v9877_v39, %v9876_v25  ;;  %v9571_v2 = vpop.permute.xlu0 %9570 }
 0x390   :  { %v9214_v31 = vadd.f32 %v11784_v0, %v18841_v10  ;;  %v9285_v47 = vmax.f32 %v9213_v56, 0.0 }
 0x391   :  { %v9283_v58 = vmax.f32 %v9211_v60, 0.0  ;;  %v9212_v1 = vadd.f32 %v11785_v62, %v18841_v10  ;;  %v9880_v11 = vadd.f32 %v9879_v51, %v9878_v42  ;;  %v20032_v42 = vld [vmem:[#allocation36_spill] sm:$0xff] }
 0x392   :  { %v9286_v57 = vmax.f32 %v9214_v31, 0.0  ;;  %v9789_v15 = vmul.f32 %v18893_v49, %v9285_v47  ;;  %v20031_v49 = vld [vmem:[#allocation35_spill] sm:$0xff] }
 0x393   :  { %v9787_v43 = vmul.f32 %v18859_v33, %v9283_v58  ;;  %v9284_v53 = vmax.f32 %v9212_v1, 0.0  ;;  %v11706_v50 = vpop.f32.mrb[28].mxu0  ;;  %v9882_v19 = vadd.f32 %v9881_v30, %v9880_v11  ;;  %v20033_v30 = vld [vmem:[#allocation64_spill] sm:$0xff] }
 0x394   :  { %v11786_v16 = vadd.f32 %v11706_v50, %v20028_v12  ;;  %v8933_v18 = vpop.f32.mrb[29].mxu0  ;;  %v9790_v26 = vmul.f32 %v18907_v54, %v9286_v57  ;;  %v9887_v52 = vsel %vm9835_vm3, %v9789_v15, 0.0 }
 0x395   :  { %v9883_v45 = vsel %vm9835_vm3, %v9787_v43, 0.0  ;;  %v9788_v7 = vmul.f32 %v18876_v38, %v9284_v53  ;;  %v11787_v14 = vadd.f32 %v8933_v18, %v20029_v46  ;;  %v11707_v20 = vpop.f32.mrb[30].mxu0 }
 0x396   :  { %v9884_v29 = vadd.f32 %v9883_v45, %v9882_v19  ;;  %v9217_v33 = vadd.f32 %v11786_v16, %v18841_v10  ;;  %v11788_v55 = vadd.f32 %v11707_v20, %v20030_v48  ;;  %v8936_v44 = vpop.f32.mrb[31].mxu0  ;;  %v9889_v23 = vsel %vm9835_vm3, %v9790_v26, 0.0  ;;  %v20034_v19 = vld [vmem:[#allocation65_spill] sm:$0xff]  ;;  %v20035_v45 = vld [vmem:[#allocation66_spill] sm:$0xff] }
 0x397   :  { %v9885_v6 = vsel %vm9835_vm3, %v9788_v7, 0.0  ;;  %v9215_v36 = vadd.f32 %v11787_v14, %v18841_v10  ;;  %v11789_v24 = vadd.f32 %v8936_v44, %v20031_v49 }
 0x398   :  { %v9886_v5 = vadd.f32 %v9885_v6, %v9884_v29  ;;  %v9218_v38 = vadd.f32 %v11788_v55, %v18841_v10  ;;  %v9289_v61 = vmax.f32 %v9217_v33, 0.0  ;;  %v19030_v55 = vpop.permute.xlu1 %9705 }
 0x399   :  { %v9287_v25 = vmax.f32 %v9215_v36, 0.0  ;;  %v9216_v56 = vadd.f32 %v11789_v24, %v18841_v10 }
 0x39a   :  { %v9888_v0 = vadd.f32 %v9887_v52, %v9886_v5  ;;  %v19006_v54 = vpop.f32.mrb[40].mxu1  ;;  %v9290_v4 = vmax.f32 %v9218_v38, 0.0  ;;  %v9793_v58 = vmul.f32 %v18961_v27, %v9289_v61  ;;  %v20036_v52 = vld [vmem:[#allocation38_spill] sm:$0xff] }
 0x39b   :  { %v9791_v35 = vmul.f32 %v18922_v3, %v9287_v25  ;;  %v9288_v39 = vmax.f32 %v9216_v56, 0.0  ;;  %v11710_v60 = vpop.f32.mrb[32].mxu0  ;;  %v19010_v63 = vpop.f32.mrb[41].mxu1 }
 0x39c   :  { %v9890_v62 = vadd.f32 %v9889_v23, %v9888_v0  ;;  %v11790_v31 = vadd.f32 %v11710_v60, %v20032_v42  ;;  %v8949_v51 = vpop.f32.mrb[33].mxu0  ;;  %v19013_v47 = vpop.f32.mrb[42].mxu1  ;;  %v9794_v18 = vmul.f32 %v18975_v13, %v9290_v4  ;;  %v9895_v20 = vsel %vm9835_vm3, %v9793_v58, 0.0  ;;  %v20037_v4 = vld [vmem:[#allocation39_spill] sm:$0xff] }
 0x39d   :  { %v9891_v1 = vsel %vm9835_vm3, %v9791_v35, 0.0  ;;  %v9792_v11 = vmul.f32 %v18944_v37, %v9288_v39  ;;  %v11791_v43 = vadd.f32 %v8949_v51, %v20033_v30  ;;  %v11711_v3 = vpop.f32.mrb[34].mxu0  ;;  %v19019_v57 = vpop.f32.mrb[43].mxu1  ;;  %v20038_v51 = vld [vmem:[#allocation40_spill] sm:$0xff] }
 0x39e   :  { %v9892_v53 = vadd.f32 %v9891_v1, %v9890_v62  ;;  %v9221_v50 = vadd.f32 %v11790_v31, %v18841_v10  ;;  %v11792_v12 = vadd.f32 %v11711_v3, %v20034_v19  ;;  %v8952_v16 = vpop.f32.mrb[35].mxu0  ;;  %v9576_v37 = vpop.permute.xlu0 %9575  ;;  %v9897_v26 = vsel %vm9835_vm3, %v9794_v18, 0.0  ;;  %v20039_v3 = vld [vmem:[#allocation67_spill] sm:$0xff] }
 0x39f   :  { %v9893_v15 = vsel %vm9835_vm3, %v9792_v11, 0.0  ;;  %v9219_v27 = vadd.f32 %v11791_v43, %v18841_v10  ;;  %v11793_v7 = vadd.f32 %v8952_v16, %v20035_v45  ;;  %v20040_v45 = vld [vmem:[#allocation57_spill] sm:$0xff] }
 0x3a0   :  { %v9894_v46 = vadd.f32 %v9893_v15, %v9892_v53  ;;  %v9222_v14 = vadd.f32 %v11792_v12, %v18841_v10  ;;  %v9293_v29 = vmax.f32 %v9221_v50, 0.0  ;;  %v19052_v15 = vpop.permute.xlu1 %9710 }
 0x3a1   :  { %v9291_v33 = vmax.f32 %v9219_v27, 0.0  ;;  %v9220_v48 = vadd.f32 %v11793_v7, %v18841_v10 }
 0x3a2   :  { %v9896_v44 = vadd.f32 %v9895_v20, %v9894_v46  ;;  %v19032_v13 = vpop.f32.mrb[44].mxu1  ;;  %v9294_v36 = vmax.f32 %v9222_v14, 0.0  ;;  %v9797_v0 = vmul.f32 %v9576_v37, %v9293_v29  ;;  %v20041_v20 = vld [vmem:[#allocation28_spill] sm:$0xff] }
 0x3a3   :  { %v9795_v6 = vmul.f32 %v9566_v41, %v9291_v33  ;;  %v9292_v49 = vmax.f32 %v9220_v48, 0.0  ;;  %v11714_v24 = vpop.f32.mrb[36].mxu0  ;;  %v19035_v5 = vpop.f32.mrb[45].mxu1 }
 0x3a4   :  { %v9898_v38 = vadd.f32 %v9897_v26, %v9896_v44  ;;  %v11794_v61 = vadd.f32 %v11714_v24, %v20036_v52  ;;  %v8965_v25 = vpop.f32.mrb[37].mxu0  ;;  %v19038_v56 = vpop.f32.mrb[46].mxu1  ;;  %v9903_v12 = vsel %vm9835_vm3, %v9797_v0, 0.0  ;;  %v20043_v52 = vld [vmem:[#allocation58_spill] sm:$0xff] }
 0x3a5   :  { %v9899_v23 = vsel %vm9835_vm3, %v9795_v6, 0.0  ;;  %v9796_v35 = vmul.f32 %v9571_v2, %v9292_v49  ;;  %v11795_v39 = vadd.f32 %v8965_v25, %v20037_v4  ;;  %v11715_v60 = vpop.f32.mrb[38].mxu0  ;;  %v19042_v62 = vpop.f32.mrb[47].mxu1  ;;  %v20042_v6 = vld [vmem:[#allocation29_spill] sm:$0xff] }
 0x3a6   :  { %v9581_v41 = vpop.permute.xlu0 %9580  ;;  %v9900_v42 = vadd.f32 %v9899_v23, %v9898_v38  ;;  %v9225_v31 = vadd.f32 %v11794_v61, %v18841_v10  ;;  %v11796_v58 = vadd.f32 %v11715_v60, %v20038_v51  ;;  %v8968_v1 = vpop.f32.mrb[39].mxu0 }
 0x3a7   :  { %v9798_v11 = vmul.f32 %v9581_v41, %v9294_v36  ;;  %v9901_v30 = vsel %vm9835_vm3, %v9796_v35, 0.0  ;;  %v9223_v43 = vadd.f32 %v11795_v39, %v18841_v10  ;;  %v11797_v53 = vadd.f32 %v8968_v1, %v20039_v3 }
 0x3a8   :  { %v9902_v2 = vadd.f32 %v9901_v30, %v9900_v42  ;;  %v9297_v50 = vmax.f32 %v9225_v31, 0.0  ;;  %v9226_v19 = vadd.f32 %v11796_v58, %v18841_v10  ;;  %v19080_v30 = vpop.permute.xlu1 %9715 }
 0x3a9   :  { %v9295_v16 = vmax.f32 %v9223_v43, 0.0  ;;  %v9224_v18 = vadd.f32 %v11797_v53, %v18841_v10  ;;  %v9905_v14 = vsel %vm9835_vm3, %v9798_v11, 0.0 }
 0x3aa   :  { %v9904_v27 = vadd.f32 %v9903_v12, %v9902_v2  ;;  %v9801_v7 = vmul.f32 %v20040_v45, %v9297_v50  ;;  %v9298_v37 = vmax.f32 %v9226_v19, 0.0  ;;  %v19055_v46 = vpop.f32.mrb[48].mxu1  ;;  %v20044_v2 = vld [vmem:[#allocation30_spill] sm:$0xff] }
 0x3ab   :  { %v9799_v29 = vmul.f32 %v20041_v20, %v9295_v16  ;;  %v9296_v33 = vmax.f32 %v9224_v18, 0.0  ;;  %v11718_v48 = vpop.f32.mrb[40].mxu0  ;;  %v19059_v44 = vpop.f32.mrb[49].mxu1  ;;  %v20045_v16 = vld [vmem:[#allocation56_spill] sm:$0xff] }
 0x3ac   :  { %v19061_v26 = vadd.f32 %v9905_v14, %v9904_v27  ;;  %v9802_v36 = vmul.f32 %v20042_v6, %v9298_v37  ;;  %v11798_v49 = vadd.f32 %v11718_v48, %v19006_v54  ;;  %v8981_v24 = vpop.f32.mrb[41].mxu0  ;;  %v19065_v38 = vpop.f32.mrb[50].mxu1  ;;  %v9916_v58 = vsel %vm9835_vm3, %v9801_v7, 0.0  ;;  %v20046_v14 = vld [vmem:[#allocation31_spill] sm:$0xff] }
 0x3ad   :  { %v9800_v61 = vmul.f32 %v20043_v52, %v9296_v33  ;;  %v11799_v25 = vadd.f32 %v8981_v24, %v19010_v63  ;;  %v11719_v0 = vpop.f32.mrb[42].mxu0  ;;  %v19069_v23 = vpop.f32.mrb[51].mxu1  ;;  %v9913_v60 = vsel %vm9835_vm3, %v9799_v29, 0.0 }
 0x3ae   :  { %v9229_v35 = vadd.f32 %v11798_v49, %v18841_v10  ;;  %v11800_v4 = vadd.f32 %v11719_v0, %v19013_v47  ;;  %v8984_v39 = vpop.f32.mrb[43].mxu0  ;;  %v9918_v53 = vsel %vm9835_vm3, %v9802_v36, 0.0  ;;  %v20047_v49 = vld [vmem:[#allocation48_spill] sm:$0xff] }
 0x3af   :  { %v9914_v41 = vsel %vm9835_vm3, %v9800_v61, 0.0  ;;  %v9227_v54 = vadd.f32 %v11799_v25, %v18841_v10  ;;  %v11801_v42 = vadd.f32 %v8984_v39, %v19019_v57 }
 0x3b0   :  { %v9915_v31 = vadd.f32 %v9914_v41, %v9913_v60  ;;  %v9301_v51 = vmax.f32 %v9229_v35, 0.0  ;;  %v9230_v63 = vadd.f32 %v11800_v4, %v18841_v10 }
 0x3b1   :  { %v9299_v1 = vmax.f32 %v9227_v54, 0.0  ;;  %v9228_v11 = vadd.f32 %v11801_v42, %v18841_v10  ;;  %v19106_v42 = vpop.permute.xlu1 %9720 }
 0x3b2   :  { %v9917_v47 = vadd.f32 %v9916_v58, %v9915_v31  ;;  %v9302_v43 = vmax.f32 %v9230_v63, 0.0  ;;  %v19082_v3 = vpop.f32.mrb[52].mxu1  ;;  %v9805_v18 = vmul.f32 %v20045_v16, %v9301_v51  ;;  %v20048_v63 = vld [vmem:[#allocation60_spill] sm:$0xff] }
 0x3b3   :  { %v9803_v50 = vmul.f32 %v20044_v2, %v9299_v1  ;;  %v9300_v57 = vmax.f32 %v9228_v11, 0.0  ;;  %v11722_v19 = vpop.f32.mrb[44].mxu0  ;;  %v19086_v12 = vpop.f32.mrb[53].mxu1 }
 0x3b4   :  { %v9919_v27 = vadd.f32 %v9918_v53, %v9917_v47  ;;  %v8997_v45 = vpop.f32.mrb[45].mxu0  ;;  %v19089_v7 = vpop.f32.mrb[54].mxu1  ;;  %v11802_v29 = vadd.f32 %v11722_v19, %v19032_v13  ;;  %v9806_v24 = vmul.f32 %v20047_v49, %v9302_v43  ;;  %v9924_v39 = vsel %vm9835_vm3, %v9805_v18, 0.0  ;;  %v20050_v18 = vld [vmem:[#allocation33_spill] sm:$0xff] }
 0x3b5   :  { %v9920_v37 = vsel %vm9835_vm3, %v9803_v50, 0.0  ;;  %v9804_v20 = vmul.f32 %v20046_v14, %v9300_v57  ;;  %v11803_v33 = vadd.f32 %v8997_v45, %v19035_v5  ;;  %v11723_v48 = vpop.f32.mrb[46].mxu0  ;;  %v19095_v6 = vpop.f32.mrb[55].mxu1  ;;  %v20049_v57 = vld [vmem:[#allocation63_spill] sm:$0xff] }
 0x3b6   :  { %v9921_v36 = vadd.f32 %v9920_v37, %v9919_v27  ;;  %v11804_v52 = vadd.f32 %v11723_v48, %v19038_v56  ;;  %v9000_v61 = vpop.f32.mrb[47].mxu0  ;;  %v9233_v0 = vadd.f32 %v11802_v29, %v18841_v10  ;;  %v9926_v51 = vsel %vm9835_vm3, %v9806_v24, 0.0  ;;  %v20051_v48 = vld [vmem:[#allocation37_spill] sm:$0xff] }
 0x3b7   :  { %v9922_v25 = vsel %vm9835_vm3, %v9804_v20, 0.0  ;;  %v9231_v35 = vadd.f32 %v11803_v33, %v18841_v10  ;;  %v11805_v4 = vadd.f32 %v9000_v61, %v19042_v62 }
 0x3b8   :  { %v9923_v13 = vadd.f32 %v9922_v25, %v9921_v36  ;;  %v9234_v5 = vadd.f32 %v11804_v52, %v18841_v10  ;;  %v9305_v60 = vmax.f32 %v9233_v0, 0.0 }
 0x3b9   :  { %v9303_v41 = vmax.f32 %v9231_v35, 0.0  ;;  %v9232_v54 = vadd.f32 %v11805_v4, %v18841_v10 }
 0x3ba   :  { %v9925_v56 = vadd.f32 %v9924_v39, %v9923_v13  ;;  %v19108_v31 = vpop.f32.mrb[56].mxu1  ;;  %v9306_v1 = vmax.f32 %v9234_v5, 0.0  ;;  %v9809_v19 = vmul.f32 %v20049_v57, %v9305_v60  ;;  %v19132_v13 = vpop.permute.xlu1 %9725  ;;  %v20052_v60 = vld [vmem:[#allocation41_spill] sm:$0xff] }
 0x3bb   :  { %v9807_v58 = vmul.f32 %v20048_v63, %v9303_v41  ;;  %v9304_v62 = vmax.f32 %v9232_v54, 0.0  ;;  %v11726_v11 = vpop.f32.mrb[48].mxu0  ;;  %v19112_v47 = vpop.f32.mrb[57].mxu1 }
 0x3bc   :  { %v9927_v43 = vadd.f32 %v9926_v51, %v9925_v56  ;;  %v11806_v53 = vadd.f32 %v11726_v11, %v19055_v46  ;;  %v9013_v2 = vpop.f32.mrb[49].mxu0  ;;  %v19115_v50 = vpop.f32.mrb[58].mxu1  ;;  %v9810_v36 = vmul.f32 %v20051_v48, %v9306_v1  ;;  %v9932_v25 = vsel %vm9835_vm3, %v9809_v19, 0.0 }
 0x3bd   :  { %v9928_v16 = vsel %vm9835_vm3, %v9807_v58, 0.0  ;;  %v9808_v27 = vmul.f32 %v20050_v18, %v9304_v62  ;;  %v11807_v45 = vadd.f32 %v9013_v2, %v19059_v44  ;;  %v11727_v37 = vpop.f32.mrb[50].mxu0  ;;  %v19121_v14 = vpop.f32.mrb[59].mxu1 }
 0x3be   :  { %v9929_v20 = vadd.f32 %v9928_v16, %v9927_v43  ;;  %v9237_v29 = vadd.f32 %v11806_v53, %v18841_v10  ;;  %v11808_v33 = vadd.f32 %v11727_v37, %v19065_v38  ;;  %v9016_v46 = vpop.f32.mrb[51].mxu0  ;;  %v9934_v39 = vsel %vm9835_vm3, %v9810_v36, 0.0  ;;  %v20053_v53 = vld [vmem:[#allocation42_spill] sm:$0xff] }
 0x3bf   :  { %v9930_v49 = vsel %vm9835_vm3, %v9808_v27, 0.0  ;;  %v9235_v24 = vadd.f32 %v11807_v45, %v18841_v10  ;;  %v11809_v52 = vadd.f32 %v9016_v46, %v19069_v23 }
 0x3c0   :  { %v9931_v61 = vadd.f32 %v9930_v49, %v9929_v20  ;;  %v9238_v44 = vadd.f32 %v11808_v33, %v18841_v10  ;;  %v9309_v0 = vmax.f32 %v9237_v29, 0.0 }
 0x3c1   :  { %v9307_v35 = vmax.f32 %v9235_v24, 0.0  ;;  %v9236_v4 = vadd.f32 %v11809_v52, %v18841_v10  ;;  %v19158_v24 = vpop.permute.xlu1 %9730 }
 0x3c2   :  { %v9933_v38 = vadd.f32 %v9932_v25, %v9931_v61  ;;  %v19134_v5 = vpop.f32.mrb[60].mxu1  ;;  %v9310_v54 = vmax.f32 %v9238_v44, 0.0  ;;  %v9813_v11 = vmul.f32 %v18856_v22, %v9309_v0 }
 0x3c3   :  { %v9811_v41 = vmul.f32 %v20052_v60, %v9307_v35  ;;  %v9308_v23 = vmax.f32 %v9236_v4, 0.0  ;;  %v11730_v56 = vpop.f32.mrb[52].mxu0  ;;  %v19138_v51 = vpop.f32.mrb[61].mxu1 }
 0x3c4   :  { %v9935_v63 = vadd.f32 %v9934_v39, %v9933_v38  ;;  %v11810_v58 = vadd.f32 %v11730_v56, %v19082_v3  ;;  %v9029_v1 = vpop.f32.mrb[53].mxu0  ;;  %v19141_v62 = vpop.f32.mrb[62].mxu1  ;;  %v9814_v37 = vmul.f32 %v18872_v40, %v9310_v54  ;;  %v9940_v46 = vsel %vm9835_vm3, %v9813_v11, 0.0 }
 0x3c5   :  { %v9936_v43 = vsel %vm9835_vm3, %v9811_v41, 0.0  ;;  %v9812_v2 = vmul.f32 %v20053_v53, %v9308_v23  ;;  %v11811_v57 = vadd.f32 %v9029_v1, %v19086_v12  ;;  %v11731_v19 = vpop.f32.mrb[54].mxu0  ;;  %v19147_v16 = vpop.f32.mrb[63].mxu1 }
 0x3c6   :  { %v9937_v18 = vadd.f32 %v9936_v43, %v9935_v63  ;;  %v9241_v27 = vadd.f32 %v11810_v58, %v18841_v10  ;;  %v11812_v45 = vadd.f32 %v11731_v19, %v19089_v7  ;;  %v9032_v3 = vpop.f32.mrb[55].mxu0  ;;  %v9942_v40 = vsel %vm9835_vm3, %v9814_v37, 0.0 }
 0x3c7   :  { %v9938_v20 = vsel %vm9835_vm3, %v9812_v2, 0.0  ;;  %v9239_v22 = vadd.f32 %v11811_v57, %v18841_v10  ;;  %v11813_v29 = vadd.f32 %v9032_v3, %v19095_v6 }
 0x3c8   :  { %v9939_v33 = vadd.f32 %v9938_v20, %v9937_v18  ;;  %v9242_v12 = vadd.f32 %v11812_v45, %v18841_v10  ;;  %v9313_v48 = vmax.f32 %v9241_v27, 0.0 }
 0x3c9   :  { %v9311_v36 = vmax.f32 %v9239_v22, 0.0  ;;  %v9240_v49 = vadd.f32 %v11813_v29, %v18841_v10 }
 0x3ca   :  { %v9941_v7 = vadd.f32 %v9940_v46, %v9939_v33  ;;  %v19160_v52 = vpop.f32.mrb[64].mxu1  ;;  %v9314_v44 = vmax.f32 %v9242_v12, 0.0  ;;  %v9817_v60 = vmul.f32 %v18918_v21, %v9313_v48 }
 0x3cb   :  { %v9815_v61 = vmul.f32 %v18887_v59, %v9311_v36  ;;  %v9312_v6 = vmax.f32 %v9240_v49, 0.0  ;;  %v11734_v25 = vpop.f32.mrb[56].mxu0  ;;  %v19164_v0 = vpop.f32.mrb[65].mxu1 }
 0x3cc   :  { %v9943_v35 = vadd.f32 %v9942_v40, %v9941_v7  ;;  %v11814_v4 = vadd.f32 %v11734_v25, %v19108_v31  ;;  %v9045_v38 = vpop.f32.mrb[57].mxu0  ;;  %v19167_v39 = vpop.f32.mrb[66].mxu1  ;;  %v9818_v11 = vmul.f32 %v18939_v34, %v9314_v44  ;;  %v9948_v57 = vsel %vm9835_vm3, %v9817_v60, 0.0 }
 0x3cd   :  { %v9944_v41 = vsel %vm9835_vm3, %v9815_v61, 0.0  ;;  %v9816_v54 = vmul.f32 %v18901_v9, %v9312_v6  ;;  %v11815_v23 = vadd.f32 %v9045_v38, %v19112_v47  ;;  %v11735_v59 = vpop.f32.mrb[58].mxu0  ;;  %v19173_v56 = vpop.f32.mrb[67].mxu1 }
 0x3ce   :  { %v9945_v63 = vadd.f32 %v9944_v41, %v9943_v35  ;;  %v9245_v58 = vadd.f32 %v11814_v4, %v18841_v10  ;;  %v11816_v1 = vadd.f32 %v11735_v59, %v19115_v50  ;;  %v9048_v31 = vpop.f32.mrb[59].mxu0  ;;  %v19181_v9 = vpop.permute.xlu1 %9735  ;;  %v9950_v34 = vsel %vm9835_vm3, %v9818_v11, 0.0 }
 0x3cf   :  { %v9946_v43 = vsel %vm9835_vm3, %v9816_v54, 0.0  ;;  %v9243_v21 = vadd.f32 %v11815_v23, %v18841_v10  ;;  %v11817_v53 = vadd.f32 %v9048_v31, %v19121_v14 }
 0x3d0   :  { %v9947_v47 = vadd.f32 %v9946_v43, %v9945_v63  ;;  %v9246_v2 = vadd.f32 %v11816_v1, %v18841_v10  ;;  %v9317_v19 = vmax.f32 %v9245_v58, 0.0 }
 0x3d1   :  { %v9315_v18 = vmax.f32 %v9243_v21, 0.0  ;;  %v9244_v50 = vadd.f32 %v11817_v53, %v18841_v10 }
 0x3d2   :  { %v9949_v27 = vadd.f32 %v9948_v57, %v9947_v47  ;;  %v19186_v45 = vpop.f32.mrb[68].mxu1  ;;  %v9318_v37 = vmax.f32 %v9246_v2, 0.0  ;;  %v9821_v48 = vmul.f32 %v18986_v28, %v9317_v19  ;;  %v19201_v61 = vpop.permute.xlu1 %9740 }
 0x3d3   :  { %v9819_v3 = vmul.f32 %v18955_v32, %v9315_v18  ;;  %v9316_v14 = vmax.f32 %v9244_v50, 0.0  ;;  %v11738_v20 = vpop.f32.mrb[60].mxu0  ;;  %v19190_v22 = vpop.f32.mrb[69].mxu1 }
 0x3d4   :  { %v9951_v29 = vadd.f32 %v9950_v34, %v9949_v27  ;;  %v11818_v33 = vadd.f32 %v11738_v20, %v19134_v5  ;;  %v9061_v12 = vpop.f32.mrb[61].mxu0  ;;  %v19193_v46 = vpop.f32.mrb[70].mxu1  ;;  %v9822_v35 = vmul.f32 %v19002_v17, %v9318_v37  ;;  %v9956_v60 = vsel %vm9835_vm3, %v9821_v48, 0.0 }
 0x3d5   :  { %v9952_v36 = vsel %vm9835_vm3, %v9819_v3, 0.0  ;;  %v9820_v49 = vmul.f32 %v18969_v8, %v9316_v14  ;;  %v11819_v7 = vadd.f32 %v9061_v12, %v19138_v51  ;;  %v11739_v32 = vpop.f32.mrb[62].mxu0  ;;  %v19199_v40 = vpop.f32.mrb[71].mxu1 }
 0x3d6   :  { %v9953_v44 = vadd.f32 %v9952_v36, %v9951_v29  ;;  %v9249_v6 = vadd.f32 %v11818_v33, %v18841_v10  ;;  %v11820_v5 = vadd.f32 %v11739_v32, %v19141_v62  ;;  %v9064_v25 = vpop.f32.mrb[63].mxu0  ;;  %v9958_v62 = vsel %vm9835_vm3, %v9822_v35, 0.0  ;;  %v9746_v31 = vpop.permute.xlu1 %9745 }
 0x3d7   :  { %v9954_v28 = vsel %vm9835_vm3, %v9820_v49, 0.0  ;;  %v9247_v4 = vadd.f32 %v11819_v7, %v18841_v10  ;;  %v11821_v8 = vadd.f32 %v9064_v25, %v19147_v16 }
 0x3d8   :  { %v9955_v51 = vadd.f32 %v9954_v28, %v9953_v44  ;;  %v9250_v38 = vadd.f32 %v11820_v5, %v18841_v10  ;;  %v9321_v41 = vmax.f32 %v9249_v6, 0.0 }
 0x3d9   :  { %v9319_v54 = vmax.f32 %v9247_v4, 0.0  ;;  %v9248_v23 = vadd.f32 %v11821_v8, %v18841_v10 }
 0x3da   :  { %v9957_v59 = vadd.f32 %v9956_v60, %v9955_v51  ;;  %v9322_v63 = vmax.f32 %v9250_v38, 0.0  ;;  %v9825_v21 = vmul.f32 %v19080_v30, %v9321_v41  ;;  %v9751_v29 = vpop.permute.xlu1 %9750 }
 0x3db   :  { %v9823_v17 = vmul.f32 %v19030_v55, %v9319_v54  ;;  %v9320_v58 = vmax.f32 %v9248_v23, 0.0  ;;  %v11742_v1 = vpop.f32.mrb[64].mxu0  ;;  %v12743_v55 = vld [vmem:[%s19265_s2] ss:$0 sm:$0xff] }
 0x3dc   :  { %v9959_v11 = vadd.f32 %v9958_v62, %v9957_v59  ;;  %v11822_v16 = vadd.f32 %v11742_v1, %v19160_v52  ;;  %v9077_v43 = vpop.f32.mrb[65].mxu0  ;;  %v9826_v52 = vmul.f32 %v19106_v42, %v9322_v63 }
 0x3dd   :  { %v9960_v53 = vsel %vm9835_vm3, %v9823_v17, 0.0  ;;  %v9824_v47 = vmul.f32 %v19052_v15, %v9320_v58  ;;  %v11823_v10 = vadd.f32 %v9077_v43, %v19164_v0  ;;  %v11743_v2 = vpop.f32.mrb[66].mxu0  ;;  %v9964_v0 = vsel %vm9835_vm3, %v9825_v21, 0.0 }
 0x3de   :  { %v9961_v57 = vadd.f32 %v9960_v53, %v9959_v11  ;;  %v9253_v19 = vadd.f32 %v12743_v55, %v11822_v16  ;;  %v11824_v18 = vadd.f32 %v11743_v2, %v19167_v39  ;;  %v9080_v50 = vpop.f32.mrb[67].mxu0  ;;  %v9966_v12 = vsel %vm9835_vm3, %v9826_v52, 0.0 }
 0x3df   :  { %v9962_v30 = vsel %vm9835_vm3, %v9824_v47, 0.0  ;;  %v9251_v27 = vadd.f32 %v12743_v55, %v11823_v10  ;;  %v11825_v34 = vadd.f32 %v9080_v50, %v19173_v56 }
 0x3e0   :  { %v9963_v15 = vadd.f32 %v9962_v30, %v9961_v57  ;;  %v9254_v3 = vadd.f32 %v12743_v55, %v11824_v18  ;;  %v9325_v37 = vmax.f32 %v9253_v19, 0.0 }
 0x3e1   :  { %v9323_v14 = vmax.f32 %v9251_v27, 0.0  ;;  %v9252_v20 = vadd.f32 %v12743_v55, %v11825_v34 }
 0x3e2   :  { %v9965_v33 = vadd.f32 %v9964_v0, %v9963_v15  ;;  %v9326_v48 = vmax.f32 %v9254_v3, 0.0  ;;  %v9829_v32 = vmul.f32 %v19181_v9, %v9325_v37  ;;  %v9756_v9 = vpop.permute.xlu1 %9755 }
 0x3e3   :  { %v9827_v39 = vmul.f32 %v19132_v13, %v9323_v14  ;;  %v9324_v42 = vmax.f32 %v9252_v20, 0.0  ;;  %v11746_v36 = vpop.f32.mrb[68].mxu0  ;;  %v10742_v20 = vld [vmem:[%s19268_s5] ss:$0 sm:$0xff] }
 0x3e4   :  { %v9967_v49 = vadd.f32 %v9966_v12, %v9965_v33  ;;  %v11826_v7 = vadd.f32 %v11746_v36, %v19186_v45  ;;  %v9093_v56 = vpop.f32.mrb[69].mxu0  ;;  %v9830_v8 = vmul.f32 %v19201_v61, %v9326_v48  ;;  %v9907_v61 = vrot.slane %v19061_v26, 4 }
 0x3e5   :  { %v9968_v44 = vsel %vm9835_vm3, %v9827_v39, 0.0  ;;  %v9828_v6 = vmul.f32 %v19158_v24, %v9324_v42  ;;  %v11827_v5 = vadd.f32 %v9093_v56, %v19190_v22  ;;  %v11747_v25 = vpop.f32.mrb[70].mxu0  ;;  %v9972_v24 = vsel %vm9835_vm3, %v9829_v32, 0.0 }
 0x3e6   :  { %v9969_v35 = vadd.f32 %v9968_v44, %v9967_v49  ;;  %v9257_v28 = vadd.f32 %v12743_v55, %v11826_v7  ;;  %v11828_v13 = vadd.f32 %v11747_v25, %v19193_v46  ;;  %v9096_v4 = vpop.f32.mrb[71].mxu0  ;;  %v9974_v62 = vsel %vm9835_vm3, %v9830_v8, 0.0  ;;  %v9761_v16 = vpop.permute.xlu1 %9760 }
 0x3e7   :  { %v9970_v51 = vsel %vm9835_vm3, %v9828_v6, 0.0  ;;  %v9255_v45 = vadd.f32 %v12743_v55, %v11827_v5  ;;  %v11829_v38 = vadd.f32 %v9096_v4, %v19199_v40  ;;  %v9908_v47 = vadd.f32 %v9907_v61, %v19061_v26 }
 0x3e8   :  { %v9971_v60 = vadd.f32 %v9970_v51, %v9969_v35  ;;  %v9258_v41 = vadd.f32 %v12743_v55, %v11828_v13  ;;  %v9329_v54 = vmax.f32 %v9257_v28, 0.0 }
 0x3e9   :  { %v9327_v22 = vmax.f32 %v9255_v45, 0.0  ;;  %v9256_v23 = vadd.f32 %v12743_v55, %v11829_v38  ;;  %v9909_v55 = vrot.slane %v9908_v47, 2 }
 0x3ea   :  { %v9973_v59 = vadd.f32 %v9972_v24, %v9971_v60  ;;  %v9330_v17 = vmax.f32 %v9258_v41, 0.0  ;;  %v9833_v1 = vmul.f32 %v9756_v9, %v9329_v54 }
 0x3eb   :  { %v9831_v46 = vmul.f32 %v9746_v31, %v9327_v22  ;;  %v9328_v63 = vmax.f32 %v9256_v23, 0.0  ;;  %v9910_v50 = vadd.f32 %v9909_v55, %v9908_v47 }
 0x3ec   :  { %v9975_v58 = vadd.f32 %v9974_v62, %v9973_v59  ;;  %v9834_v21 = vmul.f32 %v9761_v16, %v9330_v17  ;;  %v9980_v2 = vsel %vm9835_vm3, %v9833_v1, 0.0 }
 0x3ed   :  { %v9976_v40 = vsel %vm9835_vm3, %v9831_v46, 0.0  ;;  %v9832_v11 = vmul.f32 %v9751_v29, %v9328_v63  ;;  %v9911_v27 = vrot.slane %v9910_v50, 1 }
 0x3ee   :  { %v9977_v43 = vadd.f32 %v9976_v40, %v9975_v58  ;;  %v9982_v57 = vsel %vm9835_vm3, %v9834_v21, 0.0 }
 0x3ef   :  { %v9978_v53 = vsel %vm9835_vm3, %v9832_v11, 0.0  ;;  %v9912_v3 = vadd.f32 %v9911_v27, %v9910_v50 }
 0x3f0   :  { %v9979_v10 = vadd.f32 %v9978_v53, %v9977_v43 }
 0x3f2   :  { %v9981_v31 = vadd.f32 %v9980_v2, %v9979_v10 }
 0x3f4   :  { %v9983_v19 = vadd.f32 %v9982_v57, %v9981_v31 }
 0x3f6   :  { %v9984_v18 = vrot.slane %v9983_v19, 4 }
 0x3f8   :  { %v9985_v52 = vadd.f32 %v9984_v18, %v9983_v19 }
 0x3fa   :  { %v9986_v30 = vrot.slane %v9985_v52, 2 }
 0x3fc   :  { %v9987_v34 = vadd.f32 %v9986_v30, %v9985_v52 }
 0x3fe   :  { %v9988_v15 = vrot.slane %v9987_v34, 1 }
 0x400   :  { %v9989_v0 = vadd.f32 %v9988_v15, %v9987_v34 }
 0x402   :  { %v9991_v37 = vsel %vm8345_vm0, %v9912_v3, %v9989_v0 }
 0x403   :  { %v9992_v26 = vmul.f32 0.00390625, %v9991_v37 }
 0x405   :  { %v9993_v14 = vpack.c.bf16 %v9992_v26, %v9992_v26 }
 0x407   :  { %11753 = vmatmul.mubr.msk.bf16.vlgmr.msra.gmra.mrb[72].mxu1 %vm9835_vm3, %v9993_v14 }
 0x4da   :  { %v10054_v29 = vpop.f32.mrb[72].mxu1 }
 0x4db   :  { %v10055_v33 = vadd.f32 %v10742_v20, %v10054_v29  ;;  %v11754_v12 = vpop.f32.mrb[73].mxu1 }
 0x4dc   :  { %v10057_v39 = vpop.f32.mrb[74].mxu1 }
 0x4dd   :  { %10060 = vst [vmem:[#allocation2] sm:$0x3] %v10055_v33  ;;  %v11755_v48 = vpop.f32.mrb[75].mxu1 }
 0x4de   :  { %12755 = shalt.err (!%p12752_p4)
}
 0x4df   :  { %s12756_s5 = scalar_lea.hbm %s19269_s6, 32 }
 0x4e0   :  { %p12757_p5 = scmp.ne.s32.totalorder %s19269_s6, %s12756_s5  ;;  %p12760_p6 = scmp.lt.u32.totalorder %s12756_s5, %s19269_s6 }
 0x4e2   :  { %p12762_p7 = pnand %p12760_p6, %p12757_p5 }
 0x4e4   :  { %12765 = shalt.err (!%p12762_p7)
}
 0x4e5   :  { %10070 = dma.vmem_to_hbm [thread:$0]  %s10068_s16, 32, %s19269_s6, [#allocation3]  }
 0x4e6   :  { %12766 = dma.done.wait [#allocation3], 32  }
 0x4e7   :  { %12767 = vsyncadd [#allocation3], 4294967264 }
 0x4e8   :  { %10074 = vsyncpa [#allocation3], 1 }

</bundles_post_ra>
